<compile_context>
chip_gen: v7x
topology: tpu7x:2x2x1
jax: 0.10.0
libtpu: 0.0.40
codegen_flags: <defaults>
</compile_context>

<pallas_src>
import functools

import jax
import jax.numpy as jnp
from jax import lax
from jax.experimental import pallas as pl
from jax.experimental.pallas import tpu as pltpu

EPS = 1e-5                        # LayerNorm eps from the PyTorch module
_INV_SQRT2 = 0.7071067811865476   # 1/sqrt(2) for the exact (erf) GELU


# ------------------------------ kernel helpers ------------------------------

def _layernorm(x, g, b):
    # Channel LayerNorm (PyTorch dim=1, biased variance); rsqrt runs on the EUP.
    mean = jnp.mean(x, axis=-1, keepdims=True)
    var = jnp.mean(jnp.square(x - mean), axis=-1, keepdims=True)
    return (x - mean) * lax.rsqrt(var + EPS) * g + b


def _transformer_kernel(x_ref, pos_ref,
                        ag_ref, ab_ref, wq_ref, wk_ref, wv_ref, wo_ref, bo_ref,
                        fg_ref, fb_ref, w1_ref, b1_ref, w2_ref, b2_ref,
                        o_ref, *, depth, heads, scale):
    # One grid step == one batch element.  The whole residual stream stays
    # on-chip for all `depth` layers.
    N, C = x_ref.shape[1], x_ref.shape[2]
    dh = C // heads

    # positional embedding: one scalar per spatial position, broadcast over C.
    x = x_ref[0] + pos_ref[...]                                   # (N, C)

    for d in range(depth):                                        # static unroll
        # ---------------- PreNorm -> Attention -> residual ----------------
        xn = _layernorm(x, ag_ref[d], ab_ref[d])

        # to_qkv (1x1 conv, no bias) as three full-width matmuls (pre-split W).
        q = jnp.dot(xn, wq_ref[d], preferred_element_type=jnp.float32)   # (N, C)
        k = jnp.dot(xn, wk_ref[d], preferred_element_type=jnp.float32)
        v = jnp.dot(xn, wv_ref[d], preferred_element_type=jnp.float32)

        # Head split -> (heads, N, dh): scores, attn@V and the out-projection
        # each become ONE batched dot_general with heads as the leading batch
        # dim (no per-head matmul loop, no lane concat of head outputs).
        q3 = jnp.stack([q[:, h * dh:(h + 1) * dh] for h in range(heads)], axis=0)
        k3 = jnp.stack([k[:, h * dh:(h + 1) * dh] for h in range(heads)], axis=0)
        v3 = jnp.stack([v[:, h * dh:(h + 1) * dh] for h in range(heads)], axis=0)

        dots = lax.dot_general(q3, k3, (((2,), (2,)), ((0,), (0,))),
                               preferred_element_type=jnp.float32) * scale  # (H,N,N)
        m = jnp.max(dots, axis=-1, keepdims=True)
        e = jnp.exp(dots - m)
        attn = e * pl.reciprocal(jnp.sum(e, axis=-1, keepdims=True), approx=True)

        o3 = lax.dot_general(attn, v3, (((2,), (1,)), ((0,), (0,))),
                             preferred_element_type=jnp.float32)            # (H,N,dh)

        # to_out (1x1 conv + bias): per-head projection + sum over heads
        # == concat(heads) @ Wout^T, without the lane concat.
        proj = lax.dot_general(o3, wo_ref[d], (((2,), (1,)), ((0,), (0,))),
                               preferred_element_type=jnp.float32)          # (H,N,C)
        x = x + jnp.sum(proj, axis=0) + bo_ref[d]

        # ---------------- PreNorm -> FeedForward -> residual ----------------
        xn = _layernorm(x, fg_ref[d], fb_ref[d])
        h1 = jnp.dot(xn, w1_ref[d], preferred_element_type=jnp.float32) + b1_ref[d]
        h1 = 0.5 * h1 * (1.0 + lax.erf(h1 * _INV_SQRT2))        # exact GELU
        x = x + jnp.dot(h1, w2_ref[d], preferred_element_type=jnp.float32) + b2_ref[d]

    o_ref[0] = x


# ------------------------------ pallas wrapper ------------------------------

def _const_spec(arr):
    # Full-array block, identical for every grid step (weights / tables).
    nd = arr.ndim

    def idx(b):
        return (0,) * nd

    return pl.BlockSpec(arr.shape, idx)


def transformer_forward(x_nchw, params, *, heads):
    """x_nchw: (B, C, H, W) float32, like the PyTorch module. Returns (B, C, H, W)."""
    B, C, H, W = x_nchw.shape
    N = H * W
    dh = C // heads
    scale = float(dh) ** -0.5
    depth = params["wq_t"].shape[0]

    x = x_nchw.reshape(B, C, N).transpose(0, 2, 1)                # (B, N, C)
    pos = params["pos_emb"][:N].reshape(N, 1)                     # broadcast over C

    weights = (params["attn_g"], params["attn_b"],
               params["wq_t"], params["wk_t"], params["wv_t"],
               params["wo3"], params["bo"],
               params["ff_g"], params["ff_b"],
               params["w1_t"], params["b1"], params["w2_t"], params["b2"])

    kernel = functools.partial(_transformer_kernel, depth=depth, heads=heads,
                               scale=scale)

    y = pl.pallas_call(
        kernel,
        out_shape=jax.ShapeDtypeStruct((B, N, C), x.dtype),
        grid=(B,),                       # "parallel" -> both TensorCores on v7x
        in_specs=[pl.BlockSpec((1, N, C), lambda b: (b, 0, 0)),
                  pl.BlockSpec((N, 1), lambda b: (0, 0))]
                 + [_const_spec(w) for w in weights],
        out_specs=pl.BlockSpec((1, N, C), lambda b: (b, 0, 0)),
        compiler_params=pltpu.CompilerParams(
            dimension_semantics=("parallel",)),
    )(x, pos, *weights)

    return y.transpose(0, 2, 1).reshape(B, C, H, W)


# --------------------------------- params -----------------------------------

def init_params(key, dim, seq_len, depth, heads, mlp_mult):
    C, Ch, dh = dim, dim * mlp_mult, dim // heads
    keys = jax.random.split(key, 1 + 6 * depth)

    wq_t, wk_t, wv_t, wo3, bo = [], [], [], [], []
    w1_t, b1, w2_t, b2 = [], [], [], []
    for d in range(depth):
        k = keys[1 + 6 * d: 1 + 6 * (d + 1)]
        # torch-layout 1x1-conv weights (out_ch, in_ch), pre-arranged for the kernel
        wqkv = 0.05 * jax.random.normal(k[0], (3 * C, C), jnp.float32)
        wout = 0.05 * jax.random.normal(k[1], (C, C), jnp.float32)
        wq_t.append(wqkv[0 * C:1 * C].T)                 # (C_in, C_out)
        wk_t.append(wqkv[1 * C:2 * C].T)
        wv_t.append(wqkv[2 * C:3 * C].T)
        wo3.append(wout.T.reshape(heads, dh, C))         # per-head rows of Wout^T
        bo.append(0.01 * jax.random.normal(k[2], (1, C), jnp.float32))
        w1_t.append((0.05 * jax.random.normal(k[3], (Ch, C), jnp.float32)).T)
        b1.append(0.01 * jax.random.normal(k[4], (1, Ch), jnp.float32))
        w2_t.append((0.05 * jax.random.normal(k[5], (C, Ch), jnp.float32)).T)
        b2.append(jnp.zeros((1, C), jnp.float32))

    return dict(
        pos_emb=jax.random.normal(keys[0], (seq_len,), jnp.float32),
        attn_g=jnp.ones((depth, 1, C), jnp.float32),
        attn_b=jnp.zeros((depth, 1, C), jnp.float32),
        ff_g=jnp.ones((depth, 1, C), jnp.float32),
        ff_b=jnp.zeros((depth, 1, C), jnp.float32),
        wq_t=jnp.stack(wq_t), wk_t=jnp.stack(wk_t), wv_t=jnp.stack(wv_t),
        wo3=jnp.stack(wo3), bo=jnp.stack(bo),
        w1_t=jnp.stack(w1_t), b1=jnp.stack(b1),
        w2_t=jnp.stack(w2_t), b2=jnp.stack(b2),
    )


# ----------------------------------- main ------------------------------------

if __name__ == "__main__":
    # Small shapes consistent with the module: dim divisible by heads, seq_len = H*W,
    # dropout = 0.0 (identity).
    B, dim, H, W = 2, 32, 8, 8
    heads, depth, mlp_mult = 8, 2, 4
    seq_len = H * W

    key = jax.random.PRNGKey(0)
    kx, kp = jax.random.split(key)
    x = jax.random.normal(kx, (B, dim, H, W), jnp.float32)
    params = init_params(kp, dim, seq_len, depth, heads, mlp_mult)

    fwd = jax.jit(functools.partial(transformer_forward, heads=heads))
    y = fwd(x, params)
    jax.block_until_ready(y)

    assert y.shape == (B, dim, H, W) and y.dtype == jnp.float32
    assert bool(jnp.all(jnp.isfinite(y)))
    print("KERNEL_OK")
</pallas_src>

<mosaic_0001>
module attributes {stable_mosaic.version = 11 : i64} {
  func.func @_transformer_kernel(%arg0: i32, %arg1: memref<1x64x32xf32, #tpu.memory_space<vmem>>, %arg2: memref<64x1xf32, #tpu.memory_space<vmem>>, %arg3: memref<2x1x32xf32, #tpu.memory_space<vmem>>, %arg4: memref<2x1x32xf32, #tpu.memory_space<vmem>>, %arg5: memref<2x32x32xf32, #tpu.memory_space<vmem>>, %arg6: memref<2x32x32xf32, #tpu.memory_space<vmem>>, %arg7: memref<2x32x32xf32, #tpu.memory_space<vmem>>, %arg8: memref<2x8x4x32xf32, #tpu.memory_space<vmem>>, %arg9: memref<2x1x32xf32, #tpu.memory_space<vmem>>, %arg10: memref<2x1x32xf32, #tpu.memory_space<vmem>>, %arg11: memref<2x1x32xf32, #tpu.memory_space<vmem>>, %arg12: memref<2x32x128xf32, #tpu.memory_space<vmem>>, %arg13: memref<2x1x128xf32, #tpu.memory_space<vmem>>, %arg14: memref<2x128x32xf32, #tpu.memory_space<vmem>>, %arg15: memref<2x1x32xf32, #tpu.memory_space<vmem>>, %arg16: memref<1x64x32xf32, #tpu.memory_space<vmem>>) attributes {dimension_semantics = [#tpu.dimension_semantics<parallel>], iteration_bounds = array<i64: 2>, scalar_prefetch = 0 : i64, scratch_operands = 0 : i64, tpu.core_type = #tpu.core_type<tc>, window_params = [{transform_indices = @transform_0, window_bounds = array<i64: 1, 64, 32>}, {pipeline_mode = #tpu.pipeline_mode<synchronous>, transform_indices = @transform_1, window_bounds = array<i64: 64, 1>}, {pipeline_mode = #tpu.pipeline_mode<synchronous>, transform_indices = @transform_2, window_bounds = array<i64: 2, 1, 32>}, {pipeline_mode = #tpu.pipeline_mode<synchronous>, transform_indices = @transform_3, window_bounds = array<i64: 2, 1, 32>}, {pipeline_mode = #tpu.pipeline_mode<synchronous>, transform_indices = @transform_4, window_bounds = array<i64: 2, 32, 32>}, {pipeline_mode = #tpu.pipeline_mode<synchronous>, transform_indices = @transform_5, window_bounds = array<i64: 2, 32, 32>}, {pipeline_mode = #tpu.pipeline_mode<synchronous>, transform_indices = @transform_6, window_bounds = array<i64: 2, 32, 32>}, {pipeline_mode = #tpu.pipeline_mode<synchronous>, transform_indices = @transform_7, window_bounds = array<i64: 2, 8, 4, 32>}, {pipeline_mode = #tpu.pipeline_mode<synchronous>, transform_indices = @transform_8, window_bounds = array<i64: 2, 1, 32>}, {pipeline_mode = #tpu.pipeline_mode<synchronous>, transform_indices = @transform_9, window_bounds = array<i64: 2, 1, 32>}, {pipeline_mode = #tpu.pipeline_mode<synchronous>, transform_indices = @transform_10, window_bounds = array<i64: 2, 1, 32>}, {pipeline_mode = #tpu.pipeline_mode<synchronous>, transform_indices = @transform_11, window_bounds = array<i64: 2, 32, 128>}, {pipeline_mode = #tpu.pipeline_mode<synchronous>, transform_indices = @transform_12, window_bounds = array<i64: 2, 1, 128>}, {pipeline_mode = #tpu.pipeline_mode<synchronous>, transform_indices = @transform_13, window_bounds = array<i64: 2, 128, 32>}, {pipeline_mode = #tpu.pipeline_mode<synchronous>, transform_indices = @transform_14, window_bounds = array<i64: 2, 1, 32>}, {transform_indices = @transform_15, window_bounds = array<i64: 1, 64, 32>}]} {
    %c0 = arith.constant 0 : index
    %c0_0 = arith.constant 0 : index
    %c0_1 = arith.constant 0 : index
    %0 = vector.load %arg1[%c0, %c0_0, %c0_1] : memref<1x64x32xf32, #tpu.memory_space<vmem>>, vector<1x64x32xf32>
    %1 = vector.shape_cast %0 : vector<1x64x32xf32> to vector<64x32xf32>
    %c0_2 = arith.constant 0 : index
    %c0_3 = arith.constant 0 : index
    %2 = vector.load %arg2[%c0_2, %c0_3] : memref<64x1xf32, #tpu.memory_space<vmem>>, vector<64x1xf32>
    %3 = vector.broadcast %2 : vector<64x1xf32> to vector<64x32xf32>
    %4 = arith.addf %1, %3 : vector<64x32xf32>
    %c0_4 = arith.constant 0 : index
    %c0_5 = arith.constant 0 : index
    %c0_6 = arith.constant 0 : index
    %5 = vector.load %arg3[%c0_4, %c0_5, %c0_6] : memref<2x1x32xf32, #tpu.memory_space<vmem>>, vector<1x1x32xf32>
    %6 = vector.shape_cast %5 : vector<1x1x32xf32> to vector<1x32xf32>
    %c0_7 = arith.constant 0 : index
    %c0_8 = arith.constant 0 : index
    %c0_9 = arith.constant 0 : index
    %7 = vector.load %arg4[%c0_7, %c0_8, %c0_9] : memref<2x1x32xf32, #tpu.memory_space<vmem>>, vector<1x1x32xf32>
    %8 = vector.shape_cast %7 : vector<1x1x32xf32> to vector<1x32xf32>
    %cst = arith.constant dense<0.000000e+00> : vector<64xf32>
    %9 = vector.multi_reduction <add>, %4, %cst [1] : vector<64x32xf32> to vector<64xf32>
    %10 = vector.shape_cast %9 : vector<64xf32> to vector<64x1xf32>
    %cst_10 = arith.constant 3.200000e+01 : f32
    %11 = vector.broadcast %cst_10 : f32 to vector<64x1xf32>
    %12 = arith.divf %10, %11 : vector<64x1xf32>
    %13 = vector.broadcast %12 : vector<64x1xf32> to vector<64x32xf32>
    %14 = arith.subf %4, %13 : vector<64x32xf32>
    %15 = arith.mulf %14, %14 : vector<64x32xf32>
    %cst_11 = arith.constant dense<0.000000e+00> : vector<64xf32>
    %16 = vector.multi_reduction <add>, %15, %cst_11 [1] : vector<64x32xf32> to vector<64xf32>
    %17 = vector.shape_cast %16 : vector<64xf32> to vector<64x1xf32>
    %cst_12 = arith.constant 3.200000e+01 : f32
    %18 = vector.broadcast %cst_12 : f32 to vector<64x1xf32>
    %19 = arith.divf %17, %18 : vector<64x1xf32>
    %20 = vector.broadcast %12 : vector<64x1xf32> to vector<64x32xf32>
    %21 = arith.subf %4, %20 : vector<64x32xf32>
    %cst_13 = arith.constant 9.99999974E-6 : f32
    %22 = vector.broadcast %cst_13 : f32 to vector<64x1xf32>
    %23 = arith.addf %19, %22 : vector<64x1xf32>
    %24 = math.rsqrt %23 : vector<64x1xf32>
    %25 = vector.broadcast %24 : vector<64x1xf32> to vector<64x32xf32>
    %26 = arith.mulf %21, %25 : vector<64x32xf32>
    %27 = vector.broadcast %6 : vector<1x32xf32> to vector<64x32xf32>
    %28 = arith.mulf %26, %27 : vector<64x32xf32>
    %29 = vector.broadcast %8 : vector<1x32xf32> to vector<64x32xf32>
    %30 = arith.addf %28, %29 : vector<64x32xf32>
    %c0_14 = arith.constant 0 : index
    %c0_15 = arith.constant 0 : index
    %c0_16 = arith.constant 0 : index
    %31 = vector.load %arg5[%c0_14, %c0_15, %c0_16] : memref<2x32x32xf32, #tpu.memory_space<vmem>>, vector<1x32x32xf32>
    %32 = vector.shape_cast %31 : vector<1x32x32xf32> to vector<32x32xf32>
    %cst_17 = arith.constant dense<0.000000e+00> : vector<64x32xf32>
    %33 = tpu.matmul %30, %32, %cst_17 {dimension_numbers = #tpu.dot_dimension_numbers<[1], [0], [0], [1], [0, 0, 1, 1], [], []>} : vector<64x32xf32>, vector<32x32xf32>, vector<64x32xf32> -> vector<64x32xf32>
    %c0_18 = arith.constant 0 : index
    %c0_19 = arith.constant 0 : index
    %c0_20 = arith.constant 0 : index
    %34 = vector.load %arg6[%c0_18, %c0_19, %c0_20] : memref<2x32x32xf32, #tpu.memory_space<vmem>>, vector<1x32x32xf32>
    %35 = vector.shape_cast %34 : vector<1x32x32xf32> to vector<32x32xf32>
    %cst_21 = arith.constant dense<0.000000e+00> : vector<64x32xf32>
    %36 = tpu.matmul %30, %35, %cst_21 {dimension_numbers = #tpu.dot_dimension_numbers<[1], [0], [0], [1], [0, 0, 1, 1], [], []>} : vector<64x32xf32>, vector<32x32xf32>, vector<64x32xf32> -> vector<64x32xf32>
    %c0_22 = arith.constant 0 : index
    %c0_23 = arith.constant 0 : index
    %c0_24 = arith.constant 0 : index
    %37 = vector.load %arg7[%c0_22, %c0_23, %c0_24] : memref<2x32x32xf32, #tpu.memory_space<vmem>>, vector<1x32x32xf32>
    %38 = vector.shape_cast %37 : vector<1x32x32xf32> to vector<32x32xf32>
    %cst_25 = arith.constant dense<0.000000e+00> : vector<64x32xf32>
    %39 = tpu.matmul %30, %38, %cst_25 {dimension_numbers = #tpu.dot_dimension_numbers<[1], [0], [0], [1], [0, 0, 1, 1], [], []>} : vector<64x32xf32>, vector<32x32xf32>, vector<64x32xf32> -> vector<64x32xf32>
    %40 = vector.extract_strided_slice %33 {offsets = [0, 0], sizes = [64, 4], strides = [1, 1]} : vector<64x32xf32> to vector<64x4xf32>
    %41 = vector.extract_strided_slice %33 {offsets = [0, 4], sizes = [64, 4], strides = [1, 1]} : vector<64x32xf32> to vector<64x4xf32>
    %42 = vector.extract_strided_slice %33 {offsets = [0, 8], sizes = [64, 4], strides = [1, 1]} : vector<64x32xf32> to vector<64x4xf32>
    %43 = vector.extract_strided_slice %33 {offsets = [0, 12], sizes = [64, 4], strides = [1, 1]} : vector<64x32xf32> to vector<64x4xf32>
    %44 = vector.extract_strided_slice %33 {offsets = [0, 16], sizes = [64, 4], strides = [1, 1]} : vector<64x32xf32> to vector<64x4xf32>
    %45 = vector.extract_strided_slice %33 {offsets = [0, 20], sizes = [64, 4], strides = [1, 1]} : vector<64x32xf32> to vector<64x4xf32>
    %46 = vector.extract_strided_slice %33 {offsets = [0, 24], sizes = [64, 4], strides = [1, 1]} : vector<64x32xf32> to vector<64x4xf32>
    %47 = vector.extract_strided_slice %33 {offsets = [0, 28], sizes = [64, 4], strides = [1, 1]} : vector<64x32xf32> to vector<64x4xf32>
    %48 = vector.shape_cast %40 : vector<64x4xf32> to vector<1x64x4xf32>
    %49 = vector.shape_cast %41 : vector<64x4xf32> to vector<1x64x4xf32>
    %50 = vector.shape_cast %42 : vector<64x4xf32> to vector<1x64x4xf32>
    %51 = vector.shape_cast %43 : vector<64x4xf32> to vector<1x64x4xf32>
    %52 = vector.shape_cast %44 : vector<64x4xf32> to vector<1x64x4xf32>
    %53 = vector.shape_cast %45 : vector<64x4xf32> to vector<1x64x4xf32>
    %54 = vector.shape_cast %46 : vector<64x4xf32> to vector<1x64x4xf32>
    %55 = vector.shape_cast %47 : vector<64x4xf32> to vector<1x64x4xf32>
    %56 = tpu.concatenate %48, %49, %50, %51, %52, %53, %54, %55 in 0 : vector<1x64x4xf32>, vector<1x64x4xf32>, vector<1x64x4xf32>, vector<1x64x4xf32>, vector<1x64x4xf32>, vector<1x64x4xf32>, vector<1x64x4xf32>, vector<1x64x4xf32> -> vector<8x64x4xf32>
    %57 = vector.extract_strided_slice %36 {offsets = [0, 0], sizes = [64, 4], strides = [1, 1]} : vector<64x32xf32> to vector<64x4xf32>
    %58 = vector.extract_strided_slice %36 {offsets = [0, 4], sizes = [64, 4], strides = [1, 1]} : vector<64x32xf32> to vector<64x4xf32>
    %59 = vector.extract_strided_slice %36 {offsets = [0, 8], sizes = [64, 4], strides = [1, 1]} : vector<64x32xf32> to vector<64x4xf32>
    %60 = vector.extract_strided_slice %36 {offsets = [0, 12], sizes = [64, 4], strides = [1, 1]} : vector<64x32xf32> to vector<64x4xf32>
    %61 = vector.extract_strided_slice %36 {offsets = [0, 16], sizes = [64, 4], strides = [1, 1]} : vector<64x32xf32> to vector<64x4xf32>
    %62 = vector.extract_strided_slice %36 {offsets = [0, 20], sizes = [64, 4], strides = [1, 1]} : vector<64x32xf32> to vector<64x4xf32>
    %63 = vector.extract_strided_slice %36 {offsets = [0, 24], sizes = [64, 4], strides = [1, 1]} : vector<64x32xf32> to vector<64x4xf32>
    %64 = vector.extract_strided_slice %36 {offsets = [0, 28], sizes = [64, 4], strides = [1, 1]} : vector<64x32xf32> to vector<64x4xf32>
    %65 = vector.shape_cast %57 : vector<64x4xf32> to vector<1x64x4xf32>
    %66 = vector.shape_cast %58 : vector<64x4xf32> to vector<1x64x4xf32>
    %67 = vector.shape_cast %59 : vector<64x4xf32> to vector<1x64x4xf32>
    %68 = vector.shape_cast %60 : vector<64x4xf32> to vector<1x64x4xf32>
    %69 = vector.shape_cast %61 : vector<64x4xf32> to vector<1x64x4xf32>
    %70 = vector.shape_cast %62 : vector<64x4xf32> to vector<1x64x4xf32>
    %71 = vector.shape_cast %63 : vector<64x4xf32> to vector<1x64x4xf32>
    %72 = vector.shape_cast %64 : vector<64x4xf32> to vector<1x64x4xf32>
    %73 = tpu.concatenate %65, %66, %67, %68, %69, %70, %71, %72 in 0 : vector<1x64x4xf32>, vector<1x64x4xf32>, vector<1x64x4xf32>, vector<1x64x4xf32>, vector<1x64x4xf32>, vector<1x64x4xf32>, vector<1x64x4xf32>, vector<1x64x4xf32> -> vector<8x64x4xf32>
    %74 = vector.extract_strided_slice %39 {offsets = [0, 0], sizes = [64, 4], strides = [1, 1]} : vector<64x32xf32> to vector<64x4xf32>
    %75 = vector.extract_strided_slice %39 {offsets = [0, 4], sizes = [64, 4], strides = [1, 1]} : vector<64x32xf32> to vector<64x4xf32>
    %76 = vector.extract_strided_slice %39 {offsets = [0, 8], sizes = [64, 4], strides = [1, 1]} : vector<64x32xf32> to vector<64x4xf32>
    %77 = vector.extract_strided_slice %39 {offsets = [0, 12], sizes = [64, 4], strides = [1, 1]} : vector<64x32xf32> to vector<64x4xf32>
    %78 = vector.extract_strided_slice %39 {offsets = [0, 16], sizes = [64, 4], strides = [1, 1]} : vector<64x32xf32> to vector<64x4xf32>
    %79 = vector.extract_strided_slice %39 {offsets = [0, 20], sizes = [64, 4], strides = [1, 1]} : vector<64x32xf32> to vector<64x4xf32>
    %80 = vector.extract_strided_slice %39 {offsets = [0, 24], sizes = [64, 4], strides = [1, 1]} : vector<64x32xf32> to vector<64x4xf32>
    %81 = vector.extract_strided_slice %39 {offsets = [0, 28], sizes = [64, 4], strides = [1, 1]} : vector<64x32xf32> to vector<64x4xf32>
    %82 = vector.shape_cast %74 : vector<64x4xf32> to vector<1x64x4xf32>
    %83 = vector.shape_cast %75 : vector<64x4xf32> to vector<1x64x4xf32>
    %84 = vector.shape_cast %76 : vector<64x4xf32> to vector<1x64x4xf32>
    %85 = vector.shape_cast %77 : vector<64x4xf32> to vector<1x64x4xf32>
    %86 = vector.shape_cast %78 : vector<64x4xf32> to vector<1x64x4xf32>
    %87 = vector.shape_cast %79 : vector<64x4xf32> to vector<1x64x4xf32>
    %88 = vector.shape_cast %80 : vector<64x4xf32> to vector<1x64x4xf32>
    %89 = vector.shape_cast %81 : vector<64x4xf32> to vector<1x64x4xf32>
    %90 = tpu.concatenate %82, %83, %84, %85, %86, %87, %88, %89 in 0 : vector<1x64x4xf32>, vector<1x64x4xf32>, vector<1x64x4xf32>, vector<1x64x4xf32>, vector<1x64x4xf32>, vector<1x64x4xf32>, vector<1x64x4xf32>, vector<1x64x4xf32> -> vector<8x64x4xf32>
    %cst_26 = arith.constant dense<0.000000e+00> : vector<8x64x64xf32>
    %91 = tpu.matmul %56, %73, %cst_26 {dimension_numbers = #tpu.dot_dimension_numbers<[2], [2], [1], [1], [0, 0, 0, 1, 1, 1], [0], [0]>} : vector<8x64x4xf32>, vector<8x64x4xf32>, vector<8x64x64xf32> -> vector<8x64x64xf32>
    %cst_27 = arith.constant 5.000000e-01 : f32
    %92 = vector.broadcast %cst_27 : f32 to vector<8x64x64xf32>
    %93 = arith.mulf %91, %92 : vector<8x64x64xf32>
    %cst_28 = arith.constant dense<0xFF800000> : vector<8x64xf32>
    %94 = vector.multi_reduction <maximumf>, %93, %cst_28 [2] : vector<8x64x64xf32> to vector<8x64xf32>
    %95 = vector.shape_cast %94 : vector<8x64xf32> to vector<8x64x1xf32>
    %96 = vector.broadcast %95 : vector<8x64x1xf32> to vector<8x64x64xf32>
    %97 = arith.subf %93, %96 : vector<8x64x64xf32>
    %98 = math.exp %97 : vector<8x64x64xf32>
    %cst_29 = arith.constant dense<0.000000e+00> : vector<8x64xf32>
    %99 = vector.multi_reduction <add>, %98, %cst_29 [2] : vector<8x64x64xf32> to vector<8x64xf32>
    %100 = vector.shape_cast %99 : vector<8x64xf32> to vector<8x64x1xf32>
    %101 = tpu.reciprocal %100 {approx = true} : vector<8x64x1xf32> -> vector<8x64x1xf32>
    %102 = vector.broadcast %101 : vector<8x64x1xf32> to vector<8x64x64xf32>
    %103 = arith.mulf %98, %102 : vector<8x64x64xf32>
    %cst_30 = arith.constant dense<0.000000e+00> : vector<8x64x4xf32>
    %104 = tpu.matmul %103, %90, %cst_30 {dimension_numbers = #tpu.dot_dimension_numbers<[2], [1], [1], [2], [0, 0, 0, 1, 1, 2], [0], [0]>} : vector<8x64x64xf32>, vector<8x64x4xf32>, vector<8x64x4xf32> -> vector<8x64x4xf32>
    %c0_31 = arith.constant 0 : index
    %c0_32 = arith.constant 0 : index
    %c0_33 = arith.constant 0 : index
    %c0_34 = arith.constant 0 : index
    %105 = vector.load %arg8[%c0_31, %c0_32, %c0_33, %c0_34] : memref<2x8x4x32xf32, #tpu.memory_space<vmem>>, vector<1x8x4x32xf32>
    %106 = vector.shape_cast %105 : vector<1x8x4x32xf32> to vector<8x4x32xf32>
    %cst_35 = arith.constant dense<0.000000e+00> : vector<8x64x32xf32>
    %107 = tpu.matmul %104, %106, %cst_35 {dimension_numbers = #tpu.dot_dimension_numbers<[2], [1], [1], [2], [0, 0, 0, 1, 1, 2], [0], [0]>} : vector<8x64x4xf32>, vector<8x4x32xf32>, vector<8x64x32xf32> -> vector<8x64x32xf32>
    %cst_36 = arith.constant dense<0.000000e+00> : vector<64x32xf32>
    %108 = vector.multi_reduction <add>, %107, %cst_36 [0] : vector<8x64x32xf32> to vector<64x32xf32>
    %109 = arith.addf %4, %108 : vector<64x32xf32>
    %c0_37 = arith.constant 0 : index
    %c0_38 = arith.constant 0 : index
    %c0_39 = arith.constant 0 : index
    %110 = vector.load %arg9[%c0_37, %c0_38, %c0_39] : memref<2x1x32xf32, #tpu.memory_space<vmem>>, vector<1x1x32xf32>
    %111 = vector.shape_cast %110 : vector<1x1x32xf32> to vector<1x32xf32>
    %112 = vector.broadcast %111 : vector<1x32xf32> to vector<64x32xf32>
    %113 = arith.addf %109, %112 : vector<64x32xf32>
    %c0_40 = arith.constant 0 : index
    %c0_41 = arith.constant 0 : index
    %c0_42 = arith.constant 0 : index
    %114 = vector.load %arg10[%c0_40, %c0_41, %c0_42] : memref<2x1x32xf32, #tpu.memory_space<vmem>>, vector<1x1x32xf32>
    %115 = vector.shape_cast %114 : vector<1x1x32xf32> to vector<1x32xf32>
    %c0_43 = arith.constant 0 : index
    %c0_44 = arith.constant 0 : index
    %c0_45 = arith.constant 0 : index
    %116 = vector.load %arg11[%c0_43, %c0_44, %c0_45] : memref<2x1x32xf32, #tpu.memory_space<vmem>>, vector<1x1x32xf32>
    %117 = vector.shape_cast %116 : vector<1x1x32xf32> to vector<1x32xf32>
    %cst_46 = arith.constant dense<0.000000e+00> : vector<64xf32>
    %118 = vector.multi_reduction <add>, %113, %cst_46 [1] : vector<64x32xf32> to vector<64xf32>
    %119 = vector.shape_cast %118 : vector<64xf32> to vector<64x1xf32>
    %cst_47 = arith.constant 3.200000e+01 : f32
    %120 = vector.broadcast %cst_47 : f32 to vector<64x1xf32>
    %121 = arith.divf %119, %120 : vector<64x1xf32>
    %122 = vector.broadcast %121 : vector<64x1xf32> to vector<64x32xf32>
    %123 = arith.subf %113, %122 : vector<64x32xf32>
    %124 = arith.mulf %123, %123 : vector<64x32xf32>
    %cst_48 = arith.constant dense<0.000000e+00> : vector<64xf32>
    %125 = vector.multi_reduction <add>, %124, %cst_48 [1] : vector<64x32xf32> to vector<64xf32>
    %126 = vector.shape_cast %125 : vector<64xf32> to vector<64x1xf32>
    %cst_49 = arith.constant 3.200000e+01 : f32
    %127 = vector.broadcast %cst_49 : f32 to vector<64x1xf32>
    %128 = arith.divf %126, %127 : vector<64x1xf32>
    %129 = vector.broadcast %121 : vector<64x1xf32> to vector<64x32xf32>
    %130 = arith.subf %113, %129 : vector<64x32xf32>
    %cst_50 = arith.constant 9.99999974E-6 : f32
    %131 = vector.broadcast %cst_50 : f32 to vector<64x1xf32>
    %132 = arith.addf %128, %131 : vector<64x1xf32>
    %133 = math.rsqrt %132 : vector<64x1xf32>
    %134 = vector.broadcast %133 : vector<64x1xf32> to vector<64x32xf32>
    %135 = arith.mulf %130, %134 : vector<64x32xf32>
    %136 = vector.broadcast %115 : vector<1x32xf32> to vector<64x32xf32>
    %137 = arith.mulf %135, %136 : vector<64x32xf32>
    %138 = vector.broadcast %117 : vector<1x32xf32> to vector<64x32xf32>
    %139 = arith.addf %137, %138 : vector<64x32xf32>
    %c0_51 = arith.constant 0 : index
    %c0_52 = arith.constant 0 : index
    %c0_53 = arith.constant 0 : index
    %140 = vector.load %arg12[%c0_51, %c0_52, %c0_53] : memref<2x32x128xf32, #tpu.memory_space<vmem>>, vector<1x32x128xf32>
    %141 = vector.shape_cast %140 : vector<1x32x128xf32> to vector<32x128xf32>
    %cst_54 = arith.constant dense<0.000000e+00> : vector<64x128xf32>
    %142 = tpu.matmul %139, %141, %cst_54 {dimension_numbers = #tpu.dot_dimension_numbers<[1], [0], [0], [1], [0, 0, 1, 1], [], []>} : vector<64x32xf32>, vector<32x128xf32>, vector<64x128xf32> -> vector<64x128xf32>
    %c0_55 = arith.constant 0 : index
    %c0_56 = arith.constant 0 : index
    %c0_57 = arith.constant 0 : index
    %143 = vector.load %arg13[%c0_55, %c0_56, %c0_57] : memref<2x1x128xf32, #tpu.memory_space<vmem>>, vector<1x1x128xf32>
    %144 = vector.shape_cast %143 : vector<1x1x128xf32> to vector<1x128xf32>
    %145 = vector.broadcast %144 : vector<1x128xf32> to vector<64x128xf32>
    %146 = arith.addf %142, %145 : vector<64x128xf32>
    %cst_58 = arith.constant 5.000000e-01 : f32
    %147 = vector.broadcast %cst_58 : f32 to vector<64x128xf32>
    %148 = arith.mulf %147, %146 : vector<64x128xf32>
    %cst_59 = arith.constant 0.707106769 : f32
    %149 = vector.broadcast %cst_59 : f32 to vector<64x128xf32>
    %150 = arith.mulf %146, %149 : vector<64x128xf32>
    %151 = math.erf %150 : vector<64x128xf32>
    %cst_60 = arith.constant 1.000000e+00 : f32
    %152 = vector.broadcast %cst_60 : f32 to vector<64x128xf32>
    %153 = arith.addf %152, %151 : vector<64x128xf32>
    %154 = arith.mulf %148, %153 : vector<64x128xf32>
    %c0_61 = arith.constant 0 : index
    %c0_62 = arith.constant 0 : index
    %c0_63 = arith.constant 0 : index
    %155 = vector.load %arg14[%c0_61, %c0_62, %c0_63] : memref<2x128x32xf32, #tpu.memory_space<vmem>>, vector<1x128x32xf32>
    %156 = vector.shape_cast %155 : vector<1x128x32xf32> to vector<128x32xf32>
    %cst_64 = arith.constant dense<0.000000e+00> : vector<64x32xf32>
    %157 = tpu.matmul %154, %156, %cst_64 {dimension_numbers = #tpu.dot_dimension_numbers<[1], [0], [0], [1], [0, 0, 1, 1], [], []>} : vector<64x128xf32>, vector<128x32xf32>, vector<64x32xf32> -> vector<64x32xf32>
    %158 = arith.addf %113, %157 : vector<64x32xf32>
    %c0_65 = arith.constant 0 : index
    %c0_66 = arith.constant 0 : index
    %c0_67 = arith.constant 0 : index
    %159 = vector.load %arg15[%c0_65, %c0_66, %c0_67] : memref<2x1x32xf32, #tpu.memory_space<vmem>>, vector<1x1x32xf32>
    %160 = vector.shape_cast %159 : vector<1x1x32xf32> to vector<1x32xf32>
    %161 = vector.broadcast %160 : vector<1x32xf32> to vector<64x32xf32>
    %162 = arith.addf %158, %161 : vector<64x32xf32>
    %c1 = arith.constant 1 : index
    %c0_68 = arith.constant 0 : index
    %c0_69 = arith.constant 0 : index
    %163 = vector.load %arg3[%c1, %c0_68, %c0_69] : memref<2x1x32xf32, #tpu.memory_space<vmem>>, vector<1x1x32xf32>
    %164 = vector.shape_cast %163 : vector<1x1x32xf32> to vector<1x32xf32>
    %c1_70 = arith.constant 1 : index
    %c0_71 = arith.constant 0 : index
    %c0_72 = arith.constant 0 : index
    %165 = vector.load %arg4[%c1_70, %c0_71, %c0_72] : memref<2x1x32xf32, #tpu.memory_space<vmem>>, vector<1x1x32xf32>
    %166 = vector.shape_cast %165 : vector<1x1x32xf32> to vector<1x32xf32>
    %cst_73 = arith.constant dense<0.000000e+00> : vector<64xf32>
    %167 = vector.multi_reduction <add>, %162, %cst_73 [1] : vector<64x32xf32> to vector<64xf32>
    %168 = vector.shape_cast %167 : vector<64xf32> to vector<64x1xf32>
    %cst_74 = arith.constant 3.200000e+01 : f32
    %169 = vector.broadcast %cst_74 : f32 to vector<64x1xf32>
    %170 = arith.divf %168, %169 : vector<64x1xf32>
    %171 = vector.broadcast %170 : vector<64x1xf32> to vector<64x32xf32>
    %172 = arith.subf %162, %171 : vector<64x32xf32>
    %173 = arith.mulf %172, %172 : vector<64x32xf32>
    %cst_75 = arith.constant dense<0.000000e+00> : vector<64xf32>
    %174 = vector.multi_reduction <add>, %173, %cst_75 [1] : vector<64x32xf32> to vector<64xf32>
    %175 = vector.shape_cast %174 : vector<64xf32> to vector<64x1xf32>
    %cst_76 = arith.constant 3.200000e+01 : f32
    %176 = vector.broadcast %cst_76 : f32 to vector<64x1xf32>
    %177 = arith.divf %175, %176 : vector<64x1xf32>
    %178 = vector.broadcast %170 : vector<64x1xf32> to vector<64x32xf32>
    %179 = arith.subf %162, %178 : vector<64x32xf32>
    %cst_77 = arith.constant 9.99999974E-6 : f32
    %180 = vector.broadcast %cst_77 : f32 to vector<64x1xf32>
    %181 = arith.addf %177, %180 : vector<64x1xf32>
    %182 = math.rsqrt %181 : vector<64x1xf32>
    %183 = vector.broadcast %182 : vector<64x1xf32> to vector<64x32xf32>
    %184 = arith.mulf %179, %183 : vector<64x32xf32>
    %185 = vector.broadcast %164 : vector<1x32xf32> to vector<64x32xf32>
    %186 = arith.mulf %184, %185 : vector<64x32xf32>
    %187 = vector.broadcast %166 : vector<1x32xf32> to vector<64x32xf32>
    %188 = arith.addf %186, %187 : vector<64x32xf32>
    %c1_78 = arith.constant 1 : index
    %c0_79 = arith.constant 0 : index
    %c0_80 = arith.constant 0 : index
    %189 = vector.load %arg5[%c1_78, %c0_79, %c0_80] : memref<2x32x32xf32, #tpu.memory_space<vmem>>, vector<1x32x32xf32>
    %190 = vector.shape_cast %189 : vector<1x32x32xf32> to vector<32x32xf32>
    %cst_81 = arith.constant dense<0.000000e+00> : vector<64x32xf32>
    %191 = tpu.matmul %188, %190, %cst_81 {dimension_numbers = #tpu.dot_dimension_numbers<[1], [0], [0], [1], [0, 0, 1, 1], [], []>} : vector<64x32xf32>, vector<32x32xf32>, vector<64x32xf32> -> vector<64x32xf32>
    %c1_82 = arith.constant 1 : index
    %c0_83 = arith.constant 0 : index
    %c0_84 = arith.constant 0 : index
    %192 = vector.load %arg6[%c1_82, %c0_83, %c0_84] : memref<2x32x32xf32, #tpu.memory_space<vmem>>, vector<1x32x32xf32>
    %193 = vector.shape_cast %192 : vector<1x32x32xf32> to vector<32x32xf32>
    %cst_85 = arith.constant dense<0.000000e+00> : vector<64x32xf32>
    %194 = tpu.matmul %188, %193, %cst_85 {dimension_numbers = #tpu.dot_dimension_numbers<[1], [0], [0], [1], [0, 0, 1, 1], [], []>} : vector<64x32xf32>, vector<32x32xf32>, vector<64x32xf32> -> vector<64x32xf32>
    %c1_86 = arith.constant 1 : index
    %c0_87 = arith.constant 0 : index
    %c0_88 = arith.constant 0 : index
    %195 = vector.load %arg7[%c1_86, %c0_87, %c0_88] : memref<2x32x32xf32, #tpu.memory_space<vmem>>, vector<1x32x32xf32>
    %196 = vector.shape_cast %195 : vector<1x32x32xf32> to vector<32x32xf32>
    %cst_89 = arith.constant dense<0.000000e+00> : vector<64x32xf32>
    %197 = tpu.matmul %188, %196, %cst_89 {dimension_numbers = #tpu.dot_dimension_numbers<[1], [0], [0], [1], [0, 0, 1, 1], [], []>} : vector<64x32xf32>, vector<32x32xf32>, vector<64x32xf32> -> vector<64x32xf32>
    %198 = vector.extract_strided_slice %191 {offsets = [0, 0], sizes = [64, 4], strides = [1, 1]} : vector<64x32xf32> to vector<64x4xf32>
    %199 = vector.extract_strided_slice %191 {offsets = [0, 4], sizes = [64, 4], strides = [1, 1]} : vector<64x32xf32> to vector<64x4xf32>
    %200 = vector.extract_strided_slice %191 {offsets = [0, 8], sizes = [64, 4], strides = [1, 1]} : vector<64x32xf32> to vector<64x4xf32>
    %201 = vector.extract_strided_slice %191 {offsets = [0, 12], sizes = [64, 4], strides = [1, 1]} : vector<64x32xf32> to vector<64x4xf32>
    %202 = vector.extract_strided_slice %191 {offsets = [0, 16], sizes = [64, 4], strides = [1, 1]} : vector<64x32xf32> to vector<64x4xf32>
    %203 = vector.extract_strided_slice %191 {offsets = [0, 20], sizes = [64, 4], strides = [1, 1]} : vector<64x32xf32> to vector<64x4xf32>
    %204 = vector.extract_strided_slice %191 {offsets = [0, 24], sizes = [64, 4], strides = [1, 1]} : vector<64x32xf32> to vector<64x4xf32>
    %205 = vector.extract_strided_slice %191 {offsets = [0, 28], sizes = [64, 4], strides = [1, 1]} : vector<64x32xf32> to vector<64x4xf32>
    %206 = vector.shape_cast %198 : vector<64x4xf32> to vector<1x64x4xf32>
    %207 = vector.shape_cast %199 : vector<64x4xf32> to vector<1x64x4xf32>
    %208 = vector.shape_cast %200 : vector<64x4xf32> to vector<1x64x4xf32>
    %209 = vector.shape_cast %201 : vector<64x4xf32> to vector<1x64x4xf32>
    %210 = vector.shape_cast %202 : vector<64x4xf32> to vector<1x64x4xf32>
    %211 = vector.shape_cast %203 : vector<64x4xf32> to vector<1x64x4xf32>
    %212 = vector.shape_cast %204 : vector<64x4xf32> to vector<1x64x4xf32>
    %213 = vector.shape_cast %205 : vector<64x4xf32> to vector<1x64x4xf32>
    %214 = tpu.concatenate %206, %207, %208, %209, %210, %211, %212, %213 in 0 : vector<1x64x4xf32>, vector<1x64x4xf32>, vector<1x64x4xf32>, vector<1x64x4xf32>, vector<1x64x4xf32>, vector<1x64x4xf32>, vector<1x64x4xf32>, vector<1x64x4xf32> -> vector<8x64x4xf32>
    %215 = vector.extract_strided_slice %194 {offsets = [0, 0], sizes = [64, 4], strides = [1, 1]} : vector<64x32xf32> to vector<64x4xf32>
    %216 = vector.extract_strided_slice %194 {offsets = [0, 4], sizes = [64, 4], strides = [1, 1]} : vector<64x32xf32> to vector<64x4xf32>
    %217 = vector.extract_strided_slice %194 {offsets = [0, 8], sizes = [64, 4], strides = [1, 1]} : vector<64x32xf32> to vector<64x4xf32>
    %218 = vector.extract_strided_slice %194 {offsets = [0, 12], sizes = [64, 4], strides = [1, 1]} : vector<64x32xf32> to vector<64x4xf32>
    %219 = vector.extract_strided_slice %194 {offsets = [0, 16], sizes = [64, 4], strides = [1, 1]} : vector<64x32xf32> to vector<64x4xf32>
    %220 = vector.extract_strided_slice %194 {offsets = [0, 20], sizes = [64, 4], strides = [1, 1]} : vector<64x32xf32> to vector<64x4xf32>
    %221 = vector.extract_strided_slice %194 {offsets = [0, 24], sizes = [64, 4], strides = [1, 1]} : vector<64x32xf32> to vector<64x4xf32>
    %222 = vector.extract_strided_slice %194 {offsets = [0, 28], sizes = [64, 4], strides = [1, 1]} : vector<64x32xf32> to vector<64x4xf32>
    %223 = vector.shape_cast %215 : vector<64x4xf32> to vector<1x64x4xf32>
    %224 = vector.shape_cast %216 : vector<64x4xf32> to vector<1x64x4xf32>
    %225 = vector.shape_cast %217 : vector<64x4xf32> to vector<1x64x4xf32>
    %226 = vector.shape_cast %218 : vector<64x4xf32> to vector<1x64x4xf32>
    %227 = vector.shape_cast %219 : vector<64x4xf32> to vector<1x64x4xf32>
    %228 = vector.shape_cast %220 : vector<64x4xf32> to vector<1x64x4xf32>
    %229 = vector.shape_cast %221 : vector<64x4xf32> to vector<1x64x4xf32>
    %230 = vector.shape_cast %222 : vector<64x4xf32> to vector<1x64x4xf32>
    %231 = tpu.concatenate %223, %224, %225, %226, %227, %228, %229, %230 in 0 : vector<1x64x4xf32>, vector<1x64x4xf32>, vector<1x64x4xf32>, vector<1x64x4xf32>, vector<1x64x4xf32>, vector<1x64x4xf32>, vector<1x64x4xf32>, vector<1x64x4xf32> -> vector<8x64x4xf32>
    %232 = vector.extract_strided_slice %197 {offsets = [0, 0], sizes = [64, 4], strides = [1, 1]} : vector<64x32xf32> to vector<64x4xf32>
    %233 = vector.extract_strided_slice %197 {offsets = [0, 4], sizes = [64, 4], strides = [1, 1]} : vector<64x32xf32> to vector<64x4xf32>
    %234 = vector.extract_strided_slice %197 {offsets = [0, 8], sizes = [64, 4], strides = [1, 1]} : vector<64x32xf32> to vector<64x4xf32>
    %235 = vector.extract_strided_slice %197 {offsets = [0, 12], sizes = [64, 4], strides = [1, 1]} : vector<64x32xf32> to vector<64x4xf32>
    %236 = vector.extract_strided_slice %197 {offsets = [0, 16], sizes = [64, 4], strides = [1, 1]} : vector<64x32xf32> to vector<64x4xf32>
    %237 = vector.extract_strided_slice %197 {offsets = [0, 20], sizes = [64, 4], strides = [1, 1]} : vector<64x32xf32> to vector<64x4xf32>
    %238 = vector.extract_strided_slice %197 {offsets = [0, 24], sizes = [64, 4], strides = [1, 1]} : vector<64x32xf32> to vector<64x4xf32>
    %239 = vector.extract_strided_slice %197 {offsets = [0, 28], sizes = [64, 4], strides = [1, 1]} : vector<64x32xf32> to vector<64x4xf32>
    %240 = vector.shape_cast %232 : vector<64x4xf32> to vector<1x64x4xf32>
    %241 = vector.shape_cast %233 : vector<64x4xf32> to vector<1x64x4xf32>
    %242 = vector.shape_cast %234 : vector<64x4xf32> to vector<1x64x4xf32>
    %243 = vector.shape_cast %235 : vector<64x4xf32> to vector<1x64x4xf32>
    %244 = vector.shape_cast %236 : vector<64x4xf32> to vector<1x64x4xf32>
    %245 = vector.shape_cast %237 : vector<64x4xf32> to vector<1x64x4xf32>
    %246 = vector.shape_cast %238 : vector<64x4xf32> to vector<1x64x4xf32>
    %247 = vector.shape_cast %239 : vector<64x4xf32> to vector<1x64x4xf32>
    %248 = tpu.concatenate %240, %241, %242, %243, %244, %245, %246, %247 in 0 : vector<1x64x4xf32>, vector<1x64x4xf32>, vector<1x64x4xf32>, vector<1x64x4xf32>, vector<1x64x4xf32>, vector<1x64x4xf32>, vector<1x64x4xf32>, vector<1x64x4xf32> -> vector<8x64x4xf32>
    %cst_90 = arith.constant dense<0.000000e+00> : vector<8x64x64xf32>
    %249 = tpu.matmul %214, %231, %cst_90 {dimension_numbers = #tpu.dot_dimension_numbers<[2], [2], [1], [1], [0, 0, 0, 1, 1, 1], [0], [0]>} : vector<8x64x4xf32>, vector<8x64x4xf32>, vector<8x64x64xf32> -> vector<8x64x64xf32>
    %cst_91 = arith.constant 5.000000e-01 : f32
    %250 = vector.broadcast %cst_91 : f32 to vector<8x64x64xf32>
    %251 = arith.mulf %249, %250 : vector<8x64x64xf32>
    %cst_92 = arith.constant dense<0xFF800000> : vector<8x64xf32>
    %252 = vector.multi_reduction <maximumf>, %251, %cst_92 [2] : vector<8x64x64xf32> to vector<8x64xf32>
    %253 = vector.shape_cast %252 : vector<8x64xf32> to vector<8x64x1xf32>
    %254 = vector.broadcast %253 : vector<8x64x1xf32> to vector<8x64x64xf32>
    %255 = arith.subf %251, %254 : vector<8x64x64xf32>
    %256 = math.exp %255 : vector<8x64x64xf32>
    %cst_93 = arith.constant dense<0.000000e+00> : vector<8x64xf32>
    %257 = vector.multi_reduction <add>, %256, %cst_93 [2] : vector<8x64x64xf32> to vector<8x64xf32>
    %258 = vector.shape_cast %257 : vector<8x64xf32> to vector<8x64x1xf32>
    %259 = tpu.reciprocal %258 {approx = true} : vector<8x64x1xf32> -> vector<8x64x1xf32>
    %260 = vector.broadcast %259 : vector<8x64x1xf32> to vector<8x64x64xf32>
    %261 = arith.mulf %256, %260 : vector<8x64x64xf32>
    %cst_94 = arith.constant dense<0.000000e+00> : vector<8x64x4xf32>
    %262 = tpu.matmul %261, %248, %cst_94 {dimension_numbers = #tpu.dot_dimension_numbers<[2], [1], [1], [2], [0, 0, 0, 1, 1, 2], [0], [0]>} : vector<8x64x64xf32>, vector<8x64x4xf32>, vector<8x64x4xf32> -> vector<8x64x4xf32>
    %c1_95 = arith.constant 1 : index
    %c0_96 = arith.constant 0 : index
    %c0_97 = arith.constant 0 : index
    %c0_98 = arith.constant 0 : index
    %263 = vector.load %arg8[%c1_95, %c0_96, %c0_97, %c0_98] : memref<2x8x4x32xf32, #tpu.memory_space<vmem>>, vector<1x8x4x32xf32>
    %264 = vector.shape_cast %263 : vector<1x8x4x32xf32> to vector<8x4x32xf32>
    %cst_99 = arith.constant dense<0.000000e+00> : vector<8x64x32xf32>
    %265 = tpu.matmul %262, %264, %cst_99 {dimension_numbers = #tpu.dot_dimension_numbers<[2], [1], [1], [2], [0, 0, 0, 1, 1, 2], [0], [0]>} : vector<8x64x4xf32>, vector<8x4x32xf32>, vector<8x64x32xf32> -> vector<8x64x32xf32>
    %cst_100 = arith.constant dense<0.000000e+00> : vector<64x32xf32>
    %266 = vector.multi_reduction <add>, %265, %cst_100 [0] : vector<8x64x32xf32> to vector<64x32xf32>
    %267 = arith.addf %162, %266 : vector<64x32xf32>
    %c1_101 = arith.constant 1 : index
    %c0_102 = arith.constant 0 : index
    %c0_103 = arith.constant 0 : index
    %268 = vector.load %arg9[%c1_101, %c0_102, %c0_103] : memref<2x1x32xf32, #tpu.memory_space<vmem>>, vector<1x1x32xf32>
    %269 = vector.shape_cast %268 : vector<1x1x32xf32> to vector<1x32xf32>
    %270 = vector.broadcast %269 : vector<1x32xf32> to vector<64x32xf32>
    %271 = arith.addf %267, %270 : vector<64x32xf32>
    %c1_104 = arith.constant 1 : index
    %c0_105 = arith.constant 0 : index
    %c0_106 = arith.constant 0 : index
    %272 = vector.load %arg10[%c1_104, %c0_105, %c0_106] : memref<2x1x32xf32, #tpu.memory_space<vmem>>, vector<1x1x32xf32>
    %273 = vector.shape_cast %272 : vector<1x1x32xf32> to vector<1x32xf32>
    %c1_107 = arith.constant 1 : index
    %c0_108 = arith.constant 0 : index
    %c0_109 = arith.constant 0 : index
    %274 = vector.load %arg11[%c1_107, %c0_108, %c0_109] : memref<2x1x32xf32, #tpu.memory_space<vmem>>, vector<1x1x32xf32>
    %275 = vector.shape_cast %274 : vector<1x1x32xf32> to vector<1x32xf32>
    %cst_110 = arith.constant dense<0.000000e+00> : vector<64xf32>
    %276 = vector.multi_reduction <add>, %271, %cst_110 [1] : vector<64x32xf32> to vector<64xf32>
    %277 = vector.shape_cast %276 : vector<64xf32> to vector<64x1xf32>
    %cst_111 = arith.constant 3.200000e+01 : f32
    %278 = vector.broadcast %cst_111 : f32 to vector<64x1xf32>
    %279 = arith.divf %277, %278 : vector<64x1xf32>
    %280 = vector.broadcast %279 : vector<64x1xf32> to vector<64x32xf32>
    %281 = arith.subf %271, %280 : vector<64x32xf32>
    %282 = arith.mulf %281, %281 : vector<64x32xf32>
    %cst_112 = arith.constant dense<0.000000e+00> : vector<64xf32>
    %283 = vector.multi_reduction <add>, %282, %cst_112 [1] : vector<64x32xf32> to vector<64xf32>
    %284 = vector.shape_cast %283 : vector<64xf32> to vector<64x1xf32>
    %cst_113 = arith.constant 3.200000e+01 : f32
    %285 = vector.broadcast %cst_113 : f32 to vector<64x1xf32>
    %286 = arith.divf %284, %285 : vector<64x1xf32>
    %287 = vector.broadcast %279 : vector<64x1xf32> to vector<64x32xf32>
    %288 = arith.subf %271, %287 : vector<64x32xf32>
    %cst_114 = arith.constant 9.99999974E-6 : f32
    %289 = vector.broadcast %cst_114 : f32 to vector<64x1xf32>
    %290 = arith.addf %286, %289 : vector<64x1xf32>
    %291 = math.rsqrt %290 : vector<64x1xf32>
    %292 = vector.broadcast %291 : vector<64x1xf32> to vector<64x32xf32>
    %293 = arith.mulf %288, %292 : vector<64x32xf32>
    %294 = vector.broadcast %273 : vector<1x32xf32> to vector<64x32xf32>
    %295 = arith.mulf %293, %294 : vector<64x32xf32>
    %296 = vector.broadcast %275 : vector<1x32xf32> to vector<64x32xf32>
    %297 = arith.addf %295, %296 : vector<64x32xf32>
    %c1_115 = arith.constant 1 : index
    %c0_116 = arith.constant 0 : index
    %c0_117 = arith.constant 0 : index
    %298 = vector.load %arg12[%c1_115, %c0_116, %c0_117] : memref<2x32x128xf32, #tpu.memory_space<vmem>>, vector<1x32x128xf32>
    %299 = vector.shape_cast %298 : vector<1x32x128xf32> to vector<32x128xf32>
    %cst_118 = arith.constant dense<0.000000e+00> : vector<64x128xf32>
    %300 = tpu.matmul %297, %299, %cst_118 {dimension_numbers = #tpu.dot_dimension_numbers<[1], [0], [0], [1], [0, 0, 1, 1], [], []>} : vector<64x32xf32>, vector<32x128xf32>, vector<64x128xf32> -> vector<64x128xf32>
    %c1_119 = arith.constant 1 : index
    %c0_120 = arith.constant 0 : index
    %c0_121 = arith.constant 0 : index
    %301 = vector.load %arg13[%c1_119, %c0_120, %c0_121] : memref<2x1x128xf32, #tpu.memory_space<vmem>>, vector<1x1x128xf32>
    %302 = vector.shape_cast %301 : vector<1x1x128xf32> to vector<1x128xf32>
    %303 = vector.broadcast %302 : vector<1x128xf32> to vector<64x128xf32>
    %304 = arith.addf %300, %303 : vector<64x128xf32>
    %cst_122 = arith.constant 5.000000e-01 : f32
    %305 = vector.broadcast %cst_122 : f32 to vector<64x128xf32>
    %306 = arith.mulf %305, %304 : vector<64x128xf32>
    %cst_123 = arith.constant 0.707106769 : f32
    %307 = vector.broadcast %cst_123 : f32 to vector<64x128xf32>
    %308 = arith.mulf %304, %307 : vector<64x128xf32>
    %309 = math.erf %308 : vector<64x128xf32>
    %cst_124 = arith.constant 1.000000e+00 : f32
    %310 = vector.broadcast %cst_124 : f32 to vector<64x128xf32>
    %311 = arith.addf %310, %309 : vector<64x128xf32>
    %312 = arith.mulf %306, %311 : vector<64x128xf32>
    %c1_125 = arith.constant 1 : index
    %c0_126 = arith.constant 0 : index
    %c0_127 = arith.constant 0 : index
    %313 = vector.load %arg14[%c1_125, %c0_126, %c0_127] : memref<2x128x32xf32, #tpu.memory_space<vmem>>, vector<1x128x32xf32>
    %314 = vector.shape_cast %313 : vector<1x128x32xf32> to vector<128x32xf32>
    %cst_128 = arith.constant dense<0.000000e+00> : vector<64x32xf32>
    %315 = tpu.matmul %312, %314, %cst_128 {dimension_numbers = #tpu.dot_dimension_numbers<[1], [0], [0], [1], [0, 0, 1, 1], [], []>} : vector<64x128xf32>, vector<128x32xf32>, vector<64x32xf32> -> vector<64x32xf32>
    %316 = arith.addf %271, %315 : vector<64x32xf32>
    %c1_129 = arith.constant 1 : index
    %c0_130 = arith.constant 0 : index
    %c0_131 = arith.constant 0 : index
    %317 = vector.load %arg15[%c1_129, %c0_130, %c0_131] : memref<2x1x32xf32, #tpu.memory_space<vmem>>, vector<1x1x32xf32>
    %318 = vector.shape_cast %317 : vector<1x1x32xf32> to vector<1x32xf32>
    %319 = vector.broadcast %318 : vector<1x32xf32> to vector<64x32xf32>
    %320 = arith.addf %316, %319 : vector<64x32xf32>
    %c0_132 = arith.constant 0 : index
    %c0_133 = arith.constant 0 : index
    %c0_134 = arith.constant 0 : index
    %321 = vector.load %arg16[%c0_132, %c0_133, %c0_134] : memref<1x64x32xf32, #tpu.memory_space<vmem>>, vector<1x64x32xf32>
    %322 = vector.shape_cast %321 : vector<1x64x32xf32> to vector<64x32xf32>
    %323 = vector.shape_cast %320 : vector<64x32xf32> to vector<1x64x32xf32>
    tpu.vector_store %arg16[%c0_132, %c0_133, %c0_134], %323 {strides = array<i32>} : memref<1x64x32xf32, #tpu.memory_space<vmem>>, vector<1x64x32xf32>,
    return
  }
  func.func @transform_0(%arg0: i32) -> (i32, i32, i32) {
    %c0_i32 = arith.constant 0 : i32
    %c0_i32_0 = arith.constant 0 : i32
    %c0_i32_1 = arith.constant 0 : i32
    return %arg0, %c0_i32, %c0_i32_0 : i32, i32, i32
  }
  func.func @transform_1(%arg0: i32) -> (i32, i32) {
    %c0_i32 = arith.constant 0 : i32
    %c0_i32_0 = arith.constant 0 : i32
    %c0_i32_1 = arith.constant 0 : i32
    return %c0_i32, %c0_i32_0 : i32, i32
  }
  func.func @transform_2(%arg0: i32) -> (i32, i32, i32) {
    %c0_i32 = arith.constant 0 : i32
    %c0_i32_0 = arith.constant 0 : i32
    %c0_i32_1 = arith.constant 0 : i32
    %c0_i32_2 = arith.constant 0 : i32
    return %c0_i32, %c0_i32_0, %c0_i32_1 : i32, i32, i32
  }
  func.func @transform_3(%arg0: i32) -> (i32, i32, i32) {
    %c0_i32 = arith.constant 0 : i32
    %c0_i32_0 = arith.constant 0 : i32
    %c0_i32_1 = arith.constant 0 : i32
    %c0_i32_2 = arith.constant 0 : i32
    return %c0_i32, %c0_i32_0, %c0_i32_1 : i32, i32, i32
  }
  func.func @transform_4(%arg0: i32) -> (i32, i32, i32) {
    %c0_i32 = arith.constant 0 : i32
    %c0_i32_0 = arith.constant 0 : i32
    %c0_i32_1 = arith.constant 0 : i32
    %c0_i32_2 = arith.constant 0 : i32
    return %c0_i32, %c0_i32_0, %c0_i32_1 : i32, i32, i32
  }
  func.func @transform_5(%arg0: i32) -> (i32, i32, i32) {
    %c0_i32 = arith.constant 0 : i32
    %c0_i32_0 = arith.constant 0 : i32
    %c0_i32_1 = arith.constant 0 : i32
    %c0_i32_2 = arith.constant 0 : i32
    return %c0_i32, %c0_i32_0, %c0_i32_1 : i32, i32, i32
  }
  func.func @transform_6(%arg0: i32) -> (i32, i32, i32) {
    %c0_i32 = arith.constant 0 : i32
    %c0_i32_0 = arith.constant 0 : i32
    %c0_i32_1 = arith.constant 0 : i32
    %c0_i32_2 = arith.constant 0 : i32
    return %c0_i32, %c0_i32_0, %c0_i32_1 : i32, i32, i32
  }
  func.func @transform_7(%arg0: i32) -> (i32, i32, i32, i32) {
    %c0_i32 = arith.constant 0 : i32
    %c0_i32_0 = arith.constant 0 : i32
    %c0_i32_1 = arith.constant 0 : i32
    %c0_i32_2 = arith.constant 0 : i32
    %c0_i32_3 = arith.constant 0 : i32
    return %c0_i32, %c0_i32_0, %c0_i32_1, %c0_i32_2 : i32, i32, i32, i32
  }
  func.func @transform_8(%arg0: i32) -> (i32, i32, i32) {
    %c0_i32 = arith.constant 0 : i32
    %c0_i32_0 = arith.constant 0 : i32
    %c0_i32_1 = arith.constant 0 : i32
    %c0_i32_2 = arith.constant 0 : i32
    return %c0_i32, %c0_i32_0, %c0_i32_1 : i32, i32, i32
  }
  func.func @transform_9(%arg0: i32) -> (i32, i32, i32) {
    %c0_i32 = arith.constant 0 : i32
    %c0_i32_0 = arith.constant 0 : i32
    %c0_i32_1 = arith.constant 0 : i32
    %c0_i32_2 = arith.constant 0 : i32
    return %c0_i32, %c0_i32_0, %c0_i32_1 : i32, i32, i32
  }
  func.func @transform_10(%arg0: i32) -> (i32, i32, i32) {
    %c0_i32 = arith.constant 0 : i32
    %c0_i32_0 = arith.constant 0 : i32
    %c0_i32_1 = arith.constant 0 : i32
    %c0_i32_2 = arith.constant 0 : i32
    return %c0_i32, %c0_i32_0, %c0_i32_1 : i32, i32, i32
  }
  func.func @transform_11(%arg0: i32) -> (i32, i32, i32) {
    %c0_i32 = arith.constant 0 : i32
    %c0_i32_0 = arith.constant 0 : i32
    %c0_i32_1 = arith.constant 0 : i32
    %c0_i32_2 = arith.constant 0 : i32
    return %c0_i32, %c0_i32_0, %c0_i32_1 : i32, i32, i32
  }
  func.func @transform_12(%arg0: i32) -> (i32, i32, i32) {
    %c0_i32 = arith.constant 0 : i32
    %c0_i32_0 = arith.constant 0 : i32
    %c0_i32_1 = arith.constant 0 : i32
    %c0_i32_2 = arith.constant 0 : i32
    return %c0_i32, %c0_i32_0, %c0_i32_1 : i32, i32, i32
  }
  func.func @transform_13(%arg0: i32) -> (i32, i32, i32) {
    %c0_i32 = arith.constant 0 : i32
    %c0_i32_0 = arith.constant 0 : i32
    %c0_i32_1 = arith.constant 0 : i32
    %c0_i32_2 = arith.constant 0 : i32
    return %c0_i32, %c0_i32_0, %c0_i32_1 : i32, i32, i32
  }
  func.func @transform_14(%arg0: i32) -> (i32, i32, i32) {
    %c0_i32 = arith.constant 0 : i32
    %c0_i32_0 = arith.constant 0 : i32
    %c0_i32_1 = arith.constant 0 : i32
    %c0_i32_2 = arith.constant 0 : i32
    return %c0_i32, %c0_i32_0, %c0_i32_1 : i32, i32, i32
  }
  func.func @transform_15(%arg0: i32) -> (i32, i32, i32) {
    %c0_i32 = arith.constant 0 : i32
    %c0_i32_0 = arith.constant 0 : i32
    %c0_i32_1 = arith.constant 0 : i32
    return %arg0, %c0_i32, %c0_i32_0 : i32, i32, i32
  }
}

</mosaic_0001>

<bundles_post_ra>
// kernel: transformer_forward.1
= control target key start
LH: loop header
LB: loop body
LE: loop exit
PB: predicated region body
PF: predicated region fallthrough
CT: control target
= control target key end

     0   :  { %20 = vsyncpa [#allocation3], 0  ;;  %s20774_s0 = inlined_call_operand.vmem [shape: f32[2,64,32], index: 0, kind: input, shape index: {}]   ;;  %s20775_s1 = inlined_call_operand.vmem [shape: f32[64,1], index: 1, kind: input, shape index: {}]   ;;  %s20776_s2 = inlined_call_operand.vmem [shape: f32[2,1,32], index: 2, kind: input, shape index: {}]   ;;  %s20777_s3 = inlined_call_operand.vmem [shape: f32[2,1,32], index: 3, kind: input, shape index: {}]   ;;  %s20778_s4 = inlined_call_operand.vmem [shape: f32[2,32,32], index: 4, kind: input, shape index: {}]   ;;  %s20779_s5 = inlined_call_operand.vmem [shape: f32[2,32,32], index: 5, kind: input, shape index: {}]   ;;  %s20780_s6 = inlined_call_operand.vmem [shape: f32[2,32,32], index: 6, kind: input, shape index: {}]   ;;  %s20781_s7 = inlined_call_operand.vmem [shape: f32[2,8,4,32], index: 7, kind: input, shape index: {}]   ;;  %s20782_s8 = inlined_call_operand.vmem [shape: f32[2,1,32], index: 8, kind: input, shape index: {}]   ;;  %s20783_s9 = inlined_call_operand.vmem [shape: f32[2,1,32], index: 9, kind: input, shape index: {}]   ;;  %s20784_s10 = inlined_call_operand.vmem [shape: f32[2,1,32], index: 10, kind: input, shape index: {}]   ;;  %s20785_s11 = inlined_call_operand.hbm [shape: f32[2,32,128], index: 11, kind: input, shape index: {}]   ;;  %s20786_s12 = inlined_call_operand.vmem [shape: f32[2,1,128], index: 12, kind: input, shape index: {}]   ;;  %s20787_s13 = inlined_call_operand.vmem [shape: f32[2,128,32], index: 13, kind: input, shape index: {}]   ;;  %s20788_s14 = inlined_call_operand.vmem [shape: f32[2,1,32], index: 14, kind: input, shape index: {}]   ;;  %s20789_s15 = inlined_call_operand.hbm [shape: f32[2,64,32], index: 15, kind: output, shape index: {}]  }
   0x1   :  { %21 = vsyncpa [#allocation4], 0 }
   0x2   :  { %23 = vsyncpa [#allocation4 + $0x1], 0  ;;  %s16633_s18 = smov 0   ;;  %s16635_s19 = smov 0  }
   0x3   :  { %s16637_s20 = smov 0   ;;  %s16639_s21 = smov 0  }
   0x4 LB: > { %20926 = sst [smem:[#allocation8_spill]] %s16525_s18  ;;  %s16654_s22 = sadd.s32 4294967295, %s16537_s21   ;;  %s16537_s21 = sphi %s16639_s21, %s21172_s21   ;;  %s16533_s20 = sphi %s16637_s20, %s21174_s20   ;;  %s16529_s19 = sphi %s16635_s19, %s21176_s19   ;;  %s16525_s18 = sphi %s16633_s18, %s21175_s18  }
   0x5   : > { %20927 = sst [smem:[#allocation9_spill]] %s16533_s20  ;;  %s11610_s23 = sadd.s32 4294967294, %s16537_s21  }
   0x6   : > { %s16658_s24 = sadd.s32 1, %s16537_s21   ;;  %s356_s25 = sadd.s32 1, %s16533_s20 }
   0x7   : > { %20928 = sst [smem:[#allocation10_spill]] %s16658_s24  ;;  %s353_s26 = ssub.s32 %s16537_s21, %s16658_s24 }
   0x8   : > { %p366_p0 = scmp.ne.s32.totalorder %s16533_s20, %s16529_s19  ;;  %p354_p1 = scmp.eq.s32.totalorder %s353_s26, 0 }
   0x9   : > { %p367_p2 = scmp.eq.s32.totalorder %s16654_s22, 1  ;;  %p372_p3 = scmp.ne.s32.totalorder %s16529_s19, %s16525_s18 }
   0xa   : > { %p373_p4 = scmp.eq.s32.totalorder %s11610_s23, 1  ;;  %p11611_p7 = scmp.ge.s32.totalorder %s16537_s21, 1 }
   0xb   : > { %s16669_s27 = scalar_select %p354_p1, %s16533_s20, %s356_s25  }
   0xc   : > { %p16671_p5 = por %p367_p2, %p366_p0  ;;  %p16675_p6 = por %p373_p4, %p372_p3 }
   0xd   : > { %20929 = sst [smem:[#allocation11_spill]] %s16669_s27  ;;  %p380_p8 = scmp.lt.s32.totalorder %s16537_s21, 3 }
   0xe   : > { %s20930_s28 = scalar_select %p16671_p5, 1, 0 }
   0xf   : > { %s20931_s29 = scalar_select %p16675_p6, 1, 0 }
  0x10   : > { %p20795_p9 = scmp.eq.s32.totalorder %s16654_s22, 0  ;;  %p16682_p10 = pnand %p11611_p7, %p380_p8 }
  0x11   : > { %20932 = sst [smem:[#allocation12_spill]] %s20931_s29  ;;  %s16539_s16 = smov [#allocation2]  }
  0x12   : > { %s20933_s30 = scalar_select %p16682_p10, 1, 0 }
  0x13   : > { %s422_s17 = sshll.u32 %s16539_s16, 4  ;;  %p15217_p11 = pneg %p16682_p10  ;;  %s423_s17 = int_to_ptr.vmem [resolvable:$true] %s422_s17 }
  0x14   : > { %s16443_s27 = scalar_lea.hbm %s20785_s11, 1024 }
  0x15   : > { %p16690_p12 = pnand %p20795_p9, %p15217_p11  ;;  %p16444_p13 = scmp.ne.s32.totalorder %s20785_s11, %s16443_s27 }
  0x16   : > { %p16450_p3 = scmp.lt.u32.totalorder %s16443_s27, %s20785_s11 }
  0x17   : > { %p16445_p0 = pneg %p16690_p12 }
  0x19   : > { %p16446_p1 = pnand %p16445_p0, %p16444_p13 }
  0x1b   : > { %p16447_p2 = pneg %p16446_p1 }
  0x1d   : > { %p16452_p4 = pnand %p16450_p3, %p16447_p2 }
  0x1f   : > { %16455 = shalt.err (!%p16452_p4)
}
  0x20   : > { %s16456_s18 = scalar_lea.vmem %s423_s17, 1024  ;;  %p16464_p9 = scmp.lt.s32.totalorder %s423_s17, %s423_s17 }
  0x21   : > { %p16457_p7 = scmp.ne.s32.totalorder %s423_s17, %s16456_s18  ;;  %p16465_p6 = scmp.lt.s32.totalorder %s16456_s18, %s16456_s18 }
  0x23   : > { %p16459_p8 = pnand %p16457_p7, %p16445_p0  ;;  %p16466_p5 = por %p16465_p6, %p16464_p9 }
  0x25   : > { %p16460_p11 = pneg %p16459_p8 }
  0x27   : > { %p16467_p10 = pnand %p16466_p5, %p16460_p11 }
  0x29   : > { %16470 = shalt.err (!%p16467_p10)
}
  0x2a   : > { %s16540_s20 = smov 128   ;;  %s16541_s24 = smov 8  }
  0x2b   : > { %15220 = dma.hbm_to_vmem [thread:$0]  (!%p16690_p12), %s20785_s11, 1024, %s423_s17, [#allocation3], %s16540_s20, %s16540_s20, %s16541_s24  }
  0x2c   : > { %p20935_p13 = scmp.ne.s32.totalorder %s20933_s30, 0 }
  0x2e   : > { %455 = sbr.rel (%p20935_p13) target bundleno = 5425 (0x1531), region = 80 }
  0x35   : > { %p20936_p1 = scmp.eq.s32.totalorder %s16654_s22, 0 }
  0x37   : > { %16516 = dma.done.wait (%p20936_p1), [#allocation3], 1024   ;;  %p20937_p0 = pmov %p20936_p1 }
  0x38   : > { %v16542_v0 = vmov 0   ;;  %v518_v1 = vld [vmem:[%s20775_s1 + $0x10] sm:$0xff]  ;;  %v516_v2 = vld [vmem:[%s20775_s1] sm:$0xff]  ;;  %v519_v3 = vld [vmem:[%s20775_s1 + $0x18] sm:$0xff]  ;;  %p503_p5 = scmp.lt.s32.totalorder %s16654_s22, 1  ;;  %vm574_vm0 = vcmask 261120  }
  0x39   : > { %16518 = vsyncadd (%p20937_p0), [#allocation3], 4294966272  ;;  %15274 = vset.pattern.permute.xlu1 %v16542_v0  ;;  %15273 = vset.pattern.permute.xlu0 %v16542_v0  ;;  %v517_v4 = vld [vmem:[%s20775_s1 + $0x8] sm:$0xff]  ;;  %v520_v6 = vld [vmem:[%s20775_s1 + $0x20] sm:$0xff]  ;;  %vm1475_vm1 = vcmask 31744   ;;  %s20865_s20 = smov 116  }
  0x3a   : > { %536 = vperm.xlu1 %15274, %v518_v1   ;;  %526 = vperm.xlu0 %15273, %v516_v2   ;;  %v521_v5 = vld [vmem:[%s20775_s1 + $0x28] sm:$0xff]  ;;  %v523_v7 = vld [vmem:[%s20775_s1 + $0x38] sm:$0xff]  ;;  %v522_v8 = vld [vmem:[%s20775_s1 + $0x30] sm:$0xff]  ;;  %s504_s17 = scalar_select %p503_p5, %s16654_s22, 1  ;;  %vm2636_vm3 = vcmask 523264   ;;  %vm4405_vm4 = vcmask 1043456  }
  0x3b   : > { %vm16951_vm2 = vmpackc.low %vm1475_vm1, %vm1475_vm1  ;;  %s20863_s24 = smov 112   ;;  %s20859_s26 = smov 100  }
  0x3c   : > { %s12273_s16 = sshll.u32 %s504_s17, 6  ;;  %s16543_s17 = smov 124  }
  0x3d   : > { %s507_s25 = scalar_lea.vmem %s20774_s0, %s12273_s16  ;;  %s20867_s16 = smov 120  }
  0x3e   : > { %541 = vperm.xlu1 %15274, %v519_v3   ;;  %531 = vperm.xlu0 %15273, %v517_v4   ;;  %v510_v9 = vld [vmem:[%s507_s25 + $0x10] sm:$0xff]  ;;  %v508_v10 = vld [vmem:[%s507_s25] sm:$0xff]  ;;  %v509_v15 = vld [vmem:[%s507_s25 + $0x8] sm:$0xff]  ;;  %s20857_s18 = smov 104   ;;  %s21062_s27 = smov 120  }
  0x3f   : > { %v511_v18 = vld [vmem:[%s507_s25 + $0x18] sm:$0xff]  ;;  %v512_v22 = vld [vmem:[%s507_s25 + $0x20] sm:$0xff]  ;;  %v513_v26 = vld [vmem:[%s507_s25 + $0x28] sm:$0xff]  ;;  %s21063_s29 = smov 116   ;;  %s21064_s23 = smov 112  }
  0x40   : > { %v514_v29 = vld [vmem:[%s507_s25 + $0x30] sm:$0xff]  ;;  %v515_v34 = vld [vmem:[%s507_s25 + $0x38] sm:$0xff]  ;;  %s20861_s25 = smov 108   ;;  %s21065_s30 = smov 108  }
  0x41   : > { %p21168_p9 = scmp.ne.s32.totalorder %s20930_s28, 0 }
  0x42   : > { %551 = vperm.xlu1 %15274, %v521_v5   ;;  %546 = vperm.xlu0 %15273, %v520_v6  }
  0x46   : > { %561 = vperm.xlu1 %15274, %v523_v7   ;;  %556 = vperm.xlu0 %15273, %v522_v8  }
  0xb9   : > { %v537_v11 = vpop.permute.xlu1 %536  ;;  %v527_v12 = vpop.permute.xlu0 %526 }
  0xba   : > { %v16745_v13 = vadd.f32 %v537_v11, %v510_v9  ;;  %v16747_v14 = vadd.f32 %v527_v12, %v508_v10 }
  0xbc   : > { %20938 = vst [vmem:[#allocation13_spill] sm:$0xff] %v16745_v13  ;;  %20939 = vst [vmem:[#allocation14_spill] sm:$0xff] %v16747_v14  ;;  %v575_v16 = vsel %vm574_vm0, %v16747_v14, 0.0  ;;  %v581_v21 = vsel %vm574_vm0, %v16745_v13, 0.0 }
  0xbd   : > { %v542_v17 = vpop.permute.xlu1 %541  ;;  %v532_v19 = vpop.permute.xlu0 %531  ;;  %576 = vadd.xlane.f32.xlu0 %v575_v16 }
  0xbe   : > { %v16751_v20 = vadd.f32 %v532_v19, %v509_v15  ;;  %v16755_v23 = vadd.f32 %v542_v17, %v511_v18  ;;  %v708_v19 = vld [vmem:[%s20778_s4] sm:$0xff] }
  0xc0   : > { %20940 = vst [vmem:[#allocation15_spill] sm:$0xff] %v16751_v20  ;;  %20941 = vst [vmem:[#allocation16_spill] sm:$0xff] %v16755_v23  ;;  %v578_v24 = vsel %vm574_vm0, %v16751_v20, 0.0  ;;  %v584_v32 = vsel %vm574_vm0, %v16755_v23, 0.0 }
  0xc1   : > { %v552_v25 = vpop.permute.xlu1 %551  ;;  %v547_v27 = vpop.permute.xlu0 %546  ;;  %579 = vadd.xlane.f32.xlu1 %v578_v24  ;;  %582 = vadd.xlane.f32.xlu0 %v581_v21  ;;  %v709_v21 = vld [vmem:[%s20778_s4 + $0x8] sm:$0xff] }
  0xc2   : > { %v16759_v28 = vadd.f32 %v547_v27, %v512_v22  ;;  %v16761_v30 = vadd.f32 %v552_v25, %v513_v26  ;;  %v950_v22 = vld [vmem:[%s20780_s6] sm:$0xff]  ;;  %v14443_v24 = vpack.c.bf16 %v709_v21, %v708_v19  ;;  %v951_v25 = vld [vmem:[%s20780_s6 + $0x8] sm:$0xff]  ;;  %v710_v27 = vld [vmem:[%s20778_s4 + $0x10] sm:$0xff] }
  0xc3   : > { %v14459_v26 = vpack.c.bf16 %v951_v25, %v950_v22  ;;  %v843_v21 = vld [vmem:[%s20779_s5 + $0x10] sm:$0xff]  ;;  %v844_v22 = vld [vmem:[%s20779_s5 + $0x18] sm:$0xff] }
  0xc4   : > { %20942 = vst [vmem:[#allocation17_spill] sm:$0xff] %v16759_v28  ;;  %20943 = vst [vmem:[#allocation18_spill] sm:$0xff] %v16761_v30  ;;  %v587_v31 = vsel %vm574_vm0, %v16759_v28, 0.0  ;;  %v590_v39 = vsel %vm574_vm0, %v16761_v30, 0.0  ;;  %14444 = vmatprep.subr.bf16.mxu1 %v14443_v24 }
  0xc5   : > { %v562_v33 = vpop.permute.xlu1 %561  ;;  %v557_v35 = vpop.permute.xlu0 %556  ;;  %588 = vadd.xlane.f32.xlu1 %v587_v31  ;;  %585 = vadd.xlane.f32.xlu0 %v584_v32  ;;  %v952_v32 = vld [vmem:[%s20780_s6 + $0x10] sm:$0xff] }
  0xc6   : > { %v16767_v36 = vadd.f32 %v557_v35, %v514_v29  ;;  %v16769_v37 = vadd.f32 %v562_v33, %v515_v34  ;;  %14460 = vmatprep.subr.bf16.mxu0 %v14459_v26  ;;  %14446 = vmatpush3.bf16.msra.mxu1 %v14443_v24  ;;  %v711_v29 = vld [vmem:[%s20778_s4 + $0x18] sm:$0xff]  ;;  %v841_v35 = vld [vmem:[%s20779_s5] sm:$0xff] }
  0xc7   : > { %14462 = vmatpush3.bf16.msra.mxu0 %v14459_v26  ;;  %v14447_v31 = vpack.c.bf16 %v711_v29, %v710_v27  ;;  %v953_v33 = vld [vmem:[%s20780_s6 + $0x18] sm:$0xff] }
  0xc8   : > { %20944 = vst [vmem:[#allocation19_spill] sm:$0xff] %v16767_v36  ;;  %20945 = vst [vmem:[#allocation20_spill] sm:$0xff] %v16769_v37  ;;  %v593_v38 = vsel %vm574_vm0, %v16767_v36, 0.0  ;;  %v596_v40 = vsel %vm574_vm0, %v16769_v37, 0.0  ;;  %v14463_v34 = vpack.c.bf16 %v953_v33, %v952_v32 }
  0xc9   : > { %594 = vadd.xlane.f32.xlu1 %v593_v38  ;;  %591 = vadd.xlane.f32.xlu0 %v590_v39  ;;  %v842_v38 = vld [vmem:[%s20779_s5 + $0x8] sm:$0xff] }
  0xca   : > { %14448 = vmatprep.subr.bf16.mxu1 %v14447_v31  ;;  %14464 = vmatprep.subr.bf16.mxu0 %v14463_v34  ;;  %v16855_v39 = vpack.c.bf16 %v842_v38, %v841_v35 }
  0xcb   : > { %14450 = vmatpush3.bf16.msra.mxu1 %v14447_v31  ;;  %14466 = vmatpush3.bf16.msra.mxu0 %v14463_v34  ;;  %v14455_v31 = vpack.c.bf16 %v844_v22, %v843_v21 }
  0xcc   : > { %14452 = vmatprep.subr.bf16.mxu1 %v16855_v39 }
  0xcd   : > { %597 = vadd.xlane.f32.xlu0 %v596_v40 }
 0x14a   : > { %v577_v41 = vpop.xlane.xlu0 %576 }
 0x14b   : > { %v600_v42 = vmul.f32 0.03125, %v577_v41 }
 0x14d   : > { %v16778_v43 = vsub.f32 %v16747_v14, %v600_v42 }
 0x14e   : > { %v580_v44 = vpop.xlane.xlu1 %579  ;;  %v583_v45 = vpop.xlane.xlu0 %582 }
 0x14f   : > { %v601_v46 = vmul.f32 0.03125, %v580_v44  ;;  %v602_v47 = vmul.f32 0.03125, %v583_v45  ;;  %v616_v48 = vmul.f32 %v16778_v43, %v16778_v43 }
 0x151   : > { %v16783_v49 = vsub.f32 %v16751_v20, %v601_v46  ;;  %v16786_v50 = vsub.f32 %v16745_v13, %v602_v47  ;;  %v624_v51 = vsel %vm574_vm0, %v616_v48, 0.0 }
 0x152   : > { %v589_v52 = vpop.xlane.xlu1 %588  ;;  %625 = vadd.xlane.f32.xlu1 %v624_v51  ;;  %v586_v53 = vpop.xlane.xlu0 %585 }
 0x153   : > { %v604_v54 = vmul.f32 0.03125, %v589_v52  ;;  %v603_v55 = vmul.f32 0.03125, %v586_v53  ;;  %v617_v56 = vmul.f32 %v16783_v49, %v16783_v49  ;;  %v618_v57 = vmul.f32 %v16786_v50, %v16786_v50 }
 0x155   : > { %v16794_v58 = vsub.f32 %v16759_v28, %v604_v54  ;;  %v16797_v59 = vsub.f32 %v16755_v23, %v603_v55  ;;  %v627_v60 = vsel %vm574_vm0, %v617_v56, 0.0  ;;  %v630_v61 = vsel %vm574_vm0, %v618_v57, 0.0 }
 0x156   : > { %v595_v62 = vpop.xlane.xlu1 %594  ;;  %628 = vadd.xlane.f32.xlu0 %v627_v60  ;;  %631 = vadd.xlane.f32.xlu1 %v630_v61  ;;  %v592_v63 = vpop.xlane.xlu0 %591 }
 0x157   : > { %v606_v0 = vmul.f32 0.03125, %v595_v62  ;;  %v605_v1 = vmul.f32 0.03125, %v592_v63  ;;  %v620_v2 = vmul.f32 %v16794_v58, %v16794_v58  ;;  %v619_v3 = vmul.f32 %v16797_v59, %v16797_v59 }
 0x159   : > { %v16806_v4 = vsub.f32 %v16767_v36, %v606_v0  ;;  %v16809_v5 = vsub.f32 %v16761_v30, %v605_v1  ;;  %v636_v6 = vsel %vm574_vm0, %v620_v2, 0.0  ;;  %v633_v7 = vsel %vm574_vm0, %v619_v3, 0.0  ;;  %v11619_v3 = vld [vmem:[%s20776_s2] ss:$0 sm:$0xff] }
 0x15a   : > { %637 = vadd.xlane.f32.xlu1 %v636_v6  ;;  %634 = vadd.xlane.f32.xlu0 %v633_v7  ;;  %v598_v8 = vpop.xlane.xlu0 %597 }
 0x15b   : > { %v607_v9 = vmul.f32 0.03125, %v598_v8  ;;  %v622_v10 = vmul.f32 %v16806_v4, %v16806_v4  ;;  %v621_v11 = vmul.f32 %v16809_v5, %v16809_v5 }
 0x15d   : > { %v16818_v12 = vsub.f32 %v16769_v37, %v607_v9  ;;  %v642_v15 = vsel %vm574_vm0, %v622_v10, 0.0  ;;  %v639_v16 = vsel %vm574_vm0, %v621_v11, 0.0  ;;  %v11620_v9 = vld [vmem:[%s20777_s3] ss:$0 sm:$0xff] }
 0x15e   : > { %643 = vadd.xlane.f32.xlu1 %v642_v15  ;;  %640 = vadd.xlane.f32.xlu0 %v639_v16 }
 0x15f   : > { %v623_v17 = vmul.f32 %v16818_v12, %v16818_v12 }
 0x161   : > { %v645_v18 = vsel %vm574_vm0, %v623_v17, 0.0 }
 0x162   : > { %646 = vadd.xlane.f32.xlu0 %v645_v18 }
 0x1df   : > { %v626_v40 = vpop.xlane.xlu1 %625 }
 0x1e0   : > { %v648_v41 = vmul.f32 0.03125, %v626_v40 }
 0x1e2   : > { %v656_v42 = vadd.f32 1e-05, %v648_v41 }
 0x1e3   : > { %v632_v44 = vpop.xlane.xlu1 %631  ;;  %v629_v45 = vpop.xlane.xlu0 %628 }
 0x1e4   : > { %15835 = vrsqrt.f32 %v656_v42  ;;  %v650_v46 = vmul.f32 0.03125, %v632_v44  ;;  %v649_v47 = vmul.f32 0.03125, %v629_v45 }
 0x1e6   : > { %v658_v48 = vadd.f32 1e-05, %v650_v46  ;;  %v657_v51 = vadd.f32 1e-05, %v649_v47 }
 0x1e7   : > { %v638_v52 = vpop.xlane.xlu1 %637  ;;  %v635_v53 = vpop.xlane.xlu0 %634 }
 0x1e8   : > { %15837 = vrsqrt.f32 %v658_v48  ;;  %v652_v54 = vmul.f32 0.03125, %v638_v52  ;;  %v651_v55 = vmul.f32 0.03125, %v635_v53 }
 0x1e9   : > { %15839 = vrsqrt.f32 %v657_v51 }
 0x1ea   : > { %v660_v56 = vadd.f32 1e-05, %v652_v54  ;;  %v659_v57 = vadd.f32 1e-05, %v651_v55 }
 0x1eb   : > { %v644_v60 = vpop.xlane.xlu1 %643  ;;  %v641_v61 = vpop.xlane.xlu0 %640 }
 0x1ec   : > { %15841 = vrsqrt.f32 %v660_v56  ;;  %v654_v62 = vmul.f32 0.03125, %v644_v60  ;;  %v653_v63 = vmul.f32 0.03125, %v641_v61 }
 0x1ed   : > { %15843 = vrsqrt.f32 %v659_v57 }
 0x1ee   : > { %v15836_v0 = vpop.eup %15835  ;;  %v662_v1 = vadd.f32 1e-05, %v654_v62  ;;  %v661_v2 = vadd.f32 1e-05, %v653_v63 }
 0x1ef   : > { %v647_v6 = vpop.xlane.xlu0 %646  ;;  %v672_v7 = vmul.f32 %v15836_v0, %v16778_v43 }
 0x1f0   : > { %15845 = vrsqrt.f32 %v662_v1  ;;  %v655_v8 = vmul.f32 0.03125, %v647_v6 }
 0x1f1   : > { %15847 = vrsqrt.f32 %v661_v2  ;;  %v686_v10 = vmul.f32 %v11619_v3, %v672_v7 }
 0x1f2   : > { %v15838_v11 = vpop.eup %15837  ;;  %v663_v15 = vadd.f32 1e-05, %v655_v8 }
 0x1f3   : > { %v15840_v16 = vpop.eup %15839  ;;  %v700_v17 = vadd.f32 %v11620_v9, %v686_v10  ;;  %v674_v18 = vmul.f32 %v15838_v11, %v16786_v50 }
 0x1f4   : > { %15849 = vrsqrt.f32 %v663_v15  ;;  %v673_v19 = vmul.f32 %v15840_v16, %v16783_v49 }
 0x1f5   : > { %13083 = vmatprep.mubr.msk.f32.mxu1 %vm574_vm0, %v700_v17  ;;  %13123 = vmatprep.mubr.msk.f32.mxu0 %vm574_vm0, %v700_v17  ;;  %v688_v43 = vmul.f32 %v11619_v3, %v674_v18 }
 0x1f6   : > { %v15842_v24 = vpop.eup %15841  ;;  %v687_v25 = vmul.f32 %v11619_v3, %v673_v19 }
 0x1f7   : > { %v15844_v26 = vpop.eup %15843  ;;  %v702_v50 = vadd.f32 %v11620_v9, %v688_v43  ;;  %v676_v27 = vmul.f32 %v15842_v24, %v16794_v58 }
 0x1f8   : > { %v701_v49 = vadd.f32 %v11620_v9, %v687_v25  ;;  %v675_v29 = vmul.f32 %v15844_v26, %v16797_v59 }
 0x1f9   : > { %v690_v32 = vmul.f32 %v11619_v3, %v676_v27 }
 0x1fa   : > { %v15846_v33 = vpop.eup %15845  ;;  %13084 = vmatmul.mubr.msk.f32.vlgmr.msra.gmra.mrb[0].mxu1 %vm574_vm0, %v701_v49  ;;  %13124 = vmatmul.mubr.msk.f32.vlgmr.msra.gmra.mrb[0].mxu0 %vm574_vm0, %v701_v49  ;;  %v689_v34 = vmul.f32 %v11619_v3, %v675_v29 }
 0x1fb   : > { %v15848_v35 = vpop.eup %15847  ;;  %13086 = vmatprep.mubr.msk.f32.mxu1 %vm574_vm0, %v702_v50  ;;  %14454 = vmatpush3.bf16.msra.mxu1 %v16855_v39  ;;  %v704_v38 = vadd.f32 %v11620_v9, %v690_v32  ;;  %v678_v40 = vmul.f32 %v15846_v33, %v16806_v4 }
 0x1fc   : > { %13126 = vmatprep.mubr.msk.f32.mxu0 %vm574_vm0, %v702_v50  ;;  %v703_v58 = vadd.f32 %v11620_v9, %v689_v34  ;;  %v677_v59 = vmul.f32 %v15848_v35, %v16809_v5  ;;  %14456 = vmatprep.subr.bf16.mxu1 %v14455_v31 }
 0x1fd   : > { %v692_v41 = vmul.f32 %v11619_v3, %v678_v40 }
 0x1fe   : > { %v15850_v42 = vpop.eup %15849  ;;  %13087 = vmatmul.mubr.msk.f32.gmra.mrb[2].mxu1 %vm574_vm0, %v703_v58  ;;  %13127 = vmatmul.mubr.msk.f32.gmra.mrb[2].mxu0 %vm574_vm0, %v703_v58  ;;  %v691_v44 = vmul.f32 %v11619_v3, %v677_v59 }
 0x1ff   : > { %13089 = vmatprep.mubr.msk.f32.mxu1 %vm574_vm0, %v704_v38  ;;  %13129 = vmatprep.mubr.msk.f32.mxu0 %vm574_vm0, %v704_v38  ;;  %v706_v39 = vadd.f32 %v11620_v9, %v692_v41  ;;  %v679_v4 = vmul.f32 %v15850_v42, %v16818_v12 }
 0x200   : > { %v705_v45 = vadd.f32 %v11620_v9, %v691_v44  ;;  %14458 = vmatpush3.bf16.msra.mxu1 %v14455_v31 }
 0x201   : > { %v693_v46 = vmul.f32 %v11619_v3, %v679_v4 }
 0x202   : > { %13090 = vmatmul.mubr.msk.f32.gmra.mrb[4].mxu1 %vm574_vm0, %v705_v45  ;;  %13130 = vmatmul.mubr.msk.f32.gmra.mrb[4].mxu0 %vm574_vm0, %v705_v45 }
 0x203   : > { %13092 = vmatprep.mubr.msk.f32.mxu1 %vm574_vm0, %v706_v39  ;;  %13132 = vmatprep.mubr.msk.f32.mxu0 %vm574_vm0, %v706_v39  ;;  %v707_v5 = vadd.f32 %v11620_v9, %v693_v46 }
 0x206   : > { %13093 = vmatmul.mubr.msk.f32.gmra.mrb[6].mxu1 %vm574_vm0, %v707_v5  ;;  %13133 = vmatmul.mubr.msk.f32.gmra.mrb[6].mxu0 %vm574_vm0, %v707_v5 }
 0x207   : > { %13103 = vmatprep.mubr.msk.f32.mxu1 %vm574_vm0, %v700_v17  ;;  %v20948_v17 = vmov 0 }
 0x208   : > { %v20949_v17 = vsel %vm16951_vm2, 4294967295, %v20948_v17 }
 0x209   : > { %20950 = vst [vmem:[#allocation23_spill] sm:$0xff] %v20949_v17 }
 0x20a   : > { %13104 = vmatmul.mubr.msk.f32.vlgmr.msra.gmra.mrb[8].mxu1 %vm574_vm0, %v701_v49 }
 0x20b   : > { %13106 = vmatprep.mubr.msk.f32.mxu1 %vm574_vm0, %v702_v50 }
 0x20e   : > { %13107 = vmatmul.mubr.msk.f32.gmra.mrb[10].mxu1 %vm574_vm0, %v703_v58 }
 0x20f   : > { %13109 = vmatprep.mubr.msk.f32.mxu1 %vm574_vm0, %v704_v38 }
 0x212   : > { %13110 = vmatmul.mubr.msk.f32.gmra.mrb[12].mxu1 %vm574_vm0, %v705_v45 }
 0x213   : > { %13112 = vmatprep.mubr.msk.f32.mxu1 %vm574_vm0, %v706_v39 }
 0x216   : > { %13113 = vmatmul.mubr.msk.f32.gmra.mrb[14].mxu1 %vm574_vm0, %v707_v5 }
 0x2cd   : > { %v16903_v12 = vpop.f32.mrb[0].mxu1  ;;  %v13125_v47 = vpop.f32.mrb[0].mxu0 }
 0x2ce   : > { %v1020_v48 = vpop.f32.mrb[1].mxu0  ;;  %1069 = vrot.lane.b32.xlu1 %v16903_v12, %s16543_s17  ;;  %v16907_v51 = vpop.f32.mrb[1].mxu1 }
 0x2cf   : > { %1067 = vrot.lane.b32.xlu0 %v16907_v51, %s16543_s17  ;;  %13151 = vmatprep.mubr.msk.f32.mxu1 %vm1475_vm1, %v16907_v51  ;;  %v16913_v52 = vpack.i.bf16 %v13125_v47, %v1020_v48  ;;  %v16917_v55 = vpack.c.bf16 %v13125_v47, %v1020_v48 }
 0x2d1   : > { %v16915_v53 = vpop.f32.mrb[2].mxu1  ;;  %v13128_v54 = vpop.f32.mrb[2].mxu0 }
 0x2d2   : > { %v16919_v56 = vpop.f32.mrb[3].mxu1  ;;  %v1030_v57 = vpop.f32.mrb[3].mxu0 }
 0x2d3   : > { %1073 = vrot.lane.b32.xlu0 %v16915_v53, %s16543_s17  ;;  %v16923_v60 = vpack.i.bf16 %v13128_v54, %v1030_v57  ;;  %v16925_v61 = vpack.c.bf16 %v13128_v54, %v1030_v57 }
 0x2d5   : > { %v16927_v62 = vpop.f32.mrb[4].mxu1  ;;  %v13131_v63 = vpop.f32.mrb[4].mxu0 }
 0x2d6   : > { %v1040_v0 = vpop.f32.mrb[5].mxu0  ;;  %1077 = vrot.lane.b32.xlu1 %v16927_v62, %s16543_s17  ;;  %v16931_v1 = vpop.f32.mrb[5].mxu1 }
 0x2d7   : > { %1071 = vrot.lane.b32.xlu0 %v16919_v56, %s16543_s17  ;;  %v16935_v2 = vpack.i.bf16 %v13131_v63, %v1040_v0  ;;  %v16937_v3 = vpack.c.bf16 %v13131_v63, %v1040_v0 }
 0x2d9   : > { %20946 = vst [vmem:[#allocation21_spill] sm:$0xff] %v16935_v2  ;;  %v16939_v6 = vpop.f32.mrb[6].mxu1  ;;  %v13134_v7 = vpop.f32.mrb[6].mxu0 }
 0x2da   : > { %v16941_v8 = vpop.f32.mrb[7].mxu1  ;;  %v1050_v9 = vpop.f32.mrb[7].mxu0 }
 0x2db   : > { %1075 = vrot.lane.b32.xlu0 %v16931_v1, %s16543_s17  ;;  %v16945_v10 = vpack.i.bf16 %v13134_v7, %v1050_v9  ;;  %v16947_v11 = vpack.c.bf16 %v13134_v7, %v1050_v9 }
 0x2dd   : > { %20947 = vst [vmem:[#allocation22_spill] sm:$0xff] %v16945_v10  ;;  %v13105_v15 = vpop.f32.mrb[8].mxu1 }
 0x2de   : > { %v911_v16 = vpop.f32.mrb[9].mxu1 }
 0x2df   : > { %1079 = vrot.lane.b32.xlu0 %v16941_v8, %s16543_s17  ;;  %v16957_v18 = vpack.i.bf16 %v13105_v15, %v911_v16  ;;  %v14467_v19 = vpack.c.bf16 %v13105_v15, %v911_v16 }
 0x2e1   : > { %15276 = vrot.lane.b32.xlu1 %v16957_v18, %s16543_s17  ;;  %v13108_v43 = vpop.f32.mrb[10].mxu1  ;;  %14469 = vmatprep.subr.msk.bf16.mxu1 %vm16951_vm2, %v14467_v19 }
 0x2e2   : > { %v921_v21 = vpop.f32.mrb[11].mxu1  ;;  %14472 = vmatpush3.bf16.xpose.msk.msra.mxu1 %vm16951_vm2, %v14467_v19 }
 0x2e3   : > { %15281 = vrot.lane.b32.xlu0 %v16957_v18, %s20867_s16  ;;  %v14473_v22 = vpack.c.bf16 %v13108_v43, %v921_v21  ;;  %v16967_v24 = vpack.i.bf16 %v13108_v43, %v921_v21 }
 0x2e5   : > { %15286 = vrot.lane.b32.xlu1 %v16957_v18, %s20865_s20  ;;  %v13111_v25 = vpop.f32.mrb[12].mxu1  ;;  %14475 = vmatprep.subr.msk.bf16.mxu1 %vm16951_vm2, %v14473_v22 }
 0x2e6   : > { %v931_v26 = vpop.f32.mrb[13].mxu1 }
 0x2e7   : > { %15296 = vrot.lane.b32.xlu0 %v16967_v24, %s16543_s17  ;;  %v14479_v50 = vpack.c.bf16 %v13111_v25, %v931_v26  ;;  %v16975_v27 = vpack.i.bf16 %v13111_v25, %v931_v26 }
 0x2e9   : > { %15291 = vrot.lane.b32.xlu1 %v16957_v18, %s20863_s24  ;;  %v13114_v49 = vpop.f32.mrb[14].mxu1 }
 0x2ea   : > { %v941_v29 = vpop.f32.mrb[15].mxu1  ;;  %14478 = vmatpush3.bf16.xpose.msk.msra.mxu1 %vm16951_vm2, %v14473_v22 }
 0x2eb   : > { %1081 = vrot.lane.b32.xlu0 %v16939_v6, %s16543_s17  ;;  %14481 = vmatprep.subr.msk.bf16.mxu1 %vm16951_vm2, %v14479_v50  ;;  %v14485_v31 = vpack.c.bf16 %v13114_v49, %v941_v29  ;;  %v16985_v32 = vpack.i.bf16 %v13114_v49, %v941_v29 }
 0x2ed   : > { %1083 = vrot.lane.b32.xlu1 %v16907_v51, %s20867_s16 }
 0x2ef   : > { %15301 = vrot.lane.b32.xlu0 %v16957_v18, %s20861_s25 }
 0x2f1   : > { %1085 = vrot.lane.b32.xlu1 %v16903_v12, %s20867_s16 }
 0x2f2   : > { %14484 = vmatpush3.bf16.xpose.msk.msra.mxu1 %vm16951_vm2, %v14479_v50 }
 0x2f3   : > { %1099 = vrot.lane.b32.xlu0 %v16907_v51, %s20865_s20  ;;  %14487 = vmatprep.subr.msk.bf16.mxu1 %vm16951_vm2, %v14485_v31 }
 0x2f5   : > { %1101 = vrot.lane.b32.xlu1 %v16903_v12, %s20865_s20 }
 0x2f7   : > { %15306 = vrot.lane.b32.xlu0 %v16967_v24, %s20867_s16 }
 0x2f9   : > { %15311 = vrot.lane.b32.xlu1 %v16967_v24, %s20865_s20 }
 0x2fa   : > { %14490 = vmatpush3.bf16.xpose.msk.msra.mxu1 %vm16951_vm2, %v14485_v31 }
 0x2fb   : > { %15316 = vrot.lane.b32.xlu0 %v16967_v24, %s20863_s24 }
 0x2fd   : > { %15321 = vrot.lane.b32.xlu1 %v16967_v24, %s20861_s25 }
 0x2ff   : > { %15331 = vrot.lane.b32.xlu0 %v16975_v27, %s20867_s16 }
 0x301   : > { %15326 = vrot.lane.b32.xlu1 %v16975_v27, %s16543_s17  ;;  %13152 = vmatmul.mubr.msk.f32.vlgmr.msra.gmra.mrb[16].mxu1 %vm1475_vm1, %v16903_v12 }
 0x302   : > { %13154 = vmatprep.mubr.msk.f32.mxu1 %vm1475_vm1, %v16919_v56 }
 0x303   : > { %15341 = vrot.lane.b32.xlu0 %v16975_v27, %s20863_s24 }
 0x305   : > { %15336 = vrot.lane.b32.xlu1 %v16975_v27, %s20865_s20  ;;  %13155 = vmatmul.mubr.msk.f32.gmra.mrb[18].mxu1 %vm1475_vm1, %v16915_v53 }
 0x306   : > { %13157 = vmatprep.mubr.msk.f32.mxu1 %vm1475_vm1, %v16931_v1 }
 0x307   : > { %1087 = vrot.lane.b32.xlu0 %v16919_v56, %s20867_s16 }
 0x309   : > { %15346 = vrot.lane.b32.xlu1 %v16985_v32, %s16543_s17  ;;  %13158 = vmatmul.mubr.msk.f32.gmra.mrb[20].mxu1 %vm1475_vm1, %v16927_v62 }
 0x30a   : > { %13160 = vmatprep.mubr.msk.f32.mxu1 %vm1475_vm1, %v16941_v8 }
 0x30b   : > { %1103 = vrot.lane.b32.xlu0 %v16919_v56, %s20865_s20 }
 0x30d   : > { %15351 = vrot.lane.b32.xlu1 %v16975_v27, %s20861_s25  ;;  %13161 = vmatmul.mubr.msk.f32.gmra.mrb[22].mxu1 %vm1475_vm1, %v16939_v6 }
 0x30f   : > { %1105 = vrot.lane.b32.xlu0 %v16915_v53, %s20865_s20 }
 0x311   : > { %1089 = vrot.lane.b32.xlu1 %v16915_v53, %s20867_s16 }
 0x313   : > { %1107 = vrot.lane.b32.xlu0 %v16931_v1, %s20865_s20 }
 0x315   : > { %1091 = vrot.lane.b32.xlu1 %v16931_v1, %s20867_s16 }
 0x317   : > { %1095 = vrot.lane.b32.xlu0 %v16941_v8, %s20867_s16 }
 0x319   : > { %1093 = vrot.lane.b32.xlu1 %v16927_v62, %s20867_s16 }
 0x31b   : > { %1111 = vrot.lane.b32.xlu0 %v16941_v8, %s20865_s20 }
 0x31d   : > { %1109 = vrot.lane.b32.xlu1 %v16927_v62, %s20865_s20 }
 0x31f   : > { %1113 = vrot.lane.b32.xlu0 %v16939_v6, %s20865_s20 }
 0x321   : > { %1097 = vrot.lane.b32.xlu1 %v16939_v6, %s20867_s16 }
 0x323   : > { %15371 = vrot.lane.b32.xlu0 %v16957_v18, %s20859_s26 }
 0x325   : > { %15356 = vrot.lane.b32.xlu1 %v16985_v32, %s20867_s16 }
 0x327   : > { %1131 = vrot.lane.b32.xlu0 %v16907_v51, %s20861_s25 }
 0x329   : > { %15361 = vrot.lane.b32.xlu1 %v16985_v32, %s20865_s20 }
 0x32b   : > { %15376 = vrot.lane.b32.xlu0 %v16967_v24, %s20857_s18 }
 0x32d   : > { %15366 = vrot.lane.b32.xlu1 %v16957_v18, %s20857_s18 }
 0x32f   : > { %15386 = vrot.lane.b32.xlu0 %v16975_v27, %s20857_s18 }
 0x331   : > { %1115 = vrot.lane.b32.xlu1 %v16907_v51, %s20863_s24 }
 0x333   : > { %1119 = vrot.lane.b32.xlu0 %v16919_v56, %s20863_s24 }
 0x335   : > { %1117 = vrot.lane.b32.xlu1 %v16903_v12, %s20863_s24 }
 0x337   : > { %15401 = vrot.lane.b32.xlu0 %v16985_v32, %s20861_s25 }
 0x339   : > { %1133 = vrot.lane.b32.xlu1 %v16903_v12, %s20861_s25 }
 0x33b   : > { %1135 = vrot.lane.b32.xlu0 %v16919_v56, %s20861_s25 }
 0x33d   : > { %15381 = vrot.lane.b32.xlu1 %v16967_v24, %s20859_s26 }
 0x33f   : > { %1125 = vrot.lane.b32.xlu0 %v16927_v62, %s20863_s24 }
 0x340   : > { %v17106_v38 = vpop.permute.xlu1 %1069 }
 0x341   : > { %15391 = vrot.lane.b32.xlu1 %v16975_v27, %s20859_s26  ;;  %v1068_v33 = vpop.permute.xlu0 %1067 }
 0x342   : > { %13179 = vmatprep.mubr.msk.f32.mxu0 %vm1475_vm1, %v1068_v33 }
 0x343   : > { %1139 = vrot.lane.b32.xlu0 %v16931_v1, %s20861_s25 }
 0x345   : > { %1121 = vrot.lane.b32.xlu1 %v16915_v53, %s20863_s24  ;;  %v17098_v34 = vpop.permute.xlu0 %1073 }
 0x347   : > { %1127 = vrot.lane.b32.xlu0 %v16941_v8, %s20863_s24 }
 0x348   : > { %v17114_v58 = vpop.permute.xlu1 %1077 }
 0x349   : > { %15396 = vrot.lane.b32.xlu1 %v16985_v32, %s20863_s24  ;;  %v17104_v35 = vpop.permute.xlu0 %1071 }
 0x34b   : > { %1143 = vrot.lane.b32.xlu0 %v16941_v8, %s20861_s25 }
 0x34d   : > { %1137 = vrot.lane.b32.xlu1 %v16915_v53, %s20861_s25  ;;  %v17112_v40 = vpop.permute.xlu0 %1075 }
 0x34f   : > { %1147 = vrot.lane.b32.xlu0 %v16907_v51, %s20857_s18 }
 0x351   : > { %1123 = vrot.lane.b32.xlu1 %v16931_v1, %s20863_s24  ;;  %v17120_v59 = vpop.permute.xlu0 %1079 }
 0x353   : > { %v15277_v41 = vpop.permute.xlu1 %15276  ;;  %1163 = vrot.lane.b32.xlu0 %v16907_v51, %s20859_s26 }
 0x354   : > { %v15279_v42 = vunpack.i.h.bf16 %v15277_v41  ;;  %v15278_v44 = vunpack.i.l.bf16 %v15277_v41 }
 0x355   : > { %1141 = vrot.lane.b32.xlu1 %v16927_v62, %s20861_s25  ;;  %v15282_v39 = vpop.permute.xlu0 %15281 }
 0x356   : > { %v14491_v4 = vpack.c.bf16 %v15279_v42, %v15278_v44  ;;  %v15284_v45 = vunpack.i.h.bf16 %v15282_v39  ;;  %v15283_v46 = vunpack.i.l.bf16 %v15282_v39 }
 0x357   : > { %v17126_v5 = vpop.permute.xlu1 %15286  ;;  %15406 = vrot.lane.b32.xlu0 %v16985_v32, %s20857_s18 }
 0x358   : > { %v14515_v47 = vpack.c.bf16 %v15284_v45, %v15283_v46  ;;  %14493 = vmatprep.subr.msk.bf16.mxu0 %vm16951_vm2, %v14491_v4  ;;  %v15289_v41 = vunpack.i.h.bf16 %v17126_v5  ;;  %v15288_v42 = vunpack.i.l.bf16 %v17126_v5 }
 0x359   : > { %14496 = vmatpush3.bf16.xpose.msk.msra.mxu0 %vm16951_vm2, %v14491_v4  ;;  %1129 = vrot.lane.b32.xlu1 %v16939_v6, %s20863_s24  ;;  %v15297_v48 = vpop.permute.xlu0 %15296 }
 0x35a   : > { %v15299_v51 = vunpack.i.h.bf16 %v15297_v48  ;;  %v15298_v54 = vunpack.i.l.bf16 %v15297_v48  ;;  %14517 = vmatprep.subr.msk.bf16.mxu1 %vm16951_vm2, %v14515_v47  ;;  %v14539_v46 = vpack.c.bf16 %v15289_v41, %v15288_v42 }
 0x35b   : > { %v17138_v57 = vpop.permute.xlu1 %15291  ;;  %1151 = vrot.lane.b32.xlu0 %v16919_v56, %s20857_s18  ;;  %14520 = vmatpush3.bf16.xpose.msk.msra.mxu1 %vm16951_vm2, %v14515_v47 }
 0x35c   : > { %v14497_v63 = vpack.c.bf16 %v15299_v51, %v15298_v54 }
 0x35d   : > { %1145 = vrot.lane.b32.xlu1 %v16939_v6, %s20861_s25  ;;  %v17146_v0 = vpop.permute.xlu0 %1081 }
 0x35e   : > { %14499 = vmatprep.subr.msk.bf16.mxu0 %vm16951_vm2, %v14497_v63 }
 0x35f   : > { %v1084_v7 = vpop.permute.xlu1 %1083  ;;  %1167 = vrot.lane.b32.xlu0 %v16919_v56, %s20859_s26 }
 0x360   : > { %13207 = vmatprep.mubr.msk.f32.mxu1 %vm1475_vm1, %v1084_v7 }
 0x361   : > { %1149 = vrot.lane.b32.xlu1 %v16903_v12, %s20857_s18  ;;  %v17155_v9 = vpop.permute.xlu0 %15301  ;;  %14502 = vmatpush3.bf16.xpose.msk.msra.mxu0 %vm16951_vm2, %v14497_v63 }
 0x363   : > { %v17159_v15 = vpop.permute.xlu1 %1085  ;;  %1155 = vrot.lane.b32.xlu0 %v16931_v1, %s20857_s18 }
 0x365   : > { %1165 = vrot.lane.b32.xlu1 %v16903_v12, %s20859_s26  ;;  %v17165_v16 = vpop.permute.xlu0 %1099 }
 0x367   : > { %v17167_v56 = vpop.permute.xlu1 %1101  ;;  %1171 = vrot.lane.b32.xlu0 %v16931_v1, %s20859_s26 }
 0x369   : > { %15411 = vrot.lane.b32.xlu1 %v16985_v32, %s20859_s26  ;;  %v15307_v18 = vpop.permute.xlu0 %15306 }
 0x36a   : > { %v15309_v19 = vunpack.i.h.bf16 %v15307_v18  ;;  %v15308_v43 = vunpack.i.l.bf16 %v15307_v18 }
 0x36b   : > { %v15312_v21 = vpop.permute.xlu1 %15311  ;;  %1159 = vrot.lane.b32.xlu0 %v16941_v8, %s20857_s18 }
 0x36c   : > { %v14521_v22 = vpack.c.bf16 %v15309_v19, %v15308_v43  ;;  %v15314_v48 = vunpack.i.h.bf16 %v15312_v21  ;;  %v15313_v51 = vunpack.i.l.bf16 %v15312_v21 }
 0x36d   : > { %1153 = vrot.lane.b32.xlu1 %v16915_v53, %s20857_s18  ;;  %v17177_v12 = vpop.permute.xlu0 %15316 }
 0x36e   : > { %14523 = vmatprep.subr.msk.bf16.mxu1 %vm16951_vm2, %v14521_v22  ;;  %v14545_v63 = vpack.c.bf16 %v15314_v48, %v15313_v51 }
 0x36f   : > { %v17181_v1 = vpop.permute.xlu1 %15321  ;;  %1175 = vrot.lane.b32.xlu0 %v16941_v8, %s20859_s26  ;;  %14526 = vmatpush3.bf16.xpose.msk.msra.mxu1 %vm16951_vm2, %v14521_v22  ;;  %v15294_v22 = vunpack.i.h.bf16 %v17138_v57 }
 0x370   : > { %v15324_v48 = vunpack.i.h.bf16 %v17181_v1  ;;  %v15323_v51 = vunpack.i.l.bf16 %v17181_v1 }
 0x371   : > { %1169 = vrot.lane.b32.xlu1 %v16915_v53, %s20859_s26  ;;  %v15332_v24 = vpop.permute.xlu0 %15331 }
 0x372   : > { %v15334_v25 = vunpack.i.h.bf16 %v15332_v24  ;;  %v15333_v26 = vunpack.i.l.bf16 %v15332_v24  ;;  %v15293_v24 = vunpack.i.l.bf16 %v17138_v57  ;;  %v15304_v57 = vunpack.i.h.bf16 %v17155_v9 }
 0x373   : > { %v15327_v50 = vpop.permute.xlu1 %15326  ;;  %15426 = vrot.lane.b32.xlu0 %v16935_v2, %s16543_s17 }
 0x374   : > { %v14527_v27 = vpack.c.bf16 %v15334_v25, %v15333_v26  ;;  %v15329_v49 = vunpack.i.h.bf16 %v15327_v50  ;;  %v15328_v29 = vunpack.i.l.bf16 %v15327_v50 }
 0x375   : > { %1157 = vrot.lane.b32.xlu1 %v16927_v62, %s20857_s18  ;;  %v17193_v8 = vpop.permute.xlu0 %15341 }
 0x376   : > { %v14503_v31 = vpack.c.bf16 %v15329_v49, %v15328_v29  ;;  %14529 = vmatprep.subr.msk.bf16.mxu1 %vm16951_vm2, %v14527_v27  ;;  %v15344_v1 = vunpack.i.h.bf16 %v17193_v8 }
 0x377   : > { %v15337_v53 = vpop.permute.xlu1 %15336  ;;  %15436 = vrot.lane.b32.xlu0 %v16913_v52, %s20867_s16  ;;  %14532 = vmatpush3.bf16.xpose.msk.msra.mxu1 %vm16951_vm2, %v14527_v27  ;;  %v14563_v27 = vpack.c.bf16 %v15294_v22, %v15293_v24 }
 0x378   : > { %14505 = vmatprep.subr.msk.bf16.mxu0 %vm16951_vm2, %v14503_v31  ;;  %v15338_v19 = vunpack.i.l.bf16 %v15337_v53 }
 0x379   : > { %1173 = vrot.lane.b32.xlu1 %v16927_v62, %s20859_s26  ;;  %v17205_v32 = vpop.permute.xlu0 %1087  ;;  %14508 = vmatpush3.bf16.xpose.msk.msra.mxu0 %vm16951_vm2, %v14503_v31  ;;  %v15303_v31 = vunpack.i.l.bf16 %v17155_v9  ;;  %v15319_v9 = vunpack.i.h.bf16 %v17177_v12 }
 0x37b   : > { %15446 = vrot.lane.b32.xlu0 %v16923_v60, %s20867_s16  ;;  %v15347_v33 = vpop.permute.xlu1 %15346  ;;  %v14587_v42 = vpack.c.bf16 %v15304_v57, %v15303_v31 }
 0x37c   : > { %v15349_v44 = vunpack.i.h.bf16 %v15347_v33  ;;  %v15348_v39 = vunpack.i.l.bf16 %v15347_v33 }
 0x37d   : > { %1161 = vrot.lane.b32.xlu1 %v16939_v6, %s20857_s18  ;;  %v17215_v4 = vpop.permute.xlu0 %1103 }
 0x37e   : > { %v14509_v62 = vpack.c.bf16 %v15349_v44, %v15348_v39  ;;  %v15318_v44 = vunpack.i.l.bf16 %v17177_v12 }
 0x37f   : > { %15456 = vrot.lane.b32.xlu0 %v16935_v2, %s20867_s16  ;;  %v17219_v45 = vpop.permute.xlu1 %15351 }
 0x380   : > { %14511 = vmatprep.subr.msk.bf16.mxu0 %vm16951_vm2, %v14509_v62 }
 0x381   : > { %1177 = vrot.lane.b32.xlu1 %v16939_v6, %s20859_s26  ;;  %v17225_v5 = vpop.permute.xlu0 %1105  ;;  %14514 = vmatpush3.bf16.xpose.msk.msra.mxu0 %vm16951_vm2, %v14509_v62 }
 0x382   : > { %14541 = vmatprep.subr.msk.bf16.mxu0 %vm16951_vm2, %v14539_v46 }
 0x383   : > { %15466 = vrot.lane.b32.xlu0 %v16945_v10, %s20867_s16  ;;  %v17233_v47 = vpop.permute.xlu1 %1089  ;;  %s21066_s16 = smov 100  }
 0x385   : > { %15416 = vrot.lane.b32.xlu1 %v16913_v52, %s16543_s17  ;;  %v17237_v54 = vpop.permute.xlu0 %1107 }
 0x387   : > { %15476 = vrot.lane.b32.xlu0 %v16913_v52, %s20863_s24  ;;  %v17241_v6 = vpop.permute.xlu1 %1091 }
 0x388   : > { %13180 = vmatmul.mubr.msk.f32.vlgmr.msra.gmra.mrb[8].mxu0 %vm1475_vm1, %v17106_v38  ;;  %v15339_v38 = vunpack.i.h.bf16 %v15337_v53 }
 0x389   : > { %15421 = vrot.lane.b32.xlu1 %v16923_v60, %s16543_s17  ;;  %v17247_v7 = vpop.permute.xlu0 %1095  ;;  %13182 = vmatprep.mubr.msk.f32.mxu0 %vm1475_vm1, %v17104_v35 }
 0x38a   : > { %14544 = vmatpush3.bf16.xpose.msk.msra.mxu0 %vm16951_vm2, %v14539_v46  ;;  %v14551_v21 = vpack.c.bf16 %v15339_v38, %v15338_v19  ;;  %v14569_v46 = vpack.c.bf16 %v15319_v9, %v15318_v44  ;;  %v15343_v38 = vunpack.i.l.bf16 %v17193_v8 }
 0x38b   : > { %14547 = vmatprep.subr.msk.bf16.mxu0 %vm16951_vm2, %v14545_v63  ;;  %15486 = vrot.lane.b32.xlu0 %v16923_v60, %s20863_s24  ;;  %v17257_v18 = vpop.permute.xlu1 %1093 }
 0x38c   : > { %13183 = vmatmul.mubr.msk.f32.gmra.mrb[10].mxu0 %vm1475_vm1, %v17098_v34  ;;  %v14575_v8 = vpack.c.bf16 %v15344_v1, %v15343_v38 }
 0x38d   : > { %15431 = vrot.lane.b32.xlu1 %v16945_v10, %s16543_s17  ;;  %v17263_v35 = vpop.permute.xlu0 %1111  ;;  %13185 = vmatprep.mubr.msk.f32.mxu0 %vm1475_vm1, %v17112_v40 }
 0x38f   : > { %15496 = vrot.lane.b32.xlu0 %v16935_v2, %s20863_s24  ;;  %v17269_v43 = vpop.permute.xlu1 %1109 }
 0x390   : > { %13186 = vmatmul.mubr.msk.f32.gmra.mrb[12].mxu0 %vm1475_vm1, %v17114_v58 }
 0x391   : > { %15441 = vrot.lane.b32.xlu1 %v16913_v52, %s20865_s20  ;;  %v17275_v34 = vpop.permute.xlu0 %1113  ;;  %13188 = vmatprep.mubr.msk.f32.mxu0 %vm1475_vm1, %v17120_v59 }
 0x392   : > { %14550 = vmatpush3.bf16.xpose.msk.msra.mxu0 %vm16951_vm2, %v14545_v63  ;;  %v14593_v63 = vpack.c.bf16 %v15324_v48, %v15323_v51 }
 0x393   : > { %14553 = vmatprep.subr.msk.bf16.mxu0 %vm16951_vm2, %v14551_v21  ;;  %v17283_v40 = vpop.permute.xlu1 %1097  ;;  %15506 = vrot.lane.b32.xlu0 %v16945_v10, %s20863_s24  ;;  %s500_s24 = sand.u32 1, %s16529_s19  }
 0x394   : > { %13189 = vmatmul.mubr.msk.f32.gmra.mrb[14].mxu0 %vm1475_vm1, %v17146_v0 }
 0x395   : > { %15451 = vrot.lane.b32.xlu1 %v16923_v60, %s20865_s20  ;;  %v17291_v58 = vpop.permute.xlu0 %15371  ;;  %13235 = vmatprep.mubr.msk.f32.mxu0 %vm1475_vm1, %v17165_v16 }
 0x397   : > { %v15357_v59 = vpop.permute.xlu1 %15356  ;;  %15516 = vrot.lane.b32.xlu0 %v16913_v52, %s20857_s18 }
 0x398   : > { %v15359_v25 = vunpack.i.h.bf16 %v15357_v59  ;;  %v15358_v26 = vunpack.i.l.bf16 %v15357_v59 }
 0x399   : > { %15461 = vrot.lane.b32.xlu1 %v16935_v2, %s20865_s20  ;;  %v17301_v0 = vpop.permute.xlu0 %1131 }
 0x39a   : > { %v14533_v50 = vpack.c.bf16 %v15359_v25, %v15358_v26  ;;  %14556 = vmatpush3.bf16.xpose.msk.msra.mxu0 %vm16951_vm2, %v14551_v21  ;;  %v15374_v25 = vunpack.i.h.bf16 %v17291_v58  ;;  %v15373_v26 = vunpack.i.l.bf16 %v17291_v58 }
 0x39b   : > { %v15362_v16 = vpop.permute.xlu1 %15361  ;;  %15526 = vrot.lane.b32.xlu0 %v16923_v60, %s20857_s18 }
 0x39c   : > { %v15364_v49 = vunpack.i.h.bf16 %v15362_v16  ;;  %v15363_v29 = vunpack.i.l.bf16 %v15362_v16  ;;  %14535 = vmatprep.subr.msk.bf16.mxu1 %vm16951_vm2, %v14533_v50 }
 0x39d   : > { %15471 = vrot.lane.b32.xlu1 %v16945_v10, %s20865_s20  ;;  %v17313_v53 = vpop.permute.xlu0 %15376  ;;  %14538 = vmatpush3.bf16.xpose.msk.msra.mxu1 %vm16951_vm2, %v14533_v50  ;;  %s21067_s20 = smov 104  }
 0x39e   : > { %v14557_v33 = vpack.c.bf16 %v15364_v49, %v15363_v29  ;;  %14565 = vmatprep.subr.msk.bf16.mxu1 %vm16951_vm2, %v14563_v27  ;;  %v14635_v49 = vpack.c.bf16 %v15374_v25, %v15373_v26  ;;  %v15379_v58 = vunpack.i.h.bf16 %v17313_v53  ;;  %v15378_v57 = vunpack.i.l.bf16 %v17313_v53 }
 0x39f   : > { %v17319_v41 = vpop.permute.xlu1 %15366 }
 0x3a0   : > { %14559 = vmatprep.subr.msk.bf16.mxu0 %vm16951_vm2, %v14557_v33  ;;  %v14617_v9 = vpack.c.bf16 %v15379_v58, %v15378_v57 }
 0x3a1   : > { %15481 = vrot.lane.b32.xlu1 %v16913_v52, %s20861_s25  ;;  %v17327_v39 = vpop.permute.xlu0 %15386 }
 0x3a2   : > { %14562 = vmatpush3.bf16.xpose.msk.msra.mxu0 %vm16951_vm2, %v14557_v33 }
 0x3a3   : > { %14589 = vmatprep.subr.msk.bf16.mxu0 %vm16951_vm2, %v14587_v42  ;;  %v1116_v62 = vpop.permute.xlu1 %1115 }
 0x3a4   : > { %13208 = vmatmul.mubr.msk.f32.vlgmr.msra.gmra.mrb[24].mxu1 %vm1475_vm1, %v17159_v15 }
 0x3a5   : > { %15491 = vrot.lane.b32.xlu1 %v16923_v60, %s20861_s25  ;;  %v17337_v12 = vpop.permute.xlu0 %1119  ;;  %13210 = vmatprep.mubr.msk.f32.mxu1 %vm1475_vm1, %v17205_v32 }
 0x3a6   : > { %14568 = vmatpush3.bf16.xpose.msk.msra.mxu1 %vm16951_vm2, %v14563_v27 }
 0x3a7   : > { %14571 = vmatprep.subr.msk.bf16.mxu1 %vm16951_vm2, %v14569_v46  ;;  %v17347_v15 = vpop.permute.xlu1 %1117 }
 0x3a8   : > { %13211 = vmatmul.mubr.msk.f32.gmra.mrb[26].mxu1 %vm1475_vm1, %v17233_v47 }
 0x3a9   : > { %13236 = vmatmul.mubr.msk.f32.vlgmr.msra.gmra.mrb[16].mxu0 %vm1475_vm1, %v17167_v56  ;;  %15501 = vrot.lane.b32.xlu1 %v16935_v2, %s20861_s25  ;;  %v15402_v32 = vpop.permute.xlu0 %15401 }
 0x3aa   : > { %13213 = vmatprep.mubr.msk.f32.mxu1 %vm1475_vm1, %v17241_v6  ;;  %13238 = vmatprep.mubr.msk.f32.mxu0 %vm1475_vm1, %v17215_v4  ;;  %v15354_v4 = vunpack.i.h.bf16 %v17219_v45  ;;  %v15353_v6 = vunpack.i.l.bf16 %v17219_v45  ;;  %v15403_v19 = vunpack.i.l.bf16 %v15402_v32 }
 0x3ab   : > { %14592 = vmatpush3.bf16.xpose.msk.msra.mxu0 %vm16951_vm2, %v14587_v42  ;;  %v17363_v47 = vpop.permute.xlu1 %1133 }
 0x3ac   : > { %14595 = vmatprep.subr.msk.bf16.mxu0 %vm16951_vm2, %v14593_v63  ;;  %13214 = vmatmul.mubr.msk.f32.gmra.mrb[28].mxu1 %vm1475_vm1, %v17257_v18  ;;  %v15404_v18 = vunpack.i.h.bf16 %v15402_v32 }
 0x3ad   : > { %13239 = vmatmul.mubr.msk.f32.gmra.mrb[18].mxu0 %vm1475_vm1, %v17225_v5  ;;  %15511 = vrot.lane.b32.xlu1 %v16945_v10, %s20861_s25  ;;  %v17373_v56 = vpop.permute.xlu0 %1135  ;;  %s11616_s25 = sshll.u32 %s500_s24, 6 }
 0x3ae   : > { %13216 = vmatprep.mubr.msk.f32.mxu1 %vm1475_vm1, %v17247_v7  ;;  %13241 = vmatprep.mubr.msk.f32.mxu0 %vm1475_vm1, %v17237_v54  ;;  %v14599_v7 = vpack.c.bf16 %v15354_v4, %v15353_v6  ;;  %v14605_v21 = vpack.c.bf16 %v15404_v18, %v15403_v19 }
 0x3af   : > { %14574 = vmatpush3.bf16.xpose.msk.msra.mxu1 %vm16951_vm2, %v14569_v46  ;;  %v15382_v5 = vpop.permute.xlu1 %15381  ;;  %v15389_v46 = vunpack.i.h.bf16 %v17327_v39 }
 0x3b0   : > { %14577 = vmatprep.subr.msk.bf16.mxu1 %vm16951_vm2, %v14575_v8  ;;  %13217 = vmatmul.mubr.msk.f32.gmra.mrb[30].mxu1 %vm1475_vm1, %v17283_v40  ;;  %v15384_v33 = vunpack.i.h.bf16 %v15382_v5 }
 0x3b1   : > { %13242 = vmatmul.mubr.msk.f32.gmra.mrb[20].mxu0 %vm1475_vm1, %v17269_v43  ;;  %15521 = vrot.lane.b32.xlu1 %v16913_v52, %s20859_s26  ;;  %v17391_v45 = vpop.permute.xlu0 %1125 }
 0x3b2   : > { %13244 = vmatprep.mubr.msk.f32.mxu0 %vm1475_vm1, %v17263_v35  ;;  %13263 = vmatprep.mubr.msk.f32.mxu1 %vm1475_vm1, %v1116_v62 }
 0x3b3   : > { %14598 = vmatpush3.bf16.xpose.msk.msra.mxu0 %vm16951_vm2, %v14593_v63  ;;  %v17398_v54 = vpop.permute.xlu1 %15391 }
 0x3b4   : > { %14601 = vmatprep.subr.msk.bf16.mxu0 %vm16951_vm2, %v14599_v7  ;;  %v15394_v51 = vunpack.i.h.bf16 %v17398_v54 }
 0x3b5   : > { %13245 = vmatmul.mubr.msk.f32.gmra.mrb[22].mxu0 %vm1475_vm1, %v17275_v34  ;;  %15531 = vrot.lane.b32.xlu1 %v16923_v60, %s20859_s26  ;;  %v1140_v52 = vpop.permute.xlu0 %1139  ;;  %v15369_v34 = vunpack.i.h.bf16 %v17319_v41  ;;  %v15368_v60 = vunpack.i.l.bf16 %v17319_v41  ;;  %v15383_v41 = vunpack.i.l.bf16 %v15382_v5 }
 0x3b6   : > { %13291 = vmatprep.mubr.msk.f32.mxu0 %vm1475_vm1, %v17301_v0 }
 0x3b7   : > { %14580 = vmatpush3.bf16.xpose.msk.msra.mxu1 %vm16951_vm2, %v14575_v8  ;;  %v1122_v35 = vpop.permute.xlu1 %1121  ;;  %v14611_v16 = vpack.c.bf16 %v15369_v34, %v15368_v60  ;;  %v14641_v62 = vpack.c.bf16 %v15384_v33, %v15383_v41 }
 0x3b9   : > { %v1128_v43 = vpop.permute.xlu0 %1127 }
 0x3bb   : > { %14604 = vmatpush3.bf16.xpose.msk.msra.mxu0 %vm16951_vm2, %v14599_v7  ;;  %v15397_v40 = vpop.permute.xlu1 %15396 }
 0x3bc   : > { %14607 = vmatprep.subr.msk.bf16.mxu0 %vm16951_vm2, %v14605_v21  ;;  %v15399_v59 = vunpack.i.h.bf16 %v15397_v40  ;;  %v15398_v22 = vunpack.i.l.bf16 %v15397_v40 }
 0x3bd   : > { %v1144_v24 = vpop.permute.xlu0 %1143 }
 0x3be   : > { %v14581_v0 = vpack.c.bf16 %v15399_v59, %v15398_v22 }
 0x3bf   : > { %v1138_v50 = vpop.permute.xlu1 %1137 }
 0x3c0   : > { %14583 = vmatprep.subr.msk.bf16.mxu1 %vm16951_vm2, %v14581_v0 }
 0x3c1   : > { %v1148_v27 = vpop.permute.xlu0 %1147  ;;  %14586 = vmatpush3.bf16.xpose.msk.msra.mxu1 %vm16951_vm2, %v14581_v0 }
 0x3c2   : > { %14613 = vmatprep.subr.msk.bf16.mxu1 %vm16951_vm2, %v14611_v16 }
 0x3c3   : > { %14610 = vmatpush3.bf16.xpose.msk.msra.mxu0 %vm16951_vm2, %v14605_v21  ;;  %v1124_v29 = vpop.permute.xlu1 %1123 }
 0x3c4   : > { %14637 = vmatprep.subr.msk.bf16.mxu0 %vm16951_vm2, %v14635_v49 }
 0x3c5   : > { %v1164_v31 = vpop.permute.xlu0 %1163 }
 0x3c7   : > { %v1142_v42 = vpop.permute.xlu1 %1141 }
 0x3c8   : > { %13264 = vmatmul.mubr.msk.f32.vlgmr.msra.gmra.mrb[32].mxu1 %vm1475_vm1, %v17347_v15  ;;  %v15393_v15 = vunpack.i.l.bf16 %v17398_v54 }
 0x3c9   : > { %v15407_v44 = vpop.permute.xlu0 %15406  ;;  %13266 = vmatprep.mubr.msk.f32.mxu1 %vm1475_vm1, %v17337_v12  ;;  %14616 = vmatpush3.bf16.xpose.msk.msra.mxu1 %vm16951_vm2, %v14611_v16  ;;  %v15388_v12 = vunpack.i.l.bf16 %v17327_v39 }
 0x3ca   : > { %13292 = vmatmul.mubr.msk.f32.vlgmr.msra.gmra.mrb[24].mxu0 %vm1475_vm1, %v17363_v47  ;;  %14619 = vmatprep.subr.msk.bf16.mxu1 %vm16951_vm2, %v14617_v9  ;;  %v14647_v1 = vpack.c.bf16 %v15394_v51, %v15393_v15  ;;  %v15408_v8 = vunpack.i.l.bf16 %v15407_v44 }
 0x3cb   : > { %13294 = vmatprep.mubr.msk.f32.mxu0 %vm1475_vm1, %v17373_v56  ;;  %14640 = vmatpush3.bf16.xpose.msk.msra.mxu0 %vm16951_vm2, %v14635_v49  ;;  %v1130_v53 = vpop.permute.xlu1 %1129  ;;  %v14623_v63 = vpack.c.bf16 %v15389_v46, %v15388_v12  ;;  %v15409_v56 = vunpack.i.h.bf16 %v15407_v44 }
 0x3cc   : > { %14643 = vmatprep.subr.msk.bf16.mxu0 %vm16951_vm2, %v14641_v62  ;;  %13267 = vmatmul.mubr.msk.f32.gmra.mrb[34].mxu1 %vm1475_vm1, %v1122_v35 }
 0x3cd   : > { %v17449_v48 = vpop.permute.xlu0 %1151  ;;  %13269 = vmatprep.mubr.msk.f32.mxu1 %vm1475_vm1, %v1124_v29  ;;  %v14629_v19 = vpack.c.bf16 %v15409_v56, %v15408_v8 }
 0x3ce   : > { %13295 = vmatmul.mubr.msk.f32.gmra.mrb[26].mxu0 %vm1475_vm1, %v1138_v50 }
 0x3cf   : > { %13297 = vmatprep.mubr.msk.f32.mxu0 %vm1475_vm1, %v1140_v52  ;;  %v1146_v32 = vpop.permute.xlu1 %1145 }
 0x3d0   : > { %13270 = vmatmul.mubr.msk.f32.gmra.mrb[36].mxu1 %vm1475_vm1, %v17391_v45 }
 0x3d1   : > { %v17458_v39 = vpop.permute.xlu0 %1167  ;;  %13272 = vmatprep.mubr.msk.f32.mxu1 %vm1475_vm1, %v1128_v43  ;;  %14622 = vmatpush3.bf16.xpose.msk.msra.mxu1 %vm16951_vm2, %v14617_v9 }
 0x3d2   : > { %13298 = vmatmul.mubr.msk.f32.gmra.mrb[28].mxu0 %vm1475_vm1, %v1142_v42  ;;  %14625 = vmatprep.subr.msk.bf16.mxu1 %vm16951_vm2, %v14623_v63 }
 0x3d3   : > { %13300 = vmatprep.mubr.msk.f32.mxu0 %vm1475_vm1, %v1144_v24  ;;  %14646 = vmatpush3.bf16.xpose.msk.msra.mxu0 %vm16951_vm2, %v14641_v62  ;;  %v1150_v38 = vpop.permute.xlu1 %1149 }
 0x3d4   : > { %14649 = vmatprep.subr.msk.bf16.mxu0 %vm16951_vm2, %v14647_v1  ;;  %v13153_v47 = vpop.f32.mrb[16].mxu1  ;;  %13273 = vmatmul.mubr.msk.f32.gmra.mrb[38].mxu1 %vm1475_vm1, %v1130_v53 }
 0x3d5   : > { %v17472_v4 = vmul.f32 0.5, %v13153_v47  ;;  %v1574_v6 = vpop.f32.mrb[17].mxu1  ;;  %v1156_v5 = vpop.permute.xlu0 %1155  ;;  %13319 = vmatprep.mubr.msk.f32.mxu1 %vm1475_vm1, %v1148_v27 }
 0x3d6   : > { %13301 = vmatmul.mubr.msk.f32.gmra.mrb[30].mxu0 %vm1475_vm1, %v1146_v32  ;;  %v17476_v45 = vmul.f32 0.5, %v1574_v6 }
 0x3d7   : > { %13347 = vmatprep.mubr.msk.f32.mxu0 %vm1475_vm1, %v1164_v31  ;;  %v1166_v7 = vpop.permute.xlu1 %1165  ;;  %v2640_v54 = vsel %vm2636_vm3, %v17472_v4, -inf }
 0x3d8   : > { %v13156_v52 = vpop.f32.mrb[18].mxu1  ;;  %v2637_v18 = vsel %vm2636_vm3, %v17476_v45, -inf }
 0x3d9   : > { %v17483_v35 = vmul.f32 0.5, %v13156_v52  ;;  %2641 = vmax.xlane.f32.xlu1 %v2640_v54  ;;  %v1584_v43 = vpop.f32.mrb[19].mxu1  ;;  %2638 = vmax.xlane.f32.xlu0 %v2637_v18  ;;  %v1172_v21 = vpop.permute.xlu0 %1171 }
 0x3da   : > { %v17485_v40 = vmul.f32 0.5, %v1584_v43  ;;  %14628 = vmatpush3.bf16.xpose.msk.msra.mxu1 %vm16951_vm2, %v14623_v63 }
 0x3db   : > { %14652 = vmatpush3.bf16.xpose.msk.msra.mxu0 %vm16951_vm2, %v14647_v1  ;;  %14631 = vmatprep.subr.msk.bf16.mxu1 %vm16951_vm2, %v14629_v19  ;;  %v15412_v34 = vpop.permute.xlu1 %15411  ;;  %v2646_v60 = vsel %vm2636_vm3, %v17483_v35, -inf }
 0x3dc   : > { %v15414_v59 = vunpack.i.h.bf16 %v15412_v34  ;;  %v15413_v22 = vunpack.i.l.bf16 %v15412_v34  ;;  %v13159_v24 = vpop.f32.mrb[20].mxu1  ;;  %v2643_v25 = vsel %vm2636_vm3, %v17485_v40, -inf }
 0x3dd   : > { %v17497_v26 = vmul.f32 0.5, %v13159_v24  ;;  %2644 = vmax.xlane.f32.xlu1 %v2643_v25  ;;  %v1594_v0 = vpop.f32.mrb[21].mxu1  ;;  %2647 = vmax.xlane.f32.xlu0 %v2646_v60  ;;  %v1160_v50 = vpop.permute.xlu0 %1159 }
 0x3de   : > { %v14653_v16 = vpack.c.bf16 %v15414_v59, %v15413_v22  ;;  %v17499_v27 = vmul.f32 0.5, %v1594_v0 }
 0x3df   : > { %v1154_v49 = vpop.permute.xlu1 %1153  ;;  %v2652_v29 = vsel %vm2636_vm3, %v17497_v26, -inf }
 0x3e0   : > { %v13162_v58 = vpop.f32.mrb[22].mxu1  ;;  %14655 = vmatprep.subr.msk.bf16.mxu0 %vm16951_vm2, %v14653_v16  ;;  %v2649_v57 = vsel %vm2636_vm3, %v17499_v27, -inf }
 0x3e1   : > { %v17507_v31 = vmul.f32 0.5, %v13162_v58  ;;  %2650 = vmax.xlane.f32.xlu1 %v2649_v57  ;;  %v1604_v33 = vpop.f32.mrb[23].mxu1  ;;  %2653 = vmax.xlane.f32.xlu0 %v2652_v29  ;;  %v1176_v42 = vpop.permute.xlu0 %1175 }
 0x3e2   : > { %v17509_v41 = vmul.f32 0.5, %v1604_v33  ;;  %14634 = vmatpush3.bf16.xpose.msk.msra.mxu1 %vm16951_vm2, %v14629_v19 }
 0x3e3   : > { %14658 = vmatpush3.bf16.xpose.msk.msra.mxu0 %vm16951_vm2, %v14653_v16  ;;  %14660 = vmatprep.subr.bf16.mxu1 %v16917_v55  ;;  %v1170_v9 = vpop.permute.xlu1 %1169  ;;  %v2658_v44 = vsel %vm2636_vm3, %v17507_v31, -inf }
 0x3e4   : > { %v2655_v62 = vsel %vm2636_vm3, %v17509_v41, -inf }
 0x3e5   : > { %2656 = vmax.xlane.f32.xlu1 %v2655_v62  ;;  %2659 = vmax.xlane.f32.xlu0 %v2658_v44  ;;  %v15427_v46 = vpop.permute.xlu0 %15426 }
 0x3e6   : > { %v15429_v56 = vunpack.i.h.bf16 %v15427_v46 }
 0x3e7   : > { %v1158_v53 = vpop.permute.xlu1 %1157 }
 0x3e9   : > { %13320 = vmatmul.mubr.msk.f32.vlgmr.msra.gmra.mrb[40].mxu1 %vm1475_vm1, %v1150_v38  ;;  %v15437_v51 = vpop.permute.xlu0 %15436 }
 0x3ea   : > { %13348 = vmatmul.mubr.msk.f32.vlgmr.msra.gmra.mrb[32].mxu0 %vm1475_vm1, %v1166_v7  ;;  %13322 = vmatprep.mubr.msk.f32.mxu1 %vm1475_vm1, %v17449_v48  ;;  %v15438_v15 = vunpack.i.l.bf16 %v15437_v51 }
 0x3eb   : > { %13350 = vmatprep.mubr.msk.f32.mxu0 %vm1475_vm1, %v17458_v39  ;;  %14662 = vmatpush3.bf16.msra.mxu1 %v16917_v55  ;;  %v1174_v12 = vpop.permute.xlu1 %1173  ;;  %v15439_v55 = vunpack.i.h.bf16 %v15437_v51 }
 0x3ec   : > { %14664 = vmatprep.subr.bf16.mxu1 %v16925_v61 }
 0x3ed   : > { %13323 = vmatmul.mubr.msk.f32.gmra.mrb[42].mxu1 %vm1475_vm1, %v1154_v49  ;;  %v17555_v29 = vpop.permute.xlu0 %15446 }
 0x3ee   : > { %13351 = vmatmul.mubr.msk.f32.gmra.mrb[34].mxu0 %vm1475_vm1, %v1170_v9  ;;  %13325 = vmatprep.mubr.msk.f32.mxu1 %vm1475_vm1, %v1156_v5 }
 0x3ef   : > { %13353 = vmatprep.mubr.msk.f32.mxu0 %vm1475_vm1, %v1172_v21  ;;  %14666 = vmatpush3.bf16.msra.mxu1 %v16925_v61  ;;  %v1162_v48 = vpop.permute.xlu1 %1161  ;;  %v17542_v61 = vpack.c.bf16 %v15439_v55, %v15438_v15 }
 0x3f0   : > { %14668 = vmatprep.subr.bf16.mxu1 %v16937_v3 }
 0x3f1   : > { %13326 = vmatmul.mubr.msk.f32.gmra.mrb[44].mxu1 %vm1475_vm1, %v1158_v53  ;;  %20951 = vst [vmem:[#allocation24_spill] sm:$0xff] %v17542_v61 }
 0x3f2   : > { %13354 = vmatmul.mubr.msk.f32.gmra.mrb[36].mxu0 %vm1475_vm1, %v1174_v12  ;;  %13328 = vmatprep.mubr.msk.f32.mxu1 %vm1475_vm1, %v1160_v50 }
 0x3f3   : > { %13356 = vmatprep.mubr.msk.f32.mxu0 %vm1475_vm1, %v1176_v42  ;;  %14670 = vmatpush3.bf16.msra.mxu1 %v16937_v3  ;;  %v1178_v32 = vpop.permute.xlu1 %1177  ;;  %v15428_v3 = vunpack.i.l.bf16 %v15427_v46  ;;  %v17559_v42 = vpop.permute.xlu0 %15456 }
 0x3f4   : > { %14672 = vmatprep.subr.bf16.mxu1 %v16947_v11  ;;  %20955 = vst [vmem:[#allocation28_spill] sm:$0xff] %v17559_v42 }
 0x3f5   : > { %13329 = vmatmul.mubr.msk.f32.gmra.mrb[46].mxu1 %vm1475_vm1, %v1162_v48  ;;  %v14683_v18 = vpack.c.bf16 %v15429_v56, %v15428_v3 }
 0x3f6   : > { %13357 = vmatmul.mubr.msk.f32.gmra.mrb[38].mxu0 %vm1475_vm1, %v1178_v32 }
 0x3f7   : > { %14674 = vmatpush3.bf16.msra.mxu1 %v16947_v11  ;;  %v15417_v63 = vpop.permute.xlu1 %15416  ;;  %v17563_v44 = vpop.permute.xlu0 %15466 }
 0x3f8   : > { %14692 = vmatprep.subr.bf16.mxu1 %v17542_v61  ;;  %v15419_v39 = vunpack.i.h.bf16 %v15417_v63  ;;  %v15418_v1 = vunpack.i.l.bf16 %v15417_v63  ;;  %20957 = vst [vmem:[#allocation30_spill] sm:$0xff] %v17563_v44 }
 0x3fa   : > { %v14675_v38 = vpack.c.bf16 %v15419_v39, %v15418_v1 }
 0x3fb   : > { %v15422_v47 = vpop.permute.xlu1 %15421  ;;  %v17569_v51 = vpop.permute.xlu0 %15476 }
 0x3fc   : > { %v15424_v8 = vunpack.i.h.bf16 %v15422_v47  ;;  %v15423_v6 = vunpack.i.l.bf16 %v15422_v47  ;;  %14676 = vmatprep.subr.bf16.mxu0 %v14675_v38  ;;  %20959 = vst [vmem:[#allocation32_spill] sm:$0xff] %v17569_v51 }
 0x3fd   : > { %14678 = vmatpush3.bf16.msra.mxu0 %v14675_v38 }
 0x3fe   : > { %v14679_v5 = vpack.c.bf16 %v15424_v8, %v15423_v6 }
 0x3ff   : > { %v15432_v7 = vpop.permute.xlu1 %15431  ;;  %v17587_v6 = vpop.permute.xlu0 %15486 }
 0x400   : > { %v15434_v54 = vunpack.i.h.bf16 %v15432_v7  ;;  %v15433_v52 = vunpack.i.l.bf16 %v15432_v7  ;;  %14680 = vmatprep.subr.bf16.mxu0 %v14679_v5  ;;  %20961 = vst [vmem:[#allocation34_spill] sm:$0xff] %v17587_v6 }
 0x401   : > { %14682 = vmatpush3.bf16.msra.mxu0 %v14679_v5 }
 0x402   : > { %14684 = vmatprep.subr.bf16.mxu0 %v14683_v18  ;;  %v14687_v21 = vpack.c.bf16 %v15434_v54, %v15433_v52 }
 0x403   : > { %v15442_v11 = vpop.permute.xlu1 %15441 }
 0x404   : > { %v15444_v19 = vunpack.i.h.bf16 %v15442_v11  ;;  %v15443_v43 = vunpack.i.l.bf16 %v15442_v11 }
 0x405   : > { %14686 = vmatpush3.bf16.msra.mxu0 %v14683_v18 }
 0x406   : > { %14688 = vmatprep.subr.bf16.mxu0 %v14687_v21  ;;  %v17546_v34 = vpack.c.bf16 %v15444_v19, %v15443_v43 }
 0x407   : > { %v17553_v49 = vpop.permute.xlu1 %15451 }
 0x408   : > { %20952 = vst [vmem:[#allocation25_spill] sm:$0xff] %v17546_v34  ;;  %20953 = vst [vmem:[#allocation26_spill] sm:$0xff] %v17553_v49 }
 0x409   : > { %14690 = vmatpush3.bf16.msra.mxu0 %v14687_v21 }
 0x40a   : > { %14708 = vmatprep.subr.bf16.mxu0 %v17546_v34 }
 0x40b   : > { %v17557_v33 = vpop.permute.xlu1 %15461 }
 0x40c   : > { %20954 = vst [vmem:[#allocation27_spill] sm:$0xff] %v17557_v33 }
 0x40f   : > { %v17561_v9 = vpop.permute.xlu1 %15471 }
 0x410   : > { %20956 = vst [vmem:[#allocation29_spill] sm:$0xff] %v17561_v9 }
 0x413   : > { %v17565_v62 = vpop.permute.xlu1 %15481 }
 0x414   : > { %20958 = vst [vmem:[#allocation31_spill] sm:$0xff] %v17565_v62 }
 0x417   : > { %v17581_v47 = vpop.permute.xlu1 %15491 }
 0x418   : > { %20960 = vst [vmem:[#allocation33_spill] sm:$0xff] %v17581_v47 }
 0x41b   : > { %v17601_v21 = vpop.permute.xlu1 %15501 }
 0x41c   : > { %20962 = vst [vmem:[#allocation35_spill] sm:$0xff] %v17601_v21 }
 0x45b   : > { %v13181_v60 = vpop.f32.mrb[8].mxu0 }
 0x45c   : > { %v17549_v59 = vmul.f32 0.5, %v13181_v60  ;;  %v1711_v22 = vpop.f32.mrb[9].mxu0 }
 0x45d   : > { %v17573_v55 = vmul.f32 0.5, %v1711_v22 }
 0x45e   : > { %v2664_v24 = vsel %vm2636_vm3, %v17549_v59, -inf }
 0x45f   : > { %2665 = vmax.xlane.f32.xlu0 %v2664_v24  ;;  %v13184_v25 = vpop.f32.mrb[10].mxu0  ;;  %v2661_v8 = vsel %vm2636_vm3, %v17573_v55, -inf }
 0x460   : > { %v1721_v0 = vpop.f32.mrb[11].mxu0  ;;  %v17583_v3 = vmul.f32 0.5, %v13184_v25 }
 0x461   : > { %v17577_v32 = vmul.f32 0.5, %v1721_v0 }
 0x462   : > { %v2670_v43 = vsel %vm2636_vm3, %v17583_v3, -inf }
 0x463   : > { %v13187_v50 = vpop.f32.mrb[12].mxu0  ;;  %v2667_v54 = vsel %vm2636_vm3, %v17577_v32, -inf }
 0x464   : > { %v1731_v16 = vpop.f32.mrb[13].mxu0 }
 0x465   : > { %v17603_v60 = vmul.f32 0.5, %v1731_v16 }
 0x467   : > { %v13190_v58 = vpop.f32.mrb[14].mxu0 }
 0x468   : > { %v1741_v57 = vpop.f32.mrb[15].mxu0  ;;  %v17637_v17 = vmul.f32 0.5, %v13190_v58 }
 0x46a   : > { %v2682_v58 = vsel %vm2636_vm3, %v17637_v17, -inf }
 0x477   : > { %v13209_v53 = vpop.f32.mrb[24].mxu1 }
 0x478   : > { %v17567_v46 = vmul.f32 0.5, %v13209_v53  ;;  %v1848_v12 = vpop.f32.mrb[25].mxu1  ;;  %v17609_v53 = vpop.permute.xlu0 %15496 }
 0x479   : > { %v17571_v48 = vmul.f32 0.5, %v1848_v12  ;;  %20963 = vst [vmem:[#allocation36_spill] sm:$0xff] %v17609_v53 }
 0x47a   : > { %v2688_v15 = vsel %vm2636_vm3, %v17567_v46, -inf }
 0x47b   : > { %2689 = vmax.xlane.f32.xlu0 %v2688_v15  ;;  %v13212_v63 = vpop.f32.mrb[26].mxu1  ;;  %v2685_v39 = vsel %vm2636_vm3, %v17571_v48, -inf  ;;  %v17613_v15 = vmul.f32 0.5, %v13187_v50 }
 0x47c   : > { %v13237_v1 = vpop.f32.mrb[16].mxu0  ;;  %2686 = vmax.xlane.f32.xlu1 %v2685_v39  ;;  %v1858_v38 = vpop.f32.mrb[27].mxu1  ;;  %v17597_v19 = vmul.f32 0.5, %v13212_v63  ;;  %v2673_v39 = vsel %vm2636_vm3, %v17603_v60, -inf }
 0x47d   : > { %v1985_v56 = vpop.f32.mrb[17].mxu0  ;;  %v17589_v5 = vmul.f32 0.5, %v1858_v38  ;;  %v2676_v50 = vsel %vm2636_vm3, %v17613_v15, -inf  ;;  %v17659_v28 = vmul.f32 0.5, %v13237_v1 }
 0x47e   : > { %v2694_v63 = vsel %vm2636_vm3, %v17597_v19, -inf }
 0x47f   : > { %2662 = vmax.xlane.f32.xlu0 %v2661_v8  ;;  %v13215_v7 = vpop.f32.mrb[28].mxu1  ;;  %v2691_v24 = vsel %vm2636_vm3, %v17589_v5, -inf }
 0x480   : > { %v17593_v52 = vpop.f32.mrb[18].mxu0  ;;  %2668 = vmax.xlane.f32.xlu1 %v2667_v54  ;;  %v1868_v18 = vpop.f32.mrb[29].mxu1 }
 0x481   : > { %v17595_v11 = vpop.f32.mrb[19].mxu0  ;;  %v17617_v16 = vmul.f32 0.5, %v1868_v18  ;;  %v17625_v54 = vpop.permute.xlu1 %15511  ;;  %v17633_v18 = vmul.f32 0.5, %v1741_v57 }
 0x482   : > { %20964 = vst [vmem:[#allocation37_spill] sm:$0xff] %v17625_v54 }
 0x483   : > { %2671 = vmax.xlane.f32.xlu0 %v2670_v43  ;;  %v13218_v22 = vpop.f32.mrb[30].mxu1  ;;  %v17627_v43 = vmul.f32 0.5, %v13215_v7  ;;  %v2679_v7 = vsel %vm2636_vm3, %v17633_v18, -inf }
 0x484   : > { %v17607_v25 = vpop.f32.mrb[20].mxu0  ;;  %2692 = vmax.xlane.f32.xlu1 %v2691_v24  ;;  %v1878_v0 = vpop.f32.mrb[31].mxu1 }
 0x485   : > { %v17611_v12 = vpop.f32.mrb[21].mxu0  ;;  %v17631_v24 = vpop.permute.xlu0 %15506  ;;  %v17641_v36 = vmul.f32 0.5, %v1878_v0 }
 0x486   : > { %20965 = vst [vmem:[#allocation38_spill] sm:$0xff] %v17631_v24  ;;  %v17645_v37 = vpop.permute.xlu1 %15521 }
 0x487   : > { %2695 = vmax.xlane.f32.xlu0 %v2694_v63  ;;  %v2697_v63 = vsel %vm2636_vm3, %v17617_v16, -inf  ;;  %20966 = vst [vmem:[#allocation39_spill] sm:$0xff] %v17645_v37  ;;  %v2703_v0 = vsel %vm2636_vm3, %v17641_v36, -inf }
 0x488   : > { %v17621_v38 = vpop.f32.mrb[22].mxu0  ;;  %2674 = vmax.xlane.f32.xlu1 %v2673_v39  ;;  %v2700_v39 = vsel %vm2636_vm3, %v17627_v43, -inf }
 0x489   : > { %v17623_v8 = vpop.f32.mrb[23].mxu0  ;;  %v17647_v57 = vpop.permute.xlu0 %15516 }
 0x48a   : > { %20967 = vst [vmem:[#allocation40_spill] sm:$0xff] %v17647_v57 }
 0x48b   : > { %2677 = vmax.xlane.f32.xlu0 %v2676_v50  ;;  %v17649_v50 = vmul.f32 0.5, %v13218_v22 }
 0x48c   : > { %2698 = vmax.xlane.f32.xlu1 %v2697_v63  ;;  %v17653_v63 = vmul.f32 0.5, %v1985_v56 }
 0x48d   : > { %v17663_v30 = vpop.permute.xlu0 %15526 }
 0x48e   : > { %20969 = vst [vmem:[#allocation42_spill] sm:$0xff] %v17663_v30  ;;  %v2709_v22 = vsel %vm2636_vm3, %v17653_v63, -inf }
 0x48f   : > { %2701 = vmax.xlane.f32.xlu0 %v2700_v39  ;;  %v17657_v39 = vpop.permute.xlu1 %15531 }
 0x490   : > { %2680 = vmax.xlane.f32.xlu1 %v2679_v7  ;;  %20968 = vst [vmem:[#allocation41_spill] sm:$0xff] %v17657_v39  ;;  %v2706_v7 = vsel %vm2636_vm3, %v17649_v50, -inf }
 0x491   : > { %v2639_v13 = vpop.xlane.xlu0 %2638 }
 0x493   : > { %2683 = vmax.xlane.f32.xlu0 %v2682_v58  ;;  %v2642_v56 = vpop.xlane.xlu1 %2641  ;;  %v2712_v58 = vsel %vm2636_vm3, %v17659_v28, -inf }
 0x494   : > { %2704 = vmax.xlane.f32.xlu1 %v2703_v0  ;;  %v2830_v14 = vsub.f32 %v17472_v4, %v2642_v56 }
 0x497   : > { %2707 = vmax.xlane.f32.xlu0 %v2706_v7  ;;  %v2829_v7 = vsub.f32 %v17476_v45, %v2639_v13  ;;  %v2645_v62 = vpop.xlane.xlu1 %2644 }
 0x498   : > { %2710 = vmax.xlane.f32.xlu1 %v2709_v22  ;;  %v17678_v22 = vmul.f32 0.5, %v17593_v52  ;;  %v2648_v52 = vpop.xlane.xlu0 %2647  ;;  %v2831_v24 = vsub.f32 %v17485_v40, %v2645_v62 }
 0x499   : > { %v2893_v45 = vmul.f32 1.442695, %v2829_v7 }
 0x49a   : > { %v2897_v6 = vmul.f32 1.442695, %v2831_v24 }
 0x49b   : > { %2713 = vmax.xlane.f32.xlu0 %v2712_v58  ;;  %v13265_v0 = vpop.f32.mrb[32].mxu1 }
 0x49c   : > { %v17669_v23 = vmul.f32 0.5, %v13265_v0  ;;  %v2122_v1 = vpop.f32.mrb[33].mxu1  ;;  %v17685_v0 = vmul.f32 0.5, %v17595_v11  ;;  %v2718_v11 = vsel %vm2636_vm3, %v17678_v22, -inf }
 0x49d   : > { %v17672_v20 = vpop.f32.mrb[24].mxu0  ;;  %v17674_v39 = vmul.f32 0.5, %v2122_v1  ;;  %v2895_v1 = vmul.f32 1.442695, %v2830_v14 }
 0x49e   : > { %v17680_v37 = vpop.f32.mrb[25].mxu0  ;;  %v2736_v58 = vsel %vm2636_vm3, %v17669_v23, -inf  ;;  %v17805_v42 = vmul.f32 0.5, %v17672_v20 }
 0x49f   : > { %2737 = vmax.xlane.f32.xlu0 %v2736_v58  ;;  %v13268_v54 = vpop.f32.mrb[34].mxu1  ;;  %v2733_v4 = vsel %vm2636_vm3, %v17674_v39, -inf  ;;  %15851 = vpow2.f32 %v2895_v1  ;;  %v17788_v2 = vmul.f32 0.5, %v17680_v37 }
 0x4a0   : > { %2734 = vmax.xlane.f32.xlu1 %v2733_v4  ;;  %v2132_v56 = vpop.f32.mrb[35].mxu1  ;;  %v17691_v21 = vmul.f32 0.5, %v13268_v54  ;;  %v2715_v4 = vsel %vm2636_vm3, %v17685_v0, -inf  ;;  %15853 = vpow2.f32 %v2893_v45  ;;  %v17704_v54 = vmul.f32 0.5, %v17607_v25 }
 0x4a1   : > { %v17689_v13 = vpop.f32.mrb[26].mxu0  ;;  %v17697_v47 = vmul.f32 0.5, %v2132_v56  ;;  %v2832_v45 = vsub.f32 %v17483_v35, %v2648_v52  ;;  %20977 = vst [vmem:[#allocation50_spill] sm:$0xff] %v17788_v2  ;;  %v2757_v37 = vsel %vm2636_vm3, %v17788_v2, -inf }
 0x4a2   : > { %v17693_v30 = vpop.f32.mrb[27].mxu0  ;;  %v2742_v56 = vsel %vm2636_vm3, %v17691_v21, -inf }
 0x4a3   : > { %2719 = vmax.xlane.f32.xlu0 %v2718_v11  ;;  %v13271_v58 = vpop.f32.mrb[36].mxu1  ;;  %v17711_v11 = vmul.f32 0.5, %v17611_v12  ;;  %v2739_v1 = vsel %vm2636_vm3, %v17697_v47, -inf  ;;  %v2724_v12 = vsel %vm2636_vm3, %v17704_v54, -inf  ;;  %v2899_v35 = vmul.f32 1.442695, %v2832_v45 }
 0x4a4   : > { %2716 = vmax.xlane.f32.xlu1 %v2715_v4  ;;  %v2142_v14 = vpop.f32.mrb[37].mxu1  ;;  %v2654_v4 = vpop.xlane.xlu0 %2653  ;;  %v17719_v33 = vmul.f32 0.5, %v13271_v58 }
 0x4a5   : > { %v17701_v7 = vpop.f32.mrb[28].mxu0  ;;  %v17725_v49 = vmul.f32 0.5, %v2142_v14  ;;  %v2834_v52 = vsub.f32 %v17497_v26, %v2654_v4  ;;  %15855 = vpow2.f32 %v2899_v35  ;;  %v17741_v4 = vmul.f32 0.5, %v17621_v38 }
 0x4a6   : > { %v17706_v57 = vpop.f32.mrb[29].mxu0  ;;  %v2748_v58 = vsel %vm2636_vm3, %v17719_v33, -inf  ;;  %15857 = vpow2.f32 %v2897_v6 }
 0x4a7   : > { %2743 = vmax.xlane.f32.xlu0 %v2742_v56  ;;  %v13274_v9 = vpop.f32.mrb[38].mxu1  ;;  %v2651_v56 = vpop.xlane.xlu1 %2650  ;;  %v2745_v14 = vsel %vm2636_vm3, %v17725_v49, -inf  ;;  %v2903_v45 = vmul.f32 1.442695, %v2834_v52  ;;  %v2730_v38 = vsel %vm2636_vm3, %v17741_v4, -inf }
 0x4a8   : > { %2740 = vmax.xlane.f32.xlu1 %v2739_v1  ;;  %v2152_v34 = vpop.f32.mrb[39].mxu1  ;;  %v2721_v1 = vsel %vm2636_vm3, %v17711_v11, -inf  ;;  %v2833_v40 = vsub.f32 %v17499_v27, %v2651_v56  ;;  %v2660_v62 = vpop.xlane.xlu0 %2659  ;;  %v17751_v35 = vmul.f32 0.5, %v13274_v9 }
 0x4a9   : > { %v17716_v25 = vpop.f32.mrb[30].mxu0  ;;  %v17733_v10 = vpop.eup %15851  ;;  %v2836_v26 = vsub.f32 %v17507_v31, %v2660_v62  ;;  %15859 = vpow2.f32 %v2903_v45  ;;  %v17755_v52 = vmul.f32 0.5, %v2152_v34 }
 0x4aa   : > { %v17721_v53 = vpop.f32.mrb[31].mxu0  ;;  %20970 = vst [vmem:[#allocation43_spill] sm:$0xff] %v17733_v10  ;;  %v2901_v24 = vmul.f32 1.442695, %v2833_v40  ;;  %v3024_v56 = vsel %vm2636_vm3, %v17733_v10, 0.0  ;;  %v2754_v62 = vsel %vm2636_vm3, %v17751_v35, -inf }
 0x4ab   : > { %2725 = vmax.xlane.f32.xlu0 %v2724_v12  ;;  %v17737_v12 = vpop.eup %15853  ;;  %v2657_v27 = vpop.xlane.xlu1 %2656  ;;  %v2907_v6 = vmul.f32 1.442695, %v2836_v26  ;;  %v2751_v9 = vsel %vm2636_vm3, %v17755_v52, -inf }
 0x4ac   : > { %2722 = vmax.xlane.f32.xlu1 %v2721_v1  ;;  %20971 = vst [vmem:[#allocation44_spill] sm:$0xff] %v17737_v12  ;;  %v17746_v1 = vmul.f32 0.5, %v17623_v8  ;;  %v2835_v31 = vsub.f32 %v17509_v41, %v2657_v27  ;;  %15861 = vpow2.f32 %v2901_v24 }
 0x4ad   : > { %15863 = vpow2.f32 %v2907_v6 }
 0x4ae   : > { %v2727_v8 = vsel %vm2636_vm3, %v17746_v1, -inf  ;;  %v2905_v40 = vmul.f32 1.442695, %v2835_v31 }
 0x4af   : > { %2749 = vmax.xlane.f32.xlu0 %v2748_v58  ;;  %v3021_v58 = vsel %vm2636_vm3, %v17737_v12, 0.0  ;;  %v17761_v41 = vpop.eup %15855  ;;  %v17810_v12 = vmul.f32 0.5, %v17693_v30  ;;  %v17823_v30 = vmul.f32 0.5, %v17689_v13 }
 0x4b0   : > { %2746 = vmax.xlane.f32.xlu1 %v2745_v14  ;;  %20972 = vst [vmem:[#allocation45_spill] sm:$0xff] %v17761_v41  ;;  %v17765_v14 = vpop.eup %15857  ;;  %15865 = vpow2.f32 %v2905_v40  ;;  %v3030_v27 = vsel %vm2636_vm3, %v17761_v41, 0.0 }
 0x4b1   : > { %20973 = vst [vmem:[#allocation46_spill] sm:$0xff] %v17765_v14  ;;  %v2763_v20 = vsel %vm2636_vm3, %v17810_v12, -inf }
 0x4b3   : > { %3025 = vadd.xlane.f32.xlu0 %v3024_v56  ;;  %v17773_v56 = vpop.eup %15859 }
 0x4b4   : > { %3022 = vadd.xlane.f32.xlu1 %v3021_v58  ;;  %20974 = vst [vmem:[#allocation47_spill] sm:$0xff] %v17773_v56  ;;  %v3027_v58 = vsel %vm2636_vm3, %v17765_v14, 0.0 }
 0x4b6   : > { %v17777_v31 = vpop.eup %15861 }
 0x4b7   : > { %2731 = vmax.xlane.f32.xlu0 %v2730_v38  ;;  %20975 = vst [vmem:[#allocation48_spill] sm:$0xff] %v17777_v31 }
 0x4b8   : > { %2728 = vmax.xlane.f32.xlu1 %v2727_v8 }
 0x4bb   : > { %2755 = vmax.xlane.f32.xlu0 %v2754_v62  ;;  %v3036_v62 = vsel %vm2636_vm3, %v17773_v56, 0.0 }
 0x4bc   : > { %v13321_v34 = vpop.f32.mrb[40].mxu1  ;;  %2752 = vmax.xlane.f32.xlu1 %v2751_v9  ;;  %v17785_v9 = vpop.eup %15863 }
 0x4bd   : > { %v17767_v45 = vpop.f32.mrb[32].mxu0  ;;  %v2396_v26 = vpop.f32.mrb[41].mxu1  ;;  %20976 = vst [vmem:[#allocation49_spill] sm:$0xff] %v17785_v9  ;;  %v3042_v44 = vsel %vm2636_vm3, %v17785_v9, 0.0 }
 0x4be   : > { %v17769_v24 = vpop.f32.mrb[33].mxu0  ;;  %v17796_v61 = vpop.eup %15865  ;;  %v17798_v56 = vmul.f32 0.5, %v2396_v26  ;;  %v17814_v26 = vmul.f32 0.5, %v13321_v34 }
 0x4bf   : > { %3031 = vadd.xlane.f32.xlu0 %v3030_v27  ;;  %v3033_v27 = vsel %vm2636_vm3, %v17777_v31, 0.0  ;;  %v3039_v9 = vsel %vm2636_vm3, %v17796_v61, 0.0 }
 0x4c0   : > { %v13324_v6 = vpop.f32.mrb[42].mxu1  ;;  %3028 = vadd.xlane.f32.xlu1 %v3027_v58 }
 0x4c1   : > { %v17779_v38 = vpop.f32.mrb[34].mxu0  ;;  %v2406_v8 = vpop.f32.mrb[43].mxu1 }
 0x4c2   : > { %v17781_v40 = vpop.f32.mrb[35].mxu0  ;;  %v17818_v2 = vmul.f32 0.5, %v2406_v8  ;;  %v17832_v8 = vmul.f32 0.5, %v13324_v6 }
 0x4c3   : > { %3037 = vadd.xlane.f32.xlu0 %v3036_v62 }
 0x4c4   : > { %v13327_v41 = vpop.f32.mrb[44].mxu1  ;;  %3034 = vadd.xlane.f32.xlu1 %v3033_v27  ;;  %v2787_v34 = vsel %vm2636_vm3, %v17818_v2, -inf }
 0x4c5   : > { %v17792_v58 = vpop.f32.mrb[36].mxu0  ;;  %v2416_v14 = vpop.f32.mrb[45].mxu1 }
 0x4c6   : > { %v2553_v51 = vpop.f32.mrb[37].mxu0 }
 0x4c7   : > { %3043 = vadd.xlane.f32.xlu0 %v3042_v44  ;;  %v2781_v44 = vsel %vm2636_vm3, %v17798_v56, -inf }
 0x4c8   : > { %v13330_v62 = vpop.f32.mrb[46].mxu1  ;;  %2758 = vmax.xlane.f32.xlu1 %v2757_v37  ;;  %v2760_v37 = vsel %vm2636_vm3, %v17805_v42, -inf }
 0x4c9   : > { %v17802_v31 = vpop.f32.mrb[38].mxu0  ;;  %v2426_v27 = vpop.f32.mrb[47].mxu1 }
 0x4ca   : > { %v2563_v10 = vpop.f32.mrb[39].mxu0 }
 0x4cb   : > { %3040 = vadd.xlane.f32.xlu0 %v3039_v9  ;;  %v2784_v9 = vsel %vm2636_vm3, %v17814_v26, -inf }
 0x4cc   : > { %2782 = vmax.xlane.f32.xlu1 %v2781_v44  ;;  %v17828_v44 = vmul.f32 0.5, %v17706_v57  ;;  %v17841_v57 = vmul.f32 0.5, %v17701_v7 }
 0x4ce   : > { %v2769_v13 = vsel %vm2636_vm3, %v17828_v44, -inf }
 0x4cf   : > { %2761 = vmax.xlane.f32.xlu0 %v2760_v37  ;;  %v2766_v37 = vsel %vm2636_vm3, %v17823_v30, -inf }
 0x4d0   : > { %2764 = vmax.xlane.f32.xlu1 %v2763_v20  ;;  %v17836_v20 = vmul.f32 0.5, %v2416_v14  ;;  %v17850_v14 = vmul.f32 0.5, %v13327_v41 }
 0x4d2   : > { %v2793_v6 = vsel %vm2636_vm3, %v17836_v20, -inf }
 0x4d3   : > { %2785 = vmax.xlane.f32.xlu0 %v2784_v9  ;;  %v2790_v9 = vsel %vm2636_vm3, %v17832_v8, -inf }
 0x4d4   : > { %2788 = vmax.xlane.f32.xlu1 %v2787_v34  ;;  %v17846_v34 = vmul.f32 0.5, %v17721_v53  ;;  %v17859_v53 = vmul.f32 0.5, %v17716_v25 }
 0x4d6   : > { %v2775_v7 = vsel %vm2636_vm3, %v17846_v34, -inf  ;;  %20978 = vst [vmem:[#allocation51_spill] sm:$0xff] %v17859_v53 }
 0x4d7   : > { %2767 = vmax.xlane.f32.xlu0 %v2766_v37  ;;  %v2772_v37 = vsel %vm2636_vm3, %v17841_v57, -inf }
 0x4d8   : > { %2770 = vmax.xlane.f32.xlu1 %v2769_v13  ;;  %v17854_v13 = vmul.f32 0.5, %v2426_v27  ;;  %v17868_v27 = vmul.f32 0.5, %v13330_v62 }
 0x4da   : > { %v2799_v41 = vsel %vm2636_vm3, %v17854_v13, -inf }
 0x4db   : > { %2791 = vmax.xlane.f32.xlu0 %v2790_v9  ;;  %v2796_v9 = vsel %vm2636_vm3, %v17850_v14, -inf }
 0x4dc   : > { %2794 = vmax.xlane.f32.xlu1 %v2793_v6  ;;  %v17864_v6 = vmul.f32 0.5, %v17769_v24  ;;  %v17878_v24 = vmul.f32 0.5, %v17767_v45 }
 0x4de   : > { %20979 = vst [vmem:[#allocation52_spill] sm:$0xff] %v17864_v6  ;;  %v2805_v25 = vsel %vm2636_vm3, %v17864_v6, -inf  ;;  %v2808_v45 = vsel %vm2636_vm3, %v17878_v24, -inf }
 0x4df   : > { %2773 = vmax.xlane.f32.xlu0 %v2772_v37  ;;  %v2778_v37 = vsel %vm2636_vm3, %v17859_v53, -inf }
 0x4e0   : > { %2776 = vmax.xlane.f32.xlu1 %v2775_v7  ;;  %v17873_v7 = vmul.f32 0.5, %v17781_v40 }
 0x4e2   : > { %v2811_v62 = vsel %vm2636_vm3, %v17873_v7, -inf }
 0x4e3   : > { %2797 = vmax.xlane.f32.xlu0 %v2796_v9  ;;  %v2802_v9 = vsel %vm2636_vm3, %v17868_v27, -inf }
 0x4e4   : > { %2800 = vmax.xlane.f32.xlu1 %v2799_v41  ;;  %v17882_v41 = vmul.f32 0.5, %v2553_v51 }
 0x4e6   : > { %v2817_v51 = vsel %vm2636_vm3, %v17882_v41, -inf }
 0x4e7   : > { %2779 = vmax.xlane.f32.xlu0 %v2778_v37  ;;  %v17888_v37 = vmul.f32 0.5, %v17779_v38 }
 0x4e8   : > { %2806 = vmax.xlane.f32.xlu1 %v2805_v25  ;;  %v17892_v25 = vmul.f32 0.5, %v2563_v10  ;;  %v17904_v10 = vmul.f32 0.5, %v17802_v31 }
 0x4e9   : > { %20980 = vst [vmem:[#allocation53_spill] sm:$0xff] %v17888_v37 }
 0x4ea   : > { %20981 = vst [vmem:[#allocation54_spill] sm:$0xff] %v17892_v25  ;;  %v2823_v38 = vsel %vm2636_vm3, %v17892_v25, -inf  ;;  %20983 = vst [vmem:[#allocation56_spill] sm:$0xff] %v17904_v10 }
 0x4eb   : > { %2803 = vmax.xlane.f32.xlu0 %v2802_v9  ;;  %v17897_v9 = vmul.f32 0.5, %v17792_v58 }
 0x4ec   : > { %v2666_v53 = vpop.xlane.xlu0 %2665  ;;  %2812 = vmax.xlane.f32.xlu1 %v2811_v62 }
 0x4ed   : > { %v2838_v40 = vsub.f32 %v17549_v59, %v2666_v53  ;;  %20982 = vst [vmem:[#allocation55_spill] sm:$0xff] %v17897_v9  ;;  %v2814_v59 = vsel %vm2636_vm3, %v17888_v37, -inf  ;;  %v2820_v53 = vsel %vm2636_vm3, %v17897_v9, -inf }
 0x4ef   : > { %v2911_v6 = vmul.f32 1.442695, %v2838_v40  ;;  %2809 = vmax.xlane.f32.xlu0 %v2808_v45 }
 0x4f0   : > { %2818 = vmax.xlane.f32.xlu1 %v2817_v51 }
 0x4f1   : > { %15867 = vpow2.f32 %v2911_v6  ;;  %v2826_v6 = vsel %vm2636_vm3, %v17904_v10, -inf }
 0x4f3   : > { %2815 = vmax.xlane.f32.xlu0 %v2814_v59 }
 0x4f4   : > { %2824 = vmax.xlane.f32.xlu1 %v2823_v38 }
 0x4f7   : > { %2821 = vmax.xlane.f32.xlu0 %v2820_v53 }
 0x4fb   : > { %v17910_v58 = vpop.eup %15867  ;;  %2827 = vmax.xlane.f32.xlu0 %v2826_v6 }
 0x4fc   : > { %20984 = vst [vmem:[#allocation57_spill] sm:$0xff] %v17910_v58  ;;  %v3048_v62 = vsel %vm2636_vm3, %v17910_v58, 0.0 }
 0x4ff   : > { %3049 = vadd.xlane.f32.xlu0 %v3048_v62 }
 0x508   : > { %v2690_v40 = vpop.xlane.xlu0 %2689 }
 0x509   : > { %v2846_v45 = vsub.f32 %v17567_v46, %v2690_v40  ;;  %v2687_v51 = vpop.xlane.xlu1 %2686 }
 0x50a   : > { %v2845_v31 = vsub.f32 %v17571_v48, %v2687_v51 }
 0x50b   : > { %v2927_v59 = vmul.f32 1.442695, %v2846_v45 }
 0x50c   : > { %v2925_v38 = vmul.f32 1.442695, %v2845_v31  ;;  %v2663_v9 = vpop.xlane.xlu0 %2662 }
 0x50d   : > { %15869 = vpow2.f32 %v2927_v59  ;;  %v2837_v53 = vsub.f32 %v17573_v55, %v2663_v9  ;;  %v2669_v10 = vpop.xlane.xlu1 %2668 }
 0x50e   : > { %15871 = vpow2.f32 %v2925_v38  ;;  %v2839_v46 = vsub.f32 %v17577_v32, %v2669_v10 }
 0x50f   : > { %v2909_v25 = vmul.f32 1.442695, %v2837_v53 }
 0x510   : > { %v2672_v6 = vpop.xlane.xlu0 %2671  ;;  %v2913_v9 = vmul.f32 1.442695, %v2839_v46 }
 0x511   : > { %15873 = vpow2.f32 %v2909_v25  ;;  %v2840_v58 = vsub.f32 %v17583_v3, %v2672_v6  ;;  %v2693_v62 = vpop.xlane.xlu1 %2692 }
 0x512   : > { %v2847_v37 = vsub.f32 %v17589_v5, %v2693_v62 }
 0x513   : > { %v2915_v40 = vmul.f32 1.442695, %v2840_v58 }
 0x514   : > { %v2929_v48 = vmul.f32 1.442695, %v2847_v37  ;;  %v2696_v45 = vpop.xlane.xlu0 %2695 }
 0x515   : > { %15875 = vpow2.f32 %v2915_v40  ;;  %v2848_v51 = vsub.f32 %v17597_v19, %v2696_v45  ;;  %v2675_v31 = vpop.xlane.xlu1 %2674 }
 0x516   : > { %15877 = vpow2.f32 %v2929_v48  ;;  %v2841_v38 = vsub.f32 %v17603_v60, %v2675_v31 }
 0x517   : > { %v17921_v55 = vpop.eup %15869  ;;  %v2931_v59 = vmul.f32 1.442695, %v2848_v51 }
 0x518   : > { %v17923_v25 = vpop.eup %15871  ;;  %v2678_v3 = vpop.xlane.xlu0 %2677  ;;  %v3072_v5 = vsel %vm2636_vm3, %v17921_v55, 0.0 }
 0x519   : > { %15879 = vpow2.f32 %v2931_v59  ;;  %v2842_v32 = vsub.f32 %v17613_v15, %v2678_v3  ;;  %v2699_v37 = vpop.xlane.xlu1 %2698  ;;  %3073 = vadd.xlane.f32.xlu1 %v3072_v5  ;;  %v3069_v19 = vsel %vm2636_vm3, %v17923_v25, 0.0 }
 0x51a   : > { %v2849_v10 = vsub.f32 %v17617_v16, %v2699_v37  ;;  %3070 = vadd.xlane.f32.xlu0 %v3069_v19  ;;  %15881 = vpow2.f32 %v2913_v9  ;;  %v2917_v16 = vmul.f32 1.442695, %v2841_v38 }
 0x51b   : > { %v17931_v58 = vpop.eup %15873  ;;  %v2919_v53 = vmul.f32 1.442695, %v2842_v32 }
 0x51c   : > { %v2933_v6 = vmul.f32 1.442695, %v2849_v10  ;;  %v2702_v62 = vpop.xlane.xlu0 %2701  ;;  %v3045_v46 = vsel %vm2636_vm3, %v17931_v58, 0.0 }
 0x51d   : > { %15883 = vpow2.f32 %v2919_v53  ;;  %v2850_v15 = vsub.f32 %v17627_v43, %v2702_v62  ;;  %v2681_v40 = vpop.xlane.xlu1 %2680  ;;  %3046 = vadd.xlane.f32.xlu1 %v3045_v46 }
 0x51e   : > { %15885 = vpow2.f32 %v2933_v6  ;;  %v2843_v51 = vsub.f32 %v17633_v18, %v2681_v40 }
 0x51f   : > { %v17937_v48 = vpop.eup %15875  ;;  %v2935_v45 = vmul.f32 1.442695, %v2850_v15 }
 0x520   : > { %v2684_v9 = vpop.xlane.xlu0 %2683  ;;  %v3054_v60 = vsel %vm2636_vm3, %v17937_v48, 0.0  ;;  %v17942_v31 = vpop.eup %15877  ;;  %v2921_v5 = vmul.f32 1.442695, %v2843_v51 }
 0x521   : > { %15887 = vpow2.f32 %v2935_v45  ;;  %v2844_v59 = vsub.f32 %v17637_v17, %v2684_v9  ;;  %v2705_v3 = vpop.xlane.xlu1 %2704  ;;  %3055 = vadd.xlane.f32.xlu0 %v3054_v60  ;;  %v3075_v18 = vsel %vm2636_vm3, %v17942_v31, 0.0 }
 0x522   : > { %15889 = vpow2.f32 %v2917_v16  ;;  %v2851_v37 = vsub.f32 %v17641_v36, %v2705_v3 }
 0x523   : > { %v17945_v43 = vpop.eup %15879  ;;  %v2923_v32 = vmul.f32 1.442695, %v2844_v59 }
 0x524   : > { %v2708_v19 = vpop.xlane.xlu0 %2707  ;;  %v3078_v10 = vsel %vm2636_vm3, %v17945_v43, 0.0  ;;  %v17952_v38 = vpop.eup %15881  ;;  %v2937_v6 = vmul.f32 1.442695, %v2851_v37 }
 0x525   : > { %15891 = vpow2.f32 %v2923_v32  ;;  %v2852_v17 = vsub.f32 %v17649_v50, %v2708_v19  ;;  %3076 = vadd.xlane.f32.xlu0 %v3075_v18  ;;  %3079 = vadd.xlane.f32.xlu1 %v3078_v10  ;;  %v2711_v36 = vpop.xlane.xlu1 %2710  ;;  %v3051_v40 = vsel %vm2636_vm3, %v17952_v38, 0.0 }
 0x526   : > { %15893 = vpow2.f32 %v2921_v5  ;;  %v2853_v51 = vsub.f32 %v17653_v63, %v2711_v36 }
 0x527   : > { %v17955_v53 = vpop.eup %15883  ;;  %v2939_v62 = vmul.f32 1.442695, %v2852_v17 }
 0x528   : > { %v2714_v46 = vpop.xlane.xlu0 %2713  ;;  %v3060_v15 = vsel %vm2636_vm3, %v17955_v53, 0.0  ;;  %v17961_v16 = vpop.eup %15885  ;;  %v2941_v19 = vmul.f32 1.442695, %v2853_v51 }
 0x529   : > { %15895 = vpow2.f32 %v2939_v62  ;;  %v2854_v50 = vsub.f32 %v17659_v28, %v2714_v46  ;;  %3061 = vadd.xlane.f32.xlu0 %v3060_v15  ;;  %3052 = vadd.xlane.f32.xlu1 %v3051_v40  ;;  %v3081_v59 = vsel %vm2636_vm3, %v17961_v16, 0.0 }
 0x52a   : > { %15897 = vpow2.f32 %v2937_v6 }
 0x52b   : > { %v17964_v45 = vpop.eup %15887  ;;  %v2943_v9 = vmul.f32 1.442695, %v2854_v50 }
 0x52c   : > { %v2738_v60 = vpop.xlane.xlu0 %2737  ;;  %v3084_v3 = vsel %vm2636_vm3, %v17964_v45, 0.0  ;;  %v17971_v5 = vpop.eup %15889 }
 0x52d   : > { %v2862_v32 = vsub.f32 %v17669_v23, %v2738_v60  ;;  %v2735_v28 = vpop.xlane.xlu1 %2734  ;;  %3082 = vadd.xlane.f32.xlu0 %v3081_v59  ;;  %3085 = vadd.xlane.f32.xlu1 %v3084_v3  ;;  %15899 = vpow2.f32 %v2943_v9  ;;  %v3057_v6 = vsel %vm2636_vm3, %v17971_v5, 0.0 }
 0x52e   : > { %v2861_v18 = vsub.f32 %v17674_v39, %v2735_v28 }
 0x52f   : > { %v17974_v37 = vpop.eup %15891  ;;  %v2959_v63 = vmul.f32 1.442695, %v2862_v32 }
 0x530   : > { %v2720_v10 = vpop.xlane.xlu0 %2719  ;;  %v3066_v17 = vsel %vm2636_vm3, %v17974_v37, 0.0  ;;  %v17981_v62 = vpop.eup %15893  ;;  %v2957_v39 = vmul.f32 1.442695, %v2861_v18 }
 0x531   : > { %15901 = vpow2.f32 %v2959_v63  ;;  %v2856_v23 = vsub.f32 %v17678_v22, %v2720_v10  ;;  %v2717_v36 = vpop.xlane.xlu1 %2716  ;;  %3067 = vadd.xlane.f32.xlu0 %v3066_v17  ;;  %3058 = vadd.xlane.f32.xlu1 %v3057_v6  ;;  %v3063_v51 = vsel %vm2636_vm3, %v17981_v62, 0.0 }
 0x532   : > { %v2855_v46 = vsub.f32 %v17685_v0, %v2717_v36  ;;  %15903 = vpow2.f32 %v2941_v19 }
 0x533   : > { %v17985_v15 = vpop.eup %15895  ;;  %v2947_v40 = vmul.f32 1.442695, %v2856_v23 }
 0x534   : > { %v2744_v50 = vpop.xlane.xlu0 %2743  ;;  %v3090_v9 = vsel %vm2636_vm3, %v17985_v15, 0.0  ;;  %v17991_v60 = vpop.eup %15897  ;;  %v2945_v0 = vmul.f32 1.442695, %v2855_v46 }
 0x535   : > { %15905 = vpow2.f32 %v2947_v40  ;;  %v2864_v22 = vsub.f32 %v17691_v21, %v2744_v50  ;;  %v2741_v59 = vpop.xlane.xlu1 %2740  ;;  %3064 = vadd.xlane.f32.xlu0 %v3063_v51  ;;  %3091 = vadd.xlane.f32.xlu1 %v3090_v9  ;;  %v3087_v63 = vsel %vm2636_vm3, %v17991_v60, 0.0 }
 0x536   : > { %v2863_v3 = vsub.f32 %v17697_v47, %v2741_v59  ;;  %15907 = vpow2.f32 %v2957_v39 }
 0x537   : > { %v2963_v32 = vmul.f32 1.442695, %v2864_v22  ;;  %v17997_v18 = vpop.eup %15899 }
 0x538   : > { %v2961_v28 = vmul.f32 1.442695, %v2863_v3  ;;  %v2726_v19 = vpop.xlane.xlu0 %2725  ;;  %v3096_v46 = vsel %vm2636_vm3, %v17997_v18, 0.0 }
 0x539   : > { %15909 = vpow2.f32 %v2963_v32  ;;  %v2858_v10 = vsub.f32 %v17704_v54, %v2726_v19  ;;  %v2723_v17 = vpop.xlane.xlu1 %2722  ;;  %3088 = vadd.xlane.f32.xlu0 %v3087_v63 }
 0x53a   : > { %15911 = vpow2.f32 %v2945_v0  ;;  %v2857_v21 = vsub.f32 %v17711_v11, %v2723_v17 }
 0x53b   : > { %v18001_v6 = vpop.eup %15901  ;;  %15913 = vpow2.f32 %v2961_v28  ;;  %v2951_v47 = vmul.f32 1.442695, %v2858_v10 }
 0x53c   : > { %v2949_v23 = vmul.f32 1.442695, %v2857_v21  ;;  %v2750_v36 = vpop.xlane.xlu0 %2749  ;;  %v3120_v39 = vsel %vm2636_vm3, %v18001_v6, 0.0  ;;  %v18007_v40 = vpop.eup %15903 }
 0x53d   : > { %v2866_v54 = vsub.f32 %v17719_v33, %v2750_v36  ;;  %v2747_v50 = vpop.xlane.xlu1 %2746  ;;  %3097 = vadd.xlane.f32.xlu0 %v3096_v46  ;;  %3121 = vadd.xlane.f32.xlu1 %v3120_v39  ;;  %15915 = vpow2.f32 %v2951_v47  ;;  %v3093_v0 = vsel %vm2636_vm3, %v18007_v40, 0.0 }
 0x53e   : > { %v2865_v11 = vsub.f32 %v17725_v49, %v2747_v50  ;;  %15917 = vpow2.f32 %v2949_v23 }
 0x53f   : > { %v18011_v51 = vpop.eup %15905  ;;  %v2967_v9 = vmul.f32 1.442695, %v2866_v54 }
 0x540   : > { %v2965_v22 = vmul.f32 1.442695, %v2865_v11  ;;  %v3026_v59 = vpop.xlane.xlu0 %3025  ;;  %v3102_v3 = vsel %vm2636_vm3, %v18011_v51, 0.0  ;;  %v18017_v32 = vpop.eup %15907 }
 0x541   : > { %15919 = vpow2.f32 %v2967_v9  ;;  %v3023_v33 = vpop.xlane.xlu1 %3022  ;;  %3094 = vadd.xlane.f32.xlu0 %v3093_v0  ;;  %3103 = vadd.xlane.f32.xlu1 %v3102_v3  ;;  %v3117_v63 = vsel %vm2636_vm3, %v18017_v32, 0.0 }
 0x542   : > { %15921 = vpow2.f32 %v2965_v22 }
 0x543   : > { %v18019_v49 = vpop.eup %15909  ;;  %15923 = vrcp.f32 %v3026_v59 }
 0x544   : > { %v18021_v28 = vpop.eup %15911  ;;  %15925 = vrcp.f32 %v3023_v33  ;;  %v2732_v19 = vpop.xlane.xlu0 %2731  ;;  %v3126_v10 = vsel %vm2636_vm3, %v18019_v49, 0.0 }
 0x545   : > { %v18027_v17 = vpop.eup %15913  ;;  %v2860_v21 = vsub.f32 %v17741_v4, %v2732_v19  ;;  %v2729_v47 = vpop.xlane.xlu1 %2728  ;;  %3118 = vadd.xlane.f32.xlu0 %v3117_v63  ;;  %3127 = vadd.xlane.f32.xlu1 %v3126_v10  ;;  %v3099_v11 = vsel %vm2636_vm3, %v18021_v28, 0.0 }
 0x546   : > { %v2859_v23 = vsub.f32 %v17746_v1, %v2729_v47  ;;  %v3123_v50 = vsel %vm2636_vm3, %v18027_v17, 0.0 }
 0x547   : > { %v2955_v36 = vmul.f32 1.442695, %v2860_v21  ;;  %v18031_v46 = vpop.eup %15915 }
 0x548   : > { %20985 = vst [vmem:[#allocation58_spill] sm:$0xff] %v18031_v46  ;;  %v2953_v39 = vmul.f32 1.442695, %v2859_v23  ;;  %v2756_v54 = vpop.xlane.xlu0 %2755  ;;  %v18037_v9 = vpop.eup %15917  ;;  %v3108_v10 = vsel %vm2636_vm3, %v18031_v46, 0.0  ;;  %v15448_v23 = vunpack.i.l.bf16 %v17555_v29 }
 0x549   : > { %15927 = vpow2.f32 %v2955_v36  ;;  %v2868_v4 = vsub.f32 %v17751_v35, %v2756_v54  ;;  %v2753_v22 = vpop.xlane.xlu1 %2752  ;;  %3124 = vadd.xlane.f32.xlu0 %v3123_v50  ;;  %3100 = vadd.xlane.f32.xlu1 %v3099_v11  ;;  %v3105_v63 = vsel %vm2636_vm3, %v18037_v9, 0.0  ;;  %v20988_v36 = vld [vmem:[#allocation44_spill] sm:$0xff]  ;;  %v20989_v54 = vld [vmem:[#allocation43_spill] sm:$0xff] }
 0x54a   : > { %15929 = vpow2.f32 %v2953_v39  ;;  %v2867_v1 = vsub.f32 %v17755_v52, %v2753_v22  ;;  %v15449_v52 = vunpack.i.h.bf16 %v17555_v29 }
 0x54b   : > { %v18041_v59 = vpop.eup %15919  ;;  %v2971_v0 = vmul.f32 1.442695, %v2868_v4 }
 0x54c   : > { %20986 = vst [vmem:[#allocation59_spill] sm:$0xff] %v18041_v59  ;;  %v18043_v3 = vpop.eup %15921  ;;  %v2969_v33 = vmul.f32 1.442695, %v2867_v1  ;;  %v3032_v19 = vpop.xlane.xlu0 %3031  ;;  %v3132_v1 = vsel %vm2636_vm3, %v18041_v59, 0.0 }
 0x54d   : > { %20987 = vst [vmem:[#allocation60_spill] sm:$0xff] %v18043_v3  ;;  %v15924_v35 = vpop.eup %15923  ;;  %15931 = vpow2.f32 %v2971_v0  ;;  %v3029_v21 = vpop.xlane.xlu1 %3028  ;;  %3106 = vadd.xlane.f32.xlu0 %v3105_v63  ;;  %3109 = vadd.xlane.f32.xlu1 %v3108_v10  ;;  %v3129_v4 = vsel %vm2636_vm3, %v18043_v3, 0.0  ;;  %v20990_v0 = vld [vmem:[#allocation28_spill] sm:$0xff] }
 0x54e   : > { %v15926_v47 = vpop.eup %15925  ;;  %15933 = vpow2.f32 %v2969_v33  ;;  %v3278_v50 = vmul.f32 %v15924_v35, %v20989_v54  ;;  %v15459_v29 = vunpack.i.h.bf16 %v20990_v0  ;;  %v15458_v33 = vunpack.i.l.bf16 %v20990_v0  ;;  %v20992_v10 = vld [vmem:[#allocation24_spill] sm:$0xff] }
 0x54f   : > { %15935 = vrcp.f32 %v3032_v19  ;;  %v3277_v39 = vmul.f32 %v15926_v47, %v20988_v36  ;;  %v14695_v19 = vpack.c.bf16 %v15449_v52, %v15448_v23  ;;  %v20994_v36 = vld [vmem:[#allocation30_spill] sm:$0xff] }
 0x550   : > { %15937 = vrcp.f32 %v3029_v21  ;;  %v3038_v11 = vpop.xlane.xlu0 %3037  ;;  %v15468_v54 = vunpack.i.l.bf16 %v20994_v36  ;;  %v14699_v23 = vpack.c.bf16 %v15459_v29, %v15458_v33 }
 0x551   : > { %13375 = vmatprep.mubr.msk.f32.mxu1 %vm2636_vm3, %v3277_v39  ;;  %v3035_v22 = vpop.xlane.xlu1 %3034  ;;  %3130 = vadd.xlane.f32.xlu0 %v3129_v4  ;;  %v15469_v39 = vunpack.i.h.bf16 %v20994_v36  ;;  %v20995_v4 = vld [vmem:[#allocation50_spill] sm:$0xff] }
 0x552   : > { %13376 = vmatmul.mubr.msk.f32.vlgmr.msra.gmra.mrb[48].mxu1 %vm2636_vm3, %v3278_v50  ;;  %15939 = vrcp.f32 %v3035_v22  ;;  %3133 = vadd.xlane.f32.xlu1 %v3132_v1 }
 0x553   : > { %v18061_v63 = vpop.eup %15927  ;;  %14694 = vmatpush3.bf16.msra.mxu1 %v20992_v10  ;;  %15941 = vrcp.f32 %v3038_v11 }
 0x554   : > { %20991 = vst [vmem:[#allocation44_spill] sm:$0xff] %v18061_v63  ;;  %v18064_v35 = vpop.eup %15929  ;;  %14696 = vmatprep.subr.bf16.mxu1 %v14695_v19  ;;  %v3044_v21 = vpop.xlane.xlu0 %3043  ;;  %v3114_v47 = vsel %vm2636_vm3, %v18061_v63, 0.0 }
 0x555   : > { %20993 = vst [vmem:[#allocation43_spill] sm:$0xff] %v18064_v35  ;;  %v2759_v50 = vpop.xlane.xlu1 %2758  ;;  %v3111_v52 = vsel %vm2636_vm3, %v18064_v35, 0.0  ;;  %15943 = vrcp.f32 %v3044_v21  ;;  %v14703_v35 = vpack.c.bf16 %v15469_v39, %v15468_v54 }
 0x556   : > { %v2869_v22 = vsub.f32 %v20995_v4, %v2759_v50  ;;  %3115 = vadd.xlane.f32.xlu1 %v3114_v47  ;;  %3112 = vadd.xlane.f32.xlu0 %v3111_v52  ;;  %v20998_v50 = vld [vmem:[#allocation32_spill] sm:$0xff]  ;;  %v20999_v4 = vld [vmem:[#allocation46_spill] sm:$0xff] }
 0x557   : > { %v18073_v11 = vpop.eup %15931  ;;  %14698 = vmatpush3.bf16.msra.mxu1 %v14695_v19  ;;  %v15479_v52 = vunpack.i.h.bf16 %v20998_v50  ;;  %v15478_v19 = vunpack.i.l.bf16 %v20998_v50 }
 0x558   : > { %20996 = vst [vmem:[#allocation28_spill] sm:$0xff] %v18073_v11  ;;  %v18075_v1 = vpop.eup %15933  ;;  %14700 = vmatprep.subr.bf16.mxu1 %v14699_v23  ;;  %v2973_v0 = vmul.f32 1.442695, %v2869_v22  ;;  %v3041_v10 = vpop.xlane.xlu0 %3040  ;;  %v3138_v36 = vsel %vm2636_vm3, %v18073_v11, 0.0 }
 0x559   : > { %20997 = vst [vmem:[#allocation24_spill] sm:$0xff] %v18075_v1  ;;  %v15936_v63 = vpop.eup %15935  ;;  %15945 = vrcp.f32 %v3041_v10  ;;  %v2783_v29 = vpop.xlane.xlu1 %2782  ;;  %v3135_v33 = vsel %vm2636_vm3, %v18075_v1, 0.0  ;;  %v21000_v10 = vld [vmem:[#allocation45_spill] sm:$0xff] }
 0x55a   : > { %v15938_v47 = vpop.eup %15937  ;;  %15947 = vpow2.f32 %v2973_v0  ;;  %v2877_v21 = vsub.f32 %v17798_v56, %v2783_v29  ;;  %3139 = vadd.xlane.f32.xlu1 %v3138_v36  ;;  %3136 = vadd.xlane.f32.xlu0 %v3135_v33  ;;  %v3280_v59 = vmul.f32 %v15936_v63, %v21000_v10  ;;  %v21001_v0 = vld [vmem:[#allocation48_spill] sm:$0xff]  ;;  %v18090_v56 = vpack.c.bf16 %v15479_v52, %v15478_v19  ;;  %v21002_v29 = vld [vmem:[#allocation47_spill] sm:$0xff] }
 0x55b   : > { %14702 = vmatpush3.bf16.msra.mxu1 %v14699_v23  ;;  %v3279_v22 = vmul.f32 %v15938_v47, %v20999_v4 }
 0x55c   : > { %v15940_v11 = vpop.eup %15939  ;;  %14704 = vmatprep.subr.bf16.mxu1 %v14703_v35  ;;  %v2989_v39 = vmul.f32 1.442695, %v2877_v21  ;;  %v2762_v54 = vpop.xlane.xlu0 %2761 }
 0x55d   : > { %v15942_v1 = vpop.eup %15941  ;;  %13378 = vmatprep.mubr.msk.f32.mxu1 %vm2636_vm3, %v3279_v22  ;;  %v2870_v3 = vsub.f32 %v17805_v42, %v2762_v54  ;;  %v2765_v50 = vpop.xlane.xlu1 %2764  ;;  %v3281_v46 = vmul.f32 %v15940_v11, %v21001_v0  ;;  %v21003_v22 = vld [vmem:[#allocation49_spill] sm:$0xff] }
 0x55e   : > { %15949 = vpow2.f32 %v2989_v39  ;;  %13379 = vmatmul.mubr.msk.f32.gmra.mrb[50].mxu1 %vm2636_vm3, %v3280_v59  ;;  %v2871_v23 = vsub.f32 %v17810_v12, %v2765_v50  ;;  %v3282_v33 = vmul.f32 %v15942_v1, %v21002_v29 }
 0x55f   : > { %14706 = vmatpush3.bf16.msra.mxu1 %v14703_v35  ;;  %v2975_v36 = vmul.f32 1.442695, %v2870_v3  ;;  %13381 = vmatprep.mubr.msk.f32.mxu1 %vm2636_vm3, %v3281_v46  ;;  %v15944_v21 = vpop.eup %15943 }
 0x560   : > { %14724 = vmatprep.subr.bf16.mxu1 %v18090_v56  ;;  %v2977_v63 = vmul.f32 1.442695, %v2871_v23  ;;  %v2786_v42 = vpop.xlane.xlu0 %2785  ;;  %v3284_v39 = vmul.f32 %v15944_v21, %v21003_v22 }
 0x561   : > { %15951 = vpow2.f32 %v2975_v36  ;;  %v2878_v11 = vsub.f32 %v17814_v26, %v2786_v42  ;;  %v2789_v47 = vpop.xlane.xlu1 %2788 }
 0x562   : > { %15953 = vpow2.f32 %v2977_v63  ;;  %13382 = vmatmul.mubr.msk.f32.gmra.mrb[52].mxu1 %vm2636_vm3, %v3282_v33  ;;  %v2879_v12 = vsub.f32 %v17818_v2, %v2789_v47 }
 0x563   : > { %v15946_v59 = vpop.eup %15945  ;;  %v2991_v3 = vmul.f32 1.442695, %v2878_v11 }
 0x564   : > { %v18099_v35 = vpop.eup %15947  ;;  %v2993_v46 = vmul.f32 1.442695, %v2879_v12  ;;  %v2768_v52 = vpop.xlane.xlu0 %2767  ;;  %v3283_v19 = vmul.f32 %v15946_v59, %v17796_v61 }
 0x565   : > { %15955 = vpow2.f32 %v2991_v3  ;;  %v2872_v1 = vsub.f32 %v17823_v30, %v2768_v52  ;;  %v2771_v4 = vpop.xlane.xlu1 %2770  ;;  %v3141_v26 = vsel %vm2636_vm3, %v18099_v35, 0.0 }
 0x566   : > { %15957 = vpow2.f32 %v2993_v46  ;;  %v2873_v2 = vsub.f32 %v17828_v44, %v2771_v4  ;;  %13384 = vmatprep.mubr.msk.f32.mxu1 %vm2636_vm3, %v3283_v19  ;;  %3142 = vadd.xlane.f32.xlu0 %v3141_v26 }
 0x567   : > { %v2979_v54 = vmul.f32 1.442695, %v2872_v1  ;;  %13385 = vmatmul.mubr.msk.f32.gmra.mrb[54].mxu1 %vm2636_vm3, %v3284_v39 }
 0x568   : > { %v18109_v10 = vpop.eup %15949  ;;  %v2981_v61 = vmul.f32 1.442695, %v2873_v2  ;;  %v2792_v50 = vpop.xlane.xlu0 %2791 }
 0x569   : > { %15959 = vpow2.f32 %v2979_v54  ;;  %v2880_v30 = vsub.f32 %v17832_v8, %v2792_v50  ;;  %v2795_v0 = vpop.xlane.xlu1 %2794  ;;  %v3165_v23 = vsel %vm2636_vm3, %v18109_v10, 0.0 }
 0x56a   : > { %15961 = vpow2.f32 %v2981_v61  ;;  %v2881_v44 = vsub.f32 %v17836_v20, %v2795_v0  ;;  %3166 = vadd.xlane.f32.xlu0 %v3165_v23 }
 0x56b   : > { %v18115_v36 = vpop.eup %15951  ;;  %v2995_v63 = vmul.f32 1.442695, %v2880_v30 }
 0x56c   : > { %v18117_v29 = vpop.eup %15953  ;;  %v2997_v33 = vmul.f32 1.442695, %v2881_v44  ;;  %v2774_v42 = vpop.xlane.xlu0 %2773  ;;  %v3144_v11 = vsel %vm2636_vm3, %v18115_v36, 0.0 }
 0x56d   : > { %15963 = vpow2.f32 %v2995_v63  ;;  %v2874_v8 = vsub.f32 %v17841_v57, %v2774_v42  ;;  %v2777_v47 = vpop.xlane.xlu1 %2776  ;;  %3145 = vadd.xlane.f32.xlu1 %v3144_v11  ;;  %v3147_v21 = vsel %vm2636_vm3, %v18117_v29, 0.0 }
 0x56e   : > { %15965 = vpow2.f32 %v2997_v33  ;;  %v2875_v20 = vsub.f32 %v17846_v34, %v2777_v47  ;;  %3148 = vadd.xlane.f32.xlu0 %v3147_v21 }
 0x56f   : > { %v18125_v12 = vpop.eup %15955  ;;  %v2983_v59 = vmul.f32 1.442695, %v2874_v8 }
 0x570   : > { %v18127_v3 = vpop.eup %15957  ;;  %v2985_v46 = vmul.f32 1.442695, %v2875_v20  ;;  %v2798_v52 = vpop.xlane.xlu0 %2797  ;;  %v3168_v19 = vsel %vm2636_vm3, %v18125_v12, 0.0 }
 0x571   : > { %15967 = vpow2.f32 %v2983_v59  ;;  %v2882_v57 = vsub.f32 %v17850_v14, %v2798_v52  ;;  %3169 = vadd.xlane.f32.xlu1 %v3168_v19  ;;  %v2801_v1 = vpop.xlane.xlu1 %2800  ;;  %v3171_v4 = vsel %vm2636_vm3, %v18127_v3, 0.0  ;;  %v21004_v14 = vld [vmem:[#allocation51_spill] sm:$0xff] }
 0x572   : > { %15969 = vpow2.f32 %v2985_v46  ;;  %v2883_v34 = vsub.f32 %v17854_v13, %v2801_v1  ;;  %3172 = vadd.xlane.f32.xlu0 %v3171_v4  ;;  %v21005_v13 = vld [vmem:[#allocation52_spill] sm:$0xff] }
 0x573   : > { %v18135_v26 = vpop.eup %15959  ;;  %v2999_v22 = vmul.f32 1.442695, %v2882_v57 }
 0x574   : > { %v18137_v39 = vpop.eup %15961  ;;  %v3001_v2 = vmul.f32 1.442695, %v2883_v34  ;;  %v2780_v54 = vpop.xlane.xlu0 %2779  ;;  %v3150_v61 = vsel %vm2636_vm3, %v18135_v26, 0.0 }
 0x575   : > { %15971 = vpow2.f32 %v2999_v22  ;;  %v2876_v50 = vsub.f32 %v21004_v14, %v2780_v54  ;;  %3151 = vadd.xlane.f32.xlu1 %v3150_v61  ;;  %v2807_v30 = vpop.xlane.xlu1 %2806  ;;  %v3153_v0 = vsel %vm2636_vm3, %v18137_v39, 0.0 }
 0x576   : > { %15973 = vpow2.f32 %v3001_v2  ;;  %v2885_v23 = vsub.f32 %v21005_v13, %v2807_v30  ;;  %3154 = vadd.xlane.f32.xlu0 %v3153_v0 }
 0x577   : > { %v18145_v44 = vpop.eup %15963  ;;  %v2987_v63 = vmul.f32 1.442695, %v2876_v50 }
 0x578   : > { %v18147_v33 = vpop.eup %15965  ;;  %v3005_v42 = vmul.f32 1.442695, %v2885_v23  ;;  %v2804_v11 = vpop.xlane.xlu0 %2803  ;;  %v3174_v8 = vsel %vm2636_vm3, %v18145_v44, 0.0 }
 0x579   : > { %15975 = vpow2.f32 %v2987_v63  ;;  %v2884_v47 = vsub.f32 %v17868_v27, %v2804_v11  ;;  %3175 = vadd.xlane.f32.xlu1 %v3174_v8  ;;  %v2813_v21 = vpop.xlane.xlu1 %2812  ;;  %v3177_v20 = vsel %vm2636_vm3, %v18147_v33, 0.0 }
 0x57a   : > { %15977 = vpow2.f32 %v3005_v42  ;;  %v2887_v59 = vsub.f32 %v17873_v7, %v2813_v21  ;;  %3178 = vadd.xlane.f32.xlu0 %v3177_v20 }
 0x57b   : > { %v18155_v46 = vpop.eup %15967  ;;  %v3003_v52 = vmul.f32 1.442695, %v2884_v47 }
 0x57c   : > { %v18157_v19 = vpop.eup %15969  ;;  %v3009_v57 = vmul.f32 1.442695, %v2887_v59  ;;  %v2810_v1 = vpop.xlane.xlu0 %2809  ;;  %v3156_v4 = vsel %vm2636_vm3, %v18155_v46, 0.0  ;;  %v21008_v59 = vld [vmem:[#allocation55_spill] sm:$0xff] }
 0x57d   : > { %15979 = vpow2.f32 %v3003_v52  ;;  %v2886_v27 = vsub.f32 %v17878_v24, %v2810_v1  ;;  %3157 = vadd.xlane.f32.xlu1 %v3156_v4  ;;  %v2819_v34 = vpop.xlane.xlu1 %2818  ;;  %v3159_v22 = vsel %vm2636_vm3, %v18157_v19, 0.0  ;;  %v21006_v24 = vld [vmem:[#allocation53_spill] sm:$0xff] }
 0x57e   : > { %15981 = vpow2.f32 %v3009_v57  ;;  %v2889_v7 = vsub.f32 %v17882_v41, %v2819_v34  ;;  %3160 = vadd.xlane.f32.xlu0 %v3159_v22  ;;  %v21007_v41 = vld [vmem:[#allocation54_spill] sm:$0xff] }
 0x57f   : > { %v18165_v2 = vpop.eup %15971  ;;  %v3007_v54 = vmul.f32 1.442695, %v2886_v27 }
 0x580   : > { %v18167_v61 = vpop.eup %15973  ;;  %v3013_v14 = vmul.f32 1.442695, %v2889_v7  ;;  %v2816_v50 = vpop.xlane.xlu0 %2815  ;;  %v3180_v30 = vsel %vm2636_vm3, %v18165_v2, 0.0  ;;  %v21010_v7 = vld [vmem:[#allocation56_spill] sm:$0xff] }
 0x581   : > { %15983 = vpow2.f32 %v3007_v54  ;;  %v2888_v0 = vsub.f32 %v21006_v24, %v2816_v50  ;;  %3181 = vadd.xlane.f32.xlu1 %v3180_v30  ;;  %v2825_v13 = vpop.xlane.xlu1 %2824  ;;  %v3183_v23 = vsel %vm2636_vm3, %v18167_v61, 0.0 }
 0x582   : > { %15985 = vpow2.f32 %v3013_v14  ;;  %v2891_v63 = vsub.f32 %v21007_v41, %v2825_v13  ;;  %3184 = vadd.xlane.f32.xlu0 %v3183_v23 }
 0x583   : > { %v18175_v42 = vpop.eup %15975  ;;  %v3011_v11 = vmul.f32 1.442695, %v2888_v0 }
 0x584   : > { %v18177_v8 = vpop.eup %15977  ;;  %v3017_v47 = vmul.f32 1.442695, %v2891_v63  ;;  %v2822_v21 = vpop.xlane.xlu0 %2821  ;;  %v3162_v20 = vsel %vm2636_vm3, %v18175_v42, 0.0 }
 0x585   : > { %15987 = vpow2.f32 %v3011_v11  ;;  %v2890_v52 = vsub.f32 %v21008_v59, %v2822_v21  ;;  %3163 = vadd.xlane.f32.xlu1 %v3162_v20  ;;  %v3189_v57 = vsel %vm2636_vm3, %v18177_v8, 0.0 }
 0x586   : > { %15989 = vpow2.f32 %v3017_v47  ;;  %3190 = vadd.xlane.f32.xlu0 %v3189_v57 }
 0x587   : > { %v18184_v1 = vpop.eup %15979  ;;  %v3015_v4 = vmul.f32 1.442695, %v2890_v52 }
 0x588   : > { %21009 = vst [vmem:[#allocation30_spill] sm:$0xff] %v18184_v1  ;;  %v18186_v27 = vpop.eup %15981  ;;  %v2828_v34 = vpop.xlane.xlu0 %2827  ;;  %v3186_v22 = vsel %vm2636_vm3, %v18184_v1, 0.0 }
 0x589   : > { %15991 = vpow2.f32 %v3015_v4  ;;  %v2892_v54 = vsub.f32 %v21010_v7, %v2828_v34  ;;  %3187 = vadd.xlane.f32.xlu1 %v3186_v22  ;;  %v3195_v14 = vsel %vm2636_vm3, %v18186_v27, 0.0  ;;  %v21014_v34 = vld [vmem:[#allocation21_spill] sm:$0xff] }
 0x58a   : > { %3196 = vadd.xlane.f32.xlu0 %v3195_v14 }
 0x58b   : > { %v18193_v50 = vpop.eup %15983  ;;  %v3019_v30 = vmul.f32 1.442695, %v2892_v54  ;;  %v21015_v54 = vld [vmem:[#allocation22_spill] sm:$0xff] }
 0x58c   : > { %v18195_v24 = vpop.eup %15985  ;;  %v3192_v0 = vsel %vm2636_vm3, %v18193_v50, 0.0  ;;  %v3050_v52 = vpop.xlane.xlu0 %3049 }
 0x58d   : > { %15993 = vpow2.f32 %v3019_v30  ;;  %3193 = vadd.xlane.f32.xlu1 %v3192_v0  ;;  %v3201_v13 = vsel %vm2636_vm3, %v18195_v24, 0.0  ;;  %v21016_v0 = vld [vmem:[#allocation34_spill] sm:$0xff] }
 0x58e   : > { %3202 = vadd.xlane.f32.xlu0 %v3201_v13  ;;  %v15489_v13 = vunpack.i.h.bf16 %v21016_v0 }
 0x58f   : > { %v18201_v23 = vpop.eup %15987 }
 0x590   : > { %v18203_v41 = vpop.eup %15989  ;;  %v3198_v63 = vsel %vm2636_vm3, %v18201_v23, 0.0 }
 0x591   : > { %21011 = vst [vmem:[#allocation50_spill] sm:$0xff] %v18203_v41  ;;  %3199 = vadd.xlane.f32.xlu1 %v3198_v63  ;;  %v3207_v11 = vsel %vm2636_vm3, %v18203_v41, 0.0  ;;  %v15488_v63 = vunpack.i.l.bf16 %v21016_v0  ;;  %v21018_v0 = vld [vmem:[#allocation36_spill] sm:$0xff] }
 0x592   : > { %3208 = vadd.xlane.f32.xlu0 %v3207_v11  ;;  %v15499_v41 = vunpack.i.h.bf16 %v21018_v0 }
 0x593   : > { %v18209_v47 = vpop.eup %15991 }
 0x594   : > { %21012 = vst [vmem:[#allocation32_spill] sm:$0xff] %v18209_v47  ;;  %v3204_v21 = vsel %vm2636_vm3, %v18209_v47, 0.0  ;;  %v15498_v47 = vunpack.i.l.bf16 %v21018_v0  ;;  %v21021_v0 = vld [vmem:[#allocation38_spill] sm:$0xff] }
 0x595   : > { %3205 = vadd.xlane.f32.xlu1 %v3204_v21 }
 0x597   : > { %v18213_v20 = vpop.eup %15993 }
 0x598   : > { %21013 = vst [vmem:[#allocation46_spill] sm:$0xff] %v18213_v20  ;;  %v3210_v59 = vsel %vm2636_vm3, %v18213_v20, 0.0 }
 0x599   : > { %3211 = vadd.xlane.f32.xlu1 %v3210_v59 }
 0x5a6   : > { %v3074_v57 = vpop.xlane.xlu1 %3073 }
 0x5a7   : > { %15995 = vrcp.f32 %v3074_v57  ;;  %v3071_v4 = vpop.xlane.xlu0 %3070 }
 0x5a8   : > { %15997 = vrcp.f32 %v3071_v4  ;;  %15536 = vrot.lane.b32.xlu0 %v21014_v34, %s20857_s18 }
 0x5a9   : > { %15999 = vrcp.f32 %v3050_v52 }
 0x5aa   : > { %15541 = vrot.lane.b32.xlu1 %v21014_v34, %s20859_s26  ;;  %v3047_v22 = vpop.xlane.xlu1 %3046  ;;  %v21017_v34 = vld [vmem:[#allocation26_spill] sm:$0xff] }
 0x5ab   : > { %16001 = vrcp.f32 %v3047_v22  ;;  %v15454_v22 = vunpack.i.h.bf16 %v21017_v34  ;;  %v15453_v20 = vunpack.i.l.bf16 %v21017_v34 }
 0x5ae   : > { %v3056_v7 = vpop.xlane.xlu0 %3055  ;;  %15546 = vrot.lane.b32.xlu1 %v21015_v54, %s20857_s18 }
 0x5b1   : > { %v15996_v14 = vpop.eup %15995 }
 0x5b2   : > { %v15998_v30 = vpop.eup %15997  ;;  %v3077_v11 = vpop.xlane.xlu0 %3076  ;;  %15551 = vrot.lane.b32.xlu1 %v21015_v54, %s20859_s26  ;;  %v3294_v57 = vmul.f32 %v15996_v14, %v17921_v55  ;;  %v21019_v55 = vld [vmem:[#allocation57_spill] sm:$0xff] }
 0x5b3   : > { %v3080_v21 = vpop.xlane.xlu1 %3079  ;;  %16003 = vrcp.f32 %v3077_v11  ;;  %v3293_v59 = vmul.f32 %v15998_v30, %v17923_v25  ;;  %v16000_v52 = vpop.eup %15999  ;;  %v14727_v25 = vpack.c.bf16 %v15489_v13, %v15488_v63  ;;  %v15509_v13 = vunpack.i.h.bf16 %v21021_v0  ;;  %v21022_v63 = vld [vmem:[#allocation25_spill] sm:$0xff] }
 0x5b4   : > { %16005 = vrcp.f32 %v3080_v21  ;;  %v3286_v14 = vmul.f32 %v16000_v52, %v21019_v55  ;;  %v21020_v21 = vld [vmem:[#allocation27_spill] sm:$0xff] }
 0x5b5   : > { %v16002_v4 = vpop.eup %16001  ;;  %13431 = vmatprep.mubr.msk.f32.mxu1 %vm2636_vm3, %v3293_v59  ;;  %16007 = vrcp.f32 %v3056_v7  ;;  %v15464_v59 = vunpack.i.h.bf16 %v21020_v21  ;;  %v15463_v34 = vunpack.i.l.bf16 %v21020_v21 }
 0x5b6   : > { %v3062_v54 = vpop.xlane.xlu0 %3061  ;;  %13432 = vmatmul.mubr.msk.f32.vlgmr.msra.gmra.mrb[56].mxu1 %vm2636_vm3, %v3294_v57  ;;  %v3285_v30 = vmul.f32 %v16002_v4, %v17931_v58  ;;  %v14711_v57 = vpack.c.bf16 %v15454_v22, %v15453_v20  ;;  %v15508_v58 = vunpack.i.l.bf16 %v21021_v0 }
 0x5b7   : > { %v3053_v11 = vpop.xlane.xlu1 %3052  ;;  %14726 = vmatpush3.bf16.msra.mxu1 %v18090_v56  ;;  %v14731_v56 = vpack.c.bf16 %v15499_v41, %v15498_v47  ;;  %v14715_v20 = vpack.c.bf16 %v15464_v59, %v15463_v34 }
 0x5b8   : > { %16009 = vrcp.f32 %v3053_v11  ;;  %14728 = vmatprep.subr.bf16.mxu1 %v14727_v25  ;;  %13403 = vmatprep.mubr.msk.f32.mxu0 %vm2636_vm3, %v3285_v30  ;;  %v21023_v11 = vld [vmem:[#allocation29_spill] sm:$0xff]  ;;  %v14735_v41 = vpack.c.bf16 %v15509_v13, %v15508_v58 }
 0x5b9   : > { %13404 = vmatmul.mubr.msk.f32.vlgmr.msra.gmra.mrb[40].mxu0 %vm2636_vm3, %v3286_v14  ;;  %v15474_v30 = vunpack.i.h.bf16 %v21023_v11  ;;  %v15473_v55 = vunpack.i.l.bf16 %v21023_v11  ;;  %v21024_v14 = vld [vmem:[#allocation40_spill] sm:$0xff] }
 0x5ba   : > { %14710 = vmatpush3.bf16.msra.mxu0 %v21022_v63  ;;  %v3083_v7 = vpop.xlane.xlu0 %3082  ;;  %v15519_v21 = vunpack.i.h.bf16 %v21024_v14  ;;  %v15518_v0 = vunpack.i.l.bf16 %v21024_v14 }
 0x5bb   : > { %v3086_v52 = vpop.xlane.xlu1 %3085  ;;  %16011 = vrcp.f32 %v3083_v7  ;;  %14712 = vmatprep.subr.bf16.mxu0 %v14711_v57  ;;  %14730 = vmatpush3.bf16.msra.mxu1 %v14727_v25  ;;  %v14719_v34 = vpack.c.bf16 %v15474_v30, %v15473_v55 }
 0x5bc   : > { %16013 = vrcp.f32 %v3086_v52  ;;  %14732 = vmatprep.subr.bf16.mxu1 %v14731_v56 }
 0x5bd   : > { %v16004_v4 = vpop.eup %16003  ;;  %16015 = vrcp.f32 %v3062_v54  ;;  %v18255_v54 = vpack.c.bf16 %v15519_v21, %v15518_v0 }
 0x5be   : > { %v16006_v22 = vpop.eup %16005  ;;  %14714 = vmatpush3.bf16.msra.mxu0 %v14711_v57  ;;  %v3068_v63 = vpop.xlane.xlu0 %3067  ;;  %v3295_v47 = vmul.f32 %v16004_v4, %v17942_v31  ;;  %v21025_v57 = vld [vmem:[#allocation31_spill] sm:$0xff] }
 0x5bf   : > { %v3059_v1 = vpop.xlane.xlu1 %3058  ;;  %14716 = vmatprep.subr.bf16.mxu0 %v14715_v20  ;;  %14734 = vmatpush3.bf16.msra.mxu1 %v14731_v56  ;;  %v3296_v25 = vmul.f32 %v16006_v22, %v17945_v43  ;;  %v16008_v59 = vpop.eup %16007  ;;  %v15484_v52 = vunpack.i.h.bf16 %v21025_v57  ;;  %v15483_v13 = vunpack.i.l.bf16 %v21025_v57 }
 0x5c0   : > { %16017 = vrcp.f32 %v3059_v1  ;;  %14736 = vmatprep.subr.bf16.mxu1 %v14735_v41  ;;  %13434 = vmatprep.mubr.msk.f32.mxu1 %vm2636_vm3, %v3295_v47  ;;  %v3288_v58 = vmul.f32 %v16008_v59, %v17937_v48 }
 0x5c1   : > { %13435 = vmatmul.mubr.msk.f32.gmra.mrb[58].mxu1 %vm2636_vm3, %v3296_v25  ;;  %16019 = vrcp.f32 %v3068_v63  ;;  %v14739_v30 = vpack.c.bf16 %v15484_v52, %v15483_v13 }
 0x5c2   : > { %v16010_v7 = vpop.eup %16009  ;;  %14718 = vmatpush3.bf16.msra.mxu0 %v14715_v20  ;;  %v3065_v31 = vpop.xlane.xlu0 %3064 }
 0x5c3   : > { %16021 = vrcp.f32 %v3065_v31  ;;  %14720 = vmatprep.subr.bf16.mxu0 %v14719_v34  ;;  %14738 = vmatpush3.bf16.msra.mxu1 %v14735_v41  ;;  %v3092_v43 = vpop.xlane.xlu1 %3091  ;;  %v3287_v1 = vmul.f32 %v16010_v7, %v17952_v38  ;;  %v21026_v31 = vld [vmem:[#allocation33_spill] sm:$0xff] }
 0x5c4   : > { %14756 = vmatprep.subr.bf16.mxu1 %v18255_v54  ;;  %16023 = vrcp.f32 %v3092_v43  ;;  %v15494_v43 = vunpack.i.h.bf16 %v21026_v31 }
 0x5c5   : > { %v16012_v56 = vpop.eup %16011  ;;  %13406 = vmatprep.mubr.msk.f32.mxu0 %vm2636_vm3, %v3287_v1  ;;  %v15493_v1 = vunpack.i.l.bf16 %v21026_v31 }
 0x5c6   : > { %v16014_v4 = vpop.eup %16013  ;;  %13407 = vmatmul.mubr.msk.f32.gmra.mrb[42].mxu0 %vm2636_vm3, %v3288_v58  ;;  %v3089_v11 = vpop.xlane.xlu0 %3088  ;;  %v3297_v55 = vmul.f32 %v16012_v56, %v17961_v16 }
 0x5c7   : > { %14722 = vmatpush3.bf16.msra.mxu0 %v14719_v34  ;;  %16025 = vrcp.f32 %v3089_v11  ;;  %v3298_v20 = vmul.f32 %v16014_v4, %v17964_v45  ;;  %v16016_v38 = vpop.eup %16015  ;;  %v21027_v11 = vld [vmem:[#allocation42_spill] sm:$0xff] }
 0x5c8   : > { %14740 = vmatprep.subr.bf16.mxu0 %v14739_v30  ;;  %13437 = vmatprep.mubr.msk.f32.mxu1 %vm2636_vm3, %v3297_v55  ;;  %v3290_v63 = vmul.f32 %v16016_v38, %v17955_v53  ;;  %v15529_v55 = vunpack.i.h.bf16 %v21027_v11  ;;  %v15528_v38 = vunpack.i.l.bf16 %v21027_v11  ;;  %v21033_v11 = vld [vmem:[#allocation59_spill] sm:$0xff] }
 0x5c9   : > { %13438 = vmatmul.mubr.msk.f32.gmra.mrb[60].mxu1 %vm2636_vm3, %v3298_v20 }
 0x5ca   : > { %v16018_v48 = vpop.eup %16017  ;;  %v3098_v22 = vpop.xlane.xlu0 %3097 }
 0x5cb   : > { %v3122_v14 = vpop.xlane.xlu1 %3121  ;;  %v3289_v21 = vmul.f32 %v16018_v48, %v17971_v5  ;;  %v16020_v0 = vpop.eup %16019  ;;  %16027 = vrcp.f32 %v3098_v22  ;;  %v21028_v48 = vld [vmem:[#allocation35_spill] sm:$0xff] }
 0x5cc   : > { %v3292_v59 = vmul.f32 %v16020_v0, %v17974_v37  ;;  %v15504_v22 = vunpack.i.h.bf16 %v21028_v48 }
 0x5cd   : > { %v16022_v41 = vpop.eup %16021  ;;  %13409 = vmatprep.mubr.msk.f32.mxu0 %vm2636_vm3, %v3289_v21  ;;  %v14743_v21 = vpack.c.bf16 %v15494_v43, %v15493_v1  ;;  %v21031_v43 = vld [vmem:[#allocation58_spill] sm:$0xff] }
 0x5ce   : > { %13410 = vmatmul.mubr.msk.f32.gmra.mrb[44].mxu0 %vm2636_vm3, %v3290_v63  ;;  %v3095_v16 = vpop.xlane.xlu0 %3094  ;;  %v3291_v47 = vmul.f32 %v16022_v41, %v17981_v62  ;;  %v16024_v25 = vpop.eup %16023 }
 0x5cf   : > { %v3104_v45 = vpop.xlane.xlu1 %3103  ;;  %16029 = vrcp.f32 %v3095_v16  ;;  %v3300_v57 = vmul.f32 %v16024_v25, %v17985_v15  ;;  %v14759_v25 = vpack.c.bf16 %v15529_v55, %v15528_v38  ;;  %v21034_v38 = vld [vmem:[#allocation43_spill] sm:$0xff] }
 0x5d0   : > { %13412 = vmatprep.mubr.msk.f32.mxu0 %vm2636_vm3, %v3291_v47  ;;  %16031 = vrcp.f32 %v3122_v14  ;;  %v15503_v14 = vunpack.i.l.bf16 %v21028_v48 }
 0x5d1   : > { %v16026_v5 = vpop.eup %16025 }
 0x5d2   : > { %13413 = vmatmul.mubr.msk.f32.gmra.mrb[46].mxu0 %vm2636_vm3, %v3292_v59  ;;  %v3119_v53 = vpop.xlane.xlu0 %3118  ;;  %v3299_v7 = vmul.f32 %v16026_v5, %v17991_v60  ;;  %v14747_v47 = vpack.c.bf16 %v15504_v22, %v15503_v14  ;;  %v21035_v22 = vld [vmem:[#allocation44_spill] sm:$0xff] }
 0x5d3   : > { %v3128_v34 = vpop.xlane.xlu1 %3127  ;;  %16033 = vrcp.f32 %v3119_v53 }
 0x5d4   : > { %13440 = vmatprep.mubr.msk.f32.mxu1 %vm2636_vm3, %v3299_v7  ;;  %16035 = vrcp.f32 %v3104_v45 }
 0x5d5   : > { %13441 = vmatmul.mubr.msk.f32.gmra.mrb[62].mxu1 %vm2636_vm3, %v3300_v57  ;;  %16037 = vrcp.f32 %v3128_v34  ;;  %v16028_v37 = vpop.eup %16027 }
 0x5d6   : > { %v3125_v62 = vpop.xlane.xlu0 %3124  ;;  %v3302_v56 = vmul.f32 %v16028_v37, %v17997_v18 }
 0x5d7   : > { %v3101_v52 = vpop.xlane.xlu1 %3100  ;;  %16039 = vrcp.f32 %v3125_v62 }
 0x5d8   : > { %16041 = vrcp.f32 %v3101_v52 }
 0x5d9   : > { %v16030_v13 = vpop.eup %16029 }
 0x5da   : > { %v3107_v60 = vpop.xlane.xlu0 %3106  ;;  %v3301_v15 = vmul.f32 %v16030_v13, %v18007_v40  ;;  %v16032_v4 = vpop.eup %16031 }
 0x5db   : > { %v3110_v58 = vpop.xlane.xlu1 %3109  ;;  %16043 = vrcp.f32 %v3107_v60  ;;  %v3310_v63 = vmul.f32 %v16032_v4, %v18001_v6 }
 0x5dc   : > { %16045 = vrcp.f32 %v3110_v58  ;;  %13459 = vmatprep.mubr.msk.f32.mxu0 %vm2636_vm3, %v3301_v15 }
 0x5dd   : > { %v16034_v20 = vpop.eup %16033  ;;  %13460 = vmatmul.mubr.msk.f32.vlgmr.msra.gmra.mrb[48].mxu0 %vm2636_vm3, %v3302_v56  ;;  %v21032_v56 = vld [vmem:[#allocation60_spill] sm:$0xff] }
 0x5de   : > { %14742 = vmatpush3.bf16.msra.mxu0 %v14739_v30  ;;  %v3131_v40 = vpop.xlane.xlu0 %3130  ;;  %v3309_v18 = vmul.f32 %v16034_v20, %v18017_v32  ;;  %v16036_v0 = vpop.eup %16035  ;;  %v21029_v30 = vld [vmem:[#allocation37_spill] sm:$0xff] }
 0x5df   : > { %16047 = vrcp.f32 %v3131_v40  ;;  %14744 = vmatprep.subr.bf16.mxu0 %v14743_v21  ;;  %v3134_v41 = vpop.xlane.xlu1 %3133  ;;  %v16038_v16 = vpop.eup %16037  ;;  %v15514_v5 = vunpack.i.h.bf16 %v21029_v30  ;;  %v15513_v32 = vunpack.i.l.bf16 %v21029_v30  ;;  %v3304_v62 = vmul.f32 %v16036_v0, %v18011_v51  ;;  %v21036_v0 = vld [vmem:[#allocation24_spill] sm:$0xff] }
 0x5e0   : > { %16049 = vrcp.f32 %v3134_v41  ;;  %13487 = vmatprep.mubr.msk.f32.mxu1 %vm2636_vm3, %v3309_v18  ;;  %v3312_v57 = vmul.f32 %v16038_v16, %v18019_v49  ;;  %v21037_v41 = vld [vmem:[#allocation28_spill] sm:$0xff] }
 0x5e1   : > { %v16040_v45 = vpop.eup %16039  ;;  %13488 = vmatmul.mubr.msk.f32.vlgmr.msra.gmra.mrb[64].mxu1 %vm2636_vm3, %v3310_v63  ;;  %v14751_v49 = vpack.c.bf16 %v15514_v5, %v15513_v32 }
 0x5e2   : > { %v16042_v59 = vpop.eup %16041  ;;  %14746 = vmatpush3.bf16.msra.mxu0 %v14743_v21  ;;  %14758 = vmatpush3.bf16.msra.mxu1 %v18255_v54  ;;  %v3311_v6 = vmul.f32 %v16040_v45, %v18027_v17  ;;  %v21030_v54 = vld [vmem:[#allocation39_spill] sm:$0xff] }
 0x5e3   : > { %14748 = vmatprep.subr.bf16.mxu0 %v14747_v47  ;;  %14760 = vmatprep.subr.bf16.mxu1 %v14759_v25  ;;  %v3116_v53 = vpop.xlane.xlu1 %3115  ;;  %v3113_v34 = vpop.xlane.xlu0 %3112  ;;  %v3303_v7 = vmul.f32 %v16042_v59, %v18021_v28  ;;  %v15524_v37 = vunpack.i.h.bf16 %v21030_v54  ;;  %v15523_v13 = vunpack.i.l.bf16 %v21030_v54 }
 0x5e4   : > { %16051 = vrcp.f32 %v3116_v53  ;;  %13490 = vmatprep.mubr.msk.f32.mxu1 %vm2636_vm3, %v3311_v6 }
 0x5e5   : > { %v16044_v52 = vpop.eup %16043  ;;  %16053 = vrcp.f32 %v3113_v34  ;;  %13462 = vmatprep.mubr.msk.f32.mxu0 %vm2636_vm3, %v3303_v7  ;;  %13491 = vmatmul.mubr.msk.f32.gmra.mrb[66].mxu1 %vm2636_vm3, %v3312_v57  ;;  %v14771_v15 = vpack.c.bf16 %v15524_v37, %v15523_v13  ;;  %v21038_v57 = vld [vmem:[#allocation41_spill] sm:$0xff] }
 0x5e6   : > { %v16046_v17 = vpop.eup %16045  ;;  %13463 = vmatmul.mubr.msk.f32.gmra.mrb[50].mxu0 %vm2636_vm3, %v3304_v62  ;;  %14762 = vmatpush3.bf16.msra.mxu1 %v14759_v25  ;;  %v3305_v28 = vmul.f32 %v16044_v52, %v18037_v9  ;;  %v15534_v62 = vunpack.i.h.bf16 %v21038_v57  ;;  %v15533_v52 = vunpack.i.l.bf16 %v21038_v57  ;;  %v4373_v57 = vld [vmem:[%s20781_s7] sm:$0xf] }
 0x5e7   : > { %14750 = vmatpush3.bf16.msra.mxu0 %v14747_v47  ;;  %v3140_v31 = vpop.xlane.xlu1 %3139  ;;  %v3137_v51 = vpop.xlane.xlu0 %3136  ;;  %v3306_v1 = vmul.f32 %v16046_v17, %v21031_v43 }
 0x5e8   : > { %14752 = vmatprep.subr.bf16.mxu0 %v14751_v49  ;;  %16055 = vrcp.f32 %v3140_v31  ;;  %13465 = vmatprep.mubr.msk.f32.mxu0 %vm2636_vm3, %v3305_v28  ;;  %v14775_v28 = vpack.c.bf16 %v15534_v62, %v15533_v52 }
 0x5e9   : > { %v16048_v60 = vpop.eup %16047  ;;  %16057 = vrcp.f32 %v3137_v51 }
 0x5ea   : > { %v16050_v58 = vpop.eup %16049  ;;  %13466 = vmatmul.mubr.msk.f32.gmra.mrb[52].mxu0 %vm2636_vm3, %v3306_v1  ;;  %v3313_v4 = vmul.f32 %v16048_v60, %v21032_v56 }
 0x5eb   : > { %14754 = vmatpush3.bf16.msra.mxu0 %v14751_v49  ;;  %v3314_v9 = vmul.f32 %v16050_v58, %v21033_v11 }
 0x5ec   : > { %14772 = vmatprep.subr.bf16.mxu0 %v14771_v15  ;;  %13493 = vmatprep.mubr.msk.f32.mxu1 %vm2636_vm3, %v3313_v4 }
 0x5ed   : > { %13494 = vmatmul.mubr.msk.f32.gmra.mrb[68].mxu1 %vm2636_vm3, %v3314_v9 }
 0x5ee   : > { %v16052_v55 = vpop.eup %16051 }
 0x5ef   : > { %v16054_v20 = vpop.eup %16053  ;;  %v3308_v14 = vmul.f32 %v16052_v55, %v21035_v22 }
 0x5f0   : > { %v3307_v48 = vmul.f32 %v16054_v20, %v21034_v38 }
 0x5f2   : > { %v16056_v21 = vpop.eup %16055  ;;  %13468 = vmatprep.mubr.msk.f32.mxu0 %vm2636_vm3, %v3307_v48 }
 0x5f3   : > { %v16058_v40 = vpop.eup %16057  ;;  %13469 = vmatmul.mubr.msk.f32.gmra.mrb[54].mxu0 %vm2636_vm3, %v3308_v14  ;;  %v3143_v18 = vpop.xlane.xlu0 %3142  ;;  %v3316_v16 = vmul.f32 %v16056_v21, %v21037_v41 }
 0x5f4   : > { %16059 = vrcp.f32 %v3143_v18  ;;  %v3315_v63 = vmul.f32 %v16058_v40, %v21036_v0 }
 0x5f6   : > { %13496 = vmatprep.mubr.msk.f32.mxu1 %vm2636_vm3, %v3315_v63 }
 0x5f7   : > { %13497 = vmatmul.mubr.msk.f32.gmra.mrb[70].mxu1 %vm2636_vm3, %v3316_v16  ;;  %v3167_v45 = vpop.xlane.xlu0 %3166 }
 0x5f8   : > { %16061 = vrcp.f32 %v3167_v45 }
 0x5fa   : > { %v3146_v47 = vpop.xlane.xlu1 %3145 }
 0x5fb   : > { %16063 = vrcp.f32 %v3146_v47  ;;  %v3149_v25 = vpop.xlane.xlu0 %3148 }
 0x5fc   : > { %16065 = vrcp.f32 %v3149_v25 }
 0x5fe   : > { %v16060_v59 = vpop.eup %16059  ;;  %v18321_v30 = vpop.xlane.xlu1 %3169 }
 0x5ff   : > { %v18323_v5 = vpop.xlane.xlu0 %3172  ;;  %v3317_v32 = vmul.f32 %v16060_v59, %v18099_v35 }
 0x601   : > { %13515 = vmatprep.mubr.msk.f32.mxu0 %vm2636_vm3, %v3317_v32 }
 0x602   : > { %v16062_v6 = vpop.eup %16061  ;;  %v3152_v53 = vpop.xlane.xlu1 %3151 }
 0x603   : > { %16067 = vrcp.f32 %v3152_v53  ;;  %v3155_v34 = vpop.xlane.xlu0 %3154  ;;  %v3325_v7 = vmul.f32 %v16062_v6, %v18109_v10 }
 0x604   : > { %16069 = vrcp.f32 %v3155_v34 }
 0x605   : > { %v16064_v17 = vpop.eup %16063  ;;  %13543 = vmatprep.mubr.msk.f32.mxu1 %vm2636_vm3, %v3325_v7 }
 0x606   : > { %v16066_v54 = vpop.eup %16065  ;;  %v3318_v37 = vmul.f32 %v16064_v17, %v18115_v36  ;;  %v3176_v35 = vpop.xlane.xlu1 %3175 }
 0x607   : > { %v3179_v13 = vpop.xlane.xlu0 %3178  ;;  %v3319_v49 = vmul.f32 %v16066_v54, %v18117_v29 }
 0x608   : > { %13516 = vmatmul.mubr.msk.f32.vlgmr.msra.gmra.mrb[56].mxu0 %vm2636_vm3, %v3318_v37 }
 0x609   : > { %14774 = vmatpush3.bf16.msra.mxu0 %v14771_v15  ;;  %13518 = vmatprep.mubr.msk.f32.mxu0 %vm2636_vm3, %v3319_v49 }
 0x60a   : > { %14776 = vmatprep.subr.bf16.mxu0 %v14775_v28  ;;  %v3158_v10 = vpop.xlane.xlu1 %3157 }
 0x60b   : > { %16071 = vrcp.f32 %v3158_v10  ;;  %v3161_v31 = vpop.xlane.xlu0 %3160 }
 0x60c   : > { %16073 = vrcp.f32 %v3161_v31 }
 0x60d   : > { %v16068_v51 = vpop.eup %16067  ;;  %14778 = vmatpush3.bf16.msra.mxu0 %v14775_v28 }
 0x60e   : > { %v16070_v43 = vpop.eup %16069  ;;  %v3182_v1 = vpop.xlane.xlu1 %3181  ;;  %v3320_v36 = vmul.f32 %v16068_v51, %v18135_v26  ;;  %v4374_v51 = vld [vmem:[%s20781_s7 + $0x4] sm:$0xf] }
 0x60f   : > { %v3185_v60 = vpop.xlane.xlu0 %3184  ;;  %v3321_v29 = vmul.f32 %v16070_v43, %v18137_v39 }
 0x610   : > { %13519 = vmatmul.mubr.msk.f32.gmra.mrb[58].mxu0 %vm2636_vm3, %v3320_v36 }
 0x611   : > { %13521 = vmatprep.mubr.msk.f32.mxu0 %vm2636_vm3, %v3321_v29 }
 0x612   : > { %v3164_v58 = vpop.xlane.xlu1 %3163 }
 0x613   : > { %16075 = vrcp.f32 %v3164_v58  ;;  %v3191_v15 = vpop.xlane.xlu0 %3190 }
 0x614   : > { %16077 = vrcp.f32 %v3191_v15 }
 0x615   : > { %v16072_v56 = vpop.eup %16071  ;;  %16079 = vrcp.f32 %v18321_v30 }
 0x616   : > { %v16074_v4 = vpop.eup %16073  ;;  %v3188_v11 = vpop.xlane.xlu1 %3187  ;;  %v3322_v9 = vmul.f32 %v16072_v56, %v18155_v46  ;;  %16081 = vrcp.f32 %v18323_v5 }
 0x617   : > { %v3197_v55 = vpop.xlane.xlu0 %3196  ;;  %v3323_v20 = vmul.f32 %v16074_v4, %v18157_v19  ;;  %16083 = vrcp.f32 %v3176_v35 }
 0x618   : > { %13522 = vmatmul.mubr.msk.f32.gmra.mrb[60].mxu0 %vm2636_vm3, %v3322_v9  ;;  %16085 = vrcp.f32 %v3179_v13 }
 0x619   : > { %13524 = vmatprep.mubr.msk.f32.mxu0 %vm2636_vm3, %v3323_v20 }
 0x61a   : > { %v3194_v26 = vpop.xlane.xlu1 %3193 }
 0x61b   : > { %v3203_v39 = vpop.xlane.xlu0 %3202  ;;  %16087 = vrcp.f32 %v3194_v26 }
 0x61c   : > { %16089 = vrcp.f32 %v3197_v55 }
 0x61d   : > { %v16076_v38 = vpop.eup %16075  ;;  %16091 = vrcp.f32 %v3182_v1 }
 0x61e   : > { %v16078_v48 = vpop.eup %16077  ;;  %v3200_v22 = vpop.xlane.xlu1 %3199  ;;  %v3324_v14 = vmul.f32 %v16076_v38, %v18175_v42  ;;  %16093 = vrcp.f32 %v3185_v60 }
 0x61f   : > { %v3209_v21 = vpop.xlane.xlu0 %3208  ;;  %v3333_v40 = vmul.f32 %v16078_v48, %v18177_v8  ;;  %16095 = vrcp.f32 %v3200_v22  ;;  %v16080_v53 = vpop.eup %16079  ;;  %v21041_v22 = vld [vmem:[#allocation50_spill] sm:$0xff] }
 0x620   : > { %13525 = vmatmul.mubr.msk.f32.gmra.mrb[62].mxu0 %vm2636_vm3, %v3324_v14  ;;  %16097 = vrcp.f32 %v3203_v39  ;;  %v16082_v62 = vpop.eup %16081  ;;  %v3326_v35 = vmul.f32 %v16080_v53, %v18125_v12  ;;  %v4375_v12 = vld [vmem:[%s20781_s7 + $0x8] sm:$0xf]  ;;  %v21040_v39 = vld [vmem:[#allocation32_spill] sm:$0xff] }
 0x621   : > { %13571 = vmatprep.mubr.msk.f32.mxu0 %vm2636_vm3, %v3333_v40  ;;  %16099 = vrcp.f32 %v3188_v11  ;;  %v16084_v54 = vpop.eup %16083  ;;  %v3327_v31 = vmul.f32 %v16082_v62, %v18127_v3 }
 0x622   : > { %v3206_v46 = vpop.xlane.xlu1 %3205  ;;  %v16086_v37 = vpop.eup %16085  ;;  %v3328_v60 = vmul.f32 %v16084_v54, %v18145_v44  ;;  %v4376_v44 = vld [vmem:[%s20781_s7 + $0xc] sm:$0xf] }
 0x623   : > { %v15537_v19 = vpop.permute.xlu0 %15536  ;;  %16101 = vrcp.f32 %v3206_v46  ;;  %v3329_v15 = vmul.f32 %v16086_v37, %v18147_v33 }
 0x624   : > { %v15539_v18 = vunpack.i.h.bf16 %v15537_v19  ;;  %v15538_v0 = vunpack.i.l.bf16 %v15537_v19  ;;  %16103 = vrcp.f32 %v3209_v21  ;;  %v4377_v21 = vld [vmem:[%s20781_s7 + $0x10] sm:$0xf]  ;;  %v4379_v19 = vld [vmem:[%s20781_s7 + $0x18] sm:$0xf] }
 0x625   : > { %v18347_v63 = vpop.f32.mrb[48].mxu1  ;;  %v16088_v28 = vpop.eup %16087 }
 0x626   : > { %v18349_v41 = vpop.f32.mrb[49].mxu1  ;;  %v3212_v16 = vpop.xlane.xlu1 %3211  ;;  %v14763_v45 = vpack.c.bf16 %v15539_v18, %v15538_v0  ;;  %v3334_v3 = vmul.f32 %v16088_v28, %v18193_v50 }
 0x627   : > { %v16090_v43 = vpop.eup %16089  ;;  %16105 = vrcp.f32 %v3212_v16 }
 0x628   : > { %14764 = vmatprep.subr.bf16.mxu1 %v14763_v45  ;;  %v16092_v1 = vpop.eup %16091  ;;  %v3335_v56 = vmul.f32 %v16090_v43, %v18186_v27 }
 0x629   : > { %14766 = vmatpush3.bf16.msra.mxu1 %v14763_v45  ;;  %v16094_v36 = vpop.eup %16093  ;;  %v3330_v33 = vmul.f32 %v16092_v1, %v18165_v2  ;;  %v21039_v2 = vld [vmem:[#allocation30_spill] sm:$0xff] }
 0x62a   : > { %v15542_v42 = vpop.permute.xlu1 %15541  ;;  %v16096_v29 = vpop.eup %16095  ;;  %v3331_v55 = vmul.f32 %v16094_v36, %v18167_v61 }
 0x62b   : > { %v15544_v8 = vunpack.i.h.bf16 %v15542_v42  ;;  %v15543_v47 = vunpack.i.l.bf16 %v15542_v42  ;;  %v16098_v4 = vpop.eup %16097  ;;  %v3336_v27 = vmul.f32 %v16096_v29, %v18201_v23 }
 0x62c   : > { %v16100_v50 = vpop.eup %16099  ;;  %v3337_v20 = vmul.f32 %v16098_v4, %v18195_v24  ;;  %v21042_v24 = vld [vmem:[#allocation46_spill] sm:$0xff] }
 0x62d   : > { %v14779_v25 = vpack.c.bf16 %v15544_v8, %v15543_v47  ;;  %v16102_v9 = vpop.eup %16101  ;;  %v3332_v23 = vmul.f32 %v16100_v50, %v21039_v2 }
 0x62e   : > { %v15547_v59 = vpop.permute.xlu1 %15546  ;;  %v16104_v26 = vpop.eup %16103  ;;  %v3338_v38 = vmul.f32 %v16102_v9, %v21040_v39 }
 0x62f   : > { %v15549_v32 = vunpack.i.h.bf16 %v15547_v59  ;;  %v15548_v6 = vunpack.i.l.bf16 %v15547_v59  ;;  %14780 = vmatprep.subr.bf16.mxu0 %v14779_v25  ;;  %v3339_v61 = vmul.f32 %v16104_v26, %v21041_v22 }
 0x630   : > { %14782 = vmatpush3.bf16.msra.mxu0 %v14779_v25 }
 0x631   : > { %v18353_v30 = vpop.f32.mrb[50].mxu1  ;;  %v14767_v5 = vpack.c.bf16 %v15549_v32, %v15548_v6  ;;  %v16106_v48 = vpop.eup %16105 }
 0x632   : > { %v18355_v34 = vpop.f32.mrb[51].mxu1  ;;  %v15552_v7 = vpop.permute.xlu1 %15551  ;;  %v3340_v14 = vmul.f32 %v16106_v48, %v21042_v24 }
 0x633   : > { %v15554_v52 = vunpack.i.h.bf16 %v15552_v7  ;;  %v15553_v17 = vunpack.i.l.bf16 %v15552_v7  ;;  %14768 = vmatprep.subr.bf16.mxu1 %v14767_v5  ;;  %v4380_v7 = vld [vmem:[%s20781_s7 + $0x1c] sm:$0xf] }
 0x634   : > { %14770 = vmatpush3.bf16.msra.mxu1 %v14767_v5 }
 0x635   : > { %v13383_v13 = vpop.f32.mrb[52].mxu1  ;;  %v14783_v49 = vpack.c.bf16 %v15554_v52, %v15553_v17  ;;  %13583 = vmatprep.subr.msk.mxu1 %vm4405_vm4, %v4373_v57 }
 0x636   : > { %v3451_v10 = vpop.f32.mrb[53].mxu1 }
 0x637   : > { %13544 = vmatmul.mubr.msk.f32.vlgmr.msra.gmra.mrb[72].mxu1 %vm2636_vm3, %v3326_v35  ;;  %14784 = vmatprep.subr.bf16.mxu0 %v14783_v49 }
 0x638   : > { %13546 = vmatprep.mubr.msk.f32.mxu1 %vm2636_vm3, %v3327_v31  ;;  %14786 = vmatpush3.bf16.msra.mxu0 %v14783_v49 }
 0x639   : > { %13584 = vmatpush3.msk.msra.mxu1 %vm4405_vm4, %v4373_v57  ;;  %13597 = vmatprep.subr.msk.mxu0 %vm4405_vm4, %v4374_v51 }
 0x63a   : > { %v13386_v58 = vpop.f32.mrb[54].mxu1  ;;  %13611 = vmatprep.subr.msk.mxu1 %vm4405_vm4, %v4375_v12 }
 0x63b   : > { %v3461_v11 = vpop.f32.mrb[55].mxu1  ;;  %13547 = vmatmul.mubr.msk.f32.gmra.mrb[74].mxu1 %vm2636_vm3, %v3328_v60  ;;  %13572 = vmatmul.mubr.msk.f32.vlgmr.msra.gmra.mrb[64].mxu0 %vm2636_vm3, %v3334_v3 }
 0x63c   : > { %13549 = vmatprep.mubr.msk.f32.mxu1 %vm2636_vm3, %v3329_v15  ;;  %13574 = vmatprep.mubr.msk.f32.mxu0 %vm2636_vm3, %v3335_v56 }
 0x63d   : > { %13598 = vmatpush3.msk.msra.mxu0 %vm4405_vm4, %v4374_v51 }
 0x63e   : > { %13625 = vmatprep.subr.msk.mxu0 %vm4405_vm4, %v4376_v44 }
 0x63f   : > { %13550 = vmatmul.mubr.msk.f32.gmra.mrb[76].mxu1 %vm2636_vm3, %v3330_v33  ;;  %13575 = vmatmul.mubr.msk.f32.gmra.mrb[66].mxu0 %vm2636_vm3, %v3336_v27 }
 0x640   : > { %13552 = vmatprep.mubr.msk.f32.mxu1 %vm2636_vm3, %v3331_v55  ;;  %13577 = vmatprep.mubr.msk.f32.mxu0 %vm2636_vm3, %v3337_v20 }
 0x643   : > { %13553 = vmatmul.mubr.msk.f32.gmra.mrb[78].mxu1 %vm2636_vm3, %v3332_v23  ;;  %13578 = vmatmul.mubr.msk.f32.gmra.mrb[68].mxu0 %vm2636_vm3, %v3338_v38 }
 0x644   : > { %13580 = vmatprep.mubr.msk.f32.mxu0 %vm2636_vm3, %v3339_v61  ;;  %13585 = vmatprep.mubr.msk.f32.mxu1 %vm1475_vm1, %v18349_v41 }
 0x647   : > { %13581 = vmatmul.mubr.msk.f32.gmra.mrb[70].mxu0 %vm2636_vm3, %v3340_v14  ;;  %13586 = vmatmul.mubr.msk.f32.vlgmr.msra.gmra.mrb[80].mxu1 %vm1475_vm1, %v18347_v63  ;;  %v4378_v63 = vld [vmem:[%s20781_s7 + $0x14] sm:$0xf] }
 0x648   : > { %13588 = vmatprep.mubr.msk.f32.mxu1 %vm1475_vm1, %v18355_v34  ;;  %13612 = vmatpush3.msk.msra.mxu1 %vm4405_vm4, %v4375_v12 }
 0x649   : > { %13639 = vmatprep.subr.msk.mxu1 %vm4405_vm4, %v4377_v21 }
 0x64b   : > { %13589 = vmatmul.mubr.msk.f32.gmra.mrb[82].mxu1 %vm1475_vm1, %v18353_v30 }
 0x64c   : > { %13591 = vmatprep.mubr.msk.f32.mxu1 %vm1475_vm1, %v3451_v10 }
 0x64f   : > { %13592 = vmatmul.mubr.msk.f32.gmra.mrb[84].mxu1 %vm1475_vm1, %v13383_v13 }
 0x650   : > { %13594 = vmatprep.mubr.msk.f32.mxu1 %vm1475_vm1, %v3461_v11 }
 0x653   : > { %13595 = vmatmul.mubr.msk.f32.gmra.mrb[86].mxu1 %vm1475_vm1, %v13386_v58 }
 0x689   : > { %v13433_v40 = vpop.f32.mrb[56].mxu1 }
 0x68a   : > { %v3689_v46 = vpop.f32.mrb[57].mxu1 }
 0x68b   : > { %13613 = vmatprep.mubr.msk.f32.mxu1 %vm1475_vm1, %v3689_v46 }
 0x68c   : > { %v13405_v18 = vpop.f32.mrb[40].mxu0  ;;  %13614 = vmatmul.mubr.msk.f32.vlgmr.msra.gmra.mrb[88].mxu1 %vm1475_vm1, %v13433_v40 }
 0x68d   : > { %v3560_v0 = vpop.f32.mrb[41].mxu0  ;;  %13640 = vmatpush3.msk.msra.mxu1 %vm4405_vm4, %v4377_v21 }
 0x68e   : > { %13599 = vmatprep.mubr.msk.f32.mxu0 %vm1475_vm1, %v3560_v0  ;;  %13667 = vmatprep.subr.msk.mxu1 %vm4405_vm4, %v4379_v19 }
 0x68f   : > { %13600 = vmatmul.mubr.msk.f32.vlgmr.msra.gmra.mrb[72].mxu0 %vm1475_vm1, %v13405_v18 }
 0x690   : > { %13626 = vmatpush3.msk.msra.mxu0 %vm4405_vm4, %v4376_v44 }
 0x691   : > { %13653 = vmatprep.subr.msk.mxu0 %vm4405_vm4, %v4378_v63 }
 0x694   : > { %v13436_v41 = vpop.f32.mrb[58].mxu1 }
 0x695   : > { %v3699_v16 = vpop.f32.mrb[59].mxu1 }
 0x696   : > { %13616 = vmatprep.mubr.msk.f32.mxu1 %vm1475_vm1, %v3699_v16 }
 0x697   : > { %13617 = vmatmul.mubr.msk.f32.gmra.mrb[90].mxu1 %vm1475_vm1, %v13436_v41 }
 0x699   : > { %v13408_v45 = vpop.f32.mrb[42].mxu0 }
 0x69a   : > { %v3570_v42 = vpop.f32.mrb[43].mxu0 }
 0x69b   : > { %13602 = vmatprep.mubr.msk.f32.mxu0 %vm1475_vm1, %v3570_v42 }
 0x69c   : > { %13603 = vmatmul.mubr.msk.f32.gmra.mrb[74].mxu0 %vm1475_vm1, %v13408_v45  ;;  %v13439_v8 = vpop.f32.mrb[60].mxu1 }
 0x69d   : > { %v3709_v47 = vpop.f32.mrb[61].mxu1 }
 0x69e   : > { %13619 = vmatprep.mubr.msk.f32.mxu1 %vm1475_vm1, %v3709_v47 }
 0x69f   : > { %13620 = vmatmul.mubr.msk.f32.gmra.mrb[92].mxu1 %vm1475_vm1, %v13439_v8 }
 0x6a1   : > { %v13411_v25 = vpop.f32.mrb[44].mxu0 }
 0x6a2   : > { %v3580_v59 = vpop.f32.mrb[45].mxu0 }
 0x6a3   : > { %13605 = vmatprep.mubr.msk.f32.mxu0 %vm1475_vm1, %v3580_v59 }
 0x6a4   : > { %13606 = vmatmul.mubr.msk.f32.gmra.mrb[76].mxu0 %vm1475_vm1, %v13411_v25 }
 0x6a5   : > { %v13414_v32 = vpop.f32.mrb[46].mxu0 }
 0x6a6   : > { %v3590_v6 = vpop.f32.mrb[47].mxu0 }
 0x6a7   : > { %13608 = vmatprep.mubr.msk.f32.mxu0 %vm1475_vm1, %v3590_v6 }
 0x6a8   : > { %13609 = vmatmul.mubr.msk.f32.gmra.mrb[78].mxu0 %vm1475_vm1, %v13414_v32  ;;  %v13442_v30 = vpop.f32.mrb[62].mxu1 }
 0x6a9   : > { %v3719_v5 = vpop.f32.mrb[63].mxu1 }
 0x6aa   : > { %13622 = vmatprep.mubr.msk.f32.mxu1 %vm1475_vm1, %v3719_v5 }
 0x6ab   : > { %13623 = vmatmul.mubr.msk.f32.gmra.mrb[94].mxu1 %vm1475_vm1, %v13442_v30 }
 0x6b0   : > { %v13461_v53 = vpop.f32.mrb[48].mxu0 }
 0x6b1   : > { %v3818_v34 = vpop.f32.mrb[49].mxu0 }
 0x6b2   : > { %13627 = vmatprep.mubr.msk.f32.mxu0 %vm1475_vm1, %v3818_v34 }
 0x6b3   : > { %13628 = vmatmul.mubr.msk.f32.vlgmr.msra.gmra.mrb[80].mxu0 %vm1475_vm1, %v13461_v53 }
 0x6b4   : > { %v13489_v57 = vpop.f32.mrb[64].mxu1  ;;  %13654 = vmatpush3.msk.msra.mxu0 %vm4405_vm4, %v4378_v63 }
 0x6b5   : > { %v3947_v62 = vpop.f32.mrb[65].mxu1  ;;  %13681 = vmatprep.subr.msk.mxu0 %vm4405_vm4, %v4380_v7 }
 0x6b6   : > { %13641 = vmatprep.mubr.msk.f32.mxu1 %vm1475_vm1, %v3947_v62 }
 0x6b7   : > { %13642 = vmatmul.mubr.msk.f32.vlgmr.msra.gmra.mrb[96].mxu1 %vm1475_vm1, %v13489_v57 }
 0x6b8   : > { %v13492_v52 = vpop.f32.mrb[66].mxu1  ;;  %13668 = vmatpush3.msk.msra.mxu1 %vm4405_vm4, %v4379_v19 }
 0x6b9   : > { %v13464_v17 = vpop.f32.mrb[50].mxu0  ;;  %v3957_v54 = vpop.f32.mrb[67].mxu1 }
 0x6ba   : > { %v3828_v37 = vpop.f32.mrb[51].mxu0  ;;  %13644 = vmatprep.mubr.msk.f32.mxu1 %vm1475_vm1, %v3957_v54 }
 0x6bb   : > { %13630 = vmatprep.mubr.msk.f32.mxu0 %vm1475_vm1, %v3828_v37  ;;  %13645 = vmatmul.mubr.msk.f32.gmra.mrb[98].mxu1 %vm1475_vm1, %v13492_v52 }
 0x6bc   : > { %13631 = vmatmul.mubr.msk.f32.gmra.mrb[82].mxu0 %vm1475_vm1, %v13464_v17 }
 0x6bd   : > { %v13467_v35 = vpop.f32.mrb[52].mxu0 }
 0x6be   : > { %v3838_v13 = vpop.f32.mrb[53].mxu0 }
 0x6bf   : > { %13633 = vmatprep.mubr.msk.f32.mxu0 %vm1475_vm1, %v3838_v13 }
 0x6c0   : > { %13634 = vmatmul.mubr.msk.f32.gmra.mrb[84].mxu0 %vm1475_vm1, %v13467_v35  ;;  %v13495_v49 = vpop.f32.mrb[68].mxu1 }
 0x6c1   : > { %v3967_v28 = vpop.f32.mrb[69].mxu1 }
 0x6c2   : > { %13647 = vmatprep.mubr.msk.f32.mxu1 %vm1475_vm1, %v3967_v28 }
 0x6c3   : > { %13648 = vmatmul.mubr.msk.f32.gmra.mrb[100].mxu1 %vm1475_vm1, %v13495_v49 }
 0x6c6   : > { %v13470_v10 = vpop.f32.mrb[54].mxu0 }
 0x6c7   : > { %v3848_v31 = vpop.f32.mrb[55].mxu0 }
 0x6c8   : > { %13636 = vmatprep.mubr.msk.f32.mxu0 %vm1475_vm1, %v3848_v31 }
 0x6c9   : > { %13637 = vmatmul.mubr.msk.f32.gmra.mrb[86].mxu0 %vm1475_vm1, %v13470_v10 }
 0x6ca   : > { %v13498_v51 = vpop.f32.mrb[70].mxu1 }
 0x6cb   : > { %v3977_v43 = vpop.f32.mrb[71].mxu1 }
 0x6cc   : > { %13650 = vmatprep.mubr.msk.f32.mxu1 %vm1475_vm1, %v3977_v43 }
 0x6cd   : > { %13651 = vmatmul.mubr.msk.f32.gmra.mrb[102].mxu1 %vm1475_vm1, %v13498_v51 }
 0x6db   : > { %v13517_v12 = vpop.f32.mrb[56].mxu0 }
 0x6dc   : > { %v4076_v1 = vpop.f32.mrb[57].mxu0 }
 0x6dd   : > { %13655 = vmatprep.mubr.msk.f32.mxu0 %vm1475_vm1, %v4076_v1 }
 0x6de   : > { %13656 = vmatmul.mubr.msk.f32.vlgmr.msra.gmra.mrb[88].mxu0 %vm1475_vm1, %v13517_v12 }
 0x6df   : > { %13682 = vmatpush3.msk.msra.mxu0 %vm4405_vm4, %v4380_v7 }
 0x6e3   : > { %v13520_v36 = vpop.f32.mrb[58].mxu0 }
 0x6e4   : > { %v4086_v3 = vpop.f32.mrb[59].mxu0 }
 0x6e5   : > { %13658 = vmatprep.mubr.msk.f32.mxu0 %vm1475_vm1, %v4086_v3 }
 0x6e6   : > { %13659 = vmatmul.mubr.msk.f32.gmra.mrb[90].mxu0 %vm1475_vm1, %v13520_v36 }
 0x6eb   : > { %v13523_v60 = vpop.f32.mrb[60].mxu0 }
 0x6ec   : > { %v4096_v29 = vpop.f32.mrb[61].mxu0 }
 0x6ed   : > { %13661 = vmatprep.mubr.msk.f32.mxu0 %vm1475_vm1, %v4096_v29 }
 0x6ee   : > { %13662 = vmatmul.mubr.msk.f32.gmra.mrb[92].mxu0 %vm1475_vm1, %v13523_v60 }
 0x6f3   : > { %v13526_v58 = vpop.f32.mrb[62].mxu0 }
 0x6f4   : > { %v4106_v15 = vpop.f32.mrb[63].mxu0 }
 0x6f5   : > { %13664 = vmatprep.mubr.msk.f32.mxu0 %vm1475_vm1, %v4106_v15 }
 0x6f6   : > { %13665 = vmatmul.mubr.msk.f32.gmra.mrb[94].mxu0 %vm1475_vm1, %v13526_v58 }
 0x70a   : > { %v13545_v56 = vpop.f32.mrb[72].mxu1 }
 0x70b   : > { %v4205_v4 = vpop.f32.mrb[73].mxu1 }
 0x70c   : > { %13669 = vmatprep.mubr.msk.f32.mxu1 %vm1475_vm1, %v4205_v4 }
 0x70d   : > { %13670 = vmatmul.mubr.msk.f32.vlgmr.msra.gmra.mrb[104].mxu1 %vm1475_vm1, %v13545_v56 }
 0x70e   : > { %v13548_v11 = vpop.f32.mrb[74].mxu1  ;;  %v13573_v44 = vpop.f32.mrb[64].mxu0 }
 0x70f   : > { %v4215_v50 = vpop.f32.mrb[75].mxu1  ;;  %v4334_v33 = vpop.f32.mrb[65].mxu0 }
 0x710   : > { %13672 = vmatprep.mubr.msk.f32.mxu1 %vm1475_vm1, %v4215_v50  ;;  %13683 = vmatprep.mubr.msk.f32.mxu0 %vm1475_vm1, %v4334_v33 }
 0x711   : > { %13673 = vmatmul.mubr.msk.f32.gmra.mrb[106].mxu1 %vm1475_vm1, %v13548_v11  ;;  %13684 = vmatmul.mubr.msk.f32.vlgmr.msra.gmra.mrb[96].mxu0 %vm1475_vm1, %v13573_v44 }
 0x712   : > { %v13551_v27 = vpop.f32.mrb[76].mxu1  ;;  %v13576_v9 = vpop.f32.mrb[66].mxu0 }
 0x713   : > { %v4225_v55 = vpop.f32.mrb[77].mxu1  ;;  %v4344_v20 = vpop.f32.mrb[67].mxu0 }
 0x714   : > { %13675 = vmatprep.mubr.msk.f32.mxu1 %vm1475_vm1, %v4225_v55  ;;  %13686 = vmatprep.mubr.msk.f32.mxu0 %vm1475_vm1, %v4344_v20 }
 0x715   : > { %13676 = vmatmul.mubr.msk.f32.gmra.mrb[108].mxu1 %vm1475_vm1, %v13551_v27  ;;  %13687 = vmatmul.mubr.msk.f32.gmra.mrb[98].mxu0 %vm1475_vm1, %v13576_v9 }
 0x716   : > { %v13554_v26 = vpop.f32.mrb[78].mxu1  ;;  %v13579_v2 = vpop.f32.mrb[68].mxu0 }
 0x717   : > { %v4235_v23 = vpop.f32.mrb[79].mxu1  ;;  %v4354_v39 = vpop.f32.mrb[69].mxu0 }
 0x718   : > { %13678 = vmatprep.mubr.msk.f32.mxu1 %vm1475_vm1, %v4235_v23  ;;  %13689 = vmatprep.mubr.msk.f32.mxu0 %vm1475_vm1, %v4354_v39 }
 0x719   : > { %13679 = vmatmul.mubr.msk.f32.gmra.mrb[110].mxu1 %vm1475_vm1, %v13554_v26  ;;  %13690 = vmatmul.mubr.msk.f32.gmra.mrb[100].mxu0 %vm1475_vm1, %v13579_v2 }
 0x71a   : > { %v13582_v38 = vpop.f32.mrb[70].mxu0  ;;  %v13587_v48 = vpop.f32.mrb[80].mxu1 }
 0x71b   : > { %v4364_v22 = vpop.f32.mrb[71].mxu0  ;;  %v4475_v61 = vpop.f32.mrb[81].mxu1  ;;  %v5453_v41 = vsel %vm574_vm0, %v13587_v48, 0.0 }
 0x71c   : > { %13692 = vmatprep.mubr.msk.f32.mxu0 %vm1475_vm1, %v4364_v22  ;;  %v5438_v42 = vsel %vm574_vm0, %v4475_v61, 0.0 }
 0x71d   : > { %13693 = vmatmul.mubr.msk.f32.gmra.mrb[102].mxu0 %vm1475_vm1, %v13582_v38 }
 0x71e   : > { %v13590_v24 = vpop.f32.mrb[82].mxu1 }
 0x71f   : > { %v4485_v14 = vpop.f32.mrb[83].mxu1  ;;  %v5483_v7 = vsel %vm574_vm0, %v13590_v24, 0.0 }
 0x720   : > { %v5468_v52 = vsel %vm574_vm0, %v4485_v14, 0.0 }
 0x722   : > { %v13593_v21 = vpop.f32.mrb[84].mxu1 }
 0x723   : > { %v4495_v40 = vpop.f32.mrb[85].mxu1  ;;  %v5513_v43 = vsel %vm574_vm0, %v13593_v21, 0.0 }
 0x724   : > { %v5498_v36 = vsel %vm574_vm0, %v4495_v40, 0.0 }
 0x726   : > { %v13596_v46 = vpop.f32.mrb[86].mxu1 }
 0x727   : > { %v4505_v19 = vpop.f32.mrb[87].mxu1  ;;  %v5543_v11 = vsel %vm574_vm0, %v13596_v46, 0.0 }
 0x728   : > { %v5528_v27 = vsel %vm574_vm0, %v4505_v19, 0.0 }
 0x75f   : > { %v13615_v18 = vpop.f32.mrb[88].mxu1 }
 0x760   : > { %v4739_v0 = vpop.f32.mrb[89].mxu1  ;;  %v5456_v25 = vsel %vm574_vm0, %v13615_v18, 0.0 }
 0x761   : > { %v5441_v32 = vsel %vm574_vm0, %v4739_v0, 0.0 }
 0x762   : > { %v13601_v63 = vpop.f32.mrb[72].mxu0 }
 0x763   : > { %v5454_v16 = vsel %vm574_vm0, %v13601_v63, 0.0  ;;  %v4607_v45 = vpop.f32.mrb[73].mxu0 }
 0x764   : > { %v5455_v8 = vadd.f32 %v5454_v16, %v5453_v41  ;;  %v5439_v47 = vsel %vm574_vm0, %v4607_v45, 0.0 }
 0x765   : > { %v5440_v59 = vadd.f32 %v5439_v47, %v5438_v42 }
 0x766   : > { %v5457_v6 = vadd.f32 %v5456_v25, %v5455_v8 }
 0x767   : > { %v5442_v30 = vadd.f32 %v5441_v32, %v5440_v59 }
 0x76a   : > { %v13618_v5 = vpop.f32.mrb[90].mxu1 }
 0x76b   : > { %v4749_v53 = vpop.f32.mrb[91].mxu1  ;;  %v5486_v37 = vsel %vm574_vm0, %v13618_v5, 0.0 }
 0x76c   : > { %v5471_v49 = vsel %vm574_vm0, %v4749_v53, 0.0 }
 0x76f   : > { %v13604_v34 = vpop.f32.mrb[74].mxu0 }
 0x770   : > { %v5484_v57 = vsel %vm574_vm0, %v13604_v34, 0.0  ;;  %v4617_v62 = vpop.f32.mrb[75].mxu0 }
 0x771   : > { %v5485_v17 = vadd.f32 %v5484_v57, %v5483_v7  ;;  %v5469_v54 = vsel %vm574_vm0, %v4617_v62, 0.0 }
 0x772   : > { %v5470_v35 = vadd.f32 %v5469_v54, %v5468_v52  ;;  %v13621_v13 = vpop.f32.mrb[92].mxu1 }
 0x773   : > { %v4759_v28 = vpop.f32.mrb[93].mxu1  ;;  %v5487_v10 = vadd.f32 %v5486_v37, %v5485_v17  ;;  %v5516_v29 = vsel %vm574_vm0, %v13621_v13, 0.0 }
 0x774   : > { %v5472_v31 = vadd.f32 %v5471_v49, %v5470_v35  ;;  %v5501_v15 = vsel %vm574_vm0, %v4759_v28, 0.0 }
 0x777   : > { %v13607_v51 = vpop.f32.mrb[76].mxu0 }
 0x778   : > { %v5514_v12 = vsel %vm574_vm0, %v13607_v51, 0.0  ;;  %v4627_v1 = vpop.f32.mrb[77].mxu0 }
 0x779   : > { %v5515_v3 = vadd.f32 %v5514_v12, %v5513_v43  ;;  %v5499_v60 = vsel %vm574_vm0, %v4627_v1, 0.0 }
 0x77a   : > { %v5500_v58 = vadd.f32 %v5499_v60, %v5498_v36 }
 0x77b   : > { %v13610_v56 = vpop.f32.mrb[78].mxu0  ;;  %v5517_v4 = vadd.f32 %v5516_v29, %v5515_v3 }
 0x77c   : > { %v5544_v44 = vsel %vm574_vm0, %v13610_v56, 0.0  ;;  %v4637_v50 = vpop.f32.mrb[79].mxu0  ;;  %v5502_v33 = vadd.f32 %v5501_v15, %v5500_v58 }
 0x77d   : > { %v5545_v9 = vadd.f32 %v5544_v44, %v5543_v11  ;;  %v5529_v55 = vsel %vm574_vm0, %v4637_v50, 0.0 }
 0x77e   : > { %v5530_v20 = vadd.f32 %v5529_v55, %v5528_v27  ;;  %v13624_v26 = vpop.f32.mrb[94].mxu1 }
 0x77f   : > { %v5546_v2 = vsel %vm574_vm0, %v13624_v26, 0.0  ;;  %v4769_v23 = vpop.f32.mrb[95].mxu1 }
 0x780   : > { %v5547_v39 = vadd.f32 %v5546_v2, %v5545_v9  ;;  %v5531_v38 = vsel %vm574_vm0, %v4769_v23, 0.0 }
 0x781   : > { %v5532_v48 = vadd.f32 %v5531_v38, %v5530_v20 }
 0x786   : > { %v13629_v22 = vpop.f32.mrb[80].mxu0 }
 0x787   : > { %v5458_v61 = vsel %vm574_vm0, %v13629_v22, 0.0  ;;  %v4871_v24 = vpop.f32.mrb[81].mxu0 }
 0x788   : > { %v5459_v14 = vadd.f32 %v5458_v61, %v5457_v6  ;;  %v5443_v21 = vsel %vm574_vm0, %v4871_v24, 0.0 }
 0x789   : > { %v5444_v40 = vadd.f32 %v5443_v21, %v5442_v30 }
 0x78a   : > { %v13643_v46 = vpop.f32.mrb[96].mxu1 }
 0x78b   : > { %v5460_v19 = vsel %vm574_vm0, %v13643_v46, 0.0  ;;  %v5003_v18 = vpop.f32.mrb[97].mxu1 }
 0x78c   : > { %v5461_v0 = vadd.f32 %v5460_v19, %v5459_v14  ;;  %v5445_v63 = vsel %vm574_vm0, %v5003_v18, 0.0 }
 0x78d   : > { %v5446_v41 = vadd.f32 %v5445_v63, %v5444_v40 }
 0x78e   : > { %v13646_v16 = vpop.f32.mrb[98].mxu1 }
 0x78f   : > { %v13632_v45 = vpop.f32.mrb[82].mxu0  ;;  %v5013_v42 = vpop.f32.mrb[99].mxu1  ;;  %v5490_v32 = vsel %vm574_vm0, %v13646_v16, 0.0 }
 0x790   : > { %v5488_v8 = vsel %vm574_vm0, %v13632_v45, 0.0  ;;  %v4881_v47 = vpop.f32.mrb[83].mxu0  ;;  %v5475_v5 = vsel %vm574_vm0, %v5013_v42, 0.0 }
 0x791   : > { %v5489_v25 = vadd.f32 %v5488_v8, %v5487_v10  ;;  %v5473_v59 = vsel %vm574_vm0, %v4881_v47, 0.0 }
 0x792   : > { %v5474_v6 = vadd.f32 %v5473_v59, %v5472_v31 }
 0x793   : > { %v5491_v30 = vadd.f32 %v5490_v32, %v5489_v25  ;;  %v13635_v53 = vpop.f32.mrb[84].mxu0 }
 0x794   : > { %v5476_v34 = vadd.f32 %v5475_v5, %v5474_v6  ;;  %v5518_v7 = vsel %vm574_vm0, %v13635_v53, 0.0  ;;  %v4891_v57 = vpop.f32.mrb[85].mxu0 }
 0x795   : > { %v5519_v62 = vadd.f32 %v5518_v7, %v5517_v4  ;;  %v5503_v52 = vsel %vm574_vm0, %v4891_v57, 0.0 }
 0x796   : > { %v5504_v17 = vadd.f32 %v5503_v52, %v5502_v33  ;;  %v13649_v54 = vpop.f32.mrb[100].mxu1 }
 0x797   : > { %v5520_v37 = vsel %vm574_vm0, %v13649_v54, 0.0  ;;  %v5023_v35 = vpop.f32.mrb[101].mxu1 }
 0x798   : > { %v5521_v13 = vadd.f32 %v5520_v37, %v5519_v62  ;;  %v5505_v49 = vsel %vm574_vm0, %v5023_v35, 0.0  ;;  %v21043_v62 = vld [vmem:[#allocation15_spill] sm:$0xff]  ;;  %v21044_v37 = vld [vmem:[#allocation14_spill] sm:$0xff] }
 0x799   : > { %v5506_v28 = vadd.f32 %v5505_v49, %v5504_v17 }
 0x79c   : > { %v13638_v10 = vpop.f32.mrb[86].mxu0 }
 0x79d   : > { %v5548_v31 = vsel %vm574_vm0, %v13638_v10, 0.0  ;;  %v4901_v51 = vpop.f32.mrb[87].mxu0 }
 0x79e   : > { %v5549_v43 = vadd.f32 %v5548_v31, %v5547_v39  ;;  %v5533_v12 = vsel %vm574_vm0, %v4901_v51, 0.0 }
 0x79f   : > { %v5534_v1 = vadd.f32 %v5533_v12, %v5532_v48 }
 0x7a0   : > { %v13652_v36 = vpop.f32.mrb[102].mxu1 }
 0x7a1   : > { %v5550_v3 = vsel %vm574_vm0, %v13652_v36, 0.0  ;;  %v5033_v60 = vpop.f32.mrb[103].mxu1 }
 0x7a2   : > { %v5551_v29 = vadd.f32 %v5550_v3, %v5549_v43  ;;  %v5535_v58 = vsel %vm574_vm0, %v5033_v60, 0.0  ;;  %v21045_v60 = vld [vmem:[#allocation16_spill] sm:$0xff] }
 0x7a3   : > { %v5536_v15 = vadd.f32 %v5535_v58, %v5534_v1 }
 0x7b1   : > { %v13657_v56 = vpop.f32.mrb[88].mxu0 }
 0x7b2   : > { %v5462_v4 = vsel %vm574_vm0, %v13657_v56, 0.0  ;;  %v5135_v11 = vpop.f32.mrb[89].mxu0 }
 0x7b3   : > { %v5463_v44 = vadd.f32 %v5462_v4, %v5461_v0  ;;  %v5447_v50 = vsel %vm574_vm0, %v5135_v11, 0.0 }
 0x7b4   : > { %v5448_v33 = vadd.f32 %v5447_v50, %v5446_v41 }
 0x7b9   : > { %v13660_v27 = vpop.f32.mrb[90].mxu0 }
 0x7ba   : > { %v5492_v9 = vsel %vm574_vm0, %v13660_v27, 0.0  ;;  %v5145_v55 = vpop.f32.mrb[91].mxu0 }
 0x7bb   : > { %v5493_v20 = vadd.f32 %v5492_v9, %v5491_v30  ;;  %v5477_v26 = vsel %vm574_vm0, %v5145_v55, 0.0  ;;  %v21046_v55 = vld [vmem:[#allocation13_spill] sm:$0xff] }
 0x7bc   : > { %v5478_v2 = vadd.f32 %v5477_v26, %v5476_v34  ;;  %v11909_v34 = vld [vmem:[%s20782_s8] ss:$0 sm:$0xff] }
 0x7c1   : > { %v13663_v23 = vpop.f32.mrb[92].mxu0 }
 0x7c2   : > { %v5522_v39 = vsel %vm574_vm0, %v13663_v23, 0.0  ;;  %v5155_v38 = vpop.f32.mrb[93].mxu0 }
 0x7c3   : > { %v5523_v48 = vadd.f32 %v5522_v39, %v5521_v13  ;;  %v5507_v22 = vsel %vm574_vm0, %v5155_v38, 0.0 }
 0x7c4   : > { %v5508_v61 = vadd.f32 %v5507_v22, %v5506_v28 }
 0x7c9   : > { %v13666_v24 = vpop.f32.mrb[94].mxu0 }
 0x7ca   : > { %v5552_v14 = vsel %vm574_vm0, %v13666_v24, 0.0  ;;  %v5165_v21 = vpop.f32.mrb[95].mxu0 }
 0x7cb   : > { %v5553_v40 = vadd.f32 %v5552_v14, %v5551_v29  ;;  %v5537_v46 = vsel %vm574_vm0, %v5165_v21, 0.0 }
 0x7cc   : > { %v5538_v19 = vadd.f32 %v5537_v46, %v5536_v15 }
 0x7e0   : > { %v13671_v18 = vpop.f32.mrb[104].mxu1 }
 0x7e1   : > { %v5464_v0 = vsel %vm574_vm0, %v13671_v18, 0.0  ;;  %v5267_v63 = vpop.f32.mrb[105].mxu1 }
 0x7e2   : > { %v5465_v41 = vadd.f32 %v5464_v0, %v5463_v44  ;;  %v5449_v16 = vsel %vm574_vm0, %v5267_v63, 0.0  ;;  %v21048_v0 = vld [vmem:[#allocation17_spill] sm:$0xff] }
 0x7e3   : > { %v5450_v45 = vadd.f32 %v5449_v16, %v5448_v33 }
 0x7e4   : > { %v13674_v42 = vpop.f32.mrb[106].mxu1  ;;  %v13685_v8 = vpop.f32.mrb[96].mxu0 }
 0x7e5   : > { %v5494_v47 = vsel %vm574_vm0, %v13674_v42, 0.0  ;;  %v5466_v25 = vsel %vm574_vm0, %v13685_v8, 0.0  ;;  %v5277_v59 = vpop.f32.mrb[107].mxu1  ;;  %v5399_v32 = vpop.f32.mrb[97].mxu0  ;;  %v21049_v8 = vld [vmem:[#allocation20_spill] sm:$0xff] }
 0x7e6   : > { %v5495_v6 = vadd.f32 %v5494_v47, %v5493_v20  ;;  %v5467_v30 = vadd.f32 %v5466_v25, %v5465_v41  ;;  %v5479_v5 = vsel %vm574_vm0, %v5277_v59, 0.0  ;;  %v5451_v53 = vsel %vm574_vm0, %v5399_v32, 0.0  ;;  %v21050_v59 = vld [vmem:[#allocation19_spill] sm:$0xff] }
 0x7e7   : > { %v5480_v7 = vadd.f32 %v5479_v5, %v5478_v2  ;;  %v5452_v57 = vadd.f32 %v5451_v53, %v5450_v45 }
 0x7e8   : > { %v5559_v52 = vadd.f32 %v5467_v30, %v21043_v62  ;;  %v13677_v17 = vpop.f32.mrb[108].mxu1  ;;  %v13688_v54 = vpop.f32.mrb[98].mxu0 }
 0x7e9   : > { %v5558_v35 = vadd.f32 %v5452_v57, %v21044_v37  ;;  %v5524_v13 = vsel %vm574_vm0, %v13677_v17, 0.0  ;;  %v5496_v49 = vsel %vm574_vm0, %v13688_v54, 0.0  ;;  %v5287_v28 = vpop.f32.mrb[109].mxu1  ;;  %v5409_v10 = vpop.f32.mrb[99].mxu0 }
 0x7ea   : > { %v18554_v31 = vadd.f32 %v11909_v34, %v5559_v52  ;;  %v5525_v51 = vadd.f32 %v5524_v13, %v5523_v48  ;;  %v5497_v43 = vadd.f32 %v5496_v49, %v5495_v6  ;;  %v5509_v12 = vsel %vm574_vm0, %v5287_v28, 0.0  ;;  %v21047_v48 = vld [vmem:[#allocation18_spill] sm:$0xff] }
 0x7eb   : > { %v18557_v1 = vadd.f32 %v11909_v34, %v5558_v35  ;;  %v5510_v36 = vadd.f32 %v5509_v12, %v5508_v61  ;;  %v5481_v3 = vsel %vm574_vm0, %v5409_v10, 0.0 }
 0x7ec   : > { %v5561_v29 = vadd.f32 %v5497_v43, %v21045_v60  ;;  %v5482_v58 = vadd.f32 %v5481_v3, %v5480_v7  ;;  %v13680_v15 = vpop.f32.mrb[110].mxu1  ;;  %v13691_v56 = vpop.f32.mrb[100].mxu0  ;;  %v5586_v4 = vsel %vm574_vm0, %v18554_v31, 0.0 }
 0x7ed   : > { %v5554_v11 = vsel %vm574_vm0, %v13680_v15, 0.0  ;;  %v5526_v44 = vsel %vm574_vm0, %v13691_v56, 0.0  ;;  %v5297_v50 = vpop.f32.mrb[111].mxu1  ;;  %5587 = vadd.xlane.f32.xlu0 %v5586_v4  ;;  %v5419_v33 = vpop.f32.mrb[101].mxu0  ;;  %v5583_v27 = vsel %vm574_vm0, %v18557_v1, 0.0 }
 0x7ee   : > { %v18567_v9 = vadd.f32 %v11909_v34, %v5561_v29  ;;  %v5560_v20 = vadd.f32 %v5482_v58, %v21046_v55  ;;  %v5555_v26 = vadd.f32 %v5554_v11, %v5553_v40  ;;  %v5527_v2 = vadd.f32 %v5526_v44, %v5525_v51  ;;  %5584 = vadd.xlane.f32.xlu1 %v5583_v27 }
 0x7ef   : > { %v5539_v23 = vsel %vm574_vm0, %v5297_v50, 0.0  ;;  %v5511_v39 = vsel %vm574_vm0, %v5419_v33, 0.0 }
 0x7f0   : > { %v18572_v38 = vadd.f32 %v11909_v34, %v5560_v20  ;;  %v5563_v22 = vadd.f32 %v5527_v2, %v21047_v48  ;;  %v5540_v61 = vadd.f32 %v5539_v23, %v5538_v19  ;;  %v5512_v24 = vadd.f32 %v5511_v39, %v5510_v36  ;;  %v13694_v14 = vpop.f32.mrb[102].mxu0 }
 0x7f1   : > { %v5556_v21 = vsel %vm574_vm0, %v13694_v14, 0.0  ;;  %v5592_v46 = vsel %vm574_vm0, %v18567_v9, 0.0  ;;  %v5429_v18 = vpop.f32.mrb[103].mxu0 }
 0x7f2   : > { %v18578_v40 = vadd.f32 %v11909_v34, %v5563_v22  ;;  %v5562_v63 = vadd.f32 %v5512_v24, %v21048_v0  ;;  %v5557_v41 = vadd.f32 %v5556_v21, %v5555_v26  ;;  %5593 = vadd.xlane.f32.xlu0 %v5592_v46  ;;  %v5541_v16 = vsel %vm574_vm0, %v5429_v18, 0.0  ;;  %v5715_v46 = vld [vmem:[#allocation2] sm:$0xff]  ;;  %v5716_v18 = vld [vmem:[#allocation2 + $0x8] sm:$0xff] }
 0x7f3   : > { %v5542_v45 = vadd.f32 %v5541_v16, %v5540_v61  ;;  %v5589_v19 = vsel %vm574_vm0, %v18572_v38, 0.0  ;;  %v14787_v0 = vpack.c.bf16 %v5716_v18, %v5715_v46 }
 0x7f4   : > { %v18584_v42 = vadd.f32 %v11909_v34, %v5562_v63  ;;  %v5565_v47 = vadd.f32 %v5557_v41, %v21049_v8  ;;  %5590 = vadd.xlane.f32.xlu1 %v5589_v19  ;;  %v5598_v25 = vsel %vm574_vm0, %v18578_v40, 0.0  ;;  %v5717_v63 = vld [vmem:[#allocation2 + $0x10] sm:$0xff]  ;;  %v5718_v41 = vld [vmem:[#allocation2 + $0x18] sm:$0xff]  ;;  %v5896_v19 = vld [vmem:[%s20787_s13 + $0x8] sm:$0xff] }
 0x7f5   : > { %v5564_v32 = vadd.f32 %v5542_v45, %v21050_v59  ;;  %14788 = vmatprep.subr.bf16.mxu1 %v14787_v0  ;;  %v14791_v16 = vpack.c.bf16 %v5718_v41, %v5717_v63  ;;  %v5895_v45 = vld [vmem:[%s20787_s13] sm:$0xff]  ;;  %v5897_v8 = vld [vmem:[%s20787_s13 + $0x10] sm:$0xff] }
 0x7f6   : > { %v18590_v6 = vadd.f32 %v11909_v34, %v5565_v47  ;;  %5599 = vadd.xlane.f32.xlu0 %v5598_v25  ;;  %v5595_v30 = vsel %vm574_vm0, %v18584_v42, 0.0  ;;  %14790 = vmatpush3.bf16.msra.mxu1 %v14787_v0  ;;  %v14795_v47 = vpack.c.bf16 %v5896_v19, %v5895_v45  ;;  %v5898_v25 = vld [vmem:[%s20787_s13 + $0x18] sm:$0xff] }
 0x7f7   : > { %v18594_v5 = vadd.f32 %v11909_v34, %v5564_v32  ;;  %14792 = vmatprep.subr.bf16.mxu1 %v14791_v16  ;;  %v14799_v59 = vpack.c.bf16 %v5898_v25, %v5897_v8  ;;  %v5899_v32 = vld [vmem:[%s20787_s13 + $0x20] sm:$0xff] }
 0x7f8   : > { %5596 = vadd.xlane.f32.xlu1 %v5595_v30  ;;  %v5604_v53 = vsel %vm574_vm0, %v18590_v6, 0.0  ;;  %v5900_v30 = vld [vmem:[%s20787_s13 + $0x28] sm:$0xff]  ;;  %14796 = vmatprep.subr.bf16.mxu0 %v14795_v47 }
 0x7f9   : > { %v5601_v7 = vsel %vm574_vm0, %v18594_v5, 0.0  ;;  %14798 = vmatpush3.bf16.msra.mxu0 %v14795_v47 }
 0x7fa   : > { %5605 = vadd.xlane.f32.xlu0 %v5604_v53  ;;  %14794 = vmatpush3.bf16.msra.mxu1 %v14791_v16  ;;  %v14803_v53 = vpack.c.bf16 %v5900_v30, %v5899_v32 }
 0x7fb   : > { %14800 = vmatprep.subr.bf16.mxu0 %v14799_v59 }
 0x7fc   : > { %5602 = vadd.xlane.f32.xlu1 %v5601_v7 }
 0x7fd   : > { %14802 = vmatpush3.bf16.msra.mxu0 %v14799_v59 }
 0x7fe   : > { %14804 = vmatprep.subr.bf16.mxu0 %v14803_v53 }
 0x801   : > { %14806 = vmatpush3.bf16.msra.mxu0 %v14803_v53 }
 0x87a   : > { %v5588_v57 = vpop.xlane.xlu0 %5587 }
 0x87b   : > { %v5608_v62 = vmul.f32 0.03125, %v5588_v57  ;;  %v5585_v52 = vpop.xlane.xlu1 %5584 }
 0x87c   : > { %v5607_v17 = vmul.f32 0.03125, %v5585_v52 }
 0x87d   : > { %v18601_v54 = vsub.f32 %v18554_v31, %v5608_v62 }
 0x87e   : > { %v18604_v37 = vsub.f32 %v18557_v1, %v5607_v17 }
 0x87f   : > { %v5594_v34 = vpop.xlane.xlu0 %5593  ;;  %v5624_v35 = vmul.f32 %v18601_v54, %v18601_v54 }
 0x880   : > { %v5610_v13 = vmul.f32 0.03125, %v5594_v34  ;;  %v5623_v49 = vmul.f32 %v18604_v37, %v18604_v37 }
 0x881   : > { %v5591_v28 = vpop.xlane.xlu1 %5590  ;;  %v5634_v10 = vsel %vm574_vm0, %v5624_v35, 0.0 }
 0x882   : > { %v18612_v51 = vsub.f32 %v18567_v9, %v5610_v13  ;;  %v5609_v43 = vmul.f32 0.03125, %v5591_v28  ;;  %5635 = vadd.xlane.f32.xlu0 %v5634_v10  ;;  %v5631_v12 = vsel %vm574_vm0, %v5623_v49, 0.0 }
 0x883   : > { %v5600_v36 = vpop.xlane.xlu0 %5599  ;;  %5632 = vadd.xlane.f32.xlu1 %v5631_v12 }
 0x884   : > { %v18616_v3 = vsub.f32 %v18572_v38, %v5609_v43  ;;  %v5612_v60 = vmul.f32 0.03125, %v5600_v36  ;;  %v5626_v29 = vmul.f32 %v18612_v51, %v18612_v51 }
 0x885   : > { %v5597_v58 = vpop.xlane.xlu1 %5596 }
 0x886   : > { %v18621_v15 = vsub.f32 %v18578_v40, %v5612_v60  ;;  %v5611_v56 = vmul.f32 0.03125, %v5597_v58  ;;  %v5640_v4 = vsel %vm574_vm0, %v5626_v29, 0.0  ;;  %v5625_v11 = vmul.f32 %v18616_v3, %v18616_v3 }
 0x887   : > { %5641 = vadd.xlane.f32.xlu0 %v5640_v4  ;;  %v5606_v44 = vpop.xlane.xlu0 %5605 }
 0x888   : > { %v18627_v50 = vsub.f32 %v18584_v42, %v5611_v56  ;;  %v5614_v33 = vmul.f32 0.03125, %v5606_v44  ;;  %v5637_v27 = vsel %vm574_vm0, %v5625_v11, 0.0  ;;  %v5628_v55 = vmul.f32 %v18621_v15, %v18621_v15 }
 0x889   : > { %5638 = vadd.xlane.f32.xlu1 %v5637_v27  ;;  %v5603_v20 = vpop.xlane.xlu1 %5602 }
 0x88a   : > { %v18633_v26 = vsub.f32 %v18590_v6, %v5614_v33  ;;  %v5613_v2 = vmul.f32 0.03125, %v5603_v20  ;;  %v5646_v23 = vsel %vm574_vm0, %v5628_v55, 0.0  ;;  %v5627_v39 = vmul.f32 %v18627_v50, %v18627_v50  ;;  %v11910_v33 = vld [vmem:[%s20783_s9] ss:$0 sm:$0xff] }
 0x88b   : > { %5647 = vadd.xlane.f32.xlu0 %v5646_v23 }
 0x88c   : > { %v18639_v48 = vsub.f32 %v18594_v5, %v5613_v2  ;;  %v5643_v22 = vsel %vm574_vm0, %v5627_v39, 0.0  ;;  %v5630_v61 = vmul.f32 %v18633_v26, %v18633_v26 }
 0x88d   : > { %5644 = vadd.xlane.f32.xlu1 %v5643_v22 }
 0x88e   : > { %v5652_v24 = vsel %vm574_vm0, %v5630_v61, 0.0  ;;  %v5629_v14 = vmul.f32 %v18639_v48, %v18639_v48 }
 0x88f   : > { %5653 = vadd.xlane.f32.xlu0 %v5652_v24  ;;  %v11911_v24 = vld [vmem:[%s20784_s10] ss:$0 sm:$0xff] }
 0x890   : > { %v5649_v21 = vsel %vm574_vm0, %v5629_v14, 0.0 }
 0x891   : > { %5650 = vadd.xlane.f32.xlu1 %v5649_v21 }
 0x90f   : > { %v5636_v7 = vpop.xlane.xlu0 %5635 }
 0x910   : > { %v5656_v57 = vmul.f32 0.03125, %v5636_v7  ;;  %v5633_v62 = vpop.xlane.xlu1 %5632 }
 0x911   : > { %v5655_v52 = vmul.f32 0.03125, %v5633_v62 }
 0x912   : > { %v5664_v17 = vadd.f32 1e-05, %v5656_v57 }
 0x913   : > { %v5663_v34 = vadd.f32 1e-05, %v5655_v52 }
 0x914   : > { %16107 = vrsqrt.f32 %v5664_v17  ;;  %v5642_v35 = vpop.xlane.xlu0 %5641 }
 0x915   : > { %16109 = vrsqrt.f32 %v5663_v34  ;;  %v5658_v13 = vmul.f32 0.03125, %v5642_v35  ;;  %v5903_v34 = vld [vmem:[%s20787_s13 + $0x40] sm:$0xff]  ;;  %v5904_v35 = vld [vmem:[%s20787_s13 + $0x48] sm:$0xff] }
 0x916   : > { %v5639_v49 = vpop.xlane.xlu1 %5638 }
 0x917   : > { %v5666_v28 = vadd.f32 1e-05, %v5658_v13  ;;  %v5657_v10 = vmul.f32 0.03125, %v5639_v49  ;;  %v14811_v13 = vpack.c.bf16 %v5904_v35, %v5903_v34  ;;  %v5905_v49 = vld [vmem:[%s20787_s13 + $0x50] sm:$0xff] }
 0x918   : > { %v5648_v43 = vpop.xlane.xlu0 %5647 }
 0x919   : > { %16111 = vrsqrt.f32 %v5666_v28  ;;  %v5665_v12 = vadd.f32 1e-05, %v5657_v10  ;;  %v5660_v36 = vmul.f32 0.03125, %v5648_v43  ;;  %v5906_v28 = vld [vmem:[%s20787_s13 + $0x58] sm:$0xff]  ;;  %v5907_v43 = vld [vmem:[%s20787_s13 + $0x60] sm:$0xff] }
 0x91a   : > { %v5645_v60 = vpop.xlane.xlu1 %5644  ;;  %v14815_v10 = vpack.c.bf16 %v5906_v28, %v5905_v49 }
 0x91b   : > { %16113 = vrsqrt.f32 %v5665_v12  ;;  %v5668_v29 = vadd.f32 1e-05, %v5660_v36  ;;  %v5659_v58 = vmul.f32 0.03125, %v5645_v60  ;;  %v5908_v12 = vld [vmem:[%s20787_s13 + $0x68] sm:$0xff]  ;;  %v5909_v60 = vld [vmem:[%s20787_s13 + $0x70] sm:$0xff] }
 0x91c   : > { %v5654_v56 = vpop.xlane.xlu0 %5653  ;;  %v14819_v36 = vpack.c.bf16 %v5908_v12, %v5907_v43 }
 0x91d   : > { %16115 = vrsqrt.f32 %v5668_v29  ;;  %v5667_v4 = vadd.f32 1e-05, %v5659_v58  ;;  %v5662_v11 = vmul.f32 0.03125, %v5654_v56  ;;  %v5910_v29 = vld [vmem:[%s20787_s13 + $0x78] sm:$0xff]  ;;  %v11912_v56 = vld [vmem:[%s20786_s12] ss:$0 sm:$0xff] }
 0x91e   : > { %v16108_v44 = vpop.eup %16107  ;;  %v5651_v27 = vpop.xlane.xlu1 %5650  ;;  %v14823_v58 = vpack.c.bf16 %v5910_v29, %v5909_v60 }
 0x91f   : > { %v16110_v55 = vpop.eup %16109  ;;  %v5680_v20 = vmul.f32 %v16108_v44, %v18601_v54  ;;  %16117 = vrsqrt.f32 %v5667_v4  ;;  %v5670_v2 = vadd.f32 1e-05, %v5662_v11  ;;  %v5661_v23 = vmul.f32 0.03125, %v5651_v27 }
 0x920   : > { %v5679_v39 = vmul.f32 %v16110_v55, %v18604_v37 }
 0x921   : > { %v5694_v22 = vmul.f32 %v11910_v33, %v5680_v20  ;;  %16119 = vrsqrt.f32 %v5670_v2  ;;  %v5669_v61 = vadd.f32 1e-05, %v5661_v23 }
 0x922   : > { %v5693_v14 = vmul.f32 %v11910_v33, %v5679_v39 }
 0x923   : > { %v16112_v21 = vpop.eup %16111  ;;  %16121 = vrsqrt.f32 %v5669_v61  ;;  %v5708_v54 = vadd.f32 %v11911_v24, %v5694_v22 }
 0x924   : > { %v5707_v46 = vadd.f32 %v11911_v24, %v5693_v14  ;;  %v5682_v18 = vmul.f32 %v16112_v21, %v18612_v51 }
 0x925   : > { %v16114_v0 = vpop.eup %16113 }
 0x926   : > { %13703 = vmatprep.mubr.msk.f32.mxu1 %vm574_vm0, %v5707_v46  ;;  %v5681_v63 = vmul.f32 %v16114_v0, %v18616_v3  ;;  %v5696_v41 = vmul.f32 %v11910_v33, %v5682_v18 }
 0x927   : > { %v16116_v37 = vpop.eup %16115  ;;  %13704 = vmatmul.mubr.msk.f32.vlgmr.msra.gmra.mrb[112].mxu1 %vm574_vm0, %v5708_v54 }
 0x928   : > { %v5695_v16 = vmul.f32 %v11910_v33, %v5681_v63  ;;  %v5684_v45 = vmul.f32 %v16116_v37, %v18621_v15  ;;  %v5710_v59 = vadd.f32 %v11911_v24, %v5696_v41 }
 0x929   : > { %v16118_v19 = vpop.eup %16117 }
 0x92a   : > { %v5709_v8 = vadd.f32 %v11911_v24, %v5695_v16  ;;  %v5683_v47 = vmul.f32 %v16118_v19, %v18627_v50  ;;  %v5698_v51 = vmul.f32 %v11910_v33, %v5684_v45 }
 0x92b   : > { %v16120_v25 = vpop.eup %16119 }
 0x92c   : > { %13706 = vmatprep.mubr.msk.f32.mxu1 %vm574_vm0, %v5709_v8  ;;  %v5697_v32 = vmul.f32 %v11910_v33, %v5683_v47  ;;  %v5686_v30 = vmul.f32 %v16120_v25, %v18633_v26  ;;  %v5712_v57 = vadd.f32 %v11911_v24, %v5698_v51  ;;  %v5901_v26 = vld [vmem:[%s20787_s13 + $0x30] sm:$0xff] }
 0x92d   : > { %v16122_v3 = vpop.eup %16121  ;;  %13707 = vmatmul.mubr.msk.f32.gmra.mrb[114].mxu1 %vm574_vm0, %v5710_v59 }
 0x92e   : > { %v5711_v53 = vadd.f32 %v11911_v24, %v5697_v32  ;;  %v5685_v7 = vmul.f32 %v16122_v3, %v18639_v48  ;;  %v5700_v15 = vmul.f32 %v11910_v33, %v5686_v30  ;;  %v5902_v48 = vld [vmem:[%s20787_s13 + $0x38] sm:$0xff] }
 0x92f   : > { %v14807_v17 = vpack.c.bf16 %v5902_v48, %v5901_v26 }
 0x930   : > { %13709 = vmatprep.mubr.msk.f32.mxu1 %vm574_vm0, %v5711_v53  ;;  %v5699_v62 = vmul.f32 %v11910_v33, %v5685_v7  ;;  %v5714_v52 = vadd.f32 %v11911_v24, %v5700_v15 }
 0x931   : > { %13710 = vmatmul.mubr.msk.f32.gmra.mrb[116].mxu1 %vm574_vm0, %v5712_v57  ;;  %14808 = vmatprep.subr.bf16.mxu0 %v14807_v17 }
 0x932   : > { %v5713_v50 = vadd.f32 %v11911_v24, %v5699_v62  ;;  %14810 = vmatpush3.bf16.msra.mxu0 %v14807_v17 }
 0x933   : > { %14812 = vmatprep.subr.bf16.mxu0 %v14811_v13 }
 0x934   : > { %13712 = vmatprep.mubr.msk.f32.mxu1 %vm574_vm0, %v5713_v50 }
 0x935   : > { %13713 = vmatmul.mubr.msk.f32.gmra.mrb[118].mxu1 %vm574_vm0, %v5714_v52 }
 0x936   : > { %14814 = vmatpush3.bf16.msra.mxu0 %v14811_v13 }
 0x937   : > { %14816 = vmatprep.subr.bf16.mxu0 %v14815_v10 }
 0x93a   : > { %14818 = vmatpush3.bf16.msra.mxu0 %v14815_v10 }
 0x93b   : > { %14820 = vmatprep.subr.bf16.mxu0 %v14819_v36 }
 0x93e   : > { %14822 = vmatpush3.bf16.msra.mxu0 %v14819_v36 }
 0x93f   : > { %14824 = vmatprep.subr.bf16.mxu0 %v14823_v58 }
 0x942   : > { %14826 = vmatpush3.bf16.msra.mxu0 %v14823_v58 }
 0x9fa   : > { %v13705_v4 = vpop.f32.mrb[112].mxu1 }
 0x9fb   : > { %v5822_v11 = vadd.f32 %v13705_v4, %v11912_v56  ;;  %v5816_v44 = vpop.f32.mrb[113].mxu1 }
 0x9fc   : > { %v5817_v33 = vadd.f32 %v11912_v56, %v5816_v44 }
 0x9fd   : > { %v5864_v27 = vmul.f32 0.70710677, %v5822_v11  ;;  %v5856_v59 = vmul.f32 0.5, %v5822_v11  ;;  %v11921_v11 = vld [vmem:[%s20788_s14] ss:$0 sm:$0xff] }
 0x9fe   : > { %v5863_v55 = vmul.f32 0.70710677, %v5817_v33  ;;  %v5855_v8 = vmul.f32 0.5, %v5817_v33 }
 0x9ff   : > { %16123 = verf.f32 %v5864_v27 }
 0xa00   : > { %16125 = verf.f32 %v5863_v55  ;;  %v13708_v20 = vpop.f32.mrb[114].mxu1 }
 0xa01   : > { %v5832_v2 = vadd.f32 %v13708_v20, %v11912_v56  ;;  %v5826_v23 = vpop.f32.mrb[115].mxu1 }
 0xa02   : > { %v5827_v39 = vadd.f32 %v11912_v56, %v5826_v23 }
 0xa03   : > { %v5866_v22 = vmul.f32 0.70710677, %v5832_v2  ;;  %v5858_v62 = vmul.f32 0.5, %v5832_v2 }
 0xa04   : > { %v5865_v61 = vmul.f32 0.70710677, %v5827_v39  ;;  %v13711_v24 = vpop.f32.mrb[116].mxu1  ;;  %v5857_v57 = vmul.f32 0.5, %v5827_v39 }
 0xa05   : > { %16127 = verf.f32 %v5866_v22  ;;  %v5842_v14 = vadd.f32 %v13711_v24, %v11912_v56  ;;  %v5836_v21 = vpop.f32.mrb[117].mxu1 }
 0xa06   : > { %16129 = verf.f32 %v5865_v61  ;;  %v5837_v46 = vadd.f32 %v11912_v56, %v5836_v21 }
 0xa07   : > { %v5868_v18 = vmul.f32 0.70710677, %v5842_v14  ;;  %v5860_v13 = vmul.f32 0.5, %v5842_v14 }
 0xa08   : > { %v5867_v0 = vmul.f32 0.70710677, %v5837_v46  ;;  %v13714_v54 = vpop.f32.mrb[118].mxu1  ;;  %v5859_v34 = vmul.f32 0.5, %v5837_v46 }
 0xa09   : > { %v16124_v63 = vpop.eup %16123  ;;  %16131 = verf.f32 %v5868_v18  ;;  %v5852_v37 = vadd.f32 %v13714_v54, %v11912_v56  ;;  %v5846_v41 = vpop.f32.mrb[119].mxu1 }
 0xa0a   : > { %v16126_v16 = vpop.eup %16125  ;;  %v5880_v45 = vadd.f32 1.0, %v16124_v63  ;;  %16133 = verf.f32 %v5867_v0  ;;  %v5847_v19 = vadd.f32 %v11912_v56, %v5846_v41 }
 0xa0b   : > { %v5879_v47 = vadd.f32 1.0, %v16126_v16  ;;  %v5870_v25 = vmul.f32 0.70710677, %v5852_v37  ;;  %v5862_v29 = vmul.f32 0.5, %v5852_v37 }
 0xa0c   : > { %v5869_v51 = vmul.f32 0.70710677, %v5847_v19  ;;  %v5888_v30 = vmul.f32 %v5880_v45, %v5856_v59  ;;  %v5861_v36 = vmul.f32 0.5, %v5847_v19 }
 0xa0d   : > { %16135 = verf.f32 %v5870_v25  ;;  %v5887_v32 = vmul.f32 %v5879_v47, %v5855_v8 }
 0xa0e   : > { %16137 = verf.f32 %v5869_v51 }
 0xa0f   : > { %v16128_v3 = vpop.eup %16127  ;;  %13747 = vmatprep.mubr.f32.mxu0 %v5887_v32 }
 0xa10   : > { %v16130_v53 = vpop.eup %16129  ;;  %v5882_v7 = vadd.f32 1.0, %v16128_v3  ;;  %13748 = vmatmul.mubr.f32.vlgmr.msra.gmra.mrb[104].mxu0 %v5888_v30 }
 0xa11   : > { %v5881_v15 = vadd.f32 1.0, %v16130_v53 }
 0xa12   : > { %v5890_v17 = vmul.f32 %v5882_v7, %v5858_v62 }
 0xa13   : > { %v16132_v50 = vpop.eup %16131  ;;  %v5889_v52 = vmul.f32 %v5881_v15, %v5857_v57 }
 0xa14   : > { %v16134_v26 = vpop.eup %16133  ;;  %v5884_v48 = vadd.f32 1.0, %v16132_v50 }
 0xa15   : > { %v5883_v35 = vadd.f32 1.0, %v16134_v26  ;;  %13750 = vmatprep.mubr.f32.mxu0 %v5889_v52 }
 0xa16   : > { %13751 = vmatmul.mubr.f32.gmra.mrb[106].mxu0 %v5890_v17  ;;  %v5892_v12 = vmul.f32 %v5884_v48, %v5860_v13 }
 0xa17   : > { %v16136_v49 = vpop.eup %16135  ;;  %v5891_v28 = vmul.f32 %v5883_v35, %v5859_v34 }
 0xa18   : > { %v16138_v10 = vpop.eup %16137  ;;  %v5886_v43 = vadd.f32 1.0, %v16136_v49 }
 0xa19   : > { %v5885_v60 = vadd.f32 1.0, %v16138_v10  ;;  %13753 = vmatprep.mubr.f32.mxu0 %v5891_v28 }
 0xa1a   : > { %13754 = vmatmul.mubr.f32.gmra.mrb[108].mxu0 %v5892_v12  ;;  %v5894_v56 = vmul.f32 %v5886_v43, %v5862_v29 }
 0xa1b   : > { %v5893_v58 = vmul.f32 %v5885_v60, %v5861_v36 }
 0xa1d   : > { %13756 = vmatprep.mubr.f32.mxu0 %v5893_v58 }
 0xa1e   : > { %13757 = vmatmul.mubr.f32.gmra.mrb[110].mxu0 %v5894_v56 }
 0xae3   : > { %v13749_v4 = vpop.f32.mrb[104].mxu0 }
 0xae4   : > { %v6017_v44 = vadd.f32 %v13749_v4, %v18554_v31  ;;  %v5977_v33 = vpop.f32.mrb[105].mxu0 }
 0xae5   : > { %v6016_v27 = vadd.f32 %v5977_v33, %v18557_v1 }
 0xae6   : > { %v18726_v55 = vadd.f32 %v11921_v11, %v6017_v44 }
 0xae7   : > { %v18728_v20 = vadd.f32 %v11921_v11, %v6016_v27 }
 0xae8   : > { %21051 = vst [vmem:[#allocation45_spill] sm:$0xff] %v18726_v55  ;;  %v6046_v2 = vsel %vm574_vm0, %v18726_v55, 0.0 }
 0xae9   : > { %21052 = vst [vmem:[#allocation48_spill] sm:$0xff] %v18728_v20  ;;  %v13752_v23 = vpop.f32.mrb[106].mxu0  ;;  %6047 = vadd.xlane.f32.xlu0 %v6046_v2  ;;  %v6043_v39 = vsel %vm574_vm0, %v18728_v20, 0.0 }
 0xaea   : > { %v6019_v22 = vadd.f32 %v13752_v23, %v18567_v9  ;;  %v5987_v61 = vpop.f32.mrb[107].mxu0  ;;  %6044 = vadd.xlane.f32.xlu1 %v6043_v39 }
 0xaeb   : > { %v6018_v31 = vadd.f32 %v5987_v61, %v18572_v38  ;;  %v11926_v61 = vld [vmem:[%s20778_s4 + $0x20] sm:$0xff] }
 0xaec   : > { %v18736_v24 = vadd.f32 %v11921_v11, %v6019_v22 }
 0xaed   : > { %v18738_v1 = vadd.f32 %v11921_v11, %v6018_v31  ;;  %v13755_v14 = vpop.f32.mrb[108].mxu0  ;;  %v11927_v31 = vld [vmem:[%s20778_s4 + $0x28] sm:$0xff] }
 0xaee   : > { %21053 = vst [vmem:[#allocation47_spill] sm:$0xff] %v18736_v24  ;;  %v6021_v21 = vadd.f32 %v13755_v14, %v18578_v40  ;;  %v5997_v46 = vpop.f32.mrb[109].mxu0  ;;  %v6052_v18 = vsel %vm574_vm0, %v18736_v24, 0.0  ;;  %v11950_v14 = vld [vmem:[%s20780_s6 + $0x20] sm:$0xff] }
 0xaef   : > { %21054 = vst [vmem:[#allocation49_spill] sm:$0xff] %v18738_v1  ;;  %v6020_v0 = vadd.f32 %v5997_v46, %v18584_v42  ;;  %6053 = vadd.xlane.f32.xlu0 %v6052_v18  ;;  %v6049_v9 = vsel %vm574_vm0, %v18738_v1, 0.0  ;;  %v11951_v46 = vld [vmem:[%s20780_s6 + $0x28] sm:$0xff] }
 0xaf0   : > { %v18746_v54 = vadd.f32 %v11921_v11, %v6021_v21  ;;  %6050 = vadd.xlane.f32.xlu1 %v6049_v9  ;;  %v14827_v21 = vpack.c.bf16 %v11927_v31, %v11926_v61  ;;  %v14843_v18 = vpack.c.bf16 %v11951_v46, %v11950_v14  ;;  %v11929_v9 = vld [vmem:[%s20778_s4 + $0x38] sm:$0xff] }
 0xaf1   : > { %v18748_v38 = vadd.f32 %v11921_v11, %v6020_v0  ;;  %v13758_v63 = vpop.f32.mrb[110].mxu0  ;;  %v11928_v0 = vld [vmem:[%s20778_s4 + $0x30] sm:$0xff] }
 0xaf2   : > { %21055 = vst [vmem:[#allocation51_spill] sm:$0xff] %v18746_v54  ;;  %v6023_v37 = vadd.f32 %v13758_v63, %v18590_v6  ;;  %v6007_v41 = vpop.f32.mrb[111].mxu0  ;;  %v6058_v40 = vsel %vm574_vm0, %v18746_v54, 0.0  ;;  %14828 = vmatprep.subr.bf16.mxu1 %v14827_v21  ;;  %14844 = vmatprep.subr.bf16.mxu0 %v14843_v18  ;;  %v11952_v63 = vld [vmem:[%s20780_s6 + $0x30] sm:$0xff] }
 0xaf3   : > { %21056 = vst [vmem:[#allocation52_spill] sm:$0xff] %v18748_v38  ;;  %v6022_v16 = vadd.f32 %v6007_v41, %v18594_v5  ;;  %6059 = vadd.xlane.f32.xlu0 %v6058_v40  ;;  %v6055_v42 = vsel %vm574_vm0, %v18748_v38, 0.0  ;;  %14830 = vmatpush3.bf16.msra.mxu1 %v14827_v21  ;;  %v11953_v41 = vld [vmem:[%s20780_s6 + $0x38] sm:$0xff] }
 0xaf4   : > { %v18756_v45 = vadd.f32 %v11921_v11, %v6023_v37  ;;  %6056 = vadd.xlane.f32.xlu1 %v6055_v42  ;;  %v14831_v37 = vpack.c.bf16 %v11929_v9, %v11928_v0  ;;  %14846 = vmatpush3.bf16.msra.mxu0 %v14843_v18  ;;  %v14847_v40 = vpack.c.bf16 %v11953_v41, %v11952_v63  ;;  %v11939_v42 = vld [vmem:[%s20779_s5 + $0x28] sm:$0xff] }
 0xaf5   : > { %v18758_v19 = vadd.f32 %v11921_v11, %v6022_v16  ;;  %v11938_v16 = vld [vmem:[%s20779_s5 + $0x20] sm:$0xff] }
 0xaf6   : > { %21057 = vst [vmem:[#allocation53_spill] sm:$0xff] %v18756_v45  ;;  %v6064_v8 = vsel %vm574_vm0, %v18756_v45, 0.0  ;;  %14832 = vmatprep.subr.bf16.mxu1 %v14831_v37  ;;  %14848 = vmatprep.subr.bf16.mxu0 %v14847_v40 }
 0xaf7   : > { %21058 = vst [vmem:[#allocation54_spill] sm:$0xff] %v18758_v19  ;;  %6065 = vadd.xlane.f32.xlu0 %v6064_v8  ;;  %v6061_v6 = vsel %vm574_vm0, %v18758_v19, 0.0  ;;  %14834 = vmatpush3.bf16.msra.mxu1 %v14831_v37  ;;  %v14835_v8 = vpack.c.bf16 %v11939_v42, %v11938_v16 }
 0xaf8   : > { %6062 = vadd.xlane.f32.xlu1 %v6061_v6  ;;  %14850 = vmatpush3.bf16.msra.mxu0 %v14847_v40 }
 0xaf9   : > { %14836 = vmatprep.subr.bf16.mxu1 %v14835_v8 }
 0xb76   : > { %v6048_v47 = vpop.xlane.xlu0 %6047 }
 0xb77   : > { %v6068_v25 = vmul.f32 0.03125, %v6048_v47  ;;  %v6045_v5 = vpop.xlane.xlu1 %6044 }
 0xb78   : > { %v6067_v59 = vmul.f32 0.03125, %v6045_v5 }
 0xb79   : > { %v18765_v51 = vsub.f32 %v18726_v55, %v6068_v25 }
 0xb7a   : > { %v18768_v32 = vsub.f32 %v18728_v20, %v6067_v59 }
 0xb7b   : > { %v6084_v30 = vmul.f32 %v18765_v51, %v18765_v51 }
 0xb7c   : > { %v6054_v3 = vpop.xlane.xlu0 %6053  ;;  %v6083_v53 = vmul.f32 %v18768_v32, %v18768_v32 }
 0xb7d   : > { %v6070_v7 = vmul.f32 0.03125, %v6054_v3  ;;  %v6051_v57 = vpop.xlane.xlu1 %6050  ;;  %v6094_v15 = vsel %vm574_vm0, %v6084_v30, 0.0 }
 0xb7e   : > { %v6069_v62 = vmul.f32 0.03125, %v6051_v57  ;;  %6095 = vadd.xlane.f32.xlu0 %v6094_v15  ;;  %v6091_v50 = vsel %vm574_vm0, %v6083_v53, 0.0 }
 0xb7f   : > { %v18777_v52 = vsub.f32 %v18736_v24, %v6070_v7  ;;  %6092 = vadd.xlane.f32.xlu1 %v6091_v50 }
 0xb80   : > { %v18780_v26 = vsub.f32 %v18738_v1, %v6069_v62  ;;  %v6060_v48 = vpop.xlane.xlu0 %6059 }
 0xb81   : > { %v6072_v17 = vmul.f32 0.03125, %v6060_v48  ;;  %v6057_v34 = vpop.xlane.xlu1 %6056  ;;  %v6086_v35 = vmul.f32 %v18777_v52, %v18777_v52 }
 0xb82   : > { %v6071_v13 = vmul.f32 0.03125, %v6057_v34  ;;  %v6085_v49 = vmul.f32 %v18780_v26, %v18780_v26 }
 0xb83   : > { %v18787_v28 = vsub.f32 %v18746_v54, %v6072_v17  ;;  %v6100_v10 = vsel %vm574_vm0, %v6086_v35, 0.0 }
 0xb84   : > { %v18791_v43 = vsub.f32 %v18748_v38, %v6071_v13  ;;  %6101 = vadd.xlane.f32.xlu0 %v6100_v10  ;;  %v6066_v12 = vpop.xlane.xlu0 %6065  ;;  %v6097_v36 = vsel %vm574_vm0, %v6085_v49, 0.0 }
 0xb85   : > { %v6074_v60 = vmul.f32 0.03125, %v6066_v12  ;;  %6098 = vadd.xlane.f32.xlu1 %v6097_v36  ;;  %v6063_v29 = vpop.xlane.xlu1 %6062  ;;  %v6088_v58 = vmul.f32 %v18787_v28, %v18787_v28  ;;  %v11924_v12 = vld [vmem:[%s20776_s2 + $0x1] ss:$0 sm:$0xff] }
 0xb86   : > { %v6073_v56 = vmul.f32 0.03125, %v6063_v29  ;;  %v6087_v4 = vmul.f32 %v18791_v43, %v18791_v43 }
 0xb87   : > { %v18799_v11 = vsub.f32 %v18756_v45, %v6074_v60  ;;  %v6106_v44 = vsel %vm574_vm0, %v6088_v58, 0.0 }
 0xb88   : > { %v18803_v33 = vsub.f32 %v18758_v19, %v6073_v56  ;;  %6107 = vadd.xlane.f32.xlu0 %v6106_v44  ;;  %v6103_v27 = vsel %vm574_vm0, %v6087_v4, 0.0 }
 0xb89   : > { %6104 = vadd.xlane.f32.xlu1 %v6103_v27  ;;  %v6090_v2 = vmul.f32 %v18799_v11, %v18799_v11 }
 0xb8a   : > { %v6089_v23 = vmul.f32 %v18803_v33, %v18803_v33 }
 0xb8b   : > { %v6112_v39 = vsel %vm574_vm0, %v6090_v2, 0.0 }
 0xb8c   : > { %6113 = vadd.xlane.f32.xlu0 %v6112_v39  ;;  %v6109_v22 = vsel %vm574_vm0, %v6089_v23, 0.0  ;;  %v11925_v23 = vld [vmem:[%s20777_s3 + $0x1] ss:$0 sm:$0xff] }
 0xb8d   : > { %6110 = vadd.xlane.f32.xlu1 %v6109_v22  ;;  %v11940_v22 = vld [vmem:[%s20779_s5 + $0x30] sm:$0xff] }
 0xc0b   : > { %v6096_v6 = vpop.xlane.xlu0 %6095 }
 0xc0c   : > { %v6116_v47 = vmul.f32 0.03125, %v6096_v6  ;;  %v6093_v25 = vpop.xlane.xlu1 %6092 }
 0xc0d   : > { %v6115_v5 = vmul.f32 0.03125, %v6093_v25 }
 0xc0e   : > { %v6124_v59 = vadd.f32 1e-05, %v6116_v47 }
 0xc0f   : > { %v6123_v30 = vadd.f32 1e-05, %v6115_v5 }
 0xc10   : > { %16139 = vrsqrt.f32 %v6124_v59 }
 0xc11   : > { %16141 = vrsqrt.f32 %v6123_v30  ;;  %v6102_v3 = vpop.xlane.xlu0 %6101 }
 0xc12   : > { %v6118_v53 = vmul.f32 0.03125, %v6102_v3  ;;  %v6099_v7 = vpop.xlane.xlu1 %6098 }
 0xc13   : > { %v6117_v57 = vmul.f32 0.03125, %v6099_v7 }
 0xc14   : > { %v6126_v15 = vadd.f32 1e-05, %v6118_v53 }
 0xc15   : > { %v6125_v62 = vadd.f32 1e-05, %v6117_v57  ;;  %v6108_v50 = vpop.xlane.xlu0 %6107 }
 0xc16   : > { %16143 = vrsqrt.f32 %v6126_v15  ;;  %v6120_v48 = vmul.f32 0.03125, %v6108_v50  ;;  %v6105_v17 = vpop.xlane.xlu1 %6104 }
 0xc17   : > { %16145 = vrsqrt.f32 %v6125_v62  ;;  %v6119_v34 = vmul.f32 0.03125, %v6105_v17 }
 0xc18   : > { %v6128_v35 = vadd.f32 1e-05, %v6120_v48 }
 0xc19   : > { %v6127_v13 = vadd.f32 1e-05, %v6119_v34  ;;  %v6114_v49 = vpop.xlane.xlu0 %6113 }
 0xc1a   : > { %v16140_v10 = vpop.eup %16139  ;;  %16147 = vrsqrt.f32 %v6128_v35  ;;  %v6122_v36 = vmul.f32 0.03125, %v6114_v49  ;;  %v6111_v60 = vpop.xlane.xlu1 %6110 }
 0xc1b   : > { %v16142_v29 = vpop.eup %16141  ;;  %v6140_v58 = vmul.f32 %v16140_v10, %v18765_v51  ;;  %16149 = vrsqrt.f32 %v6127_v13  ;;  %v6121_v56 = vmul.f32 0.03125, %v6111_v60  ;;  %v11941_v51 = vld [vmem:[%s20779_s5 + $0x38] sm:$0xff] }
 0xc1c   : > { %v6130_v4 = vadd.f32 1e-05, %v6122_v36  ;;  %v6139_v44 = vmul.f32 %v16142_v29, %v18768_v32  ;;  %v14839_v46 = vpack.c.bf16 %v11941_v51, %v11940_v22 }
 0xc1d   : > { %v6154_v27 = vmul.f32 %v11924_v12, %v6140_v58  ;;  %v6129_v2 = vadd.f32 1e-05, %v6121_v56 }
 0xc1e   : > { %16151 = vrsqrt.f32 %v6130_v4  ;;  %v6153_v39 = vmul.f32 %v11924_v12, %v6139_v44 }
 0xc1f   : > { %16153 = vrsqrt.f32 %v6129_v2  ;;  %v6168_v14 = vadd.f32 %v11925_v23, %v6154_v27 }
 0xc20   : > { %v16144_v61 = vpop.eup %16143  ;;  %v6167_v31 = vadd.f32 %v11925_v23, %v6153_v39 }
 0xc21   : > { %v16146_v32 = vpop.eup %16145  ;;  %v6142_v21 = vmul.f32 %v16144_v61, %v18777_v52 }
 0xc22   : > { %13767 = vmatprep.mubr.msk.f32.mxu1 %vm574_vm0, %v6167_v31  ;;  %13807 = vmatprep.mubr.msk.f32.mxu0 %vm574_vm0, %v6167_v31  ;;  %v6141_v18 = vmul.f32 %v16146_v32, %v18780_v26 }
 0xc23   : > { %13768 = vmatmul.mubr.msk.f32.vlgmr.msra.gmra.mrb[120].mxu1 %vm574_vm0, %v6168_v14  ;;  %13808 = vmatmul.mubr.msk.f32.vlgmr.msra.gmra.mrb[112].mxu0 %vm574_vm0, %v6168_v14  ;;  %v6156_v0 = vmul.f32 %v11924_v12, %v6142_v21 }
 0xc24   : > { %v16148_v9 = vpop.eup %16147  ;;  %14838 = vmatpush3.bf16.msra.mxu1 %v14835_v8  ;;  %v6155_v63 = vmul.f32 %v11924_v12, %v6141_v18 }
 0xc25   : > { %v16150_v37 = vpop.eup %16149  ;;  %v6144_v41 = vmul.f32 %v16148_v9, %v18787_v28  ;;  %14840 = vmatprep.subr.bf16.mxu1 %v14839_v46  ;;  %v6170_v16 = vadd.f32 %v11925_v23, %v6156_v0 }
 0xc26   : > { %v6169_v52 = vadd.f32 %v11925_v23, %v6155_v63  ;;  %v6143_v40 = vmul.f32 %v16150_v37, %v18791_v43 }
 0xc27   : > { %v6158_v42 = vmul.f32 %v11924_v12, %v6144_v41 }
 0xc28   : > { %v16152_v6 = vpop.eup %16151  ;;  %13770 = vmatprep.mubr.msk.f32.mxu1 %vm574_vm0, %v6169_v52  ;;  %13810 = vmatprep.mubr.msk.f32.mxu0 %vm574_vm0, %v6169_v52  ;;  %v6157_v26 = vmul.f32 %v11924_v12, %v6143_v40 }
 0xc29   : > { %v16154_v47 = vpop.eup %16153  ;;  %13771 = vmatmul.mubr.msk.f32.gmra.mrb[122].mxu1 %vm574_vm0, %v6170_v16  ;;  %13811 = vmatmul.mubr.msk.f32.gmra.mrb[114].mxu0 %vm574_vm0, %v6170_v16  ;;  %v6146_v8 = vmul.f32 %v16152_v6, %v18799_v11  ;;  %v6172_v43 = vadd.f32 %v11925_v23, %v6158_v42 }
 0xc2a   : > { %v6171_v28 = vadd.f32 %v11925_v23, %v6157_v26  ;;  %14842 = vmatpush3.bf16.msra.mxu1 %v14839_v46  ;;  %v6145_v25 = vmul.f32 %v16154_v47, %v18803_v33 }
 0xc2b   : > { %v6160_v5 = vmul.f32 %v11924_v12, %v6146_v8 }
 0xc2c   : > { %13773 = vmatprep.mubr.msk.f32.mxu1 %vm574_vm0, %v6171_v28  ;;  %13813 = vmatprep.mubr.msk.f32.mxu0 %vm574_vm0, %v6171_v28  ;;  %v6159_v59 = vmul.f32 %v11924_v12, %v6145_v25 }
 0xc2d   : > { %13774 = vmatmul.mubr.msk.f32.gmra.mrb[124].mxu1 %vm574_vm0, %v6172_v43  ;;  %13814 = vmatmul.mubr.msk.f32.gmra.mrb[116].mxu0 %vm574_vm0, %v6172_v43  ;;  %v6174_v3 = vadd.f32 %v11925_v23, %v6160_v5 }
 0xc2e   : > { %v6173_v30 = vadd.f32 %v11925_v23, %v6159_v59 }
 0xc30   : > { %13776 = vmatprep.mubr.msk.f32.mxu1 %vm574_vm0, %v6173_v30  ;;  %13816 = vmatprep.mubr.msk.f32.mxu0 %vm574_vm0, %v6173_v30 }
 0xc31   : > { %13777 = vmatmul.mubr.msk.f32.gmra.mrb[126].mxu1 %vm574_vm0, %v6174_v3  ;;  %13817 = vmatmul.mubr.msk.f32.gmra.mrb[118].mxu0 %vm574_vm0, %v6174_v3 }
 0xc32   : > { %13787 = vmatprep.mubr.msk.f32.mxu1 %vm574_vm0, %v6167_v31 }
 0xc35   : > { %13788 = vmatmul.mubr.msk.f32.vlgmr.msra.gmra.mrb[128].mxu1 %vm574_vm0, %v6168_v14 }
 0xc36   : > { %13790 = vmatprep.mubr.msk.f32.mxu1 %vm574_vm0, %v6169_v52 }
 0xc39   : > { %13791 = vmatmul.mubr.msk.f32.gmra.mrb[130].mxu1 %vm574_vm0, %v6170_v16 }
 0xc3a   : > { %13793 = vmatprep.mubr.msk.f32.mxu1 %vm574_vm0, %v6171_v28 }
 0xc3d   : > { %13794 = vmatmul.mubr.msk.f32.gmra.mrb[132].mxu1 %vm574_vm0, %v6172_v43 }
 0xc3e   : > { %13796 = vmatprep.mubr.msk.f32.mxu1 %vm574_vm0, %v6173_v30 }
 0xc41   : > { %13797 = vmatmul.mubr.msk.f32.gmra.mrb[134].mxu1 %vm574_vm0, %v6174_v3 }
 0xcf6   : > { %v18886_v11 = vpop.f32.mrb[120].mxu1  ;;  %v13809_v33 = vpop.f32.mrb[112].mxu0 }
 0xcf7   : > { %v6490_v53 = vpop.f32.mrb[113].mxu0  ;;  %6539 = vrot.lane.b32.xlu1 %v18886_v11, %s16543_s17  ;;  %v18890_v7 = vpop.f32.mrb[121].mxu1 }
 0xcf8   : > { %6537 = vrot.lane.b32.xlu0 %v18890_v7, %s16543_s17  ;;  %13835 = vmatprep.mubr.msk.f32.mxu1 %vm1475_vm1, %v18890_v7  ;;  %v18896_v57 = vpack.i.bf16 %v13809_v33, %v6490_v53  ;;  %v18898_v15 = vpack.c.bf16 %v13809_v33, %v6490_v53 }
 0xcfc   : > { %v18900_v62 = vpop.f32.mrb[122].mxu1  ;;  %v13812_v50 = vpop.f32.mrb[114].mxu0 }
 0xcfd   : > { %v18902_v48 = vpop.f32.mrb[123].mxu1  ;;  %v6500_v17 = vpop.f32.mrb[115].mxu0  ;;  %6543 = vrot.lane.b32.xlu0 %v18900_v62, %s16543_s17 }
 0xcfe   : > { %v18906_v34 = vpack.i.bf16 %v13812_v50, %v6500_v17  ;;  %v18908_v35 = vpack.c.bf16 %v13812_v50, %v6500_v17 }
 0xd00   : > { %v18910_v13 = vpop.f32.mrb[124].mxu1  ;;  %v13815_v49 = vpop.f32.mrb[116].mxu0 }
 0xd01   : > { %v6510_v10 = vpop.f32.mrb[117].mxu0  ;;  %6547 = vrot.lane.b32.xlu1 %v18910_v13, %s16543_s17  ;;  %v18914_v12 = vpop.f32.mrb[125].mxu1  ;;  %6541 = vrot.lane.b32.xlu0 %v18902_v48, %s16543_s17 }
 0xd02   : > { %v18918_v36 = vpack.i.bf16 %v13815_v49, %v6510_v10  ;;  %v18920_v60 = vpack.c.bf16 %v13815_v49, %v6510_v10 }
 0xd04   : > { %21059 = vst [vmem:[#allocation55_spill] sm:$0xff] %v18918_v36  ;;  %v18922_v29 = vpop.f32.mrb[126].mxu1  ;;  %v13818_v58 = vpop.f32.mrb[118].mxu0 }
 0xd05   : > { %v18924_v56 = vpop.f32.mrb[127].mxu1  ;;  %v6520_v4 = vpop.f32.mrb[119].mxu0  ;;  %6545 = vrot.lane.b32.xlu0 %v18914_v12, %s16543_s17 }
 0xd06   : > { %v18928_v44 = vpack.i.bf16 %v13818_v58, %v6520_v4  ;;  %v18930_v27 = vpack.c.bf16 %v13818_v58, %v6520_v4 }
 0xd08   : > { %21060 = vst [vmem:[#allocation56_spill] sm:$0xff] %v18928_v44  ;;  %v13789_v2 = vpop.f32.mrb[128].mxu1 }
 0xd09   : > { %v6380_v23 = vpop.f32.mrb[129].mxu1  ;;  %6549 = vrot.lane.b32.xlu0 %v18924_v56, %s16543_s17 }
 0xd0a   : > { %v18934_v39 = vpack.i.bf16 %v13789_v2, %v6380_v23  ;;  %v14851_v22 = vpack.c.bf16 %v13789_v2, %v6380_v23 }
 0xd0c   : > { %15556 = vrot.lane.b32.xlu1 %v18934_v39, %s16543_s17  ;;  %v13792_v51 = vpop.f32.mrb[130].mxu1  ;;  %14853 = vmatprep.subr.msk.bf16.mxu1 %vm16951_vm2, %v14851_v22 }
 0xd0d   : > { %v6390_v31 = vpop.f32.mrb[131].mxu1  ;;  %14856 = vmatpush3.bf16.xpose.msk.msra.mxu1 %vm16951_vm2, %v14851_v22  ;;  %15561 = vrot.lane.b32.xlu0 %v18934_v39, %s21062_s27 }
 0xd0e   : > { %v14857_v32 = vpack.c.bf16 %v13792_v51, %v6390_v31  ;;  %v18944_v14 = vpack.i.bf16 %v13792_v51, %v6390_v31 }
 0xd10   : > { %15566 = vrot.lane.b32.xlu1 %v18934_v39, %s21063_s29  ;;  %v13795_v21 = vpop.f32.mrb[132].mxu1  ;;  %14859 = vmatprep.subr.msk.bf16.mxu1 %vm16951_vm2, %v14857_v32 }
 0xd11   : > { %v6400_v46 = vpop.f32.mrb[133].mxu1  ;;  %15576 = vrot.lane.b32.xlu0 %v18944_v14, %s16543_s17 }
 0xd12   : > { %v14863_v18 = vpack.c.bf16 %v13795_v21, %v6400_v46  ;;  %v18952_v0 = vpack.i.bf16 %v13795_v21, %v6400_v46 }
 0xd14   : > { %15571 = vrot.lane.b32.xlu1 %v18934_v39, %s21064_s23  ;;  %v13798_v9 = vpop.f32.mrb[134].mxu1 }
 0xd15   : > { %v6410_v63 = vpop.f32.mrb[135].mxu1  ;;  %14862 = vmatpush3.bf16.xpose.msk.msra.mxu1 %vm16951_vm2, %v14857_v32  ;;  %6551 = vrot.lane.b32.xlu0 %v18922_v29, %s16543_s17 }
 0xd16   : > { %14865 = vmatprep.subr.msk.bf16.mxu1 %vm16951_vm2, %v14863_v18  ;;  %v14869_v37 = vpack.c.bf16 %v13798_v9, %v6410_v63  ;;  %v18962_v41 = vpack.i.bf16 %v13798_v9, %v6410_v63 }
 0xd18   : > { %6553 = vrot.lane.b32.xlu1 %v18890_v7, %s21062_s27 }
 0xd19   : > { %15581 = vrot.lane.b32.xlu0 %v18934_v39, %s21065_s30 }
 0xd1c   : > { %6555 = vrot.lane.b32.xlu1 %v18886_v11, %s21062_s27 }
 0xd1d   : > { %14868 = vmatpush3.bf16.xpose.msk.msra.mxu1 %vm16951_vm2, %v14863_v18  ;;  %6569 = vrot.lane.b32.xlu0 %v18890_v7, %s21063_s29 }
 0xd1e   : > { %14871 = vmatprep.subr.msk.bf16.mxu1 %vm16951_vm2, %v14869_v37 }
 0xd20   : > { %6571 = vrot.lane.b32.xlu1 %v18886_v11, %s21063_s29 }
 0xd21   : > { %15586 = vrot.lane.b32.xlu0 %v18944_v14, %s21062_s27 }
 0xd24   : > { %15591 = vrot.lane.b32.xlu1 %v18944_v14, %s21063_s29 }
 0xd25   : > { %14874 = vmatpush3.bf16.xpose.msk.msra.mxu1 %vm16951_vm2, %v14869_v37  ;;  %15596 = vrot.lane.b32.xlu0 %v18944_v14, %s21064_s23 }
 0xd28   : > { %15601 = vrot.lane.b32.xlu1 %v18944_v14, %s21065_s30 }
 0xd29   : > { %15611 = vrot.lane.b32.xlu0 %v18952_v0, %s21062_s27 }
 0xd2c   : > { %15606 = vrot.lane.b32.xlu1 %v18952_v0, %s16543_s17  ;;  %13836 = vmatmul.mubr.msk.f32.vlgmr.msra.gmra.mrb[136].mxu1 %vm1475_vm1, %v18886_v11 }
 0xd2d   : > { %13838 = vmatprep.mubr.msk.f32.mxu1 %vm1475_vm1, %v18902_v48  ;;  %15621 = vrot.lane.b32.xlu0 %v18952_v0, %s21064_s23 }
 0xd30   : > { %15616 = vrot.lane.b32.xlu1 %v18952_v0, %s21063_s29  ;;  %13839 = vmatmul.mubr.msk.f32.gmra.mrb[138].mxu1 %vm1475_vm1, %v18900_v62 }
 0xd31   : > { %13841 = vmatprep.mubr.msk.f32.mxu1 %vm1475_vm1, %v18914_v12  ;;  %6557 = vrot.lane.b32.xlu0 %v18902_v48, %s21062_s27 }
 0xd34   : > { %15626 = vrot.lane.b32.xlu1 %v18962_v41, %s16543_s17  ;;  %13842 = vmatmul.mubr.msk.f32.gmra.mrb[140].mxu1 %vm1475_vm1, %v18910_v13 }
 0xd35   : > { %13844 = vmatprep.mubr.msk.f32.mxu1 %vm1475_vm1, %v18924_v56  ;;  %6573 = vrot.lane.b32.xlu0 %v18902_v48, %s21063_s29 }
 0xd38   : > { %15631 = vrot.lane.b32.xlu1 %v18952_v0, %s21065_s30  ;;  %13845 = vmatmul.mubr.msk.f32.gmra.mrb[142].mxu1 %vm1475_vm1, %v18922_v29 }
 0xd39   : > { %6575 = vrot.lane.b32.xlu0 %v18900_v62, %s21063_s29 }
 0xd3c   : > { %6559 = vrot.lane.b32.xlu1 %v18900_v62, %s21062_s27 }
 0xd3d   : > { %6577 = vrot.lane.b32.xlu0 %v18914_v12, %s21063_s29 }
 0xd40   : > { %6561 = vrot.lane.b32.xlu1 %v18914_v12, %s21062_s27 }
 0xd41   : > { %6565 = vrot.lane.b32.xlu0 %v18924_v56, %s21062_s27 }
 0xd44   : > { %6563 = vrot.lane.b32.xlu1 %v18910_v13, %s21062_s27 }
 0xd45   : > { %6581 = vrot.lane.b32.xlu0 %v18924_v56, %s21063_s29 }
 0xd48   : > { %6579 = vrot.lane.b32.xlu1 %v18910_v13, %s21063_s29 }
 0xd49   : > { %6583 = vrot.lane.b32.xlu0 %v18922_v29, %s21063_s29 }
 0xd4c   : > { %6567 = vrot.lane.b32.xlu1 %v18922_v29, %s21062_s27 }
 0xd4d   : > { %15651 = vrot.lane.b32.xlu0 %v18934_v39, %s21066_s16 }
 0xd50   : > { %15636 = vrot.lane.b32.xlu1 %v18962_v41, %s21062_s27 }
 0xd51   : > { %6601 = vrot.lane.b32.xlu0 %v18890_v7, %s21065_s30 }
 0xd54   : > { %15641 = vrot.lane.b32.xlu1 %v18962_v41, %s21063_s29 }
 0xd55   : > { %15656 = vrot.lane.b32.xlu0 %v18944_v14, %s21067_s20 }
 0xd58   : > { %15646 = vrot.lane.b32.xlu1 %v18934_v39, %s21067_s20 }
 0xd59   : > { %15666 = vrot.lane.b32.xlu0 %v18952_v0, %s21067_s20 }
 0xd5c   : > { %6585 = vrot.lane.b32.xlu1 %v18890_v7, %s21064_s23 }
 0xd5d   : > { %6589 = vrot.lane.b32.xlu0 %v18902_v48, %s21064_s23 }
 0xd60   : > { %6587 = vrot.lane.b32.xlu1 %v18886_v11, %s21064_s23 }
 0xd61   : > { %15681 = vrot.lane.b32.xlu0 %v18962_v41, %s21065_s30 }
 0xd64   : > { %6603 = vrot.lane.b32.xlu1 %v18886_v11, %s21065_s30 }
 0xd65   : > { %6605 = vrot.lane.b32.xlu0 %v18902_v48, %s21065_s30 }
 0xd68   : > { %15661 = vrot.lane.b32.xlu1 %v18944_v14, %s21066_s16 }
 0xd69   : > { %6595 = vrot.lane.b32.xlu0 %v18910_v13, %s21064_s23  ;;  %v19085_v42 = vpop.permute.xlu1 %6539 }
 0xd6a   : > { %v6538_v52 = vpop.permute.xlu0 %6537 }
 0xd6b   : > { %13863 = vmatprep.mubr.msk.f32.mxu0 %vm1475_vm1, %v6538_v52 }
 0xd6c   : > { %15671 = vrot.lane.b32.xlu1 %v18952_v0, %s21066_s16 }
 0xd6d   : > { %6609 = vrot.lane.b32.xlu0 %v18914_v12, %s21065_s30 }
 0xd6f   : > { %v19073_v40 = vpop.permute.xlu0 %6543 }
 0xd70   : > { %6591 = vrot.lane.b32.xlu1 %v18900_v62, %s21064_s23 }
 0xd71   : > { %6597 = vrot.lane.b32.xlu0 %v18924_v56, %s21064_s23 }
 0xd73   : > { %v19079_v16 = vpop.permute.xlu0 %6541  ;;  %v19093_v26 = vpop.permute.xlu1 %6547 }
 0xd74   : > { %15676 = vrot.lane.b32.xlu1 %v18962_v41, %s21064_s23 }
 0xd75   : > { %6613 = vrot.lane.b32.xlu0 %v18924_v56, %s21065_s30 }
 0xd77   : > { %v19087_v6 = vpop.permute.xlu0 %6545 }
 0xd78   : > { %6607 = vrot.lane.b32.xlu1 %v18900_v62, %s21065_s30 }
 0xd79   : > { %6617 = vrot.lane.b32.xlu0 %v18890_v7, %s21067_s20 }
 0xd7b   : > { %v19095_v47 = vpop.permute.xlu0 %6549 }
 0xd7c   : > { %6593 = vrot.lane.b32.xlu1 %v18914_v12, %s21064_s23 }
 0xd7d   : > { %6633 = vrot.lane.b32.xlu0 %v18890_v7, %s21066_s16 }
 0xd7e   : > { %v15557_v8 = vpop.permute.xlu1 %15556 }
 0xd7f   : > { %v15559_v28 = vunpack.i.h.bf16 %v15557_v8  ;;  %v15558_v25 = vunpack.i.l.bf16 %v15557_v8  ;;  %v15562_v43 = vpop.permute.xlu0 %15561 }
 0xd80   : > { %v15564_v5 = vunpack.i.h.bf16 %v15562_v43  ;;  %v15563_v59 = vunpack.i.l.bf16 %v15562_v43  ;;  %6611 = vrot.lane.b32.xlu1 %v18910_v13, %s21065_s30 }
 0xd81   : > { %v14875_v30 = vpack.c.bf16 %v15559_v28, %v15558_v25  ;;  %15686 = vrot.lane.b32.xlu0 %v18962_v41, %s21067_s20 }
 0xd82   : > { %v14899_v3 = vpack.c.bf16 %v15564_v5, %v15563_v59  ;;  %v19105_v33 = vpop.permute.xlu1 %15566 }
 0xd83   : > { %14877 = vmatprep.subr.msk.bf16.mxu0 %vm16951_vm2, %v14875_v30  ;;  %v15577_v53 = vpop.permute.xlu0 %15576  ;;  %v15569_v8 = vunpack.i.h.bf16 %v19105_v33  ;;  %v15568_v28 = vunpack.i.l.bf16 %v19105_v33 }
 0xd84   : > { %v15579_v7 = vunpack.i.h.bf16 %v15577_v53  ;;  %v15578_v50 = vunpack.i.l.bf16 %v15577_v53  ;;  %6599 = vrot.lane.b32.xlu1 %v18922_v29, %s21064_s23  ;;  %14880 = vmatpush3.bf16.xpose.msk.msra.mxu0 %vm16951_vm2, %v14875_v30 }
 0xd85   : > { %14901 = vmatprep.subr.msk.bf16.mxu1 %vm16951_vm2, %v14899_v3  ;;  %6621 = vrot.lane.b32.xlu0 %v18902_v48, %s21067_s20  ;;  %v14923_v30 = vpack.c.bf16 %v15569_v8, %v15568_v28 }
 0xd86   : > { %v14881_v17 = vpack.c.bf16 %v15579_v7, %v15578_v50  ;;  %14904 = vmatpush3.bf16.xpose.msk.msra.mxu1 %vm16951_vm2, %v14899_v3  ;;  %v19119_v49 = vpop.permute.xlu1 %15571 }
 0xd87   : > { %v19121_v10 = vpop.permute.xlu0 %6551 }
 0xd88   : > { %6615 = vrot.lane.b32.xlu1 %v18922_v29, %s21065_s30  ;;  %14883 = vmatprep.subr.msk.bf16.mxu0 %vm16951_vm2, %v14881_v17 }
 0xd89   : > { %6637 = vrot.lane.b32.xlu0 %v18902_v48, %s21066_s16 }
 0xd8a   : > { %v6554_v58 = vpop.permute.xlu1 %6553 }
 0xd8b   : > { %13891 = vmatprep.mubr.msk.f32.mxu1 %vm1475_vm1, %v6554_v58  ;;  %v19130_v4 = vpop.permute.xlu0 %15581 }
 0xd8c   : > { %6619 = vrot.lane.b32.xlu1 %v18886_v11, %s21067_s20  ;;  %14886 = vmatpush3.bf16.xpose.msk.msra.mxu0 %vm16951_vm2, %v14881_v17 }
 0xd8d   : > { %6625 = vrot.lane.b32.xlu0 %v18914_v12, %s21067_s20 }
 0xd8e   : > { %v19138_v2 = vpop.permute.xlu1 %6555 }
 0xd8f   : > { %v19140_v23 = vpop.permute.xlu0 %6569 }
 0xd90   : > { %6635 = vrot.lane.b32.xlu1 %v18886_v11, %s21066_s16 }
 0xd91   : > { %6641 = vrot.lane.b32.xlu0 %v18914_v12, %s21066_s16 }
 0xd92   : > { %v19146_v48 = vpop.permute.xlu1 %6571 }
 0xd93   : > { %v15587_v39 = vpop.permute.xlu0 %15586 }
 0xd94   : > { %v15589_v22 = vunpack.i.h.bf16 %v15587_v39  ;;  %v15588_v51 = vunpack.i.l.bf16 %v15587_v39  ;;  %15691 = vrot.lane.b32.xlu1 %v18962_v41, %s21066_s16 }
 0xd95   : > { %6629 = vrot.lane.b32.xlu0 %v18924_v56, %s21067_s20 }
 0xd96   : > { %v14905_v31 = vpack.c.bf16 %v15589_v22, %v15588_v51  ;;  %v15592_v32 = vpop.permute.xlu1 %15591 }
 0xd97   : > { %v19152_v14 = vpop.permute.xlu0 %15596  ;;  %v15594_v7 = vunpack.i.h.bf16 %v15592_v32  ;;  %v15593_v50 = vunpack.i.l.bf16 %v15592_v32  ;;  %v15574_v32 = vunpack.i.h.bf16 %v19119_v49 }
 0xd98   : > { %6623 = vrot.lane.b32.xlu1 %v18900_v62, %s21067_s20  ;;  %14907 = vmatprep.subr.msk.bf16.mxu1 %vm16951_vm2, %v14905_v31 }
 0xd99   : > { %6645 = vrot.lane.b32.xlu0 %v18924_v56, %s21066_s16  ;;  %14910 = vmatpush3.bf16.xpose.msk.msra.mxu1 %vm16951_vm2, %v14905_v31  ;;  %v14929_v58 = vpack.c.bf16 %v15594_v7, %v15593_v50 }
 0xd9a   : > { %v19162_v11 = vpop.permute.xlu1 %15601 }
 0xd9b   : > { %v15612_v12 = vpop.permute.xlu0 %15611  ;;  %v15603_v50 = vunpack.i.l.bf16 %v19162_v11 }
 0xd9c   : > { %v15614_v21 = vunpack.i.h.bf16 %v15612_v12  ;;  %v15613_v46 = vunpack.i.l.bf16 %v15612_v12  ;;  %6639 = vrot.lane.b32.xlu1 %v18900_v62, %s21066_s16  ;;  %v15573_v12 = vunpack.i.l.bf16 %v19119_v49 }
 0xd9d   : > { %15706 = vrot.lane.b32.xlu0 %v18918_v36, %s16543_s17 }
 0xd9e   : > { %v14911_v18 = vpack.c.bf16 %v15614_v21, %v15613_v46  ;;  %v15607_v0 = vpop.permute.xlu1 %15606 }
 0xd9f   : > { %v15609_v9 = vunpack.i.h.bf16 %v15607_v0  ;;  %v15608_v63 = vunpack.i.l.bf16 %v15607_v0  ;;  %v19168_v37 = vpop.permute.xlu0 %15621  ;;  %v14947_v0 = vpack.c.bf16 %v15574_v32, %v15573_v12 }
 0xda0   : > { %6627 = vrot.lane.b32.xlu1 %v18910_v13, %s21067_s20  ;;  %14913 = vmatprep.subr.msk.bf16.mxu1 %vm16951_vm2, %v14911_v18 }
 0xda1   : > { %v14887_v56 = vpack.c.bf16 %v15609_v9, %v15608_v63  ;;  %15716 = vrot.lane.b32.xlu0 %v18896_v57, %s21062_s27  ;;  %14916 = vmatpush3.bf16.xpose.msk.msra.mxu1 %vm16951_vm2, %v14911_v18 }
 0xda2   : > { %v15617_v62 = vpop.permute.xlu1 %15616 }
 0xda3   : > { %14889 = vmatprep.subr.msk.bf16.mxu0 %vm16951_vm2, %v14887_v56  ;;  %v19180_v41 = vpop.permute.xlu0 %6557  ;;  %v15619_v22 = vunpack.i.h.bf16 %v15617_v62  ;;  %v15618_v51 = vunpack.i.l.bf16 %v15617_v62  ;;  %v15583_v62 = vunpack.i.l.bf16 %v19130_v4 }
 0xda4   : > { %6643 = vrot.lane.b32.xlu1 %v18910_v13, %s21066_s16  ;;  %14892 = vmatpush3.bf16.xpose.msk.msra.mxu0 %vm16951_vm2, %v14887_v56  ;;  %v15584_v56 = vunpack.i.h.bf16 %v19130_v4  ;;  %v15599_v4 = vunpack.i.h.bf16 %v19152_v14 }
 0xda5   : > { %15726 = vrot.lane.b32.xlu0 %v18906_v34, %s21062_s27 }
 0xda6   : > { %v15627_v52 = vpop.permute.xlu1 %15626 }
 0xda7   : > { %v15629_v25 = vunpack.i.h.bf16 %v15627_v52  ;;  %v15628_v43 = vunpack.i.l.bf16 %v15627_v52  ;;  %v19190_v5 = vpop.permute.xlu0 %6573 }
 0xda8   : > { %6631 = vrot.lane.b32.xlu1 %v18922_v29, %s21067_s20 }
 0xda9   : > { %v14893_v59 = vpack.c.bf16 %v15629_v25, %v15628_v43  ;;  %15736 = vrot.lane.b32.xlu0 %v18918_v36, %s21062_s27  ;;  %v14971_v25 = vpack.c.bf16 %v15584_v56, %v15583_v62  ;;  %v15598_v43 = vunpack.i.l.bf16 %v19152_v14  ;;  %v15604_v14 = vunpack.i.h.bf16 %v19162_v11 }
 0xdaa   : > { %v19196_v13 = vpop.permute.xlu1 %15631  ;;  %v15624_v11 = vunpack.i.h.bf16 %v19168_v37 }
 0xdab   : > { %14895 = vmatprep.subr.msk.bf16.mxu0 %vm16951_vm2, %v14893_v59  ;;  %v19200_v3 = vpop.permute.xlu0 %6575  ;;  %v14953_v7 = vpack.c.bf16 %v15599_v4, %v15598_v43 }
 0xdac   : > { %6647 = vrot.lane.b32.xlu1 %v18922_v29, %s21066_s16  ;;  %14898 = vmatpush3.bf16.xpose.msk.msra.mxu0 %vm16951_vm2, %v14893_v59 }
 0xdad   : > { %14925 = vmatprep.subr.msk.bf16.mxu0 %vm16951_vm2, %v14923_v30  ;;  %15746 = vrot.lane.b32.xlu0 %v18928_v44, %s21062_s27  ;;  %s502_s27 = scalar_lea.vmem [#allocation5], %s11616_s25  ;;  %s16550_s25 = smov [#allocation5]  }
 0xdae   : > { %v19210_v33 = vpop.permute.xlu1 %6559  ;;  %s16475_s26 = sshll.u32 %s16550_s25, 4  ;;  %s16476_s26 = int_to_ptr.vmem [resolvable:$false] %s16475_s26 }
 0xdaf   : > { %v19212_v53 = vpop.permute.xlu0 %6577  ;;  %s16477_s18 = scalar_lea.vmem %s16476_s26, 2048 }
 0xdb0   : > { %15696 = vrot.lane.b32.xlu1 %v18896_v57, %s16543_s17 }
 0xdb1   : > { %15756 = vrot.lane.b32.xlu0 %v18896_v57, %s21064_s23 }
 0xdb2   : > { %v19218_v29 = vpop.permute.xlu1 %6561 }
 0xdb3   : > { %13864 = vmatmul.mubr.msk.f32.vlgmr.msra.gmra.mrb[120].mxu0 %vm1475_vm1, %v19085_v42  ;;  %v19222_v17 = vpop.permute.xlu0 %6565 }
 0xdb4   : > { %15701 = vrot.lane.b32.xlu1 %v18906_v34, %s16543_s17  ;;  %13866 = vmatprep.mubr.msk.f32.mxu0 %vm1475_vm1, %v19079_v16 }
 0xdb5   : > { %14928 = vmatpush3.bf16.xpose.msk.msra.mxu0 %vm16951_vm2, %v14923_v30  ;;  %15766 = vrot.lane.b32.xlu0 %v18906_v34, %s21064_s23 }
 0xdb6   : > { %14931 = vmatprep.subr.msk.bf16.mxu0 %vm16951_vm2, %v14929_v58  ;;  %v19234_v39 = vpop.permute.xlu1 %6563 }
 0xdb7   : > { %13867 = vmatmul.mubr.msk.f32.gmra.mrb[122].mxu0 %vm1475_vm1, %v19073_v40  ;;  %v19238_v42 = vpop.permute.xlu0 %6581  ;;  %v14935_v40 = vpack.c.bf16 %v15619_v22, %v15618_v51  ;;  %v15623_v22 = vunpack.i.l.bf16 %v19168_v37 }
 0xdb8   : > { %15711 = vrot.lane.b32.xlu1 %v18928_v44, %s16543_s17  ;;  %13869 = vmatprep.mubr.msk.f32.mxu0 %vm1475_vm1, %v19087_v6 }
 0xdb9   : > { %15776 = vrot.lane.b32.xlu0 %v18918_v36, %s21064_s23  ;;  %v14959_v37 = vpack.c.bf16 %v15624_v11, %v15623_v22 }
 0xdba   : > { %v19246_v16 = vpop.permute.xlu1 %6579 }
 0xdbb   : > { %13870 = vmatmul.mubr.msk.f32.gmra.mrb[124].mxu0 %vm1475_vm1, %v19093_v26  ;;  %v19250_v31 = vpop.permute.xlu0 %6583 }
 0xdbc   : > { %15721 = vrot.lane.b32.xlu1 %v18896_v57, %s21063_s29  ;;  %13872 = vmatprep.mubr.msk.f32.mxu0 %vm1475_vm1, %v19095_v47 }
 0xdbd   : > { %14934 = vmatpush3.bf16.xpose.msk.msra.mxu0 %vm16951_vm2, %v14929_v58  ;;  %15786 = vrot.lane.b32.xlu0 %v18928_v44, %s21064_s23  ;;  %s11536_s23 = sshll.u32 %s502_s27, 4  ;;  %s20727_s23 = int_to_ptr.vmem [resolvable:$true] %s11536_s23 }
 0xdbe   : > { %14937 = vmatprep.subr.msk.bf16.mxu0 %vm16951_vm2, %v14935_v40  ;;  %v19262_v6 = vpop.permute.xlu1 %6567  ;;  %s16471_s17 = scalar_lea.vmem %s20727_s23, 1024  ;;  %p16478_p2 = scmp.lt.s32.totalorder %s20727_s23, %s16476_s26 }
 0xdbf   : > { %13873 = vmatmul.mubr.msk.f32.gmra.mrb[126].mxu0 %vm1475_vm1, %v19121_v10  ;;  %v19266_v26 = vpop.permute.xlu0 %15651  ;;  %p16472_p6 = scmp.ne.s32.totalorder %s20727_s23, %s16471_s17  ;;  %p16479_p3 = scmp.lt.s32.totalorder %s16477_s18, %s16471_s17 }
 0xdc0   : > { %15731 = vrot.lane.b32.xlu1 %v18906_v34, %s21063_s29  ;;  %13919 = vmatprep.mubr.msk.f32.mxu0 %vm1475_vm1, %v19140_v23 }
 0xdc1   : > { %15796 = vrot.lane.b32.xlu0 %v18896_v57, %s21067_s20  ;;  %p16473_p10 = pnand %p16472_p6, %p21168_p9  ;;  %p16480_p4 = por %p16479_p3, %p16478_p2 }
 0xdc2   : > { %v15637_v47 = vpop.permute.xlu1 %15636 }
 0xdc3   : > { %v15639_v21 = vunpack.i.h.bf16 %v15637_v47  ;;  %v15638_v46 = vunpack.i.l.bf16 %v15637_v47  ;;  %v19276_v18 = vpop.permute.xlu0 %6601  ;;  %p16474_p12 = pneg %p16473_p10 }
 0xdc4   : > { %15741 = vrot.lane.b32.xlu1 %v18918_v36, %s21063_s29 }
 0xdc5   : > { %v14917_v10 = vpack.c.bf16 %v15639_v21, %v15638_v46  ;;  %14940 = vmatpush3.bf16.xpose.msk.msra.mxu0 %vm16951_vm2, %v14935_v40  ;;  %15806 = vrot.lane.b32.xlu0 %v18906_v34, %s21067_s20  ;;  %v15654_v21 = vunpack.i.h.bf16 %v19266_v26  ;;  %v15653_v46 = vunpack.i.l.bf16 %v19266_v26  ;;  %p16481_p7 = pnand %p16480_p4, %p16474_p12 }
 0xdc6   : > { %v15642_v23 = vpop.permute.xlu1 %15641 }
 0xdc7   : > { %v15644_v9 = vunpack.i.h.bf16 %v15642_v23  ;;  %v15643_v63 = vunpack.i.l.bf16 %v15642_v23  ;;  %14919 = vmatprep.subr.msk.bf16.mxu1 %vm16951_vm2, %v14917_v10  ;;  %v19286_v49 = vpop.permute.xlu0 %15656 }
 0xdc8   : > { %15751 = vrot.lane.b32.xlu1 %v18928_v44, %s21063_s29  ;;  %14922 = vmatpush3.bf16.xpose.msk.msra.mxu1 %vm16951_vm2, %v14917_v10  ;;  %v15659_v26 = vunpack.i.h.bf16 %v19286_v49  ;;  %v15658_v56 = vunpack.i.l.bf16 %v19286_v49  ;;  %s12274_s29 = sshll.u32 %s16654_s22, 10  ;;  %s20733_s22 = scalar_lea.sflag [#allocation4], %s500_s24 }
 0xdc9   : > { %v14941_v52 = vpack.c.bf16 %v15644_v9, %v15643_v63  ;;  %14949 = vmatprep.subr.msk.bf16.mxu1 %vm16951_vm2, %v14947_v0  ;;  %v15019_v9 = vpack.c.bf16 %v15654_v21, %v15653_v46 }
 0xdca   : > { %v19296_v8 = vpop.permute.xlu1 %15646  ;;  %v15001_v4 = vpack.c.bf16 %v15659_v26, %v15658_v56 }
 0xdcb   : > { %14943 = vmatprep.subr.msk.bf16.mxu0 %vm16951_vm2, %v14941_v52  ;;  %v19300_v28 = vpop.permute.xlu0 %15666  ;;  %v15648_v47 = vunpack.i.l.bf16 %v19296_v8 }
 0xdcc   : > { %15761 = vrot.lane.b32.xlu1 %v18896_v57, %s21065_s30 }
 0xdcd   : > { %14946 = vmatpush3.bf16.xpose.msk.msra.mxu0 %vm16951_vm2, %v14941_v52 }
 0xdce   : > { %14973 = vmatprep.subr.msk.bf16.mxu0 %vm16951_vm2, %v14971_v25  ;;  %v6586_v59 = vpop.permute.xlu1 %6585 }
 0xdcf   : > { %13892 = vmatmul.mubr.msk.f32.vlgmr.msra.gmra.mrb[144].mxu1 %vm1475_vm1, %v19138_v2  ;;  %v19312_v30 = vpop.permute.xlu0 %6589 }
 0xdd0   : > { %15771 = vrot.lane.b32.xlu1 %v18906_v34, %s21065_s30  ;;  %13894 = vmatprep.mubr.msk.f32.mxu1 %vm1475_vm1, %v19180_v41  ;;  %v14977_v41 = vpack.c.bf16 %v15604_v14, %v15603_v50 }
 0xdd1   : > { %14952 = vmatpush3.bf16.xpose.msk.msra.mxu1 %vm16951_vm2, %v14947_v0 }
 0xdd2   : > { %14955 = vmatprep.subr.msk.bf16.mxu1 %vm16951_vm2, %v14953_v7  ;;  %v19324_v2 = vpop.permute.xlu1 %6587 }
 0xdd3   : > { %13895 = vmatmul.mubr.msk.f32.gmra.mrb[146].mxu1 %vm1475_vm1, %v19210_v33  ;;  %v15682_v58 = vpop.permute.xlu0 %15681 }
 0xdd4   : > { %13920 = vmatmul.mubr.msk.f32.vlgmr.msra.gmra.mrb[128].mxu0 %vm1475_vm1, %v19146_v48  ;;  %15781 = vrot.lane.b32.xlu1 %v18918_v36, %s21065_s30  ;;  %v15683_v51 = vunpack.i.l.bf16 %v15682_v58 }
 0xdd5   : > { %13897 = vmatprep.mubr.msk.f32.mxu1 %vm1475_vm1, %v19218_v29  ;;  %13922 = vmatprep.mubr.msk.f32.mxu0 %vm1475_vm1, %v19190_v5  ;;  %v15634_v5 = vunpack.i.h.bf16 %v19196_v13  ;;  %v15633_v29 = vunpack.i.l.bf16 %v19196_v13 }
 0xdd6   : > { %14976 = vmatpush3.bf16.xpose.msk.msra.mxu0 %vm16951_vm2, %v14971_v25  ;;  %v19340_v33 = vpop.permute.xlu1 %6603 }
 0xdd7   : > { %14979 = vmatprep.subr.msk.bf16.mxu0 %vm16951_vm2, %v14977_v41  ;;  %13898 = vmatmul.mubr.msk.f32.gmra.mrb[148].mxu1 %vm1475_vm1, %v19234_v39  ;;  %v19346_v48 = vpop.permute.xlu0 %6605  ;;  %v14983_v13 = vpack.c.bf16 %v15634_v5, %v15633_v29 }
 0xdd8   : > { %13923 = vmatmul.mubr.msk.f32.gmra.mrb[130].mxu0 %vm1475_vm1, %v19200_v3  ;;  %15791 = vrot.lane.b32.xlu1 %v18928_v44, %s21065_s30 }
 0xdd9   : > { %13900 = vmatprep.mubr.msk.f32.mxu1 %vm1475_vm1, %v19222_v17  ;;  %13925 = vmatprep.mubr.msk.f32.mxu0 %vm1475_vm1, %v19212_v53 }
 0xdda   : > { %14958 = vmatpush3.bf16.xpose.msk.msra.mxu1 %vm16951_vm2, %v14953_v7  ;;  %v15662_v39 = vpop.permute.xlu1 %15661  ;;  %v15669_v7 = vunpack.i.h.bf16 %v19300_v28 }
 0xddb   : > { %14961 = vmatprep.subr.msk.bf16.mxu1 %vm16951_vm2, %v14959_v37  ;;  %13901 = vmatmul.mubr.msk.f32.gmra.mrb[150].mxu1 %vm1475_vm1, %v19262_v6  ;;  %v19364_v3 = vpop.permute.xlu0 %6595  ;;  %v15664_v52 = vunpack.i.h.bf16 %v15662_v39 }
 0xddc   : > { %13926 = vmatmul.mubr.msk.f32.gmra.mrb[132].mxu0 %vm1475_vm1, %v19246_v16  ;;  %15801 = vrot.lane.b32.xlu1 %v18896_v57, %s21066_s16  ;;  %v15684_v57 = vunpack.i.h.bf16 %v15682_v58 }
 0xddd   : > { %13928 = vmatprep.mubr.msk.f32.mxu0 %vm1475_vm1, %v19238_v42  ;;  %13947 = vmatprep.mubr.msk.f32.mxu1 %vm1475_vm1, %v6586_v59 }
 0xdde   : > { %14982 = vmatpush3.bf16.xpose.msk.msra.mxu0 %vm16951_vm2, %v14977_v41  ;;  %v19375_v53 = vpop.permute.xlu1 %15671  ;;  %v14989_v40 = vpack.c.bf16 %v15684_v57, %v15683_v51 }
 0xddf   : > { %14985 = vmatprep.subr.msk.bf16.mxu0 %vm16951_vm2, %v14983_v13  ;;  %v6610_v17 = vpop.permute.xlu0 %6609  ;;  %v15674_v50 = vunpack.i.h.bf16 %v19375_v53 }
 0xde0   : > { %13929 = vmatmul.mubr.msk.f32.gmra.mrb[134].mxu0 %vm1475_vm1, %v19250_v31  ;;  %15811 = vrot.lane.b32.xlu1 %v18906_v34, %s21066_s16  ;;  %v15649_v31 = vunpack.i.h.bf16 %v19296_v8  ;;  %v15663_v8 = vunpack.i.l.bf16 %v15662_v39 }
 0xde1   : > { %13975 = vmatprep.mubr.msk.f32.mxu0 %vm1475_vm1, %v19276_v18 }
 0xde2   : > { %14964 = vmatpush3.bf16.xpose.msk.msra.mxu1 %vm16951_vm2, %v14959_v37  ;;  %v6592_v42 = vpop.permute.xlu1 %6591  ;;  %v14995_v23 = vpack.c.bf16 %v15649_v31, %v15648_v47  ;;  %v15025_v59 = vpack.c.bf16 %v15664_v52, %v15663_v8 }
 0xde3   : > { %v6598_v16 = vpop.permute.xlu0 %6597 }
 0xde6   : > { %14988 = vmatpush3.bf16.xpose.msk.msra.mxu0 %vm16951_vm2, %v14983_v13  ;;  %v15677_v6 = vpop.permute.xlu1 %15676 }
 0xde7   : > { %14991 = vmatprep.subr.msk.bf16.mxu0 %vm16951_vm2, %v14989_v40  ;;  %v15679_v34 = vunpack.i.h.bf16 %v15677_v6  ;;  %v15678_v32 = vunpack.i.l.bf16 %v15677_v6  ;;  %v6614_v12 = vpop.permute.xlu0 %6613 }
 0xde9   : > { %v14965_v18 = vpack.c.bf16 %v15679_v34, %v15678_v32 }
 0xdea   : > { %v6608_v10 = vpop.permute.xlu1 %6607 }
 0xdeb   : > { %14967 = vmatprep.subr.msk.bf16.mxu1 %vm16951_vm2, %v14965_v18  ;;  %v6618_v0 = vpop.permute.xlu0 %6617 }
 0xdec   : > { %14970 = vmatpush3.bf16.xpose.msk.msra.mxu1 %vm16951_vm2, %v14965_v18 }
 0xded   : > { %14997 = vmatprep.subr.msk.bf16.mxu1 %vm16951_vm2, %v14995_v23 }
 0xdee   : > { %14994 = vmatpush3.bf16.xpose.msk.msra.mxu0 %vm16951_vm2, %v14989_v40  ;;  %v6594_v63 = vpop.permute.xlu1 %6593 }
 0xdef   : > { %15021 = vmatprep.subr.msk.bf16.mxu0 %vm16951_vm2, %v15019_v9  ;;  %v6634_v62 = vpop.permute.xlu0 %6633 }
 0xdf2   : > { %v6612_v25 = vpop.permute.xlu1 %6611 }
 0xdf3   : > { %13948 = vmatmul.mubr.msk.f32.vlgmr.msra.gmra.mrb[152].mxu1 %vm1475_vm1, %v19324_v2  ;;  %v15687_v43 = vpop.permute.xlu0 %15686  ;;  %v15673_v2 = vunpack.i.l.bf16 %v19375_v53 }
 0xdf4   : > { %13950 = vmatprep.mubr.msk.f32.mxu1 %vm1475_vm1, %v19312_v30  ;;  %15000 = vmatpush3.bf16.xpose.msk.msra.mxu1 %vm16951_vm2, %v14995_v23  ;;  %v15668_v30 = vunpack.i.l.bf16 %v19300_v28  ;;  %v15689_v37 = vunpack.i.h.bf16 %v15687_v43  ;;  %v15688_v5 = vunpack.i.l.bf16 %v15687_v43 }
 0xdf5   : > { %13976 = vmatmul.mubr.msk.f32.vlgmr.msra.gmra.mrb[136].mxu0 %vm1475_vm1, %v19340_v33  ;;  %15003 = vmatprep.subr.msk.bf16.mxu1 %vm16951_vm2, %v15001_v4  ;;  %v15031_v11 = vpack.c.bf16 %v15674_v50, %v15673_v2 }
 0xdf6   : > { %13978 = vmatprep.mubr.msk.f32.mxu0 %vm1475_vm1, %v19346_v48  ;;  %15024 = vmatpush3.bf16.xpose.msk.msra.mxu0 %vm16951_vm2, %v15019_v9  ;;  %v6600_v49 = vpop.permute.xlu1 %6599  ;;  %v15007_v41 = vpack.c.bf16 %v15669_v7, %v15668_v30 }
 0xdf7   : > { %15027 = vmatprep.subr.msk.bf16.mxu0 %vm16951_vm2, %v15025_v59  ;;  %13951 = vmatmul.mubr.msk.f32.gmra.mrb[154].mxu1 %vm1475_vm1, %v6592_v42  ;;  %v19426_v14 = vpop.permute.xlu0 %6621  ;;  %v15013_v42 = vpack.c.bf16 %v15689_v37, %v15688_v5 }
 0xdf8   : > { %13953 = vmatprep.mubr.msk.f32.mxu1 %vm1475_vm1, %v6594_v63 }
 0xdf9   : > { %13979 = vmatmul.mubr.msk.f32.gmra.mrb[138].mxu0 %vm1475_vm1, %v6608_v10 }
 0xdfa   : > { %13981 = vmatprep.mubr.msk.f32.mxu0 %vm1475_vm1, %v6610_v17  ;;  %v6616_v58 = vpop.permute.xlu1 %6615 }
 0xdfb   : > { %13954 = vmatmul.mubr.msk.f32.gmra.mrb[156].mxu1 %vm1475_vm1, %v19364_v3  ;;  %v19435_v28 = vpop.permute.xlu0 %6637 }
 0xdfc   : > { %13956 = vmatprep.mubr.msk.f32.mxu1 %vm1475_vm1, %v6598_v16  ;;  %15006 = vmatpush3.bf16.xpose.msk.msra.mxu1 %vm16951_vm2, %v15001_v4 }
 0xdfd   : > { %13982 = vmatmul.mubr.msk.f32.gmra.mrb[140].mxu0 %vm1475_vm1, %v6612_v25  ;;  %15009 = vmatprep.subr.msk.bf16.mxu1 %vm16951_vm2, %v15007_v41 }
 0xdfe   : > { %13984 = vmatprep.mubr.msk.f32.mxu0 %vm1475_vm1, %v6614_v12  ;;  %15030 = vmatpush3.bf16.xpose.msk.msra.mxu0 %vm16951_vm2, %v15025_v59  ;;  %v6620_v22 = vpop.permute.xlu1 %6619 }
 0xdff   : > { %15033 = vmatprep.subr.msk.bf16.mxu0 %vm16951_vm2, %v15031_v11  ;;  %v13837_v33 = vpop.f32.mrb[136].mxu1  ;;  %13957 = vmatmul.mubr.msk.f32.gmra.mrb[158].mxu1 %vm1475_vm1, %v6600_v49  ;;  %v19449_v48 = vpop.permute.xlu0 %6625 }
 0xe00   : > { %v19451_v29 = vmul.f32 0.5, %v13837_v33  ;;  %v7043_v39 = vpop.f32.mrb[137].mxu1  ;;  %14003 = vmatprep.mubr.msk.f32.mxu1 %vm1475_vm1, %v6618_v0 }
 0xe01   : > { %13985 = vmatmul.mubr.msk.f32.gmra.mrb[142].mxu0 %vm1475_vm1, %v6616_v58  ;;  %v19455_v3 = vmul.f32 0.5, %v7043_v39 }
 0xe02   : > { %14031 = vmatprep.mubr.msk.f32.mxu0 %vm1475_vm1, %v6634_v62  ;;  %v6636_v13 = vpop.permute.xlu1 %6635  ;;  %v8108_v53 = vsel %vm2636_vm3, %v19451_v29, -inf }
 0xe03   : > { %v13840_v17 = vpop.f32.mrb[138].mxu1  ;;  %v6642_v57 = vpop.permute.xlu0 %6641  ;;  %v8105_v51 = vsel %vm2636_vm3, %v19455_v3, -inf }
 0xe04   : > { %v19462_v16 = vmul.f32 0.5, %v13840_v17  ;;  %8106 = vmax.xlane.f32.xlu0 %v8105_v51  ;;  %v7053_v40 = vpop.f32.mrb[139].mxu1  ;;  %8109 = vmax.xlane.f32.xlu1 %v8108_v53 }
 0xe05   : > { %v19464_v6 = vmul.f32 0.5, %v7053_v40  ;;  %15012 = vmatpush3.bf16.xpose.msk.msra.mxu1 %vm16951_vm2, %v15007_v41 }
 0xe06   : > { %15036 = vmatpush3.bf16.xpose.msk.msra.mxu0 %vm16951_vm2, %v15031_v11  ;;  %15015 = vmatprep.subr.msk.bf16.mxu1 %vm16951_vm2, %v15013_v42  ;;  %v15692_v31 = vpop.permute.xlu1 %15691  ;;  %v8114_v47 = vsel %vm2636_vm3, %v19462_v16, -inf }
 0xe07   : > { %v15694_v34 = vunpack.i.h.bf16 %v15692_v31  ;;  %v15693_v32 = vunpack.i.l.bf16 %v15692_v31  ;;  %v13843_v12 = vpop.f32.mrb[140].mxu1  ;;  %v8111_v21 = vsel %vm2636_vm3, %v19464_v6, -inf  ;;  %v6630_v18 = vpop.permute.xlu0 %6629 }
 0xe08   : > { %v19476_v46 = vmul.f32 0.5, %v13843_v12  ;;  %8115 = vmax.xlane.f32.xlu0 %v8114_v47  ;;  %v7063_v10 = vpop.f32.mrb[141].mxu1  ;;  %8112 = vmax.xlane.f32.xlu1 %v8111_v21 }
 0xe09   : > { %v15037_v23 = vpack.c.bf16 %v15694_v34, %v15693_v32  ;;  %v19478_v0 = vmul.f32 0.5, %v7063_v10 }
 0xe0a   : > { %v6624_v9 = vpop.permute.xlu1 %6623  ;;  %v8120_v63 = vsel %vm2636_vm3, %v19476_v46, -inf }
 0xe0b   : > { %v13846_v26 = vpop.f32.mrb[142].mxu1  ;;  %15039 = vmatprep.subr.msk.bf16.mxu0 %vm16951_vm2, %v15037_v23  ;;  %v8117_v56 = vsel %vm2636_vm3, %v19478_v0, -inf  ;;  %v6646_v25 = vpop.permute.xlu0 %6645 }
 0xe0c   : > { %v19486_v62 = vmul.f32 0.5, %v13846_v26  ;;  %8121 = vmax.xlane.f32.xlu0 %v8120_v63  ;;  %v7073_v52 = vpop.f32.mrb[143].mxu1  ;;  %8118 = vmax.xlane.f32.xlu1 %v8117_v56 }
 0xe0d   : > { %v19488_v8 = vmul.f32 0.5, %v7073_v52  ;;  %15018 = vmatpush3.bf16.xpose.msk.msra.mxu1 %vm16951_vm2, %v15013_v42 }
 0xe0e   : > { %15042 = vmatpush3.bf16.xpose.msk.msra.mxu0 %vm16951_vm2, %v15037_v23  ;;  %15044 = vmatprep.subr.bf16.mxu1 %v18898_v15  ;;  %v6640_v4 = vpop.permute.xlu1 %6639  ;;  %v8126_v43 = vsel %vm2636_vm3, %v19486_v62, -inf }
 0xe0f   : > { %v8123_v59 = vsel %vm2636_vm3, %v19488_v8, -inf  ;;  %v15707_v7 = vpop.permute.xlu0 %15706 }
 0xe10   : > { %8127 = vmax.xlane.f32.xlu0 %v8126_v43  ;;  %8124 = vmax.xlane.f32.xlu1 %v8123_v59  ;;  %v15709_v33 = vunpack.i.h.bf16 %v15707_v7 }
 0xe12   : > { %v6628_v49 = vpop.permute.xlu1 %6627 }
 0xe13   : > { %v15717_v30 = vpop.permute.xlu0 %15716 }
 0xe14   : > { %14004 = vmatmul.mubr.msk.f32.vlgmr.msra.gmra.mrb[160].mxu1 %vm1475_vm1, %v6620_v22  ;;  %v15718_v50 = vunpack.i.l.bf16 %v15717_v30 }
 0xe15   : > { %14032 = vmatmul.mubr.msk.f32.vlgmr.msra.gmra.mrb[144].mxu0 %vm1475_vm1, %v6636_v13  ;;  %14006 = vmatprep.mubr.msk.f32.mxu1 %vm1475_vm1, %v19426_v14 }
 0xe16   : > { %14034 = vmatprep.mubr.msk.f32.mxu0 %vm1475_vm1, %v19435_v28  ;;  %15046 = vmatpush3.bf16.msra.mxu1 %v18898_v15  ;;  %v6644_v61 = vpop.permute.xlu1 %6643  ;;  %v15719_v15 = vunpack.i.h.bf16 %v15717_v30 }
 0xe17   : > { %15048 = vmatprep.subr.bf16.mxu1 %v18908_v35 }
 0xe18   : > { %14007 = vmatmul.mubr.msk.f32.gmra.mrb[162].mxu1 %vm1475_vm1, %v6624_v9  ;;  %v19535_v9 = vpop.permute.xlu0 %15726 }
 0xe19   : > { %14035 = vmatmul.mubr.msk.f32.gmra.mrb[146].mxu0 %vm1475_vm1, %v6640_v4  ;;  %14009 = vmatprep.mubr.msk.f32.mxu1 %vm1475_vm1, %v19449_v48 }
 0xe1a   : > { %14037 = vmatprep.mubr.msk.f32.mxu0 %vm1475_vm1, %v6642_v57  ;;  %15050 = vmatpush3.bf16.msra.mxu1 %v18908_v35  ;;  %v6632_v14 = vpop.permute.xlu1 %6631  ;;  %v19522_v35 = vpack.c.bf16 %v15719_v15, %v15718_v50 }
 0xe1b   : > { %15052 = vmatprep.subr.bf16.mxu1 %v18920_v60 }
 0xe1c   : > { %14010 = vmatmul.mubr.msk.f32.gmra.mrb[164].mxu1 %vm1475_vm1, %v6628_v49  ;;  %21068 = vst [vmem:[#allocation21_spill] sm:$0xff] %v19522_v35  ;;  %v19539_v52 = vpop.permute.xlu0 %15736 }
 0xe1d   : > { %14038 = vmatmul.mubr.msk.f32.gmra.mrb[148].mxu0 %vm1475_vm1, %v6644_v61  ;;  %14012 = vmatprep.mubr.msk.f32.mxu1 %vm1475_vm1, %v6630_v18  ;;  %21072 = vst [vmem:[#allocation36_spill] sm:$0xff] %v19539_v52 }
 0xe1e   : > { %14040 = vmatprep.mubr.msk.f32.mxu0 %vm1475_vm1, %v6646_v25  ;;  %15054 = vmatpush3.bf16.msra.mxu1 %v18920_v60  ;;  %v6648_v2 = vpop.permute.xlu1 %6647  ;;  %v15708_v60 = vunpack.i.l.bf16 %v15707_v7 }
 0xe1f   : > { %15056 = vmatprep.subr.bf16.mxu1 %v18930_v27 }
 0xe20   : > { %14013 = vmatmul.mubr.msk.f32.gmra.mrb[166].mxu1 %vm1475_vm1, %v6632_v14  ;;  %v15067_v17 = vpack.c.bf16 %v15709_v33, %v15708_v60  ;;  %v19543_v4 = vpop.permute.xlu0 %15746 }
 0xe21   : > { %14041 = vmatmul.mubr.msk.f32.gmra.mrb[150].mxu0 %vm1475_vm1, %v6648_v2  ;;  %21074 = vst [vmem:[#allocation27_spill] sm:$0xff] %v19543_v4 }
 0xe22   : > { %15058 = vmatpush3.bf16.msra.mxu1 %v18930_v27  ;;  %v15697_v58 = vpop.permute.xlu1 %15696 }
 0xe23   : > { %15076 = vmatprep.subr.bf16.mxu1 %v19522_v35  ;;  %v15699_v41 = vunpack.i.h.bf16 %v15697_v58  ;;  %v15698_v28 = vunpack.i.l.bf16 %v15697_v58 }
 0xe24   : > { %v19549_v61 = vpop.permute.xlu0 %15756 }
 0xe25   : > { %v15059_v11 = vpack.c.bf16 %v15699_v41, %v15698_v28  ;;  %21076 = vst [vmem:[#allocation25_spill] sm:$0xff] %v19549_v61 }
 0xe26   : > { %v15702_v22 = vpop.permute.xlu1 %15701 }
 0xe27   : > { %v15704_v48 = vunpack.i.h.bf16 %v15702_v22  ;;  %v15703_v37 = vunpack.i.l.bf16 %v15702_v22  ;;  %15060 = vmatprep.subr.bf16.mxu0 %v15059_v11 }
 0xe28   : > { %15062 = vmatpush3.bf16.msra.mxu0 %v15059_v11 }
 0xe29   : > { %v15063_v5 = vpack.c.bf16 %v15704_v48, %v15703_v37  ;;  %v19567_v48 = vpop.permute.xlu0 %15766 }
 0xe2a   : > { %v15712_v39 = vpop.permute.xlu1 %15711  ;;  %21078 = vst [vmem:[#allocation40_spill] sm:$0xff] %v19567_v48 }
 0xe2b   : > { %v15714_v13 = vunpack.i.h.bf16 %v15712_v39  ;;  %v15713_v53 = vunpack.i.l.bf16 %v15712_v39  ;;  %15064 = vmatprep.subr.bf16.mxu0 %v15063_v5 }
 0xe2c   : > { %15066 = vmatpush3.bf16.msra.mxu0 %v15063_v5 }
 0xe2d   : > { %15068 = vmatprep.subr.bf16.mxu0 %v15067_v17  ;;  %v15071_v42 = vpack.c.bf16 %v15714_v13, %v15713_v53 }
 0xe2e   : > { %v15722_v27 = vpop.permute.xlu1 %15721 }
 0xe2f   : > { %v15724_v57 = vunpack.i.h.bf16 %v15722_v27  ;;  %v15723_v51 = vunpack.i.l.bf16 %v15722_v27 }
 0xe30   : > { %15070 = vmatpush3.bf16.msra.mxu0 %v15067_v17 }
 0xe31   : > { %15072 = vmatprep.subr.bf16.mxu0 %v15071_v42  ;;  %v19526_v40 = vpack.c.bf16 %v15724_v57, %v15723_v51 }
 0xe32   : > { %v19533_v23 = vpop.permute.xlu1 %15731 }
 0xe33   : > { %21069 = vst [vmem:[#allocation22_spill] sm:$0xff] %v19526_v40  ;;  %21070 = vst [vmem:[#allocation34_spill] sm:$0xff] %v19533_v23 }
 0xe34   : > { %15074 = vmatpush3.bf16.msra.mxu0 %v15071_v42 }
 0xe35   : > { %15092 = vmatprep.subr.bf16.mxu0 %v19526_v40 }
 0xe36   : > { %v19537_v56 = vpop.permute.xlu1 %15741 }
 0xe37   : > { %21071 = vst [vmem:[#allocation26_spill] sm:$0xff] %v19537_v56 }
 0xe3a   : > { %v19541_v25 = vpop.permute.xlu1 %15751 }
 0xe3b   : > { %21073 = vst [vmem:[#allocation57_spill] sm:$0xff] %v19541_v25 }
 0xe3e   : > { %v19545_v43 = vpop.permute.xlu1 %15761 }
 0xe3f   : > { %21075 = vst [vmem:[#allocation38_spill] sm:$0xff] %v19545_v43 }
 0xe42   : > { %v19561_v11 = vpop.permute.xlu1 %15771 }
 0xe43   : > { %21077 = vst [vmem:[#allocation29_spill] sm:$0xff] %v19561_v11 }
 0xe46   : > { %v19581_v51 = vpop.permute.xlu1 %15781 }
 0xe47   : > { %21079 = vst [vmem:[#allocation31_spill] sm:$0xff] %v19581_v51 }
 0xe86   : > { %v13865_v31 = vpop.f32.mrb[120].mxu0 }
 0xe87   : > { %v19529_v47 = vmul.f32 0.5, %v13865_v31  ;;  %v7180_v34 = vpop.f32.mrb[121].mxu0 }
 0xe88   : > { %v19553_v14 = vmul.f32 0.5, %v7180_v34 }
 0xe89   : > { %v8132_v32 = vsel %vm2636_vm3, %v19529_v47, -inf }
 0xe8a   : > { %8133 = vmax.xlane.f32.xlu0 %v8132_v32  ;;  %v13868_v12 = vpop.f32.mrb[122].mxu0  ;;  %v8129_v60 = vsel %vm2636_vm3, %v19553_v14, -inf }
 0xe8b   : > { %v7190_v21 = vpop.f32.mrb[123].mxu0  ;;  %v19563_v33 = vmul.f32 0.5, %v13868_v12 }
 0xe8c   : > { %v19557_v50 = vmul.f32 0.5, %v7190_v21  ;;  %v19589_v21 = vpop.permute.xlu0 %15776 }
 0xe8d   : > { %v8138_v57 = vsel %vm2636_vm3, %v19563_v33, -inf  ;;  %21080 = vst [vmem:[#allocation33_spill] sm:$0xff] %v19589_v21 }
 0xe8e   : > { %v13871_v18 = vpop.f32.mrb[124].mxu0  ;;  %v8135_v39 = vsel %vm2636_vm3, %v19557_v50, -inf }
 0xe8f   : > { %v7200_v10 = vpop.f32.mrb[125].mxu0 }
 0xe90   : > { %v19583_v42 = vmul.f32 0.5, %v7200_v10 }
 0xe92   : > { %v13874_v63 = vpop.f32.mrb[126].mxu0 }
 0xe93   : > { %v7210_v26 = vpop.f32.mrb[127].mxu0 }
 0xea2   : > { %v13893_v59 = vpop.f32.mrb[144].mxu1 }
 0xea3   : > { %v19547_v49 = vmul.f32 0.5, %v13893_v59  ;;  %v7317_v7 = vpop.f32.mrb[145].mxu1 }
 0xea4   : > { %v19551_v30 = vmul.f32 0.5, %v7317_v7  ;;  %v19593_v7 = vmul.f32 0.5, %v13871_v18 }
 0xea5   : > { %v8156_v15 = vsel %vm2636_vm3, %v19547_v49, -inf }
 0xea6   : > { %v13896_v2 = vpop.f32.mrb[146].mxu1  ;;  %8157 = vmax.xlane.f32.xlu0 %v8156_v15  ;;  %v8153_v58 = vsel %vm2636_vm3, %v19551_v30, -inf  ;;  %v8144_v18 = vsel %vm2636_vm3, %v19593_v7, -inf }
 0xea7   : > { %v13921_v41 = vpop.f32.mrb[128].mxu0  ;;  %8154 = vmax.xlane.f32.xlu1 %v8153_v58  ;;  %v7327_v28 = vpop.f32.mrb[147].mxu1  ;;  %v19577_v27 = vmul.f32 0.5, %v13896_v2  ;;  %v8141_v2 = vsel %vm2636_vm3, %v19583_v42, -inf }
 0xea8   : > { %v7454_v22 = vpop.f32.mrb[129].mxu0  ;;  %v19569_v37 = vmul.f32 0.5, %v7327_v28  ;;  %v19639_v38 = vmul.f32 0.5, %v13921_v41 }
 0xea9   : > { %v8162_v15 = vsel %vm2636_vm3, %v19577_v27, -inf }
 0xeaa   : > { %v13899_v5 = vpop.f32.mrb[148].mxu1  ;;  %8130 = vmax.xlane.f32.xlu0 %v8129_v60  ;;  %v8159_v34 = vsel %vm2636_vm3, %v19569_v37, -inf  ;;  %v19605_v60 = vpop.permute.xlu1 %15791 }
 0xeab   : > { %v19573_v13 = vpop.f32.mrb[130].mxu0  ;;  %v7337_v53 = vpop.f32.mrb[149].mxu1  ;;  %8136 = vmax.xlane.f32.xlu1 %v8135_v39  ;;  %21081 = vst [vmem:[#allocation42_spill] sm:$0xff] %v19605_v60  ;;  %v19607_v39 = vmul.f32 0.5, %v13899_v5 }
 0xeac   : > { %v19575_v17 = vpop.f32.mrb[131].mxu0  ;;  %v19597_v10 = vmul.f32 0.5, %v7337_v53  ;;  %v19613_v53 = vmul.f32 0.5, %v7210_v26 }
 0xeae   : > { %v13902_v31 = vpop.f32.mrb[150].mxu1  ;;  %8139 = vmax.xlane.f32.xlu0 %v8138_v57  ;;  %v19611_v57 = vpop.permute.xlu0 %15786  ;;  %v8147_v5 = vsel %vm2636_vm3, %v19613_v53, -inf }
 0xeaf   : > { %v19587_v32 = vpop.f32.mrb[132].mxu0  ;;  %v7347_v12 = vpop.f32.mrb[151].mxu1  ;;  %8160 = vmax.xlane.f32.xlu1 %v8159_v34  ;;  %21082 = vst [vmem:[#allocation35_spill] sm:$0xff] %v19611_v57  ;;  %v8165_v34 = vsel %vm2636_vm3, %v19597_v10, -inf }
 0xeb0   : > { %v19591_v59 = vpop.f32.mrb[133].mxu0  ;;  %v19621_v19 = vmul.f32 0.5, %v7347_v12  ;;  %v19625_v45 = vpop.permute.xlu1 %15801 }
 0xeb1   : > { %21083 = vst [vmem:[#allocation37_spill] sm:$0xff] %v19625_v45 }
 0xeb2   : > { %8163 = vmax.xlane.f32.xlu0 %v8162_v15  ;;  %v19617_v15 = vmul.f32 0.5, %v13874_v63  ;;  %v19627_v26 = vpop.permute.xlu0 %15796  ;;  %v8171_v12 = vsel %vm2636_vm3, %v19621_v19, -inf }
 0xeb3   : > { %v19601_v58 = vpop.f32.mrb[134].mxu0  ;;  %8142 = vmax.xlane.f32.xlu1 %v8141_v2  ;;  %v8168_v2 = vsel %vm2636_vm3, %v19607_v39, -inf  ;;  %21084 = vst [vmem:[#allocation39_spill] sm:$0xff] %v19627_v26 }
 0xeb4   : > { %v19603_v28 = vpop.f32.mrb[135].mxu0  ;;  %v8150_v63 = vsel %vm2636_vm3, %v19617_v15, -inf }
 0xeb6   : > { %8145 = vmax.xlane.f32.xlu0 %v8144_v18  ;;  %v19629_v18 = vmul.f32 0.5, %v13902_v31  ;;  %v19643_v54 = vpop.permute.xlu0 %15806 }
 0xeb7   : > { %8166 = vmax.xlane.f32.xlu1 %v8165_v34  ;;  %v19633_v34 = vmul.f32 0.5, %v7454_v22  ;;  %21086 = vst [vmem:[#allocation60_spill] sm:$0xff] %v19643_v54 }
 0xeb9   : > { %v8177_v31 = vsel %vm2636_vm3, %v19633_v34, -inf }
 0xeba   : > { %8169 = vmax.xlane.f32.xlu0 %v8168_v2  ;;  %v19637_v2 = vpop.permute.xlu1 %15811  ;;  %v8107_v1 = vpop.xlane.xlu0 %8106 }
 0xebb   : > { %8148 = vmax.xlane.f32.xlu1 %v8147_v5  ;;  %21085 = vst [vmem:[#allocation58_spill] sm:$0xff] %v19637_v2  ;;  %v8174_v5 = vsel %vm2636_vm3, %v19629_v18, -inf }
 0xebe   : > { %8151 = vmax.xlane.f32.xlu0 %v8150_v63  ;;  %v8110_v22 = vpop.xlane.xlu1 %8109  ;;  %v8180_v63 = vsel %vm2636_vm3, %v19639_v38, -inf }
 0xebf   : > { %8172 = vmax.xlane.f32.xlu1 %v8171_v12  ;;  %v8298_v20 = vsub.f32 %v19451_v29, %v8110_v22 }
 0xec2   : > { %8175 = vmax.xlane.f32.xlu0 %v8174_v5  ;;  %v8297_v5 = vsub.f32 %v19455_v3, %v8107_v1 }
 0xec3   : > { %8178 = vmax.xlane.f32.xlu1 %v8177_v31  ;;  %v19658_v31 = vmul.f32 0.5, %v19573_v13  ;;  %v8116_v13 = vpop.xlane.xlu0 %8115 }
 0xec4   : > { %v8361_v3 = vmul.f32 1.442695, %v8297_v5 }
 0xec6   : > { %v13949_v12 = vpop.f32.mrb[152].mxu1  ;;  %8181 = vmax.xlane.f32.xlu0 %v8180_v63  ;;  %v19665_v63 = vmul.f32 0.5, %v19575_v17  ;;  %v8186_v17 = vsel %vm2636_vm3, %v19658_v31, -inf }
 0xec7   : > { %v19649_v24 = vmul.f32 0.5, %v13949_v12  ;;  %v7591_v41 = vpop.f32.mrb[153].mxu1 }
 0xec8   : > { %v19652_v55 = vpop.f32.mrb[136].mxu0  ;;  %v19654_v2 = vmul.f32 0.5, %v7591_v41  ;;  %v8363_v41 = vmul.f32 1.442695, %v8298_v20  ;;  %v8183_v43 = vsel %vm2636_vm3, %v19665_v63, -inf  ;;  %v8113_v20 = vpop.xlane.xlu1 %8112 }
 0xec9   : > { %v19660_v45 = vpop.f32.mrb[137].mxu0  ;;  %v8204_v60 = vsel %vm2636_vm3, %v19649_v24, -inf  ;;  %v8299_v57 = vsub.f32 %v19464_v6, %v8113_v20  ;;  %v19785_v52 = vmul.f32 0.5, %v19652_v55 }
 0xeca   : > { %v13952_v12 = vpop.f32.mrb[154].mxu1  ;;  %8205 = vmax.xlane.f32.xlu0 %v8204_v60  ;;  %v8201_v29 = vsel %vm2636_vm3, %v19654_v2, -inf  ;;  %16155 = vpow2.f32 %v8363_v41  ;;  %v8122_v41 = vpop.xlane.xlu0 %8121  ;;  %v19768_v36 = vmul.f32 0.5, %v19660_v45 }
 0xecb   : > { %v7601_v22 = vpop.f32.mrb[155].mxu1  ;;  %8202 = vmax.xlane.f32.xlu1 %v8201_v29  ;;  %v19671_v51 = vmul.f32 0.5, %v13952_v12  ;;  %16157 = vpow2.f32 %v8361_v3  ;;  %v19684_v12 = vmul.f32 0.5, %v19587_v32  ;;  %v8300_v3 = vsub.f32 %v19462_v16, %v8116_v13 }
 0xecc   : > { %v19669_v1 = vpop.f32.mrb[138].mxu0  ;;  %v19677_v11 = vmul.f32 0.5, %v7601_v22  ;;  %v8302_v13 = vsub.f32 %v19476_v46, %v8122_v41  ;;  %v8365_v48 = vmul.f32 1.442695, %v8299_v57  ;;  %v19721_v41 = vmul.f32 0.5, %v19601_v58  ;;  %21094 = vst [vmem:[#allocation32_spill] sm:$0xff] %v19768_v36 }
 0xecd   : > { %v19673_v54 = vpop.f32.mrb[139].mxu0  ;;  %v8210_v22 = vsel %vm2636_vm3, %v19671_v51, -inf  ;;  %v8367_v16 = vmul.f32 1.442695, %v8300_v3  ;;  %v8225_v45 = vsel %vm2636_vm3, %v19768_v36, -inf }
 0xece   : > { %v13955_v60 = vpop.f32.mrb[156].mxu1  ;;  %8187 = vmax.xlane.f32.xlu0 %v8186_v17  ;;  %v19691_v17 = vmul.f32 0.5, %v19591_v59  ;;  %v8192_v59 = vsel %vm2636_vm3, %v19684_v12, -inf  ;;  %v8371_v3 = vmul.f32 1.442695, %v8302_v13  ;;  %v8198_v58 = vsel %vm2636_vm3, %v19721_v41, -inf }
 0xecf   : > { %v7611_v29 = vpop.f32.mrb[157].mxu1  ;;  %8184 = vmax.xlane.f32.xlu1 %v8183_v43  ;;  %v8207_v43 = vsel %vm2636_vm3, %v19677_v11, -inf  ;;  %v19699_v56 = vmul.f32 0.5, %v13955_v60  ;;  %v8128_v60 = vpop.xlane.xlu0 %8127  ;;  %16159 = vpow2.f32 %v8367_v16 }
 0xed0   : > { %v19681_v5 = vpop.f32.mrb[140].mxu0  ;;  %v19705_v23 = vmul.f32 0.5, %v7611_v29  ;;  %v8304_v46 = vsub.f32 %v19486_v62, %v8128_v60  ;;  %16161 = vpow2.f32 %v8365_v48 }
 0xed1   : > { %v19686_v26 = vpop.f32.mrb[141].mxu0  ;;  %v8216_v20 = vsel %vm2636_vm3, %v19699_v56, -inf  ;;  %16163 = vpow2.f32 %v8371_v3 }
 0xed2   : > { %v13958_v25 = vpop.f32.mrb[158].mxu1  ;;  %8211 = vmax.xlane.f32.xlu0 %v8210_v22  ;;  %v8119_v22 = vpop.xlane.xlu1 %8118  ;;  %v8213_v29 = vsel %vm2636_vm3, %v19705_v23, -inf  ;;  %v8375_v16 = vmul.f32 1.442695, %v8304_v46 }
 0xed3   : > { %v7621_v40 = vpop.f32.mrb[159].mxu1  ;;  %8208 = vmax.xlane.f32.xlu1 %v8207_v43  ;;  %v8189_v43 = vsel %vm2636_vm3, %v19691_v17, -inf  ;;  %v8301_v6 = vsub.f32 %v19478_v0, %v8119_v22  ;;  %v19731_v48 = vmul.f32 0.5, %v13958_v25 }
 0xed4   : > { %v19696_v32 = vpop.f32.mrb[142].mxu0  ;;  %v19713_v44 = vpop.eup %16155  ;;  %v19735_v13 = vmul.f32 0.5, %v7621_v40 }
 0xed5   : > { %v19701_v21 = vpop.f32.mrb[143].mxu0  ;;  %21087 = vst [vmem:[#allocation59_spill] sm:$0xff] %v19713_v44  ;;  %v8369_v57 = vmul.f32 1.442695, %v8301_v6  ;;  %v8492_v22 = vsel %vm2636_vm3, %v19713_v44, 0.0  ;;  %v8222_v60 = vsel %vm2636_vm3, %v19731_v48, -inf }
 0xed6   : > { %8193 = vmax.xlane.f32.xlu0 %v8192_v59  ;;  %v19717_v59 = vpop.eup %16157  ;;  %v8125_v0 = vpop.xlane.xlu1 %8124 }
 0xed7   : > { %8190 = vmax.xlane.f32.xlu1 %v8189_v43  ;;  %21088 = vst [vmem:[#allocation43_spill] sm:$0xff] %v19717_v59  ;;  %v19726_v43 = vmul.f32 0.5, %v19603_v28  ;;  %v8303_v62 = vsub.f32 %v19488_v8, %v8125_v0  ;;  %16165 = vpow2.f32 %v8369_v57  ;;  %v8219_v8 = vsel %vm2636_vm3, %v19735_v13, -inf }
 0xed8   : > { %16167 = vpow2.f32 %v8375_v16 }
 0xed9   : > { %v8195_v28 = vsel %vm2636_vm3, %v19726_v43, -inf  ;;  %v8373_v6 = vmul.f32 1.442695, %v8303_v62 }
 0xeda   : > { %8217 = vmax.xlane.f32.xlu0 %v8216_v20  ;;  %v8489_v20 = vsel %vm2636_vm3, %v19717_v59, 0.0  ;;  %v19790_v59 = vmul.f32 0.5, %v19673_v54  ;;  %v19803_v54 = vmul.f32 0.5, %v19669_v1 }
 0xedb   : > { %8214 = vmax.xlane.f32.xlu1 %v8213_v29  ;;  %v19741_v29 = vpop.eup %16159  ;;  %16169 = vpow2.f32 %v8373_v6 }
 0xedc   : > { %21089 = vst [vmem:[#allocation44_spill] sm:$0xff] %v19741_v29  ;;  %v19745_v25 = vpop.eup %16161  ;;  %v8498_v0 = vsel %vm2636_vm3, %v19741_v29, 0.0  ;;  %v8231_v55 = vsel %vm2636_vm3, %v19790_v59, -inf }
 0xedd   : > { %21090 = vst [vmem:[#allocation24_spill] sm:$0xff] %v19745_v25 }
 0xede   : > { %8493 = vadd.xlane.f32.xlu0 %v8492_v22  ;;  %v19753_v22 = vpop.eup %16163 }
 0xedf   : > { %8490 = vadd.xlane.f32.xlu1 %v8489_v20  ;;  %21091 = vst [vmem:[#allocation28_spill] sm:$0xff] %v19753_v22  ;;  %v8495_v20 = vsel %vm2636_vm3, %v19745_v25, 0.0 }
 0xee1   : > { %v19757_v16 = vpop.eup %16165 }
 0xee2   : > { %8199 = vmax.xlane.f32.xlu0 %v8198_v58  ;;  %21092 = vst [vmem:[#allocation41_spill] sm:$0xff] %v19757_v16 }
 0xee3   : > { %8196 = vmax.xlane.f32.xlu1 %v8195_v28 }
 0xee6   : > { %8223 = vmax.xlane.f32.xlu0 %v8222_v60  ;;  %v8504_v60 = vsel %vm2636_vm3, %v19753_v22, 0.0 }
 0xee7   : > { %v14005_v40 = vpop.f32.mrb[160].mxu1  ;;  %8220 = vmax.xlane.f32.xlu1 %v8219_v8  ;;  %v19765_v8 = vpop.eup %16167 }
 0xee8   : > { %v19747_v3 = vpop.f32.mrb[144].mxu0  ;;  %v7865_v46 = vpop.f32.mrb[161].mxu1  ;;  %21093 = vst [vmem:[#allocation30_spill] sm:$0xff] %v19765_v8  ;;  %v8510_v4 = vsel %vm2636_vm3, %v19765_v8, 0.0 }
 0xee9   : > { %v19749_v57 = vpop.f32.mrb[145].mxu0  ;;  %v19776_v35 = vpop.eup %16169  ;;  %v19778_v22 = vmul.f32 0.5, %v7865_v46  ;;  %v19794_v46 = vmul.f32 0.5, %v14005_v40 }
 0xeea   : > { %8499 = vadd.xlane.f32.xlu0 %v8498_v0  ;;  %v8501_v0 = vsel %vm2636_vm3, %v19757_v16, 0.0  ;;  %v8507_v8 = vsel %vm2636_vm3, %v19776_v35, 0.0 }
 0xeeb   : > { %v14008_v62 = vpop.f32.mrb[162].mxu1  ;;  %8496 = vadd.xlane.f32.xlu1 %v8495_v20 }
 0xeec   : > { %v19759_v58 = vpop.f32.mrb[146].mxu0  ;;  %v7875_v28 = vpop.f32.mrb[163].mxu1 }
 0xeed   : > { %v19761_v6 = vpop.f32.mrb[147].mxu0  ;;  %v19798_v36 = vmul.f32 0.5, %v7875_v28  ;;  %v19812_v28 = vmul.f32 0.5, %v14008_v62 }
 0xeee   : > { %8505 = vadd.xlane.f32.xlu0 %v8504_v60 }
 0xeef   : > { %v14011_v29 = vpop.f32.mrb[164].mxu1  ;;  %8502 = vadd.xlane.f32.xlu1 %v8501_v0  ;;  %v8255_v40 = vsel %vm2636_vm3, %v19798_v36, -inf }
 0xef0   : > { %v19772_v20 = vpop.f32.mrb[148].mxu0  ;;  %v7885_v25 = vpop.f32.mrb[165].mxu1 }
 0xef1   : > { %v8022_v61 = vpop.f32.mrb[149].mxu0 }
 0xef2   : > { %8511 = vadd.xlane.f32.xlu0 %v8510_v4  ;;  %v8249_v4 = vsel %vm2636_vm3, %v19778_v22, -inf }
 0xef3   : > { %v14014_v60 = vpop.f32.mrb[166].mxu1  ;;  %8226 = vmax.xlane.f32.xlu1 %v8225_v45  ;;  %v8228_v45 = vsel %vm2636_vm3, %v19785_v52, -inf }
 0xef4   : > { %v19782_v16 = vpop.f32.mrb[150].mxu0  ;;  %v7895_v0 = vpop.f32.mrb[167].mxu1 }
 0xef5   : > { %v8032_v44 = vpop.f32.mrb[151].mxu0 }
 0xef6   : > { %8508 = vadd.xlane.f32.xlu0 %v8507_v8  ;;  %v8252_v8 = vsel %vm2636_vm3, %v19794_v46, -inf }
 0xef7   : > { %8250 = vmax.xlane.f32.xlu1 %v8249_v4  ;;  %v19808_v4 = vmul.f32 0.5, %v19686_v26  ;;  %v19821_v26 = vmul.f32 0.5, %v19681_v5 }
 0xef9   : > { %v8237_v1 = vsel %vm2636_vm3, %v19808_v4, -inf }
 0xefa   : > { %8229 = vmax.xlane.f32.xlu0 %v8228_v45  ;;  %v8234_v45 = vsel %vm2636_vm3, %v19803_v54, -inf }
 0xefb   : > { %8232 = vmax.xlane.f32.xlu1 %v8231_v55  ;;  %v19816_v55 = vmul.f32 0.5, %v7885_v25  ;;  %v19830_v25 = vmul.f32 0.5, %v14011_v29 }
 0xefd   : > { %v8261_v62 = vsel %vm2636_vm3, %v19816_v55, -inf }
 0xefe   : > { %8253 = vmax.xlane.f32.xlu0 %v8252_v8  ;;  %v8258_v8 = vsel %vm2636_vm3, %v19812_v28, -inf }
 0xeff   : > { %8256 = vmax.xlane.f32.xlu1 %v8255_v40  ;;  %v19826_v40 = vmul.f32 0.5, %v19701_v21  ;;  %v19839_v21 = vmul.f32 0.5, %v19696_v32 }
 0xf01   : > { %v8243_v5 = vsel %vm2636_vm3, %v19826_v40, -inf  ;;  %21095 = vst [vmem:[#allocation50_spill] sm:$0xff] %v19839_v21 }
 0xf02   : > { %8235 = vmax.xlane.f32.xlu0 %v8234_v45  ;;  %v8240_v45 = vsel %vm2636_vm3, %v19821_v26, -inf }
 0xf03   : > { %8238 = vmax.xlane.f32.xlu1 %v8237_v1  ;;  %v19834_v1 = vmul.f32 0.5, %v7895_v0  ;;  %v19848_v0 = vmul.f32 0.5, %v14014_v60 }
 0xf05   : > { %v8267_v29 = vsel %vm2636_vm3, %v19834_v1, -inf }
 0xf06   : > { %8259 = vmax.xlane.f32.xlu0 %v8258_v8  ;;  %v8264_v8 = vsel %vm2636_vm3, %v19830_v25, -inf }
 0xf07   : > { %8262 = vmax.xlane.f32.xlu1 %v8261_v62  ;;  %v19844_v62 = vmul.f32 0.5, %v19749_v57  ;;  %v19858_v57 = vmul.f32 0.5, %v19747_v3 }
 0xf09   : > { %21096 = vst [vmem:[#allocation46_spill] sm:$0xff] %v19844_v62  ;;  %v8273_v32 = vsel %vm2636_vm3, %v19844_v62, -inf  ;;  %v8276_v3 = vsel %vm2636_vm3, %v19858_v57, -inf }
 0xf0a   : > { %8241 = vmax.xlane.f32.xlu0 %v8240_v45  ;;  %v8246_v45 = vsel %vm2636_vm3, %v19839_v21, -inf }
 0xf0b   : > { %8244 = vmax.xlane.f32.xlu1 %v8243_v5  ;;  %v19853_v5 = vmul.f32 0.5, %v19761_v6 }
 0xf0d   : > { %v8279_v60 = vsel %vm2636_vm3, %v19853_v5, -inf }
 0xf0e   : > { %8265 = vmax.xlane.f32.xlu0 %v8264_v8  ;;  %v8270_v8 = vsel %vm2636_vm3, %v19848_v0, -inf }
 0xf0f   : > { %8268 = vmax.xlane.f32.xlu1 %v8267_v29  ;;  %v19862_v29 = vmul.f32 0.5, %v8022_v61 }
 0xf11   : > { %v8285_v61 = vsel %vm2636_vm3, %v19862_v29, -inf }
 0xf12   : > { %8247 = vmax.xlane.f32.xlu0 %v8246_v45  ;;  %v19868_v45 = vmul.f32 0.5, %v19759_v58 }
 0xf13   : > { %8274 = vmax.xlane.f32.xlu1 %v8273_v32  ;;  %v19872_v32 = vmul.f32 0.5, %v8032_v44  ;;  %v19884_v44 = vmul.f32 0.5, %v19782_v16 }
 0xf14   : > { %21097 = vst [vmem:[#allocation15_spill] sm:$0xff] %v19868_v45 }
 0xf15   : > { %21098 = vst [vmem:[#allocation14_spill] sm:$0xff] %v19872_v32  ;;  %v8291_v58 = vsel %vm2636_vm3, %v19872_v32, -inf  ;;  %21100 = vst [vmem:[#allocation13_spill] sm:$0xff] %v19884_v44 }
 0xf16   : > { %8271 = vmax.xlane.f32.xlu0 %v8270_v8  ;;  %v19877_v8 = vmul.f32 0.5, %v19772_v20 }
 0xf17   : > { %v8134_v21 = vpop.xlane.xlu0 %8133  ;;  %8280 = vmax.xlane.f32.xlu1 %v8279_v60 }
 0xf18   : > { %v8306_v6 = vsub.f32 %v19529_v47, %v8134_v21  ;;  %21099 = vst [vmem:[#allocation16_spill] sm:$0xff] %v19877_v8  ;;  %v8282_v47 = vsel %vm2636_vm3, %v19868_v45, -inf  ;;  %v8288_v21 = vsel %vm2636_vm3, %v19877_v8, -inf }
 0xf1a   : > { %v8379_v62 = vmul.f32 1.442695, %v8306_v6  ;;  %8277 = vmax.xlane.f32.xlu0 %v8276_v3 }
 0xf1b   : > { %8286 = vmax.xlane.f32.xlu1 %v8285_v61 }
 0xf1c   : > { %16171 = vpow2.f32 %v8379_v62  ;;  %v8294_v62 = vsel %vm2636_vm3, %v19884_v44, -inf }
 0xf1e   : > { %8283 = vmax.xlane.f32.xlu0 %v8282_v47 }
 0xf1f   : > { %8292 = vmax.xlane.f32.xlu1 %v8291_v58 }
 0xf22   : > { %8289 = vmax.xlane.f32.xlu0 %v8288_v21 }
 0xf26   : > { %v19890_v20 = vpop.eup %16171  ;;  %8295 = vmax.xlane.f32.xlu0 %v8294_v62 }
 0xf27   : > { %21101 = vst [vmem:[#allocation18_spill] sm:$0xff] %v19890_v20  ;;  %v8516_v60 = vsel %vm2636_vm3, %v19890_v20, 0.0 }
 0xf2a   : > { %8517 = vadd.xlane.f32.xlu0 %v8516_v60 }
 0xf33   : > { %v8158_v6 = vpop.xlane.xlu0 %8157 }
 0xf34   : > { %v8314_v3 = vsub.f32 %v19547_v49, %v8158_v6  ;;  %v8155_v61 = vpop.xlane.xlu1 %8154 }
 0xf35   : > { %v8313_v16 = vsub.f32 %v19551_v30, %v8155_v61 }
 0xf36   : > { %v8395_v47 = vmul.f32 1.442695, %v8314_v3 }
 0xf37   : > { %v8393_v58 = vmul.f32 1.442695, %v8313_v16  ;;  %v8131_v8 = vpop.xlane.xlu0 %8130 }
 0xf38   : > { %16173 = vpow2.f32 %v8395_v47  ;;  %v8305_v21 = vsub.f32 %v19553_v14, %v8131_v8  ;;  %v8137_v44 = vpop.xlane.xlu1 %8136 }
 0xf39   : > { %16175 = vpow2.f32 %v8393_v58  ;;  %v8307_v49 = vsub.f32 %v19557_v50, %v8137_v44 }
 0xf3a   : > { %v8377_v32 = vmul.f32 1.442695, %v8305_v21 }
 0xf3b   : > { %v8140_v62 = vpop.xlane.xlu0 %8139  ;;  %v8381_v8 = vmul.f32 1.442695, %v8307_v49 }
 0xf3c   : > { %16177 = vpow2.f32 %v8377_v32  ;;  %v8308_v20 = vsub.f32 %v19563_v33, %v8140_v62  ;;  %v8161_v60 = vpop.xlane.xlu1 %8160 }
 0xf3d   : > { %v8315_v45 = vsub.f32 %v19569_v37, %v8161_v60 }
 0xf3e   : > { %v8383_v6 = vmul.f32 1.442695, %v8308_v20 }
 0xf3f   : > { %v8397_v30 = vmul.f32 1.442695, %v8315_v45  ;;  %v8164_v3 = vpop.xlane.xlu0 %8163 }
 0xf40   : > { %16179 = vpow2.f32 %v8383_v6  ;;  %v8316_v61 = vsub.f32 %v19577_v27, %v8164_v3  ;;  %v8143_v16 = vpop.xlane.xlu1 %8142 }
 0xf41   : > { %16181 = vpow2.f32 %v8397_v30  ;;  %v8309_v58 = vsub.f32 %v19583_v42, %v8143_v16 }
 0xf42   : > { %v19901_v14 = vpop.eup %16173  ;;  %v8399_v47 = vmul.f32 1.442695, %v8316_v61 }
 0xf43   : > { %v19903_v32 = vpop.eup %16175  ;;  %v8146_v33 = vpop.xlane.xlu0 %8145  ;;  %v8540_v37 = vsel %vm2636_vm3, %v19901_v14, 0.0 }
 0xf44   : > { %16183 = vpow2.f32 %v8399_v47  ;;  %v8310_v50 = vsub.f32 %v19593_v7, %v8146_v33  ;;  %v8167_v45 = vpop.xlane.xlu1 %8166  ;;  %8541 = vadd.xlane.f32.xlu1 %v8540_v37  ;;  %v8537_v27 = vsel %vm2636_vm3, %v19903_v32, 0.0 }
 0xf45   : > { %v8317_v44 = vsub.f32 %v19597_v10, %v8167_v45  ;;  %8538 = vadd.xlane.f32.xlu0 %v8537_v27  ;;  %16185 = vpow2.f32 %v8381_v8  ;;  %v8385_v10 = vmul.f32 1.442695, %v8309_v58 }
 0xf46   : > { %v19911_v20 = vpop.eup %16177  ;;  %v8387_v21 = vmul.f32 1.442695, %v8310_v50 }
 0xf47   : > { %v8401_v62 = vmul.f32 1.442695, %v8317_v44  ;;  %v8170_v60 = vpop.xlane.xlu0 %8169  ;;  %v8513_v49 = vsel %vm2636_vm3, %v19911_v20, 0.0 }
 0xf48   : > { %16187 = vpow2.f32 %v8387_v21  ;;  %v8318_v7 = vsub.f32 %v19607_v39, %v8170_v60  ;;  %v8149_v6 = vpop.xlane.xlu1 %8148  ;;  %8514 = vadd.xlane.f32.xlu1 %v8513_v49 }
 0xf49   : > { %16189 = vpow2.f32 %v8401_v62  ;;  %v8311_v61 = vsub.f32 %v19613_v53, %v8149_v6 }
 0xf4a   : > { %v19917_v30 = vpop.eup %16179  ;;  %v8403_v3 = vmul.f32 1.442695, %v8318_v7 }
 0xf4b   : > { %v8152_v8 = vpop.xlane.xlu0 %8151  ;;  %v8522_v42 = vsel %vm2636_vm3, %v19917_v30, 0.0  ;;  %v19922_v16 = vpop.eup %16181  ;;  %v8389_v37 = vmul.f32 1.442695, %v8311_v61 }
 0xf4c   : > { %16191 = vpow2.f32 %v8403_v3  ;;  %v8312_v47 = vsub.f32 %v19617_v15, %v8152_v8  ;;  %v8173_v33 = vpop.xlane.xlu1 %8172  ;;  %8523 = vadd.xlane.f32.xlu0 %v8522_v42  ;;  %v8543_v53 = vsel %vm2636_vm3, %v19922_v16, 0.0 }
 0xf4d   : > { %16193 = vpow2.f32 %v8385_v10  ;;  %v8319_v45 = vsub.f32 %v19621_v19, %v8173_v33 }
 0xf4e   : > { %v19925_v39 = vpop.eup %16183  ;;  %v8391_v50 = vmul.f32 1.442695, %v8312_v47 }
 0xf4f   : > { %v8176_v27 = vpop.xlane.xlu0 %8175  ;;  %v8546_v44 = vsel %vm2636_vm3, %v19925_v39, 0.0  ;;  %v19932_v58 = vpop.eup %16185  ;;  %v8405_v62 = vmul.f32 1.442695, %v8319_v45 }
 0xf50   : > { %16195 = vpow2.f32 %v8391_v50  ;;  %v8320_v15 = vsub.f32 %v19629_v18, %v8176_v27  ;;  %8544 = vadd.xlane.f32.xlu0 %v8543_v53  ;;  %8547 = vadd.xlane.f32.xlu1 %v8546_v44  ;;  %v8179_v19 = vpop.xlane.xlu1 %8178  ;;  %v8519_v6 = vsel %vm2636_vm3, %v19932_v58, 0.0 }
 0xf51   : > { %16197 = vpow2.f32 %v8389_v37  ;;  %v8321_v61 = vsub.f32 %v19633_v34, %v8179_v19 }
 0xf52   : > { %v19935_v21 = vpop.eup %16187  ;;  %v8407_v60 = vmul.f32 1.442695, %v8320_v15 }
 0xf53   : > { %v8182_v49 = vpop.xlane.xlu0 %8181  ;;  %v8528_v7 = vsel %vm2636_vm3, %v19935_v21, 0.0  ;;  %v19941_v10 = vpop.eup %16189  ;;  %v8409_v27 = vmul.f32 1.442695, %v8321_v61 }
 0xf54   : > { %16199 = vpow2.f32 %v8407_v60  ;;  %v8322_v18 = vsub.f32 %v19639_v38, %v8182_v49  ;;  %8529 = vadd.xlane.f32.xlu0 %v8528_v7  ;;  %8520 = vadd.xlane.f32.xlu1 %v8519_v6  ;;  %v8549_v47 = vsel %vm2636_vm3, %v19941_v10, 0.0 }
 0xf55   : > { %16201 = vpow2.f32 %v8405_v62 }
 0xf56   : > { %v19944_v3 = vpop.eup %16191  ;;  %v8411_v8 = vmul.f32 1.442695, %v8322_v18 }
 0xf57   : > { %v8206_v42 = vpop.xlane.xlu0 %8205  ;;  %v8552_v33 = vsel %vm2636_vm3, %v19944_v3, 0.0  ;;  %v19951_v37 = vpop.eup %16193 }
 0xf58   : > { %v8330_v50 = vsub.f32 %v19649_v24, %v8206_v42  ;;  %v8203_v38 = vpop.xlane.xlu1 %8202  ;;  %8550 = vadd.xlane.f32.xlu0 %v8549_v47  ;;  %8553 = vadd.xlane.f32.xlu1 %v8552_v33  ;;  %16203 = vpow2.f32 %v8411_v8  ;;  %v8525_v62 = vsel %vm2636_vm3, %v19951_v37, 0.0 }
 0xf59   : > { %v8329_v53 = vsub.f32 %v19654_v2, %v8203_v38 }
 0xf5a   : > { %v19954_v45 = vpop.eup %16195  ;;  %v8427_v34 = vmul.f32 1.442695, %v8330_v50 }
 0xf5b   : > { %v8188_v44 = vpop.xlane.xlu0 %8187  ;;  %v8534_v15 = vsel %vm2636_vm3, %v19954_v45, 0.0  ;;  %v19961_v60 = vpop.eup %16197  ;;  %v8425_v2 = vmul.f32 1.442695, %v8329_v53 }
 0xf5c   : > { %16205 = vpow2.f32 %v8427_v34  ;;  %v8324_v24 = vsub.f32 %v19658_v31, %v8188_v44  ;;  %v8185_v19 = vpop.xlane.xlu1 %8184  ;;  %8535 = vadd.xlane.f32.xlu0 %v8534_v15  ;;  %8526 = vadd.xlane.f32.xlu1 %v8525_v62  ;;  %v8531_v61 = vsel %vm2636_vm3, %v19961_v60, 0.0 }
 0xf5d   : > { %v8323_v49 = vsub.f32 %v19665_v63, %v8185_v19  ;;  %16207 = vpow2.f32 %v8409_v27 }
 0xf5e   : > { %v19965_v7 = vpop.eup %16199  ;;  %v8415_v6 = vmul.f32 1.442695, %v8324_v24 }
 0xf5f   : > { %v8212_v18 = vpop.xlane.xlu0 %8211  ;;  %v8558_v8 = vsel %vm2636_vm3, %v19965_v7, 0.0  ;;  %v19971_v42 = vpop.eup %16201  ;;  %v8413_v63 = vmul.f32 1.442695, %v8323_v49 }
 0xf60   : > { %16209 = vpow2.f32 %v8415_v6  ;;  %v8332_v31 = vsub.f32 %v19671_v51, %v8212_v18  ;;  %v8209_v47 = vpop.xlane.xlu1 %8208  ;;  %8532 = vadd.xlane.f32.xlu0 %v8531_v61  ;;  %8559 = vadd.xlane.f32.xlu1 %v8558_v8  ;;  %v8555_v34 = vsel %vm2636_vm3, %v19971_v42, 0.0 }
 0xf61   : > { %v8331_v33 = vsub.f32 %v19677_v11, %v8209_v47  ;;  %16211 = vpow2.f32 %v8425_v2 }
 0xf62   : > { %v8431_v50 = vmul.f32 1.442695, %v8332_v31  ;;  %v19977_v53 = vpop.eup %16203 }
 0xf63   : > { %v8429_v38 = vmul.f32 1.442695, %v8331_v33  ;;  %v8194_v27 = vpop.xlane.xlu0 %8193  ;;  %v8564_v49 = vsel %vm2636_vm3, %v19977_v53, 0.0 }
 0xf64   : > { %16213 = vpow2.f32 %v8431_v50  ;;  %v8326_v44 = vsub.f32 %v19684_v12, %v8194_v27  ;;  %v8191_v15 = vpop.xlane.xlu1 %8190  ;;  %8556 = vadd.xlane.f32.xlu0 %v8555_v34 }
 0xf65   : > { %16215 = vpow2.f32 %v8413_v63  ;;  %v8325_v51 = vsub.f32 %v19691_v17, %v8191_v15 }
 0xf66   : > { %v19981_v62 = vpop.eup %16205  ;;  %16217 = vpow2.f32 %v8429_v38  ;;  %v8419_v11 = vmul.f32 1.442695, %v8326_v44 }
 0xf67   : > { %v8417_v24 = vmul.f32 1.442695, %v8325_v51  ;;  %v8218_v19 = vpop.xlane.xlu0 %8217  ;;  %v8588_v2 = vsel %vm2636_vm3, %v19981_v62, 0.0  ;;  %v19987_v6 = vpop.eup %16207 }
 0xf68   : > { %v8334_v12 = vsub.f32 %v19699_v56, %v8218_v19  ;;  %v8215_v18 = vpop.xlane.xlu1 %8214  ;;  %8565 = vadd.xlane.f32.xlu0 %v8564_v49  ;;  %8589 = vadd.xlane.f32.xlu1 %v8588_v2  ;;  %16219 = vpow2.f32 %v8419_v11  ;;  %v8561_v63 = vsel %vm2636_vm3, %v19987_v6, 0.0 }
 0xf69   : > { %v8333_v17 = vsub.f32 %v19705_v23, %v8215_v18  ;;  %16221 = vpow2.f32 %v8417_v24 }
 0xf6a   : > { %v19991_v61 = vpop.eup %16209  ;;  %v8435_v8 = vmul.f32 1.442695, %v8334_v12 }
 0xf6b   : > { %v8433_v31 = vmul.f32 1.442695, %v8333_v17  ;;  %v8494_v47 = vpop.xlane.xlu0 %8493  ;;  %v8570_v33 = vsel %vm2636_vm3, %v19991_v61, 0.0  ;;  %v19997_v50 = vpop.eup %16211 }
 0xf6c   : > { %16223 = vpow2.f32 %v8435_v8  ;;  %v8491_v56 = vpop.xlane.xlu1 %8490  ;;  %8562 = vadd.xlane.f32.xlu0 %v8561_v63  ;;  %8571 = vadd.xlane.f32.xlu1 %v8570_v33  ;;  %v8585_v34 = vsel %vm2636_vm3, %v19997_v50, 0.0 }
 0xf6d   : > { %16225 = vpow2.f32 %v8433_v31 }
 0xf6e   : > { %v19999_v23 = vpop.eup %16213  ;;  %16227 = vrcp.f32 %v8494_v47 }
 0xf6f   : > { %v20001_v38 = vpop.eup %16215  ;;  %16229 = vrcp.f32 %v8491_v56  ;;  %v8200_v27 = vpop.xlane.xlu0 %8199  ;;  %v8594_v44 = vsel %vm2636_vm3, %v19999_v23, 0.0 }
 0xf70   : > { %v20007_v15 = vpop.eup %16217  ;;  %v8328_v51 = vsub.f32 %v19721_v41, %v8200_v27  ;;  %v8197_v11 = vpop.xlane.xlu1 %8196  ;;  %8586 = vadd.xlane.f32.xlu0 %v8585_v34  ;;  %8595 = vadd.xlane.f32.xlu1 %v8594_v44  ;;  %v8567_v17 = vsel %vm2636_vm3, %v20001_v38, 0.0 }
 0xf71   : > { %v8327_v24 = vsub.f32 %v19726_v43, %v8197_v11  ;;  %v8591_v18 = vsel %vm2636_vm3, %v20007_v15, 0.0 }
 0xf72   : > { %v8423_v19 = vmul.f32 1.442695, %v8328_v51  ;;  %v20011_v49 = vpop.eup %16219 }
 0xf73   : > { %21102 = vst [vmem:[#allocation17_spill] sm:$0xff] %v20011_v49  ;;  %v8421_v2 = vmul.f32 1.442695, %v8327_v24  ;;  %v8224_v12 = vpop.xlane.xlu0 %8223  ;;  %v20017_v8 = vpop.eup %16221  ;;  %v8576_v44 = vsel %vm2636_vm3, %v20011_v49, 0.0  ;;  %v15728_v24 = vunpack.i.l.bf16 %v19535_v9 }
 0xf74   : > { %16231 = vpow2.f32 %v8423_v19  ;;  %v8336_v41 = vsub.f32 %v19731_v48, %v8224_v12  ;;  %v8221_v31 = vpop.xlane.xlu1 %8220  ;;  %8592 = vadd.xlane.f32.xlu0 %v8591_v18  ;;  %8568 = vadd.xlane.f32.xlu1 %v8567_v17  ;;  %v8573_v34 = vsel %vm2636_vm3, %v20017_v8, 0.0  ;;  %v21105_v19 = vld [vmem:[#allocation43_spill] sm:$0xff] }
 0xf75   : > { %16233 = vpow2.f32 %v8421_v2  ;;  %v8335_v43 = vsub.f32 %v19735_v13, %v8221_v31  ;;  %v15729_v13 = vunpack.i.h.bf16 %v19535_v9  ;;  %v21106_v12 = vld [vmem:[#allocation59_spill] sm:$0xff] }
 0xf76   : > { %v20021_v47 = vpop.eup %16223  ;;  %v8439_v63 = vmul.f32 1.442695, %v8336_v41 }
 0xf77   : > { %21103 = vst [vmem:[#allocation20_spill] sm:$0xff] %v20021_v47  ;;  %v20023_v33 = vpop.eup %16225  ;;  %v8437_v56 = vmul.f32 1.442695, %v8335_v43  ;;  %v8500_v27 = vpop.xlane.xlu0 %8499  ;;  %v8600_v43 = vsel %vm2636_vm3, %v20021_v47, 0.0 }
 0xf78   : > { %21104 = vst [vmem:[#allocation19_spill] sm:$0xff] %v20023_v33  ;;  %v16228_v48 = vpop.eup %16227  ;;  %16235 = vpow2.f32 %v8439_v63  ;;  %v8497_v51 = vpop.xlane.xlu1 %8496  ;;  %8574 = vadd.xlane.f32.xlu0 %v8573_v34  ;;  %8577 = vadd.xlane.f32.xlu1 %v8576_v44  ;;  %v8597_v41 = vsel %vm2636_vm3, %v20023_v33, 0.0  ;;  %v21107_v63 = vld [vmem:[#allocation36_spill] sm:$0xff]  ;;  %v21109_v44 = vld [vmem:[#allocation21_spill] sm:$0xff] }
 0xf79   : > { %v16230_v11 = vpop.eup %16229  ;;  %16237 = vpow2.f32 %v8437_v56  ;;  %v8746_v18 = vmul.f32 %v16228_v48, %v21106_v12  ;;  %v15739_v9 = vunpack.i.h.bf16 %v21107_v63  ;;  %v15738_v56 = vunpack.i.l.bf16 %v21107_v63 }
 0xf7a   : > { %16239 = vrcp.f32 %v8500_v27  ;;  %v8745_v2 = vmul.f32 %v16230_v11, %v21105_v19  ;;  %v15079_v27 = vpack.c.bf16 %v15729_v13, %v15728_v24  ;;  %v21111_v19 = vld [vmem:[#allocation27_spill] sm:$0xff] }
 0xf7b   : > { %16241 = vrcp.f32 %v8497_v51  ;;  %v8506_v17 = vpop.xlane.xlu0 %8505  ;;  %v15748_v12 = vunpack.i.l.bf16 %v21111_v19  ;;  %v15083_v24 = vpack.c.bf16 %v15739_v9, %v15738_v56 }
 0xf7c   : > { %14059 = vmatprep.mubr.msk.f32.mxu1 %vm2636_vm3, %v8745_v2  ;;  %v8503_v31 = vpop.xlane.xlu1 %8502  ;;  %8598 = vadd.xlane.f32.xlu0 %v8597_v41  ;;  %v15749_v2 = vunpack.i.h.bf16 %v21111_v19  ;;  %v21112_v41 = vld [vmem:[#allocation32_spill] sm:$0xff] }
 0xf7d   : > { %14060 = vmatmul.mubr.msk.f32.vlgmr.msra.gmra.mrb[168].mxu1 %vm2636_vm3, %v8746_v18  ;;  %16243 = vrcp.f32 %v8503_v31  ;;  %8601 = vadd.xlane.f32.xlu1 %v8600_v43 }
 0xf7e   : > { %v20041_v34 = vpop.eup %16231  ;;  %15078 = vmatpush3.bf16.msra.mxu1 %v21109_v44  ;;  %16245 = vrcp.f32 %v8506_v17 }
 0xf7f   : > { %21108 = vst [vmem:[#allocation23_spill] sm:$0xff] %v20041_v34  ;;  %v20044_v48 = vpop.eup %16233  ;;  %15080 = vmatprep.subr.bf16.mxu1 %v15079_v27  ;;  %v8512_v51 = vpop.xlane.xlu0 %8511  ;;  %v8582_v11 = vsel %vm2636_vm3, %v20041_v34, 0.0 }
 0xf80   : > { %21110 = vst [vmem:[#allocation43_spill] sm:$0xff] %v20044_v48  ;;  %v8227_v18 = vpop.xlane.xlu1 %8226  ;;  %v8579_v13 = vsel %vm2636_vm3, %v20044_v48, 0.0  ;;  %16247 = vrcp.f32 %v8512_v51  ;;  %v15087_v48 = vpack.c.bf16 %v15749_v2, %v15748_v12  ;;  %v21117_v12 = vld [vmem:[#allocation44_spill] sm:$0xff] }
 0xf81   : > { %v8337_v31 = vsub.f32 %v21112_v41, %v8227_v18  ;;  %8583 = vadd.xlane.f32.xlu1 %v8582_v11  ;;  %8580 = vadd.xlane.f32.xlu0 %v8579_v13  ;;  %v21115_v18 = vld [vmem:[#allocation25_spill] sm:$0xff]  ;;  %v21116_v41 = vld [vmem:[#allocation24_spill] sm:$0xff] }
 0xf82   : > { %v20053_v17 = vpop.eup %16235  ;;  %15082 = vmatpush3.bf16.msra.mxu1 %v15079_v27  ;;  %v15759_v13 = vunpack.i.h.bf16 %v21115_v18  ;;  %v15758_v27 = vunpack.i.l.bf16 %v21115_v18 }
 0xf83   : > { %21113 = vst [vmem:[#allocation59_spill] sm:$0xff] %v20053_v17  ;;  %v20055_v43 = vpop.eup %16237  ;;  %15084 = vmatprep.subr.bf16.mxu1 %v15083_v24  ;;  %v8441_v63 = vmul.f32 1.442695, %v8337_v31  ;;  %v8509_v44 = vpop.xlane.xlu0 %8508  ;;  %v8606_v19 = vsel %vm2636_vm3, %v20053_v17, 0.0 }
 0xf84   : > { %21114 = vst [vmem:[#allocation36_spill] sm:$0xff] %v20055_v43  ;;  %v16240_v34 = vpop.eup %16239  ;;  %16249 = vrcp.f32 %v8509_v44  ;;  %v8251_v9 = vpop.xlane.xlu1 %8250  ;;  %v8603_v56 = vsel %vm2636_vm3, %v20055_v43, 0.0 }
 0xf85   : > { %v16242_v11 = vpop.eup %16241  ;;  %16251 = vpow2.f32 %v8441_v63  ;;  %v8345_v51 = vsub.f32 %v19778_v22, %v8251_v9  ;;  %8607 = vadd.xlane.f32.xlu1 %v8606_v19  ;;  %8604 = vadd.xlane.f32.xlu0 %v8603_v56  ;;  %v8748_v44 = vmul.f32 %v16240_v34, %v21117_v12  ;;  %v21118_v63 = vld [vmem:[#allocation41_spill] sm:$0xff]  ;;  %v20070_v22 = vpack.c.bf16 %v15759_v13, %v15758_v27  ;;  %v21119_v9 = vld [vmem:[#allocation28_spill] sm:$0xff] }
 0xf86   : > { %15086 = vmatpush3.bf16.msra.mxu1 %v15083_v24  ;;  %v8747_v31 = vmul.f32 %v16242_v11, %v21116_v41 }
 0xf87   : > { %v16244_v17 = vpop.eup %16243  ;;  %15088 = vmatprep.subr.bf16.mxu1 %v15087_v48  ;;  %v8457_v2 = vmul.f32 1.442695, %v8345_v51  ;;  %v8230_v47 = vpop.xlane.xlu0 %8229 }
 0xf88   : > { %v16246_v43 = vpop.eup %16245  ;;  %14062 = vmatprep.mubr.msk.f32.mxu1 %vm2636_vm3, %v8747_v31  ;;  %v8338_v33 = vsub.f32 %v19785_v52, %v8230_v47  ;;  %v8233_v18 = vpop.xlane.xlu1 %8232  ;;  %v8749_v49 = vmul.f32 %v16244_v17, %v21118_v63  ;;  %v21120_v31 = vld [vmem:[#allocation30_spill] sm:$0xff] }
 0xf89   : > { %16253 = vpow2.f32 %v8457_v2  ;;  %14063 = vmatmul.mubr.msk.f32.gmra.mrb[170].mxu1 %vm2636_vm3, %v8748_v44  ;;  %v8339_v24 = vsub.f32 %v19790_v59, %v8233_v18  ;;  %v8750_v56 = vmul.f32 %v16246_v43, %v21119_v9 }
 0xf8a   : > { %15090 = vmatpush3.bf16.msra.mxu1 %v15087_v48  ;;  %v8443_v19 = vmul.f32 1.442695, %v8338_v33  ;;  %14065 = vmatprep.mubr.msk.f32.mxu1 %vm2636_vm3, %v8749_v49  ;;  %v16248_v11 = vpop.eup %16247 }
 0xf8b   : > { %15108 = vmatprep.subr.bf16.mxu1 %v20070_v22  ;;  %v8445_v34 = vmul.f32 1.442695, %v8339_v24  ;;  %v8254_v52 = vpop.xlane.xlu0 %8253  ;;  %v8752_v2 = vmul.f32 %v16248_v11, %v21120_v31 }
 0xf8c   : > { %16255 = vpow2.f32 %v8443_v19  ;;  %v8346_v47 = vsub.f32 %v19794_v46, %v8254_v52  ;;  %v8257_v17 = vpop.xlane.xlu1 %8256 }
 0xf8d   : > { %16257 = vpow2.f32 %v8445_v34  ;;  %14066 = vmatmul.mubr.msk.f32.gmra.mrb[172].mxu1 %vm2636_vm3, %v8750_v56  ;;  %v8347_v59 = vsub.f32 %v19798_v36, %v8257_v17 }
 0xf8e   : > { %v16250_v48 = vpop.eup %16249  ;;  %v8459_v33 = vmul.f32 1.442695, %v8346_v47 }
 0xf8f   : > { %v20079_v13 = vpop.eup %16251  ;;  %v8461_v49 = vmul.f32 1.442695, %v8347_v59  ;;  %v8236_v27 = vpop.xlane.xlu0 %8235  ;;  %v8751_v51 = vmul.f32 %v16250_v48, %v19776_v35 }
 0xf90   : > { %16259 = vpow2.f32 %v8459_v33  ;;  %v8340_v43 = vsub.f32 %v19803_v54, %v8236_v27  ;;  %v8239_v41 = vpop.xlane.xlu1 %8238  ;;  %v8609_v46 = vsel %vm2636_vm3, %v20079_v13, 0.0 }
 0xf91   : > { %16261 = vpow2.f32 %v8461_v49  ;;  %v8341_v36 = vsub.f32 %v19808_v4, %v8239_v41  ;;  %14068 = vmatprep.mubr.msk.f32.mxu1 %vm2636_vm3, %v8751_v51  ;;  %8610 = vadd.xlane.f32.xlu0 %v8609_v46 }
 0xf92   : > { %v8447_v12 = vmul.f32 1.442695, %v8340_v43  ;;  %14069 = vmatmul.mubr.msk.f32.gmra.mrb[174].mxu1 %vm2636_vm3, %v8752_v2 }
 0xf93   : > { %v20089_v44 = vpop.eup %16253  ;;  %v8449_v35 = vmul.f32 1.442695, %v8341_v36  ;;  %v8260_v18 = vpop.xlane.xlu0 %8259 }
 0xf94   : > { %16263 = vpow2.f32 %v8447_v12  ;;  %v8348_v54 = vsub.f32 %v19812_v28, %v8260_v18  ;;  %v8263_v63 = vpop.xlane.xlu1 %8262  ;;  %v8633_v24 = vsel %vm2636_vm3, %v20089_v44, 0.0 }
 0xf95   : > { %16265 = vpow2.f32 %v8449_v35  ;;  %v8349_v4 = vsub.f32 %v19816_v55, %v8263_v63  ;;  %8634 = vadd.xlane.f32.xlu0 %v8633_v24 }
 0xf96   : > { %v20095_v19 = vpop.eup %16255  ;;  %v8463_v34 = vmul.f32 1.442695, %v8348_v54 }
 0xf97   : > { %v20097_v9 = vpop.eup %16257  ;;  %v8465_v56 = vmul.f32 1.442695, %v8349_v4  ;;  %v8242_v52 = vpop.xlane.xlu0 %8241  ;;  %v8612_v47 = vsel %vm2636_vm3, %v20095_v19, 0.0 }
 0xf98   : > { %16267 = vpow2.f32 %v8463_v34  ;;  %v8342_v28 = vsub.f32 %v19821_v26, %v8242_v52  ;;  %v8245_v17 = vpop.xlane.xlu1 %8244  ;;  %8613 = vadd.xlane.f32.xlu1 %v8612_v47  ;;  %v8615_v11 = vsel %vm2636_vm3, %v20097_v9, 0.0 }
 0xf99   : > { %16269 = vpow2.f32 %v8465_v56  ;;  %v8343_v55 = vsub.f32 %v19826_v40, %v8245_v17  ;;  %8616 = vadd.xlane.f32.xlu0 %v8615_v11 }
 0xf9a   : > { %v20105_v59 = vpop.eup %16259  ;;  %v8451_v48 = vmul.f32 1.442695, %v8342_v28 }
 0xf9b   : > { %v20107_v33 = vpop.eup %16261  ;;  %v8453_v49 = vmul.f32 1.442695, %v8343_v55  ;;  %v8266_v27 = vpop.xlane.xlu0 %8265  ;;  %v8636_v51 = vsel %vm2636_vm3, %v20105_v59, 0.0 }
 0xf9c   : > { %16271 = vpow2.f32 %v8451_v48  ;;  %v8350_v26 = vsub.f32 %v19830_v25, %v8266_v27  ;;  %v8269_v43 = vpop.xlane.xlu1 %8268  ;;  %8637 = vadd.xlane.f32.xlu1 %v8636_v51  ;;  %v8639_v41 = vsel %vm2636_vm3, %v20107_v33, 0.0  ;;  %v21121_v25 = vld [vmem:[#allocation50_spill] sm:$0xff] }
 0xf9d   : > { %16273 = vpow2.f32 %v8453_v49  ;;  %v8351_v40 = vsub.f32 %v19834_v1, %v8269_v43  ;;  %8640 = vadd.xlane.f32.xlu0 %v8639_v41  ;;  %v21122_v1 = vld [vmem:[#allocation46_spill] sm:$0xff] }
 0xf9e   : > { %v20115_v46 = vpop.eup %16263  ;;  %v8467_v31 = vmul.f32 1.442695, %v8350_v26 }
 0xf9f   : > { %v20117_v2 = vpop.eup %16265  ;;  %v8469_v36 = vmul.f32 1.442695, %v8351_v40  ;;  %v8248_v12 = vpop.xlane.xlu0 %8247  ;;  %v8618_v35 = vsel %vm2636_vm3, %v20115_v46, 0.0 }
 0xfa0   : > { %16275 = vpow2.f32 %v8467_v31  ;;  %v8344_v18 = vsub.f32 %v21121_v25, %v8248_v12  ;;  %v8275_v54 = vpop.xlane.xlu1 %8274  ;;  %8619 = vadd.xlane.f32.xlu1 %v8618_v35  ;;  %v8621_v63 = vsel %vm2636_vm3, %v20117_v2, 0.0 }
 0xfa1   : > { %16277 = vpow2.f32 %v8469_v36  ;;  %v8353_v24 = vsub.f32 %v21122_v1, %v8275_v54  ;;  %8622 = vadd.xlane.f32.xlu0 %v8621_v63 }
 0xfa2   : > { %v20125_v4 = vpop.eup %16267  ;;  %v8455_v34 = vmul.f32 1.442695, %v8344_v18 }
 0xfa3   : > { %v20127_v56 = vpop.eup %16269  ;;  %v8473_v52 = vmul.f32 1.442695, %v8353_v24  ;;  %v8272_v47 = vpop.xlane.xlu0 %8271  ;;  %v8642_v28 = vsel %vm2636_vm3, %v20125_v4, 0.0 }
 0xfa4   : > { %16279 = vpow2.f32 %v8455_v34  ;;  %v8352_v17 = vsub.f32 %v19848_v0, %v8272_v47  ;;  %v8281_v11 = vpop.xlane.xlu1 %8280  ;;  %8643 = vadd.xlane.f32.xlu1 %v8642_v28  ;;  %v8645_v55 = vsel %vm2636_vm3, %v20127_v56, 0.0 }
 0xfa5   : > { %16281 = vpow2.f32 %v8473_v52  ;;  %v8355_v48 = vsub.f32 %v19853_v5, %v8281_v11  ;;  %8646 = vadd.xlane.f32.xlu0 %v8645_v55 }
 0xfa6   : > { %v20135_v49 = vpop.eup %16271  ;;  %v8471_v27 = vmul.f32 1.442695, %v8352_v17 }
 0xfa7   : > { %v20137_v51 = vpop.eup %16273  ;;  %v8477_v26 = vmul.f32 1.442695, %v8355_v48  ;;  %v8278_v43 = vpop.xlane.xlu0 %8277  ;;  %v8624_v41 = vsel %vm2636_vm3, %v20135_v49, 0.0  ;;  %v21125_v48 = vld [vmem:[#allocation16_spill] sm:$0xff] }
 0xfa8   : > { %16283 = vpow2.f32 %v8471_v27  ;;  %v8354_v0 = vsub.f32 %v19858_v57, %v8278_v43  ;;  %v8287_v40 = vpop.xlane.xlu1 %8286  ;;  %8625 = vadd.xlane.f32.xlu1 %v8624_v41  ;;  %v8627_v31 = vsel %vm2636_vm3, %v20137_v51, 0.0  ;;  %v21123_v57 = vld [vmem:[#allocation15_spill] sm:$0xff] }
 0xfa9   : > { %16285 = vpow2.f32 %v8477_v26  ;;  %v8357_v5 = vsub.f32 %v19862_v29, %v8287_v40  ;;  %8628 = vadd.xlane.f32.xlu0 %v8627_v31  ;;  %v21124_v29 = vld [vmem:[#allocation14_spill] sm:$0xff] }
 0xfaa   : > { %v20145_v36 = vpop.eup %16275  ;;  %v8475_v12 = vmul.f32 1.442695, %v8354_v0 }
 0xfab   : > { %v20147_v35 = vpop.eup %16277  ;;  %v8481_v25 = vmul.f32 1.442695, %v8357_v5  ;;  %v8284_v18 = vpop.xlane.xlu0 %8283  ;;  %v8648_v54 = vsel %vm2636_vm3, %v20145_v36, 0.0  ;;  %v21127_v5 = vld [vmem:[#allocation13_spill] sm:$0xff] }
 0xfac   : > { %16287 = vpow2.f32 %v8475_v12  ;;  %v8356_v63 = vsub.f32 %v21123_v57, %v8284_v18  ;;  %8649 = vadd.xlane.f32.xlu1 %v8648_v54  ;;  %v8293_v1 = vpop.xlane.xlu1 %8292  ;;  %v8651_v24 = vsel %vm2636_vm3, %v20147_v35, 0.0 }
 0xfad   : > { %16289 = vpow2.f32 %v8481_v25  ;;  %v8359_v34 = vsub.f32 %v21124_v29, %v8293_v1  ;;  %8652 = vadd.xlane.f32.xlu0 %v8651_v24 }
 0xfae   : > { %v20155_v52 = vpop.eup %16279  ;;  %v8479_v47 = vmul.f32 1.442695, %v8356_v63 }
 0xfaf   : > { %v20157_v28 = vpop.eup %16281  ;;  %v8485_v17 = vmul.f32 1.442695, %v8359_v34  ;;  %v8290_v11 = vpop.xlane.xlu0 %8289  ;;  %v8630_v55 = vsel %vm2636_vm3, %v20155_v52, 0.0 }
 0xfb0   : > { %16291 = vpow2.f32 %v8479_v47  ;;  %v8358_v27 = vsub.f32 %v21125_v48, %v8290_v11  ;;  %8631 = vadd.xlane.f32.xlu1 %v8630_v55  ;;  %v8657_v26 = vsel %vm2636_vm3, %v20157_v28, 0.0 }
 0xfb1   : > { %16293 = vpow2.f32 %v8485_v17  ;;  %8658 = vadd.xlane.f32.xlu0 %v8657_v26 }
 0xfb2   : > { %v20164_v43 = vpop.eup %16283  ;;  %v8483_v41 = vmul.f32 1.442695, %v8358_v27 }
 0xfb3   : > { %21126 = vst [vmem:[#allocation21_spill] sm:$0xff] %v20164_v43  ;;  %v20166_v0 = vpop.eup %16285  ;;  %v8296_v40 = vpop.xlane.xlu0 %8295  ;;  %v8654_v31 = vsel %vm2636_vm3, %v20164_v43, 0.0 }
 0xfb4   : > { %16295 = vpow2.f32 %v8483_v41  ;;  %v8360_v12 = vsub.f32 %v21127_v5, %v8296_v40  ;;  %8655 = vadd.xlane.f32.xlu1 %v8654_v31  ;;  %v8663_v25 = vsel %vm2636_vm3, %v20166_v0, 0.0  ;;  %v21131_v40 = vld [vmem:[#allocation55_spill] sm:$0xff] }
 0xfb5   : > { %8664 = vadd.xlane.f32.xlu0 %v8663_v25 }
 0xfb6   : > { %v20173_v18 = vpop.eup %16287  ;;  %v8487_v54 = vmul.f32 1.442695, %v8360_v12  ;;  %v21132_v12 = vld [vmem:[#allocation56_spill] sm:$0xff] }
 0xfb7   : > { %v20175_v57 = vpop.eup %16289  ;;  %v8660_v63 = vsel %vm2636_vm3, %v20173_v18, 0.0  ;;  %v8518_v27 = vpop.xlane.xlu0 %8517 }
 0xfb8   : > { %16297 = vpow2.f32 %v8487_v54  ;;  %8661 = vadd.xlane.f32.xlu1 %v8660_v63  ;;  %v8669_v1 = vsel %vm2636_vm3, %v20175_v57, 0.0  ;;  %v21133_v63 = vld [vmem:[#allocation40_spill] sm:$0xff] }
 0xfb9   : > { %8670 = vadd.xlane.f32.xlu0 %v8669_v1  ;;  %v15769_v1 = vunpack.i.h.bf16 %v21133_v63 }
 0xfba   : > { %v20181_v24 = vpop.eup %16291 }
 0xfbb   : > { %v20183_v29 = vpop.eup %16293  ;;  %v8666_v34 = vsel %vm2636_vm3, %v20181_v24, 0.0 }
 0xfbc   : > { %21128 = vst [vmem:[#allocation27_spill] sm:$0xff] %v20183_v29  ;;  %8667 = vadd.xlane.f32.xlu1 %v8666_v34  ;;  %v8675_v47 = vsel %vm2636_vm3, %v20183_v29, 0.0  ;;  %v15768_v34 = vunpack.i.l.bf16 %v21133_v63  ;;  %v21135_v63 = vld [vmem:[#allocation33_spill] sm:$0xff] }
 0xfbd   : > { %8676 = vadd.xlane.f32.xlu0 %v8675_v47  ;;  %v15779_v29 = vunpack.i.h.bf16 %v21135_v63 }
 0xfbe   : > { %v20189_v17 = vpop.eup %16295 }
 0xfbf   : > { %21129 = vst [vmem:[#allocation32_spill] sm:$0xff] %v20189_v17  ;;  %v8672_v11 = vsel %vm2636_vm3, %v20189_v17, 0.0  ;;  %v15778_v17 = vunpack.i.l.bf16 %v21135_v63  ;;  %v21138_v63 = vld [vmem:[#allocation35_spill] sm:$0xff] }
 0xfc0   : > { %8673 = vadd.xlane.f32.xlu1 %v8672_v11 }
 0xfc2   : > { %v20193_v55 = vpop.eup %16297 }
 0xfc3   : > { %21130 = vst [vmem:[#allocation25_spill] sm:$0xff] %v20193_v55  ;;  %v8678_v48 = vsel %vm2636_vm3, %v20193_v55, 0.0 }
 0xfc4   : > { %8679 = vadd.xlane.f32.xlu1 %v8678_v48 }
 0xfd1   : > { %v8542_v26 = vpop.xlane.xlu1 %8541 }
 0xfd2   : > { %16299 = vrcp.f32 %v8542_v26  ;;  %v8539_v41 = vpop.xlane.xlu0 %8538 }
 0xfd3   : > { %16301 = vrcp.f32 %v8539_v41  ;;  %15816 = vrot.lane.b32.xlu0 %v21131_v40, %s21067_s20 }
 0xfd4   : > { %16303 = vrcp.f32 %v8518_v27 }
 0xfd5   : > { %15821 = vrot.lane.b32.xlu1 %v21131_v40, %s21066_s16  ;;  %v8515_v31 = vpop.xlane.xlu1 %8514  ;;  %v21134_v40 = vld [vmem:[#allocation34_spill] sm:$0xff] }
 0xfd6   : > { %16305 = vrcp.f32 %v8515_v31  ;;  %v15734_v31 = vunpack.i.h.bf16 %v21134_v40  ;;  %v15733_v55 = vunpack.i.l.bf16 %v21134_v40 }
 0xfd9   : > { %v8524_v5 = vpop.xlane.xlu0 %8523  ;;  %15826 = vrot.lane.b32.xlu1 %v21132_v12, %s21067_s20  ;;  %s20725_s20 = scalar_lea.hbm %s20789_s15, %s12274_s29 }
 0xfdc   : > { %v16300_v25 = vpop.eup %16299 }
 0xfdd   : > { %v16302_v54 = vpop.eup %16301  ;;  %v8545_v47 = vpop.xlane.xlu0 %8544  ;;  %15831 = vrot.lane.b32.xlu1 %v21132_v12, %s21066_s16  ;;  %v8762_v26 = vmul.f32 %v16300_v25, %v19901_v14  ;;  %v21136_v14 = vld [vmem:[#allocation18_spill] sm:$0xff] }
 0xfde   : > { %v8548_v11 = vpop.xlane.xlu1 %8547  ;;  %16307 = vrcp.f32 %v8545_v47  ;;  %v8761_v48 = vmul.f32 %v16302_v54, %v19903_v32  ;;  %v16304_v27 = vpop.eup %16303  ;;  %v15111_v32 = vpack.c.bf16 %v15769_v1, %v15768_v34  ;;  %v15789_v1 = vunpack.i.h.bf16 %v21138_v63  ;;  %v21139_v34 = vld [vmem:[#allocation22_spill] sm:$0xff] }
 0xfdf   : > { %16309 = vrcp.f32 %v8548_v11  ;;  %v8754_v25 = vmul.f32 %v16304_v27, %v21136_v14  ;;  %v21137_v11 = vld [vmem:[#allocation26_spill] sm:$0xff] }
 0xfe0   : > { %v16306_v41 = vpop.eup %16305  ;;  %14115 = vmatprep.mubr.msk.f32.mxu1 %vm2636_vm3, %v8761_v48  ;;  %16311 = vrcp.f32 %v8524_v5  ;;  %v15744_v48 = vunpack.i.h.bf16 %v21137_v11  ;;  %v15743_v40 = vunpack.i.l.bf16 %v21137_v11 }
 0xfe1   : > { %v8530_v12 = vpop.xlane.xlu0 %8529  ;;  %14116 = vmatmul.mubr.msk.f32.vlgmr.msra.gmra.mrb[176].mxu1 %vm2636_vm3, %v8762_v26  ;;  %v8753_v54 = vmul.f32 %v16306_v41, %v19911_v20  ;;  %v15095_v26 = vpack.c.bf16 %v15734_v31, %v15733_v55  ;;  %v15788_v20 = vunpack.i.l.bf16 %v21138_v63 }
 0xfe2   : > { %v8521_v47 = vpop.xlane.xlu1 %8520  ;;  %15110 = vmatpush3.bf16.msra.mxu1 %v20070_v22  ;;  %v15115_v22 = vpack.c.bf16 %v15779_v29, %v15778_v17  ;;  %v15099_v55 = vpack.c.bf16 %v15744_v48, %v15743_v40 }
 0xfe3   : > { %16313 = vrcp.f32 %v8521_v47  ;;  %15112 = vmatprep.subr.bf16.mxu1 %v15111_v32  ;;  %14087 = vmatprep.mubr.msk.f32.mxu0 %vm2636_vm3, %v8753_v54  ;;  %v21140_v47 = vld [vmem:[#allocation57_spill] sm:$0xff]  ;;  %v15119_v29 = vpack.c.bf16 %v15789_v1, %v15788_v20 }
 0xfe4   : > { %14088 = vmatmul.mubr.msk.f32.vlgmr.msra.gmra.mrb[152].mxu0 %vm2636_vm3, %v8754_v25  ;;  %v15754_v54 = vunpack.i.h.bf16 %v21140_v47  ;;  %v15753_v14 = vunpack.i.l.bf16 %v21140_v47  ;;  %v21141_v25 = vld [vmem:[#allocation39_spill] sm:$0xff] }
 0xfe5   : > { %15094 = vmatpush3.bf16.msra.mxu0 %v21139_v34  ;;  %v8551_v5 = vpop.xlane.xlu0 %8550  ;;  %v15799_v11 = vunpack.i.h.bf16 %v21141_v25  ;;  %v15798_v63 = vunpack.i.l.bf16 %v21141_v25 }
 0xfe6   : > { %v8554_v27 = vpop.xlane.xlu1 %8553  ;;  %16315 = vrcp.f32 %v8551_v5  ;;  %15096 = vmatprep.subr.bf16.mxu0 %v15095_v26  ;;  %15114 = vmatpush3.bf16.msra.mxu1 %v15111_v32  ;;  %v15103_v40 = vpack.c.bf16 %v15754_v54, %v15753_v14 }
 0xfe7   : > { %16317 = vrcp.f32 %v8554_v27  ;;  %15116 = vmatprep.subr.bf16.mxu1 %v15115_v22 }
 0xfe8   : > { %v16308_v41 = vpop.eup %16307  ;;  %16319 = vrcp.f32 %v8530_v12  ;;  %v20235_v12 = vpack.c.bf16 %v15799_v11, %v15798_v63 }
 0xfe9   : > { %v16310_v31 = vpop.eup %16309  ;;  %15098 = vmatpush3.bf16.msra.mxu0 %v15095_v26  ;;  %v8536_v34 = vpop.xlane.xlu0 %8535  ;;  %v8763_v17 = vmul.f32 %v16308_v41, %v19922_v16  ;;  %v21142_v26 = vld [vmem:[#allocation38_spill] sm:$0xff] }
 0xfea   : > { %v8527_v43 = vpop.xlane.xlu1 %8526  ;;  %15100 = vmatprep.subr.bf16.mxu0 %v15099_v55  ;;  %15118 = vmatpush3.bf16.msra.mxu1 %v15115_v22  ;;  %v8764_v32 = vmul.f32 %v16310_v31, %v19925_v39  ;;  %v16312_v48 = vpop.eup %16311  ;;  %v15764_v27 = vunpack.i.h.bf16 %v21142_v26  ;;  %v15763_v1 = vunpack.i.l.bf16 %v21142_v26 }
 0xfeb   : > { %16321 = vrcp.f32 %v8527_v43  ;;  %15120 = vmatprep.subr.bf16.mxu1 %v15119_v29  ;;  %14118 = vmatprep.mubr.msk.f32.mxu1 %vm2636_vm3, %v8763_v17  ;;  %v8756_v20 = vmul.f32 %v16312_v48, %v19917_v30 }
 0xfec   : > { %14119 = vmatmul.mubr.msk.f32.gmra.mrb[178].mxu1 %vm2636_vm3, %v8764_v32  ;;  %16323 = vrcp.f32 %v8536_v34  ;;  %v15123_v54 = vpack.c.bf16 %v15764_v27, %v15763_v1 }
 0xfed   : > { %v16314_v5 = vpop.eup %16313  ;;  %15102 = vmatpush3.bf16.msra.mxu0 %v15099_v55  ;;  %v8533_v16 = vpop.xlane.xlu0 %8532 }
 0xfee   : > { %16325 = vrcp.f32 %v8533_v16  ;;  %15104 = vmatprep.subr.bf16.mxu0 %v15103_v40  ;;  %15122 = vmatpush3.bf16.msra.mxu1 %v15119_v29  ;;  %v8560_v39 = vpop.xlane.xlu1 %8559  ;;  %v8755_v43 = vmul.f32 %v16314_v5, %v19932_v58  ;;  %v21143_v16 = vld [vmem:[#allocation29_spill] sm:$0xff] }
 0xfef   : > { %15140 = vmatprep.subr.bf16.mxu1 %v20235_v12  ;;  %16327 = vrcp.f32 %v8560_v39  ;;  %v15774_v39 = vunpack.i.h.bf16 %v21143_v16 }
 0xff0   : > { %v16316_v22 = vpop.eup %16315  ;;  %14090 = vmatprep.mubr.msk.f32.mxu0 %vm2636_vm3, %v8755_v43  ;;  %v15773_v43 = vunpack.i.l.bf16 %v21143_v16 }
 0xff1   : > { %v16318_v41 = vpop.eup %16317  ;;  %14091 = vmatmul.mubr.msk.f32.gmra.mrb[154].mxu0 %vm2636_vm3, %v8756_v20  ;;  %v8557_v47 = vpop.xlane.xlu0 %8556  ;;  %v8765_v14 = vmul.f32 %v16316_v22, %v19941_v10 }
 0xff2   : > { %15106 = vmatpush3.bf16.msra.mxu0 %v15103_v40  ;;  %16329 = vrcp.f32 %v8557_v47  ;;  %v8766_v55 = vmul.f32 %v16318_v41, %v19944_v3  ;;  %v16320_v58 = vpop.eup %16319  ;;  %v21144_v47 = vld [vmem:[#allocation60_spill] sm:$0xff] }
 0xff3   : > { %15124 = vmatprep.subr.bf16.mxu0 %v15123_v54  ;;  %14121 = vmatprep.mubr.msk.f32.mxu1 %vm2636_vm3, %v8765_v14  ;;  %v8758_v34 = vmul.f32 %v16320_v58, %v19935_v21  ;;  %v15809_v14 = vunpack.i.h.bf16 %v21144_v47  ;;  %v15808_v58 = vunpack.i.l.bf16 %v21144_v47  ;;  %v21150_v47 = vld [vmem:[#allocation20_spill] sm:$0xff] }
 0xff4   : > { %14122 = vmatmul.mubr.msk.f32.gmra.mrb[180].mxu1 %vm2636_vm3, %v8766_v55 }
 0xff5   : > { %v16322_v30 = vpop.eup %16321  ;;  %v8566_v31 = vpop.xlane.xlu0 %8565 }
 0xff6   : > { %v8590_v25 = vpop.xlane.xlu1 %8589  ;;  %v8757_v11 = vmul.f32 %v16322_v30, %v19951_v37  ;;  %v16324_v63 = vpop.eup %16323  ;;  %16331 = vrcp.f32 %v8566_v31  ;;  %v21145_v30 = vld [vmem:[#allocation31_spill] sm:$0xff] }
 0xff7   : > { %v8760_v48 = vmul.f32 %v16324_v63, %v19954_v45  ;;  %v15784_v31 = vunpack.i.h.bf16 %v21145_v30 }
 0xff8   : > { %v16326_v29 = vpop.eup %16325  ;;  %14093 = vmatprep.mubr.msk.f32.mxu0 %vm2636_vm3, %v8757_v11  ;;  %v15127_v11 = vpack.c.bf16 %v15774_v39, %v15773_v43  ;;  %v21148_v39 = vld [vmem:[#allocation17_spill] sm:$0xff] }
 0xff9   : > { %14094 = vmatmul.mubr.msk.f32.gmra.mrb[156].mxu0 %vm2636_vm3, %v8758_v34  ;;  %v8563_v10 = vpop.xlane.xlu0 %8562  ;;  %v8759_v17 = vmul.f32 %v16326_v29, %v19961_v60  ;;  %v16328_v32 = vpop.eup %16327 }
 0xffa   : > { %v8572_v3 = vpop.xlane.xlu1 %8571  ;;  %16333 = vrcp.f32 %v8563_v10  ;;  %v8768_v26 = vmul.f32 %v16328_v32, %v19965_v7  ;;  %v15143_v32 = vpack.c.bf16 %v15809_v14, %v15808_v58  ;;  %v21151_v58 = vld [vmem:[#allocation43_spill] sm:$0xff] }
 0xffb   : > { %14096 = vmatprep.mubr.msk.f32.mxu0 %vm2636_vm3, %v8759_v17  ;;  %16335 = vrcp.f32 %v8590_v25  ;;  %v15783_v25 = vunpack.i.l.bf16 %v21145_v30 }
 0xffc   : > { %v16330_v37 = vpop.eup %16329 }
 0xffd   : > { %14097 = vmatmul.mubr.msk.f32.gmra.mrb[158].mxu0 %vm2636_vm3, %v8760_v48  ;;  %v8587_v21 = vpop.xlane.xlu0 %8586  ;;  %v8767_v5 = vmul.f32 %v16330_v37, %v19971_v42  ;;  %v15131_v17 = vpack.c.bf16 %v15784_v31, %v15783_v25  ;;  %v21152_v31 = vld [vmem:[#allocation23_spill] sm:$0xff] }
 0xffe   : > { %v8596_v40 = vpop.xlane.xlu1 %8595  ;;  %16337 = vrcp.f32 %v8587_v21 }
 0xfff   : > { %14124 = vmatprep.mubr.msk.f32.mxu1 %vm2636_vm3, %v8767_v5  ;;  %16339 = vrcp.f32 %v8572_v3 }
0x1000   : > { %14125 = vmatmul.mubr.msk.f32.gmra.mrb[182].mxu1 %vm2636_vm3, %v8768_v26  ;;  %16341 = vrcp.f32 %v8596_v40  ;;  %v16332_v45 = vpop.eup %16331 }
0x1001   : > { %v8593_v60 = vpop.xlane.xlu0 %8592  ;;  %v8770_v22 = vmul.f32 %v16332_v45, %v19977_v53 }
0x1002   : > { %v8569_v27 = vpop.xlane.xlu1 %8568  ;;  %16343 = vrcp.f32 %v8593_v60 }
0x1003   : > { %16345 = vrcp.f32 %v8569_v27 }
0x1004   : > { %v16334_v1 = vpop.eup %16333 }
0x1005   : > { %v8575_v42 = vpop.xlane.xlu0 %8574  ;;  %v8769_v7 = vmul.f32 %v16334_v1, %v19987_v6  ;;  %v16336_v41 = vpop.eup %16335 }
0x1006   : > { %v8578_v20 = vpop.xlane.xlu1 %8577  ;;  %16347 = vrcp.f32 %v8575_v42  ;;  %v8778_v34 = vmul.f32 %v16336_v41, %v19981_v62 }
0x1007   : > { %16349 = vrcp.f32 %v8578_v20  ;;  %14143 = vmatprep.mubr.msk.f32.mxu0 %vm2636_vm3, %v8769_v7 }
0x1008   : > { %v16338_v55 = vpop.eup %16337  ;;  %14144 = vmatmul.mubr.msk.f32.vlgmr.msra.gmra.mrb[160].mxu0 %vm2636_vm3, %v8770_v22  ;;  %v21149_v22 = vld [vmem:[#allocation19_spill] sm:$0xff] }
0x1009   : > { %15126 = vmatpush3.bf16.msra.mxu0 %v15123_v54  ;;  %v8599_v6 = vpop.xlane.xlu0 %8598  ;;  %v8777_v53 = vmul.f32 %v16338_v55, %v19997_v50  ;;  %v16340_v63 = vpop.eup %16339  ;;  %v21146_v54 = vld [vmem:[#allocation42_spill] sm:$0xff] }
0x100a   : > { %16351 = vrcp.f32 %v8599_v6  ;;  %15128 = vmatprep.subr.bf16.mxu0 %v15127_v11  ;;  %v8602_v29 = vpop.xlane.xlu1 %8601  ;;  %v16342_v10 = vpop.eup %16341  ;;  %v15794_v37 = vunpack.i.h.bf16 %v21146_v54  ;;  %v15793_v50 = vunpack.i.l.bf16 %v21146_v54  ;;  %v8772_v60 = vmul.f32 %v16340_v63, %v19991_v61  ;;  %v21153_v63 = vld [vmem:[#allocation36_spill] sm:$0xff] }
0x100b   : > { %16353 = vrcp.f32 %v8602_v29  ;;  %14171 = vmatprep.mubr.msk.f32.mxu1 %vm2636_vm3, %v8777_v53  ;;  %v8780_v26 = vmul.f32 %v16342_v10, %v19999_v23  ;;  %v21154_v29 = vld [vmem:[#allocation59_spill] sm:$0xff] }
0x100c   : > { %v16344_v3 = vpop.eup %16343  ;;  %14172 = vmatmul.mubr.msk.f32.vlgmr.msra.gmra.mrb[184].mxu1 %vm2636_vm3, %v8778_v34  ;;  %v15135_v23 = vpack.c.bf16 %v15794_v37, %v15793_v50 }
0x100d   : > { %v16346_v48 = vpop.eup %16345  ;;  %15130 = vmatpush3.bf16.msra.mxu0 %v15127_v11  ;;  %15142 = vmatpush3.bf16.msra.mxu1 %v20235_v12  ;;  %v8779_v62 = vmul.f32 %v16344_v3, %v20007_v15  ;;  %v21147_v12 = vld [vmem:[#allocation37_spill] sm:$0xff] }
0x100e   : > { %15132 = vmatprep.subr.bf16.mxu0 %v15131_v17  ;;  %15144 = vmatprep.subr.bf16.mxu1 %v15143_v32  ;;  %v8584_v21 = vpop.xlane.xlu1 %8583  ;;  %v8581_v40 = vpop.xlane.xlu0 %8580  ;;  %v8771_v5 = vmul.f32 %v16346_v48, %v20001_v38  ;;  %v15804_v45 = vunpack.i.h.bf16 %v21147_v12  ;;  %v15803_v1 = vunpack.i.l.bf16 %v21147_v12 }
0x100f   : > { %16355 = vrcp.f32 %v8584_v21  ;;  %14174 = vmatprep.mubr.msk.f32.mxu1 %vm2636_vm3, %v8779_v62 }
0x1010   : > { %v16348_v27 = vpop.eup %16347  ;;  %16357 = vrcp.f32 %v8581_v40  ;;  %14146 = vmatprep.mubr.msk.f32.mxu0 %vm2636_vm3, %v8771_v5  ;;  %14175 = vmatmul.mubr.msk.f32.gmra.mrb[186].mxu1 %vm2636_vm3, %v8780_v26  ;;  %v15155_v7 = vpack.c.bf16 %v15804_v45, %v15803_v1  ;;  %v21155_v26 = vld [vmem:[#allocation58_spill] sm:$0xff] }
0x1011   : > { %v16350_v15 = vpop.eup %16349  ;;  %14147 = vmatmul.mubr.msk.f32.gmra.mrb[162].mxu0 %vm2636_vm3, %v8772_v60  ;;  %15146 = vmatpush3.bf16.msra.mxu1 %v15143_v32  ;;  %v8773_v38 = vmul.f32 %v16348_v27, %v20017_v8  ;;  %v15814_v60 = vunpack.i.h.bf16 %v21155_v26  ;;  %v15813_v27 = vunpack.i.l.bf16 %v21155_v26  ;;  %v12154_v26 = vld [vmem:[%s20781_s7 + $0x20] sm:$0xf] }
0x1012   : > { %15134 = vmatpush3.bf16.msra.mxu0 %v15131_v17  ;;  %v8608_v16 = vpop.xlane.xlu1 %8607  ;;  %v8605_v61 = vpop.xlane.xlu0 %8604  ;;  %v8774_v43 = vmul.f32 %v16350_v15, %v21148_v39 }
0x1013   : > { %15136 = vmatprep.subr.bf16.mxu0 %v15135_v23  ;;  %16359 = vrcp.f32 %v8608_v16  ;;  %14149 = vmatprep.mubr.msk.f32.mxu0 %vm2636_vm3, %v8773_v38  ;;  %v15159_v38 = vpack.c.bf16 %v15814_v60, %v15813_v27 }
0x1014   : > { %v16352_v42 = vpop.eup %16351  ;;  %16361 = vrcp.f32 %v8605_v61 }
0x1015   : > { %v16354_v20 = vpop.eup %16353  ;;  %14150 = vmatmul.mubr.msk.f32.gmra.mrb[164].mxu0 %vm2636_vm3, %v8774_v43  ;;  %v8781_v41 = vmul.f32 %v16352_v42, %v21149_v22 }
0x1016   : > { %15138 = vmatpush3.bf16.msra.mxu0 %v15135_v23  ;;  %v8782_v8 = vmul.f32 %v16354_v20, %v21150_v47 }
0x1017   : > { %15156 = vmatprep.subr.bf16.mxu0 %v15155_v7  ;;  %14177 = vmatprep.mubr.msk.f32.mxu1 %vm2636_vm3, %v8781_v41 }
0x1018   : > { %14178 = vmatmul.mubr.msk.f32.gmra.mrb[188].mxu1 %vm2636_vm3, %v8782_v8 }
0x1019   : > { %v16356_v14 = vpop.eup %16355 }
0x101a   : > { %v16358_v55 = vpop.eup %16357  ;;  %v8776_v25 = vmul.f32 %v16356_v14, %v21152_v31 }
0x101b   : > { %v8775_v30 = vmul.f32 %v16358_v55, %v21151_v58 }
0x101d   : > { %v16360_v11 = vpop.eup %16359  ;;  %14152 = vmatprep.mubr.msk.f32.mxu0 %vm2636_vm3, %v8775_v30 }
0x101e   : > { %v16362_v6 = vpop.eup %16361  ;;  %14153 = vmatmul.mubr.msk.f32.gmra.mrb[166].mxu0 %vm2636_vm3, %v8776_v25  ;;  %v8611_v53 = vpop.xlane.xlu0 %8610  ;;  %v8784_v10 = vmul.f32 %v16360_v11, %v21154_v29 }
0x101f   : > { %16363 = vrcp.f32 %v8611_v53  ;;  %v8783_v34 = vmul.f32 %v16362_v6, %v21153_v63 }
0x1021   : > { %14180 = vmatprep.mubr.msk.f32.mxu1 %vm2636_vm3, %v8783_v34 }
0x1022   : > { %14181 = vmatmul.mubr.msk.f32.gmra.mrb[190].mxu1 %vm2636_vm3, %v8784_v10  ;;  %v8635_v3 = vpop.xlane.xlu0 %8634 }
0x1023   : > { %16365 = vrcp.f32 %v8635_v3 }
0x1025   : > { %v8614_v17 = vpop.xlane.xlu1 %8613 }
0x1026   : > { %16367 = vrcp.f32 %v8614_v17  ;;  %v8617_v32 = vpop.xlane.xlu0 %8616 }
0x1027   : > { %16369 = vrcp.f32 %v8617_v32 }
0x1029   : > { %v16364_v48 = vpop.eup %16363  ;;  %v20301_v54 = vpop.xlane.xlu1 %8637 }
0x102a   : > { %v20303_v37 = vpop.xlane.xlu0 %8640  ;;  %v8785_v50 = vmul.f32 %v16364_v48, %v20079_v13 }
0x102c   : > { %14199 = vmatprep.mubr.msk.f32.mxu0 %vm2636_vm3, %v8785_v50 }
0x102d   : > { %v16366_v62 = vpop.eup %16365  ;;  %v8620_v21 = vpop.xlane.xlu1 %8619 }
0x102e   : > { %16371 = vrcp.f32 %v8620_v21  ;;  %v8623_v40 = vpop.xlane.xlu0 %8622  ;;  %v8793_v5 = vmul.f32 %v16366_v62, %v20089_v44 }
0x102f   : > { %16373 = vrcp.f32 %v8623_v40 }
0x1030   : > { %v16368_v15 = vpop.eup %16367  ;;  %14227 = vmatprep.mubr.msk.f32.mxu1 %vm2636_vm3, %v8793_v5 }
0x1031   : > { %v16370_v12 = vpop.eup %16369  ;;  %v8786_v45 = vmul.f32 %v16368_v15, %v20095_v19  ;;  %v8644_v13 = vpop.xlane.xlu1 %8643 }
0x1032   : > { %v8647_v1 = vpop.xlane.xlu0 %8646  ;;  %v8787_v23 = vmul.f32 %v16370_v12, %v20097_v9 }
0x1033   : > { %14200 = vmatmul.mubr.msk.f32.vlgmr.msra.gmra.mrb[168].mxu0 %vm2636_vm3, %v8786_v45 }
0x1034   : > { %15158 = vmatpush3.bf16.msra.mxu0 %v15155_v7  ;;  %14202 = vmatprep.mubr.msk.f32.mxu0 %vm2636_vm3, %v8787_v23 }
0x1035   : > { %15160 = vmatprep.subr.bf16.mxu0 %v15159_v38  ;;  %v8626_v44 = vpop.xlane.xlu1 %8625 }
0x1036   : > { %16375 = vrcp.f32 %v8626_v44  ;;  %v8629_v16 = vpop.xlane.xlu0 %8628 }
0x1037   : > { %16377 = vrcp.f32 %v8629_v16 }
0x1038   : > { %v16372_v61 = vpop.eup %16371  ;;  %15162 = vmatpush3.bf16.msra.mxu0 %v15159_v38 }
0x1039   : > { %v16374_v39 = vpop.eup %16373  ;;  %v8650_v43 = vpop.xlane.xlu1 %8649  ;;  %v8788_v19 = vmul.f32 %v16372_v61, %v20115_v46  ;;  %v12155_v61 = vld [vmem:[%s20781_s7 + $0x24] sm:$0xf] }
0x103a   : > { %v8653_v42 = vpop.xlane.xlu0 %8652  ;;  %v8789_v9 = vmul.f32 %v16374_v39, %v20117_v2 }
0x103b   : > { %14203 = vmatmul.mubr.msk.f32.gmra.mrb[170].mxu0 %vm2636_vm3, %v8788_v19 }
0x103c   : > { %14205 = vmatprep.mubr.msk.f32.mxu0 %vm2636_vm3, %v8789_v9 }
0x103d   : > { %v8632_v20 = vpop.xlane.xlu1 %8631 }
0x103e   : > { %16379 = vrcp.f32 %v8632_v20  ;;  %v8659_v7 = vpop.xlane.xlu0 %8658 }
0x103f   : > { %16381 = vrcp.f32 %v8659_v7 }
0x1040   : > { %v16376_v22 = vpop.eup %16375  ;;  %16383 = vrcp.f32 %v20301_v54 }
0x1041   : > { %v16378_v41 = vpop.eup %16377  ;;  %v8656_v47 = vpop.xlane.xlu1 %8655  ;;  %v8790_v8 = vmul.f32 %v16376_v22, %v20135_v49  ;;  %16385 = vrcp.f32 %v20303_v37 }
0x1042   : > { %v8665_v14 = vpop.xlane.xlu0 %8664  ;;  %v8791_v55 = vmul.f32 %v16378_v41, %v20137_v51  ;;  %16387 = vrcp.f32 %v8644_v13 }
0x1043   : > { %14206 = vmatmul.mubr.msk.f32.gmra.mrb[172].mxu0 %vm2636_vm3, %v8790_v8  ;;  %16389 = vrcp.f32 %v8647_v1 }
0x1044   : > { %14208 = vmatprep.mubr.msk.f32.mxu0 %vm2636_vm3, %v8791_v55 }
0x1045   : > { %v8662_v46 = vpop.xlane.xlu1 %8661 }
0x1046   : > { %v8671_v2 = vpop.xlane.xlu0 %8670  ;;  %16391 = vrcp.f32 %v8662_v46 }
0x1047   : > { %16393 = vrcp.f32 %v8665_v14 }
0x1048   : > { %v16380_v58 = vpop.eup %16379  ;;  %16395 = vrcp.f32 %v8650_v43 }
0x1049   : > { %v16382_v30 = vpop.eup %16381  ;;  %v8668_v31 = vpop.xlane.xlu1 %8667  ;;  %v8792_v25 = vmul.f32 %v16380_v58, %v20155_v52  ;;  %16397 = vrcp.f32 %v8653_v42 }
0x104a   : > { %v8677_v11 = vpop.xlane.xlu0 %8676  ;;  %v8801_v6 = vmul.f32 %v16382_v30, %v20157_v28  ;;  %16399 = vrcp.f32 %v8668_v31  ;;  %v16384_v21 = vpop.eup %16383  ;;  %v21158_v31 = vld [vmem:[#allocation27_spill] sm:$0xff] }
0x104b   : > { %14209 = vmatmul.mubr.msk.f32.gmra.mrb[174].mxu0 %vm2636_vm3, %v8792_v25  ;;  %16401 = vrcp.f32 %v8671_v2  ;;  %v16386_v60 = vpop.eup %16385  ;;  %v8794_v13 = vmul.f32 %v16384_v21, %v20105_v59  ;;  %v12156_v59 = vld [vmem:[%s20781_s7 + $0x28] sm:$0xf]  ;;  %v21157_v2 = vld [vmem:[#allocation32_spill] sm:$0xff] }
0x104c   : > { %14255 = vmatprep.mubr.msk.f32.mxu0 %vm2636_vm3, %v8801_v6  ;;  %16403 = vrcp.f32 %v8656_v47  ;;  %v16388_v12 = vpop.eup %16387  ;;  %v8795_v16 = vmul.f32 %v16386_v60, %v20107_v33 }
0x104d   : > { %v8674_v49 = vpop.xlane.xlu1 %8673  ;;  %v16390_v45 = vpop.eup %16389  ;;  %v8796_v42 = vmul.f32 %v16388_v12, %v20125_v4  ;;  %v12157_v4 = vld [vmem:[%s20781_s7 + $0x2c] sm:$0xf] }
0x104e   : > { %v15817_v51 = vpop.permute.xlu0 %15816  ;;  %16405 = vrcp.f32 %v8674_v49  ;;  %v8797_v7 = vmul.f32 %v16390_v45, %v20127_v56 }
0x104f   : > { %v15819_v53 = vunpack.i.h.bf16 %v15817_v51  ;;  %v15818_v63 = vunpack.i.l.bf16 %v15817_v51  ;;  %16407 = vrcp.f32 %v8677_v11  ;;  %v12158_v11 = vld [vmem:[%s20781_s7 + $0x30] sm:$0xf]  ;;  %v12160_v51 = vld [vmem:[%s20781_s7 + $0x38] sm:$0xf] }
0x1050   : > { %v20327_v34 = vpop.f32.mrb[168].mxu1  ;;  %v16392_v38 = vpop.eup %16391 }
0x1051   : > { %v15147_v29 = vpack.c.bf16 %v15819_v53, %v15818_v63  ;;  %v20329_v10 = vpop.f32.mrb[169].mxu1  ;;  %v8680_v3 = vpop.xlane.xlu1 %8679  ;;  %v8802_v33 = vmul.f32 %v16392_v38, %v20173_v18 }
0x1052   : > { %v16394_v39 = vpop.eup %16393  ;;  %16409 = vrcp.f32 %v8680_v3 }
0x1053   : > { %15148 = vmatprep.subr.bf16.mxu1 %v15147_v29  ;;  %v16396_v43 = vpop.eup %16395  ;;  %v8803_v22 = vmul.f32 %v16394_v39, %v20166_v0 }
0x1054   : > { %15150 = vmatpush3.bf16.msra.mxu1 %v15147_v29  ;;  %v16398_v19 = vpop.eup %16397  ;;  %v8798_v56 = vmul.f32 %v16396_v43, %v20145_v36  ;;  %v21156_v36 = vld [vmem:[#allocation21_spill] sm:$0xff] }
0x1055   : > { %v15822_v52 = vpop.permute.xlu1 %15821  ;;  %v16400_v9 = vpop.eup %16399  ;;  %v8799_v14 = vmul.f32 %v16398_v19, %v20147_v35 }
0x1056   : > { %v15824_v28 = vunpack.i.h.bf16 %v15822_v52  ;;  %v15823_v17 = vunpack.i.l.bf16 %v15822_v52  ;;  %v16402_v41 = vpop.eup %16401  ;;  %v8804_v0 = vmul.f32 %v16400_v9, %v20181_v24 }
0x1057   : > { %v16404_v18 = vpop.eup %16403  ;;  %v8805_v55 = vmul.f32 %v16402_v41, %v20175_v57  ;;  %v21159_v57 = vld [vmem:[#allocation25_spill] sm:$0xff] }
0x1058   : > { %v15163_v32 = vpack.c.bf16 %v15824_v28, %v15823_v17  ;;  %v16406_v8 = vpop.eup %16405  ;;  %v8800_v24 = vmul.f32 %v16404_v18, %v21156_v36 }
0x1059   : > { %v15827_v48 = vpop.permute.xlu1 %15826  ;;  %v16408_v46 = vpop.eup %16407  ;;  %v8806_v58 = vmul.f32 %v16406_v8, %v21157_v2 }
0x105a   : > { %v15829_v50 = vunpack.i.h.bf16 %v15827_v48  ;;  %v15828_v62 = vunpack.i.l.bf16 %v15827_v48  ;;  %15164 = vmatprep.subr.bf16.mxu0 %v15163_v32  ;;  %v8807_v35 = vmul.f32 %v16408_v46, %v21158_v31 }
0x105b   : > { %15166 = vmatpush3.bf16.msra.mxu0 %v15163_v32 }
0x105c   : > { %v15151_v54 = vpack.c.bf16 %v15829_v50, %v15828_v62  ;;  %v20333_v37 = vpop.f32.mrb[170].mxu1  ;;  %v16410_v30 = vpop.eup %16409 }
0x105d   : > { %v20335_v40 = vpop.f32.mrb[171].mxu1  ;;  %v15832_v5 = vpop.permute.xlu1 %15831  ;;  %v8808_v25 = vmul.f32 %v16410_v30, %v21159_v57 }
0x105e   : > { %v15834_v27 = vunpack.i.h.bf16 %v15832_v5  ;;  %v15833_v15 = vunpack.i.l.bf16 %v15832_v5  ;;  %15152 = vmatprep.subr.bf16.mxu1 %v15151_v54  ;;  %v12161_v5 = vld [vmem:[%s20781_s7 + $0x3c] sm:$0xf] }
0x105f   : > { %15154 = vmatpush3.bf16.msra.mxu1 %v15151_v54 }
0x1060   : > { %v15167_v1 = vpack.c.bf16 %v15834_v27, %v15833_v15  ;;  %v14067_v23 = vpop.f32.mrb[172].mxu1  ;;  %14267 = vmatprep.subr.msk.mxu1 %vm4405_vm4, %v12154_v26 }
0x1061   : > { %v8919_v44 = vpop.f32.mrb[173].mxu1 }
0x1062   : > { %14228 = vmatmul.mubr.msk.f32.vlgmr.msra.gmra.mrb[192].mxu1 %vm2636_vm3, %v8794_v13  ;;  %15168 = vmatprep.subr.bf16.mxu0 %v15167_v1 }
0x1063   : > { %14230 = vmatprep.mubr.msk.f32.mxu1 %vm2636_vm3, %v8795_v16  ;;  %15170 = vmatpush3.bf16.msra.mxu0 %v15167_v1 }
0x1064   : > { %14268 = vmatpush3.msk.msra.mxu1 %vm4405_vm4, %v12154_v26  ;;  %14281 = vmatprep.subr.msk.mxu0 %vm4405_vm4, %v12155_v61 }
0x1065   : > { %v14070_v20 = vpop.f32.mrb[174].mxu1  ;;  %14295 = vmatprep.subr.msk.mxu1 %vm4405_vm4, %v12156_v59 }
0x1066   : > { %v8929_v47 = vpop.f32.mrb[175].mxu1  ;;  %14231 = vmatmul.mubr.msk.f32.gmra.mrb[194].mxu1 %vm2636_vm3, %v8796_v42  ;;  %14256 = vmatmul.mubr.msk.f32.vlgmr.msra.gmra.mrb[176].mxu0 %vm2636_vm3, %v8802_v33 }
0x1067   : > { %14233 = vmatprep.mubr.msk.f32.mxu1 %vm2636_vm3, %v8797_v7  ;;  %14258 = vmatprep.mubr.msk.f32.mxu0 %vm2636_vm3, %v8803_v22 }
0x1068   : > { %14282 = vmatpush3.msk.msra.mxu0 %vm4405_vm4, %v12155_v61 }
0x1069   : > { %14309 = vmatprep.subr.msk.mxu0 %vm4405_vm4, %v12157_v4 }
0x106a   : > { %14234 = vmatmul.mubr.msk.f32.gmra.mrb[196].mxu1 %vm2636_vm3, %v8798_v56  ;;  %14259 = vmatmul.mubr.msk.f32.gmra.mrb[178].mxu0 %vm2636_vm3, %v8804_v0 }
0x106b   : > { %14236 = vmatprep.mubr.msk.f32.mxu1 %vm2636_vm3, %v8799_v14  ;;  %14261 = vmatprep.mubr.msk.f32.mxu0 %vm2636_vm3, %v8805_v55 }
0x106e   : > { %14237 = vmatmul.mubr.msk.f32.gmra.mrb[198].mxu1 %vm2636_vm3, %v8800_v24  ;;  %14262 = vmatmul.mubr.msk.f32.gmra.mrb[180].mxu0 %vm2636_vm3, %v8806_v58 }
0x106f   : > { %14264 = vmatprep.mubr.msk.f32.mxu0 %vm2636_vm3, %v8807_v35  ;;  %14269 = vmatprep.mubr.msk.f32.mxu1 %vm1475_vm1, %v20329_v10 }
0x1072   : > { %14265 = vmatmul.mubr.msk.f32.gmra.mrb[182].mxu0 %vm2636_vm3, %v8808_v25  ;;  %14270 = vmatmul.mubr.msk.f32.vlgmr.msra.gmra.mrb[200].mxu1 %vm1475_vm1, %v20327_v34  ;;  %v12159_v34 = vld [vmem:[%s20781_s7 + $0x34] sm:$0xf] }
0x1073   : > { %14272 = vmatprep.mubr.msk.f32.mxu1 %vm1475_vm1, %v20335_v40  ;;  %14296 = vmatpush3.msk.msra.mxu1 %vm4405_vm4, %v12156_v59 }
0x1074   : > { %14323 = vmatprep.subr.msk.mxu1 %vm4405_vm4, %v12158_v11 }
0x1076   : > { %14273 = vmatmul.mubr.msk.f32.gmra.mrb[202].mxu1 %vm1475_vm1, %v20333_v37 }
0x1077   : > { %14275 = vmatprep.mubr.msk.f32.mxu1 %vm1475_vm1, %v8919_v44 }
0x107a   : > { %14276 = vmatmul.mubr.msk.f32.gmra.mrb[204].mxu1 %vm1475_vm1, %v14067_v23 }
0x107b   : > { %14278 = vmatprep.mubr.msk.f32.mxu1 %vm1475_vm1, %v8929_v47 }
0x107e   : > { %14279 = vmatmul.mubr.msk.f32.gmra.mrb[206].mxu1 %vm1475_vm1, %v14070_v20 }
0x10b4   : > { %v14117_v6 = vpop.f32.mrb[176].mxu1 }
0x10b5   : > { %v9157_v49 = vpop.f32.mrb[177].mxu1 }
0x10b6   : > { %14297 = vmatprep.mubr.msk.f32.mxu1 %vm1475_vm1, %v9157_v49 }
0x10b7   : > { %v14089_v53 = vpop.f32.mrb[152].mxu0  ;;  %14298 = vmatmul.mubr.msk.f32.vlgmr.msra.gmra.mrb[208].mxu1 %vm1475_vm1, %v14117_v6 }
0x10b8   : > { %v9028_v63 = vpop.f32.mrb[153].mxu0  ;;  %14324 = vmatpush3.msk.msra.mxu1 %vm4405_vm4, %v12158_v11 }
0x10b9   : > { %14283 = vmatprep.mubr.msk.f32.mxu0 %vm1475_vm1, %v9028_v63  ;;  %14351 = vmatprep.subr.msk.mxu1 %vm4405_vm4, %v12160_v51 }
0x10ba   : > { %14284 = vmatmul.mubr.msk.f32.vlgmr.msra.gmra.mrb[184].mxu0 %vm1475_vm1, %v14089_v53 }
0x10bb   : > { %14310 = vmatpush3.msk.msra.mxu0 %vm4405_vm4, %v12157_v4 }
0x10bc   : > { %14337 = vmatprep.subr.msk.mxu0 %vm4405_vm4, %v12159_v34 }
0x10bf   : > { %v14120_v29 = vpop.f32.mrb[178].mxu1 }
0x10c0   : > { %v9167_v10 = vpop.f32.mrb[179].mxu1 }
0x10c1   : > { %14300 = vmatprep.mubr.msk.f32.mxu1 %vm1475_vm1, %v9167_v10 }
0x10c2   : > { %14301 = vmatmul.mubr.msk.f32.gmra.mrb[210].mxu1 %vm1475_vm1, %v14120_v29 }
0x10c4   : > { %v14092_v3 = vpop.f32.mrb[154].mxu0 }
0x10c5   : > { %v9038_v52 = vpop.f32.mrb[155].mxu0 }
0x10c6   : > { %14286 = vmatprep.mubr.msk.f32.mxu0 %vm1475_vm1, %v9038_v52 }
0x10c7   : > { %14287 = vmatmul.mubr.msk.f32.gmra.mrb[186].mxu0 %vm1475_vm1, %v14092_v3  ;;  %v14123_v28 = vpop.f32.mrb[180].mxu1 }
0x10c8   : > { %v9177_v17 = vpop.f32.mrb[181].mxu1 }
0x10c9   : > { %14303 = vmatprep.mubr.msk.f32.mxu1 %vm1475_vm1, %v9177_v17 }
0x10ca   : > { %14304 = vmatmul.mubr.msk.f32.gmra.mrb[212].mxu1 %vm1475_vm1, %v14123_v28 }
0x10cc   : > { %v14095_v32 = vpop.f32.mrb[156].mxu0 }
0x10cd   : > { %v9048_v48 = vpop.f32.mrb[157].mxu0 }
0x10ce   : > { %14289 = vmatprep.mubr.msk.f32.mxu0 %vm1475_vm1, %v9048_v48 }
0x10cf   : > { %14290 = vmatmul.mubr.msk.f32.gmra.mrb[188].mxu0 %vm1475_vm1, %v14095_v32 }
0x10d0   : > { %v14098_v50 = vpop.f32.mrb[158].mxu0 }
0x10d1   : > { %v9058_v62 = vpop.f32.mrb[159].mxu0 }
0x10d2   : > { %14292 = vmatprep.mubr.msk.f32.mxu0 %vm1475_vm1, %v9058_v62 }
0x10d3   : > { %14293 = vmatmul.mubr.msk.f32.gmra.mrb[190].mxu0 %vm1475_vm1, %v14098_v50  ;;  %v14126_v54 = vpop.f32.mrb[182].mxu1 }
0x10d4   : > { %v9187_v37 = vpop.f32.mrb[183].mxu1 }
0x10d5   : > { %14306 = vmatprep.mubr.msk.f32.mxu1 %vm1475_vm1, %v9187_v37 }
0x10d6   : > { %14307 = vmatmul.mubr.msk.f32.gmra.mrb[214].mxu1 %vm1475_vm1, %v14126_v54 }
0x10db   : > { %v14145_v21 = vpop.f32.mrb[160].mxu0 }
0x10dc   : > { %v9286_v40 = vpop.f32.mrb[161].mxu0 }
0x10dd   : > { %14311 = vmatprep.mubr.msk.f32.mxu0 %vm1475_vm1, %v9286_v40 }
0x10de   : > { %14312 = vmatmul.mubr.msk.f32.vlgmr.msra.gmra.mrb[192].mxu0 %vm1475_vm1, %v14145_v21 }
0x10df   : > { %v14173_v26 = vpop.f32.mrb[184].mxu1  ;;  %14338 = vmatpush3.msk.msra.mxu0 %vm4405_vm4, %v12159_v34 }
0x10e0   : > { %v9415_v60 = vpop.f32.mrb[185].mxu1  ;;  %14365 = vmatprep.subr.msk.mxu0 %vm4405_vm4, %v12161_v5 }
0x10e1   : > { %14325 = vmatprep.mubr.msk.f32.mxu1 %vm1475_vm1, %v9415_v60 }
0x10e2   : > { %14326 = vmatmul.mubr.msk.f32.vlgmr.msra.gmra.mrb[216].mxu1 %vm1475_vm1, %v14173_v26 }
0x10e3   : > { %v14176_v27 = vpop.f32.mrb[186].mxu1  ;;  %14352 = vmatpush3.msk.msra.mxu1 %vm4405_vm4, %v12160_v51 }
0x10e4   : > { %v14148_v15 = vpop.f32.mrb[162].mxu0  ;;  %v9425_v12 = vpop.f32.mrb[187].mxu1 }
0x10e5   : > { %v9296_v45 = vpop.f32.mrb[163].mxu0  ;;  %14328 = vmatprep.mubr.msk.f32.mxu1 %vm1475_vm1, %v9425_v12 }
0x10e6   : > { %14314 = vmatprep.mubr.msk.f32.mxu0 %vm1475_vm1, %v9296_v45  ;;  %14329 = vmatmul.mubr.msk.f32.gmra.mrb[218].mxu1 %vm1475_vm1, %v14176_v27 }
0x10e7   : > { %14315 = vmatmul.mubr.msk.f32.gmra.mrb[194].mxu0 %vm1475_vm1, %v14148_v15 }
0x10e8   : > { %v14151_v13 = vpop.f32.mrb[164].mxu0 }
0x10e9   : > { %v9306_v1 = vpop.f32.mrb[165].mxu0 }
0x10ea   : > { %14317 = vmatprep.mubr.msk.f32.mxu0 %vm1475_vm1, %v9306_v1 }
0x10eb   : > { %14318 = vmatmul.mubr.msk.f32.gmra.mrb[196].mxu0 %vm1475_vm1, %v14151_v13  ;;  %v14179_v23 = vpop.f32.mrb[188].mxu1 }
0x10ec   : > { %v9435_v38 = vpop.f32.mrb[189].mxu1 }
0x10ed   : > { %14331 = vmatprep.mubr.msk.f32.mxu1 %vm1475_vm1, %v9435_v38 }
0x10ee   : > { %14332 = vmatmul.mubr.msk.f32.gmra.mrb[220].mxu1 %vm1475_vm1, %v14179_v23 }
0x10f1   : > { %v14154_v44 = vpop.f32.mrb[166].mxu0 }
0x10f2   : > { %v9316_v16 = vpop.f32.mrb[167].mxu0 }
0x10f3   : > { %14320 = vmatprep.mubr.msk.f32.mxu0 %vm1475_vm1, %v9316_v16 }
0x10f4   : > { %14321 = vmatmul.mubr.msk.f32.gmra.mrb[198].mxu0 %vm1475_vm1, %v14154_v44 }
0x10f5   : > { %v14182_v61 = vpop.f32.mrb[190].mxu1 }
0x10f6   : > { %v9445_v39 = vpop.f32.mrb[191].mxu1 }
0x10f7   : > { %14334 = vmatprep.mubr.msk.f32.mxu1 %vm1475_vm1, %v9445_v39 }
0x10f8   : > { %14335 = vmatmul.mubr.msk.f32.gmra.mrb[222].mxu1 %vm1475_vm1, %v14182_v61 }
0x1106   : > { %v14201_v59 = vpop.f32.mrb[168].mxu0 }
0x1107   : > { %v9544_v43 = vpop.f32.mrb[169].mxu0 }
0x1108   : > { %14339 = vmatprep.mubr.msk.f32.mxu0 %vm1475_vm1, %v9544_v43 }
0x1109   : > { %14340 = vmatmul.mubr.msk.f32.vlgmr.msra.gmra.mrb[200].mxu0 %vm1475_vm1, %v14201_v59 }
0x110a   : > { %14366 = vmatpush3.msk.msra.mxu0 %vm4405_vm4, %v12161_v5 }
0x110e   : > { %v14204_v19 = vpop.f32.mrb[170].mxu0 }
0x110f   : > { %v9554_v33 = vpop.f32.mrb[171].mxu0 }
0x1110   : > { %14342 = vmatprep.mubr.msk.f32.mxu0 %vm1475_vm1, %v9554_v33 }
0x1111   : > { %14343 = vmatmul.mubr.msk.f32.gmra.mrb[202].mxu0 %vm1475_vm1, %v14204_v19 }
0x1116   : > { %v14207_v42 = vpop.f32.mrb[172].mxu0 }
0x1117   : > { %v9564_v9 = vpop.f32.mrb[173].mxu0 }
0x1118   : > { %14345 = vmatprep.mubr.msk.f32.mxu0 %vm1475_vm1, %v9564_v9 }
0x1119   : > { %14346 = vmatmul.mubr.msk.f32.gmra.mrb[204].mxu0 %vm1475_vm1, %v14207_v42 }
0x111e   : > { %v14210_v20 = vpop.f32.mrb[174].mxu0 }
0x111f   : > { %v9574_v7 = vpop.f32.mrb[175].mxu0 }
0x1120   : > { %14348 = vmatprep.mubr.msk.f32.mxu0 %vm1475_vm1, %v9574_v7 }
0x1121   : > { %14349 = vmatmul.mubr.msk.f32.gmra.mrb[206].mxu0 %vm1475_vm1, %v14210_v20 }
0x1135   : > { %v14229_v22 = vpop.f32.mrb[192].mxu1 }
0x1136   : > { %v9673_v41 = vpop.f32.mrb[193].mxu1 }
0x1137   : > { %14353 = vmatprep.mubr.msk.f32.mxu1 %vm1475_vm1, %v9673_v41 }
0x1138   : > { %14354 = vmatmul.mubr.msk.f32.vlgmr.msra.gmra.mrb[224].mxu1 %vm1475_vm1, %v14229_v22 }
0x1139   : > { %v14232_v47 = vpop.f32.mrb[194].mxu1  ;;  %v14257_v4 = vpop.f32.mrb[176].mxu0 }
0x113a   : > { %v9683_v18 = vpop.f32.mrb[195].mxu1  ;;  %v9802_v56 = vpop.f32.mrb[177].mxu0 }
0x113b   : > { %14356 = vmatprep.mubr.msk.f32.mxu1 %vm1475_vm1, %v9683_v18  ;;  %14367 = vmatprep.mubr.msk.f32.mxu0 %vm1475_vm1, %v9802_v56 }
0x113c   : > { %14357 = vmatmul.mubr.msk.f32.gmra.mrb[226].mxu1 %vm1475_vm1, %v14232_v47  ;;  %14368 = vmatmul.mubr.msk.f32.vlgmr.msra.gmra.mrb[208].mxu0 %vm1475_vm1, %v14257_v4 }
0x113d   : > { %v14235_v0 = vpop.f32.mrb[196].mxu1  ;;  %v14260_v8 = vpop.f32.mrb[178].mxu0 }
0x113e   : > { %v9693_v14 = vpop.f32.mrb[197].mxu1  ;;  %v9812_v55 = vpop.f32.mrb[179].mxu0 }
0x113f   : > { %14359 = vmatprep.mubr.msk.f32.mxu1 %vm1475_vm1, %v9693_v14  ;;  %14370 = vmatprep.mubr.msk.f32.mxu0 %vm1475_vm1, %v9812_v55 }
0x1140   : > { %14360 = vmatmul.mubr.msk.f32.gmra.mrb[228].mxu1 %vm1475_vm1, %v14235_v0  ;;  %14371 = vmatmul.mubr.msk.f32.gmra.mrb[210].mxu0 %vm1475_vm1, %v14260_v8 }
0x1141   : > { %v14238_v46 = vpop.f32.mrb[198].mxu1  ;;  %v14263_v36 = vpop.f32.mrb[180].mxu0 }
0x1142   : > { %v9703_v24 = vpop.f32.mrb[199].mxu1  ;;  %v9822_v2 = vpop.f32.mrb[181].mxu0 }
0x1143   : > { %14362 = vmatprep.mubr.msk.f32.mxu1 %vm1475_vm1, %v9703_v24  ;;  %14373 = vmatprep.mubr.msk.f32.mxu0 %vm1475_vm1, %v9822_v2 }
0x1144   : > { %14363 = vmatmul.mubr.msk.f32.gmra.mrb[230].mxu1 %vm1475_vm1, %v14238_v46  ;;  %14374 = vmatmul.mubr.msk.f32.gmra.mrb[212].mxu0 %vm1475_vm1, %v14263_v36 }
0x1145   : > { %v14266_v58 = vpop.f32.mrb[182].mxu0  ;;  %v14271_v30 = vpop.f32.mrb[200].mxu1 }
0x1146   : > { %v9832_v31 = vpop.f32.mrb[183].mxu0  ;;  %v9943_v35 = vpop.f32.mrb[201].mxu1  ;;  %v10921_v29 = vsel %vm574_vm0, %v14271_v30, 0.0 }
0x1147   : > { %14376 = vmatprep.mubr.msk.f32.mxu0 %vm1475_vm1, %v9832_v31  ;;  %v10906_v52 = vsel %vm574_vm0, %v9943_v35, 0.0 }
0x1148   : > { %14377 = vmatmul.mubr.msk.f32.gmra.mrb[214].mxu0 %vm1475_vm1, %v14266_v58 }
0x1149   : > { %v14274_v57 = vpop.f32.mrb[202].mxu1 }
0x114a   : > { %v9953_v25 = vpop.f32.mrb[203].mxu1  ;;  %v10951_v5 = vsel %vm574_vm0, %v14274_v57, 0.0 }
0x114b   : > { %v10936_v27 = vsel %vm574_vm0, %v9953_v25, 0.0 }
0x114d   : > { %v14277_v11 = vpop.f32.mrb[204].mxu1 }
0x114e   : > { %v9963_v6 = vpop.f32.mrb[205].mxu1  ;;  %v10981_v39 = vsel %vm574_vm0, %v14277_v11, 0.0 }
0x114f   : > { %v10966_v19 = vsel %vm574_vm0, %v9963_v6, 0.0 }
0x1151   : > { %v14280_v49 = vpop.f32.mrb[206].mxu1 }
0x1152   : > { %v9973_v51 = vpop.f32.mrb[207].mxu1  ;;  %v11011_v47 = vsel %vm574_vm0, %v14280_v49, 0.0 }
0x1153   : > { %v10996_v0 = vsel %vm574_vm0, %v9973_v51, 0.0 }
0x118a   : > { %v14299_v53 = vpop.f32.mrb[208].mxu1 }
0x118b   : > { %v10207_v63 = vpop.f32.mrb[209].mxu1  ;;  %v10924_v32 = vsel %vm574_vm0, %v14299_v53, 0.0 }
0x118c   : > { %v10909_v50 = vsel %vm574_vm0, %v10207_v63, 0.0 }
0x118d   : > { %v14285_v34 = vpop.f32.mrb[184].mxu0 }
0x118e   : > { %v10922_v10 = vsel %vm574_vm0, %v14285_v34, 0.0  ;;  %v10075_v3 = vpop.f32.mrb[185].mxu0 }
0x118f   : > { %v10923_v28 = vadd.f32 %v10922_v10, %v10921_v29  ;;  %v10907_v17 = vsel %vm574_vm0, %v10075_v3, 0.0 }
0x1190   : > { %v10908_v48 = vadd.f32 %v10907_v17, %v10906_v52 }
0x1191   : > { %v10925_v62 = vadd.f32 %v10924_v32, %v10923_v28 }
0x1192   : > { %v10910_v54 = vadd.f32 %v10909_v50, %v10908_v48 }
0x1195   : > { %v14302_v37 = vpop.f32.mrb[210].mxu1 }
0x1196   : > { %v10217_v21 = vpop.f32.mrb[211].mxu1  ;;  %v10954_v45 = vsel %vm574_vm0, %v14302_v37, 0.0 }
0x1197   : > { %v10939_v23 = vsel %vm574_vm0, %v10217_v21, 0.0 }
0x119a   : > { %v14288_v40 = vpop.f32.mrb[186].mxu0 }
0x119b   : > { %v10952_v26 = vsel %vm574_vm0, %v14288_v40, 0.0  ;;  %v10085_v60 = vpop.f32.mrb[187].mxu0 }
0x119c   : > { %v10953_v15 = vadd.f32 %v10952_v26, %v10951_v5  ;;  %v10937_v12 = vsel %vm574_vm0, %v10085_v60, 0.0 }
0x119d   : > { %v10938_v13 = vadd.f32 %v10937_v12, %v10936_v27  ;;  %v14305_v1 = vpop.f32.mrb[212].mxu1 }
0x119e   : > { %v10227_v38 = vpop.f32.mrb[213].mxu1  ;;  %v10955_v44 = vadd.f32 %v10954_v45, %v10953_v15  ;;  %v10984_v9 = vsel %vm574_vm0, %v14305_v1, 0.0 }
0x119f   : > { %v10940_v16 = vadd.f32 %v10939_v23, %v10938_v13  ;;  %v10969_v7 = vsel %vm574_vm0, %v10227_v38, 0.0 }
0x11a2   : > { %v14291_v61 = vpop.f32.mrb[188].mxu0 }
0x11a3   : > { %v10982_v59 = vsel %vm574_vm0, %v14291_v61, 0.0  ;;  %v10095_v43 = vpop.f32.mrb[189].mxu0 }
0x11a4   : > { %v10983_v33 = vadd.f32 %v10982_v59, %v10981_v39  ;;  %v10967_v42 = vsel %vm574_vm0, %v10095_v43, 0.0 }
0x11a5   : > { %v10968_v20 = vadd.f32 %v10967_v42, %v10966_v19 }
0x11a6   : > { %v14294_v22 = vpop.f32.mrb[190].mxu0  ;;  %v10985_v41 = vadd.f32 %v10984_v9, %v10983_v33 }
0x11a7   : > { %v11012_v4 = vsel %vm574_vm0, %v14294_v22, 0.0  ;;  %v10105_v18 = vpop.f32.mrb[191].mxu0  ;;  %v10970_v56 = vadd.f32 %v10969_v7, %v10968_v20 }
0x11a8   : > { %v11013_v8 = vadd.f32 %v11012_v4, %v11011_v47  ;;  %v10997_v14 = vsel %vm574_vm0, %v10105_v18, 0.0 }
0x11a9   : > { %v10998_v55 = vadd.f32 %v10997_v14, %v10996_v0  ;;  %v14308_v46 = vpop.f32.mrb[214].mxu1 }
0x11aa   : > { %v11014_v36 = vsel %vm574_vm0, %v14308_v46, 0.0  ;;  %v10237_v24 = vpop.f32.mrb[215].mxu1 }
0x11ab   : > { %v11015_v2 = vadd.f32 %v11014_v36, %v11013_v8  ;;  %v10999_v58 = vsel %vm574_vm0, %v10237_v24, 0.0 }
0x11ac   : > { %v11000_v30 = vadd.f32 %v10999_v58, %v10998_v55 }
0x11b1   : > { %v14313_v31 = vpop.f32.mrb[192].mxu0 }
0x11b2   : > { %v10926_v35 = vsel %vm574_vm0, %v14313_v31, 0.0  ;;  %v10339_v57 = vpop.f32.mrb[193].mxu0 }
0x11b3   : > { %v10927_v25 = vadd.f32 %v10926_v35, %v10925_v62  ;;  %v10911_v11 = vsel %vm574_vm0, %v10339_v57, 0.0 }
0x11b4   : > { %v10912_v6 = vadd.f32 %v10911_v11, %v10910_v54 }
0x11b5   : > { %v14327_v49 = vpop.f32.mrb[216].mxu1 }
0x11b6   : > { %v10928_v51 = vsel %vm574_vm0, %v14327_v49, 0.0  ;;  %v10471_v53 = vpop.f32.mrb[217].mxu1 }
0x11b7   : > { %v10929_v63 = vadd.f32 %v10928_v51, %v10927_v25  ;;  %v10913_v34 = vsel %vm574_vm0, %v10471_v53, 0.0 }
0x11b8   : > { %v10914_v29 = vadd.f32 %v10913_v34, %v10912_v6 }
0x11b9   : > { %v14330_v10 = vpop.f32.mrb[218].mxu1 }
0x11ba   : > { %v14316_v3 = vpop.f32.mrb[194].mxu0  ;;  %v10481_v52 = vpop.f32.mrb[219].mxu1  ;;  %v10958_v50 = vsel %vm574_vm0, %v14330_v10, 0.0 }
0x11bb   : > { %v10956_v28 = vsel %vm574_vm0, %v14316_v3, 0.0  ;;  %v10349_v17 = vpop.f32.mrb[195].mxu0  ;;  %v10943_v37 = vsel %vm574_vm0, %v10481_v52, 0.0 }
0x11bc   : > { %v10957_v32 = vadd.f32 %v10956_v28, %v10955_v44  ;;  %v10941_v48 = vsel %vm574_vm0, %v10349_v17, 0.0 }
0x11bd   : > { %v10942_v62 = vadd.f32 %v10941_v48, %v10940_v16 }
0x11be   : > { %v10959_v54 = vadd.f32 %v10958_v50, %v10957_v32  ;;  %v14319_v21 = vpop.f32.mrb[196].mxu0 }
0x11bf   : > { %v10944_v40 = vadd.f32 %v10943_v37, %v10942_v62  ;;  %v10986_v5 = vsel %vm574_vm0, %v14319_v21, 0.0  ;;  %v10359_v26 = vpop.f32.mrb[197].mxu0 }
0x11c0   : > { %v10987_v60 = vadd.f32 %v10986_v5, %v10985_v41  ;;  %v10971_v27 = vsel %vm574_vm0, %v10359_v26, 0.0 }
0x11c1   : > { %v10972_v15 = vadd.f32 %v10971_v27, %v10970_v56  ;;  %v14333_v12 = vpop.f32.mrb[220].mxu1 }
0x11c2   : > { %v10988_v45 = vsel %vm574_vm0, %v14333_v12, 0.0  ;;  %v10491_v13 = vpop.f32.mrb[221].mxu1 }
0x11c3   : > { %v10989_v1 = vadd.f32 %v10988_v45, %v10987_v60  ;;  %v10973_v23 = vsel %vm574_vm0, %v10491_v13, 0.0  ;;  %v21160_v60 = vld [vmem:[#allocation45_spill] sm:$0xff]  ;;  %v21161_v45 = vld [vmem:[#allocation48_spill] sm:$0xff] }
0x11c4   : > { %v10974_v38 = vadd.f32 %v10973_v23, %v10972_v15 }
0x11c7   : > { %v14322_v44 = vpop.f32.mrb[198].mxu0 }
0x11c8   : > { %v11016_v16 = vsel %vm574_vm0, %v14322_v44, 0.0  ;;  %v10369_v61 = vpop.f32.mrb[199].mxu0 }
0x11c9   : > { %v11017_v39 = vadd.f32 %v11016_v16, %v11015_v2  ;;  %v11001_v59 = vsel %vm574_vm0, %v10369_v61, 0.0 }
0x11ca   : > { %v11002_v43 = vadd.f32 %v11001_v59, %v11000_v30 }
0x11cb   : > { %v14336_v19 = vpop.f32.mrb[222].mxu1 }
0x11cc   : > { %v11018_v33 = vsel %vm574_vm0, %v14336_v19, 0.0  ;;  %v10501_v42 = vpop.f32.mrb[223].mxu1 }
0x11cd   : > { %v11019_v9 = vadd.f32 %v11018_v33, %v11017_v39  ;;  %v11003_v20 = vsel %vm574_vm0, %v10501_v42, 0.0  ;;  %v21162_v42 = vld [vmem:[#allocation47_spill] sm:$0xff] }
0x11ce   : > { %v11004_v7 = vadd.f32 %v11003_v20, %v11002_v43 }
0x11dc   : > { %v14341_v22 = vpop.f32.mrb[200].mxu0 }
0x11dd   : > { %v10930_v41 = vsel %vm574_vm0, %v14341_v22, 0.0  ;;  %v10603_v47 = vpop.f32.mrb[201].mxu0 }
0x11de   : > { %v10931_v4 = vadd.f32 %v10930_v41, %v10929_v63  ;;  %v10915_v18 = vsel %vm574_vm0, %v10603_v47, 0.0 }
0x11df   : > { %v10916_v56 = vadd.f32 %v10915_v18, %v10914_v29 }
0x11e4   : > { %v14344_v0 = vpop.f32.mrb[202].mxu0 }
0x11e5   : > { %v10960_v8 = vsel %vm574_vm0, %v14344_v0, 0.0  ;;  %v10613_v14 = vpop.f32.mrb[203].mxu0 }
0x11e6   : > { %v10961_v55 = vadd.f32 %v10960_v8, %v10959_v54  ;;  %v10945_v46 = vsel %vm574_vm0, %v10613_v14, 0.0  ;;  %v21163_v14 = vld [vmem:[#allocation49_spill] sm:$0xff] }
0x11e7   : > { %v10946_v36 = vadd.f32 %v10945_v46, %v10944_v40  ;;  %v12235_v40 = vld [vmem:[%s20782_s8 + $0x1] ss:$0 sm:$0xff] }
0x11ec   : > { %v14347_v24 = vpop.f32.mrb[204].mxu0 }
0x11ed   : > { %v10990_v2 = vsel %vm574_vm0, %v14347_v24, 0.0  ;;  %v10623_v58 = vpop.f32.mrb[205].mxu0 }
0x11ee   : > { %v10991_v30 = vadd.f32 %v10990_v2, %v10989_v1  ;;  %v10975_v31 = vsel %vm574_vm0, %v10623_v58, 0.0 }
0x11ef   : > { %v10976_v35 = vadd.f32 %v10975_v31, %v10974_v38 }
0x11f4   : > { %v14350_v57 = vpop.f32.mrb[206].mxu0 }
0x11f5   : > { %v11020_v25 = vsel %vm574_vm0, %v14350_v57, 0.0  ;;  %v10633_v11 = vpop.f32.mrb[207].mxu0 }
0x11f6   : > { %v11021_v6 = vadd.f32 %v11020_v25, %v11019_v9  ;;  %v11005_v49 = vsel %vm574_vm0, %v10633_v11, 0.0 }
0x11f7   : > { %v11006_v51 = vadd.f32 %v11005_v49, %v11004_v7 }
0x120b   : > { %v14355_v53 = vpop.f32.mrb[224].mxu1 }
0x120c   : > { %v10932_v63 = vsel %vm574_vm0, %v14355_v53, 0.0  ;;  %v10735_v34 = vpop.f32.mrb[225].mxu1 }
0x120d   : > { %v10933_v29 = vadd.f32 %v10932_v63, %v10931_v4  ;;  %v10917_v10 = vsel %vm574_vm0, %v10735_v34, 0.0  ;;  %v21165_v63 = vld [vmem:[#allocation52_spill] sm:$0xff] }
0x120e   : > { %v10918_v3 = vadd.f32 %v10917_v10, %v10916_v56 }
0x120f   : > { %v14358_v52 = vpop.f32.mrb[226].mxu1  ;;  %v14369_v28 = vpop.f32.mrb[208].mxu0 }
0x1210   : > { %v10962_v17 = vsel %vm574_vm0, %v14358_v52, 0.0  ;;  %v10934_v32 = vsel %vm574_vm0, %v14369_v28, 0.0  ;;  %v10745_v48 = vpop.f32.mrb[227].mxu1  ;;  %v10867_v50 = vpop.f32.mrb[209].mxu0  ;;  %v21166_v28 = vld [vmem:[#allocation53_spill] sm:$0xff] }
0x1211   : > { %v10963_v62 = vadd.f32 %v10962_v17, %v10961_v55  ;;  %v10935_v54 = vadd.f32 %v10934_v32, %v10933_v29  ;;  %v10947_v37 = vsel %vm574_vm0, %v10745_v48, 0.0  ;;  %v10919_v21 = vsel %vm574_vm0, %v10867_v50, 0.0  ;;  %v21167_v48 = vld [vmem:[#allocation54_spill] sm:$0xff] }
0x1212   : > { %v10948_v5 = vadd.f32 %v10947_v37, %v10946_v36  ;;  %v10920_v26 = vadd.f32 %v10919_v21, %v10918_v3 }
0x1213   : > { %v11027_v27 = vadd.f32 %v10935_v54, %v21160_v60  ;;  %v14361_v15 = vpop.f32.mrb[228].mxu1  ;;  %v14372_v12 = vpop.f32.mrb[210].mxu0 }
0x1214   : > { %v11026_v13 = vadd.f32 %v10920_v26, %v21161_v45  ;;  %v10992_v1 = vsel %vm574_vm0, %v14361_v15, 0.0  ;;  %v10964_v23 = vsel %vm574_vm0, %v14372_v12, 0.0  ;;  %v10755_v38 = vpop.f32.mrb[229].mxu1  ;;  %v10877_v44 = vpop.f32.mrb[211].mxu0 }
0x1215   : > { %v20534_v16 = vadd.f32 %v12235_v40, %v11027_v27  ;;  %v10993_v61 = vadd.f32 %v10992_v1, %v10991_v30  ;;  %v10965_v39 = vadd.f32 %v10964_v23, %v10963_v62  ;;  %v10977_v59 = vsel %vm574_vm0, %v10755_v38, 0.0  ;;  %v21164_v30 = vld [vmem:[#allocation51_spill] sm:$0xff] }
0x1216   : > { %v20537_v43 = vadd.f32 %v12235_v40, %v11026_v13  ;;  %v10978_v19 = vadd.f32 %v10977_v59, %v10976_v35  ;;  %v10949_v33 = vsel %vm574_vm0, %v10877_v44, 0.0 }
0x1217   : > { %v11029_v9 = vadd.f32 %v10965_v39, %v21162_v42  ;;  %v10950_v20 = vadd.f32 %v10949_v33, %v10948_v5  ;;  %v14364_v7 = vpop.f32.mrb[230].mxu1  ;;  %v14375_v22 = vpop.f32.mrb[212].mxu0  ;;  %v11057_v41 = vsel %vm574_vm0, %v20534_v16, 0.0 }
0x1218   : > { %v11022_v47 = vsel %vm574_vm0, %v14364_v7, 0.0  ;;  %v10994_v4 = vsel %vm574_vm0, %v14375_v22, 0.0  ;;  %v10765_v18 = vpop.f32.mrb[231].mxu1  ;;  %11058 = vadd.xlane.f32.xlu0 %v11057_v41  ;;  %v10887_v56 = vpop.f32.mrb[213].mxu0  ;;  %v11054_v0 = vsel %vm574_vm0, %v20537_v43, 0.0 }
0x1219   : > { %v20547_v8 = vadd.f32 %v12235_v40, %v11029_v9  ;;  %v11028_v55 = vadd.f32 %v10950_v20, %v21163_v14  ;;  %v11023_v46 = vadd.f32 %v11022_v47, %v11021_v6  ;;  %v10995_v36 = vadd.f32 %v10994_v4, %v10993_v61  ;;  %11055 = vadd.xlane.f32.xlu1 %v11054_v0 }
0x121a   : > { %v11007_v24 = vsel %vm574_vm0, %v10765_v18, 0.0  ;;  %v10979_v2 = vsel %vm574_vm0, %v10887_v56, 0.0 }
0x121b   : > { %v20552_v58 = vadd.f32 %v12235_v40, %v11028_v55  ;;  %v11031_v31 = vadd.f32 %v10995_v36, %v21164_v30  ;;  %v11008_v35 = vadd.f32 %v11007_v24, %v11006_v51  ;;  %v10980_v57 = vadd.f32 %v10979_v2, %v10978_v19  ;;  %v14378_v25 = vpop.f32.mrb[214].mxu0 }
0x121c   : > { %v11024_v11 = vsel %vm574_vm0, %v14378_v25, 0.0  ;;  %v11063_v49 = vsel %vm574_vm0, %v20547_v8, 0.0  ;;  %v10897_v53 = vpop.f32.mrb[215].mxu0 }
0x121d   : > { %v20558_v6 = vadd.f32 %v12235_v40, %v11031_v31  ;;  %v11030_v34 = vadd.f32 %v10980_v57, %v21165_v63  ;;  %v11025_v29 = vadd.f32 %v11024_v11, %v11023_v46  ;;  %11064 = vadd.xlane.f32.xlu0 %v11063_v49  ;;  %v11009_v10 = vsel %vm574_vm0, %v10897_v53, 0.0  ;;  %v11187_v49 = vld [vmem:[#allocation2 + $0x20] sm:$0xff]  ;;  %v11188_v53 = vld [vmem:[#allocation2 + $0x28] sm:$0xff] }
0x121e   : > { %v11010_v3 = vadd.f32 %v11009_v10, %v11008_v35  ;;  %v11060_v51 = vsel %vm574_vm0, %v20552_v58, 0.0  ;;  %v15171_v63 = vpack.c.bf16 %v11188_v53, %v11187_v49 }
0x121f   : > { %v20564_v52 = vadd.f32 %v12235_v40, %v11030_v34  ;;  %v11033_v17 = vadd.f32 %v11025_v29, %v21166_v28  ;;  %11061 = vadd.xlane.f32.xlu1 %v11060_v51  ;;  %v11069_v32 = vsel %vm574_vm0, %v20558_v6, 0.0  ;;  %v11189_v34 = vld [vmem:[#allocation2 + $0x30] sm:$0xff]  ;;  %v11190_v29 = vld [vmem:[#allocation2 + $0x38] sm:$0xff]  ;;  %v12251_v51 = vld [vmem:[%s20787_s13 + $0x88] sm:$0xff] }
0x1220   : > { %v11032_v50 = vadd.f32 %v11010_v3, %v21167_v48  ;;  %15172 = vmatprep.subr.bf16.mxu1 %v15171_v63  ;;  %v15175_v10 = vpack.c.bf16 %v11190_v29, %v11189_v34  ;;  %v12250_v3 = vld [vmem:[%s20787_s13 + $0x80] sm:$0xff]  ;;  %v12252_v28 = vld [vmem:[%s20787_s13 + $0x90] sm:$0xff] }
0x1221   : > { %v20570_v62 = vadd.f32 %v12235_v40, %v11033_v17  ;;  %11070 = vadd.xlane.f32.xlu0 %v11069_v32  ;;  %v11066_v54 = vsel %vm574_vm0, %v20564_v52, 0.0  ;;  %15174 = vmatpush3.bf16.msra.mxu1 %v15171_v63  ;;  %v15179_v17 = vpack.c.bf16 %v12251_v51, %v12250_v3  ;;  %v12253_v32 = vld [vmem:[%s20787_s13 + $0x98] sm:$0xff] }
0x1222   : > { %v20574_v37 = vadd.f32 %v12235_v40, %v11032_v50  ;;  %15176 = vmatprep.subr.bf16.mxu1 %v15175_v10  ;;  %v15183_v48 = vpack.c.bf16 %v12253_v32, %v12252_v28  ;;  %v12254_v50 = vld [vmem:[%s20787_s13 + $0xa0] sm:$0xff] }
0x1223   : > { %11067 = vadd.xlane.f32.xlu1 %v11066_v54  ;;  %v11075_v21 = vsel %vm574_vm0, %v20570_v62, 0.0  ;;  %v12255_v54 = vld [vmem:[%s20787_s13 + $0xa8] sm:$0xff]  ;;  %15180 = vmatprep.subr.bf16.mxu0 %v15179_v17 }
0x1224   : > { %v11072_v5 = vsel %vm574_vm0, %v20574_v37, 0.0  ;;  %15182 = vmatpush3.bf16.msra.mxu0 %v15179_v17 }
0x1225   : > { %11076 = vadd.xlane.f32.xlu0 %v11075_v21  ;;  %15178 = vmatpush3.bf16.msra.mxu1 %v15175_v10  ;;  %v15187_v21 = vpack.c.bf16 %v12255_v54, %v12254_v50 }
0x1226   : > { %15184 = vmatprep.subr.bf16.mxu0 %v15183_v48 }
0x1227   : > { %11073 = vadd.xlane.f32.xlu1 %v11072_v5 }
0x1228   : > { %15186 = vmatpush3.bf16.msra.mxu0 %v15183_v48 }
0x1229   : > { %15188 = vmatprep.subr.bf16.mxu0 %v15187_v21 }
0x122c   : > { %15190 = vmatpush3.bf16.msra.mxu0 %v15187_v21 }
0x12a5   : > { %v11059_v26 = vpop.xlane.xlu0 %11058 }
0x12a6   : > { %v11079_v60 = vmul.f32 0.03125, %v11059_v26  ;;  %v11056_v27 = vpop.xlane.xlu1 %11055 }
0x12a7   : > { %v11078_v15 = vmul.f32 0.03125, %v11056_v27 }
0x12a8   : > { %v20581_v12 = vsub.f32 %v20534_v16, %v11079_v60 }
0x12a9   : > { %v20584_v45 = vsub.f32 %v20537_v43, %v11078_v15 }
0x12aa   : > { %v11065_v40 = vpop.xlane.xlu0 %11064  ;;  %v11095_v13 = vmul.f32 %v20581_v12, %v20581_v12 }
0x12ab   : > { %v11081_v1 = vmul.f32 0.03125, %v11065_v40  ;;  %v11094_v23 = vmul.f32 %v20584_v45, %v20584_v45 }
0x12ac   : > { %v11062_v38 = vpop.xlane.xlu1 %11061  ;;  %v11105_v44 = vsel %vm574_vm0, %v11095_v13, 0.0 }
0x12ad   : > { %v20592_v61 = vsub.f32 %v20547_v8, %v11081_v1  ;;  %v11080_v39 = vmul.f32 0.03125, %v11062_v38  ;;  %11106 = vadd.xlane.f32.xlu0 %v11105_v44  ;;  %v11102_v59 = vsel %vm574_vm0, %v11094_v23, 0.0 }
0x12ae   : > { %v11071_v19 = vpop.xlane.xlu0 %11070  ;;  %11103 = vadd.xlane.f32.xlu1 %v11102_v59 }
0x12af   : > { %v20596_v33 = vsub.f32 %v20552_v58, %v11080_v39  ;;  %v11083_v42 = vmul.f32 0.03125, %v11071_v19  ;;  %v11097_v9 = vmul.f32 %v20592_v61, %v20592_v61 }
0x12b0   : > { %v11068_v20 = vpop.xlane.xlu1 %11067 }
0x12b1   : > { %v20601_v7 = vsub.f32 %v20558_v6, %v11083_v42  ;;  %v11082_v22 = vmul.f32 0.03125, %v11068_v20  ;;  %v11111_v41 = vsel %vm574_vm0, %v11097_v9, 0.0  ;;  %v11096_v47 = vmul.f32 %v20596_v33, %v20596_v33 }
0x12b2   : > { %11112 = vadd.xlane.f32.xlu0 %v11111_v41  ;;  %v11077_v4 = vpop.xlane.xlu0 %11076 }
0x12b3   : > { %v20607_v18 = vsub.f32 %v20564_v52, %v11082_v22  ;;  %v11085_v56 = vmul.f32 0.03125, %v11077_v4  ;;  %v11108_v0 = vsel %vm574_vm0, %v11096_v47, 0.0  ;;  %v11099_v14 = vmul.f32 %v20601_v7, %v20601_v7 }
0x12b4   : > { %11109 = vadd.xlane.f32.xlu1 %v11108_v0  ;;  %v11074_v55 = vpop.xlane.xlu1 %11073 }
0x12b5   : > { %v20613_v46 = vsub.f32 %v20570_v62, %v11085_v56  ;;  %v11084_v36 = vmul.f32 0.03125, %v11074_v55  ;;  %v11117_v24 = vsel %vm574_vm0, %v11099_v14, 0.0  ;;  %v11098_v2 = vmul.f32 %v20607_v18, %v20607_v18  ;;  %v12238_v56 = vld [vmem:[%s20783_s9 + $0x1] ss:$0 sm:$0xff] }
0x12b6   : > { %11118 = vadd.xlane.f32.xlu0 %v11117_v24 }
0x12b7   : > { %v20619_v30 = vsub.f32 %v20574_v37, %v11084_v36  ;;  %v11114_v31 = vsel %vm574_vm0, %v11098_v2, 0.0  ;;  %v11101_v35 = vmul.f32 %v20613_v46, %v20613_v46 }
0x12b8   : > { %11115 = vadd.xlane.f32.xlu1 %v11114_v31  ;;  %v12239_v31 = vld [vmem:[%s20784_s10 + $0x1] ss:$0 sm:$0xff] }
0x12b9   : > { %v11123_v57 = vsel %vm574_vm0, %v11101_v35, 0.0  ;;  %v11100_v25 = vmul.f32 %v20619_v30, %v20619_v30 }
0x12ba   : > { %11124 = vadd.xlane.f32.xlu0 %v11123_v57 }
0x12bb   : > { %v11120_v11 = vsel %vm574_vm0, %v11100_v25, 0.0 }
0x12bc   : > { %11121 = vadd.xlane.f32.xlu1 %v11120_v11 }
0x133a   : > { %v11107_v5 = vpop.xlane.xlu0 %11106 }
0x133b   : > { %v11127_v26 = vmul.f32 0.03125, %v11107_v5  ;;  %v11104_v60 = vpop.xlane.xlu1 %11103 }
0x133c   : > { %v11126_v27 = vmul.f32 0.03125, %v11104_v60 }
0x133d   : > { %v11135_v15 = vadd.f32 1e-05, %v11127_v26 }
0x133e   : > { %v11134_v40 = vadd.f32 1e-05, %v11126_v27 }
0x133f   : > { %16411 = vrsqrt.f32 %v11135_v15  ;;  %v11113_v13 = vpop.xlane.xlu0 %11112 }
0x1340   : > { %16413 = vrsqrt.f32 %v11134_v40  ;;  %v11129_v1 = vmul.f32 0.03125, %v11113_v13  ;;  %v12258_v40 = vld [vmem:[%s20787_s13 + $0xc0] sm:$0xff]  ;;  %v12259_v13 = vld [vmem:[%s20787_s13 + $0xc8] sm:$0xff] }
0x1341   : > { %v11110_v23 = vpop.xlane.xlu1 %11109 }
0x1342   : > { %v11137_v38 = vadd.f32 1e-05, %v11129_v1  ;;  %v11128_v44 = vmul.f32 0.03125, %v11110_v23  ;;  %v15195_v1 = vpack.c.bf16 %v12259_v13, %v12258_v40  ;;  %v12260_v23 = vld [vmem:[%s20787_s13 + $0xd0] sm:$0xff] }
0x1343   : > { %v11119_v39 = vpop.xlane.xlu0 %11118 }
0x1344   : > { %16415 = vrsqrt.f32 %v11137_v38  ;;  %v11136_v59 = vadd.f32 1e-05, %v11128_v44  ;;  %v11131_v19 = vmul.f32 0.03125, %v11119_v39  ;;  %v12261_v38 = vld [vmem:[%s20787_s13 + $0xd8] sm:$0xff]  ;;  %v12262_v39 = vld [vmem:[%s20787_s13 + $0xe0] sm:$0xff] }
0x1345   : > { %v11116_v42 = vpop.xlane.xlu1 %11115  ;;  %v15199_v44 = vpack.c.bf16 %v12261_v38, %v12260_v23 }
0x1346   : > { %16417 = vrsqrt.f32 %v11136_v59  ;;  %v11139_v9 = vadd.f32 1e-05, %v11131_v19  ;;  %v11130_v20 = vmul.f32 0.03125, %v11116_v42  ;;  %v12263_v59 = vld [vmem:[%s20787_s13 + $0xe8] sm:$0xff]  ;;  %v12264_v42 = vld [vmem:[%s20787_s13 + $0xf0] sm:$0xff] }
0x1347   : > { %v11125_v22 = vpop.xlane.xlu0 %11124  ;;  %v15203_v19 = vpack.c.bf16 %v12263_v59, %v12262_v39 }
0x1348   : > { %16419 = vrsqrt.f32 %v11139_v9  ;;  %v11138_v41 = vadd.f32 1e-05, %v11130_v20  ;;  %v11133_v47 = vmul.f32 0.03125, %v11125_v22  ;;  %v12265_v9 = vld [vmem:[%s20787_s13 + $0xf8] sm:$0xff]  ;;  %v12241_v22 = vld [vmem:[%s20786_s12 + $0x1] ss:$0 sm:$0xff] }
0x1349   : > { %v16412_v4 = vpop.eup %16411  ;;  %v11122_v0 = vpop.xlane.xlu1 %11121  ;;  %v15207_v20 = vpack.c.bf16 %v12265_v9, %v12264_v42 }
0x134a   : > { %v16414_v14 = vpop.eup %16413  ;;  %v11151_v55 = vmul.f32 %v16412_v4, %v20581_v12  ;;  %16421 = vrsqrt.f32 %v11138_v41  ;;  %v11141_v36 = vadd.f32 1e-05, %v11133_v47  ;;  %v11132_v24 = vmul.f32 0.03125, %v11122_v0 }
0x134b   : > { %v11150_v2 = vmul.f32 %v16414_v14, %v20584_v45 }
0x134c   : > { %v11165_v35 = vmul.f32 %v12238_v56, %v11151_v55  ;;  %16423 = vrsqrt.f32 %v11141_v36  ;;  %v11140_v57 = vadd.f32 1e-05, %v11132_v24 }
0x134d   : > { %v11164_v25 = vmul.f32 %v12238_v56, %v11150_v2 }
0x134e   : > { %v16416_v11 = vpop.eup %16415  ;;  %16425 = vrsqrt.f32 %v11140_v57  ;;  %v11179_v12 = vadd.f32 %v12239_v31, %v11165_v35 }
0x134f   : > { %v11178_v49 = vadd.f32 %v12239_v31, %v11164_v25  ;;  %v11153_v53 = vmul.f32 %v16416_v11, %v20592_v61 }
0x1350   : > { %v16418_v63 = vpop.eup %16417 }
0x1351   : > { %14387 = vmatprep.mubr.msk.f32.mxu1 %vm574_vm0, %v11178_v49  ;;  %v11152_v34 = vmul.f32 %v16418_v63, %v20596_v33  ;;  %v11167_v29 = vmul.f32 %v12238_v56, %v11153_v53 }
0x1352   : > { %v16420_v45 = vpop.eup %16419  ;;  %14388 = vmatmul.mubr.msk.f32.vlgmr.msra.gmra.mrb[232].mxu1 %vm574_vm0, %v11179_v12 }
0x1353   : > { %v11166_v10 = vmul.f32 %v12238_v56, %v11152_v34  ;;  %v11155_v3 = vmul.f32 %v16420_v45, %v20601_v7  ;;  %v11181_v48 = vadd.f32 %v12239_v31, %v11167_v29 }
0x1354   : > { %v16422_v51 = vpop.eup %16421 }
0x1355   : > { %v11180_v28 = vadd.f32 %v12239_v31, %v11166_v10  ;;  %v11154_v17 = vmul.f32 %v16422_v51, %v20607_v18  ;;  %v11169_v61 = vmul.f32 %v12238_v56, %v11155_v3 }
0x1356   : > { %v16424_v32 = vpop.eup %16423 }
0x1357   : > { %14390 = vmatprep.mubr.msk.f32.mxu1 %vm574_vm0, %v11180_v28  ;;  %v11168_v50 = vmul.f32 %v12238_v56, %v11154_v17  ;;  %v11157_v54 = vmul.f32 %v16424_v32, %v20613_v46  ;;  %v11183_v26 = vadd.f32 %v12239_v31, %v11169_v61  ;;  %v12256_v46 = vld [vmem:[%s20787_s13 + $0xb0] sm:$0xff] }
0x1358   : > { %v16426_v33 = vpop.eup %16425  ;;  %14391 = vmatmul.mubr.msk.f32.gmra.mrb[234].mxu1 %vm574_vm0, %v11181_v48 }
0x1359   : > { %v11182_v21 = vadd.f32 %v12239_v31, %v11168_v50  ;;  %v11156_v5 = vmul.f32 %v16426_v33, %v20619_v30  ;;  %v11171_v7 = vmul.f32 %v12238_v56, %v11157_v54  ;;  %v12257_v30 = vld [vmem:[%s20787_s13 + $0xb8] sm:$0xff] }
0x135a   : > { %v15191_v15 = vpack.c.bf16 %v12257_v30, %v12256_v46 }
0x135b   : > { %14393 = vmatprep.mubr.msk.f32.mxu1 %vm574_vm0, %v11182_v21  ;;  %v11170_v60 = vmul.f32 %v12238_v56, %v11156_v5  ;;  %v11185_v27 = vadd.f32 %v12239_v31, %v11171_v7 }
0x135c   : > { %14394 = vmatmul.mubr.msk.f32.gmra.mrb[236].mxu1 %vm574_vm0, %v11183_v26  ;;  %15192 = vmatprep.subr.bf16.mxu0 %v15191_v15 }
0x135d   : > { %v11184_v18 = vadd.f32 %v12239_v31, %v11170_v60  ;;  %15194 = vmatpush3.bf16.msra.mxu0 %v15191_v15 }
0x135e   : > { %15196 = vmatprep.subr.bf16.mxu0 %v15195_v1 }
0x135f   : > { %14396 = vmatprep.mubr.msk.f32.mxu1 %vm574_vm0, %v11184_v18 }
0x1360   : > { %14397 = vmatmul.mubr.msk.f32.gmra.mrb[238].mxu1 %vm574_vm0, %v11185_v27 }
0x1361   : > { %15198 = vmatpush3.bf16.msra.mxu0 %v15195_v1 }
0x1362   : > { %15200 = vmatprep.subr.bf16.mxu0 %v15199_v44 }
0x1365   : > { %15202 = vmatpush3.bf16.msra.mxu0 %v15199_v44 }
0x1366   : > { %15204 = vmatprep.subr.bf16.mxu0 %v15203_v19 }
0x1369   : > { %15206 = vmatpush3.bf16.msra.mxu0 %v15203_v19 }
0x136a   : > { %15208 = vmatprep.subr.bf16.mxu0 %v15207_v20 }
0x136d   : > { %15210 = vmatpush3.bf16.msra.mxu0 %v15207_v20 }
0x1425   : > { %v14389_v41 = vpop.f32.mrb[232].mxu1 }
0x1426   : > { %v11295_v47 = vadd.f32 %v14389_v41, %v12241_v22  ;;  %v11289_v4 = vpop.f32.mrb[233].mxu1 }
0x1427   : > { %v11290_v56 = vadd.f32 %v12241_v22, %v11289_v4 }
0x1428   : > { %v11337_v0 = vmul.f32 0.70710677, %v11295_v47  ;;  %v11329_v48 = vmul.f32 0.5, %v11295_v47  ;;  %v12267_v47 = vld [vmem:[%s20788_s14 + $0x1] ss:$0 sm:$0xff] }
0x1429   : > { %v11336_v14 = vmul.f32 0.70710677, %v11290_v56  ;;  %v11328_v28 = vmul.f32 0.5, %v11290_v56 }
0x142a   : > { %16427 = verf.f32 %v11337_v0 }
0x142b   : > { %16429 = verf.f32 %v11336_v14  ;;  %v14392_v55 = vpop.f32.mrb[234].mxu1 }
0x142c   : > { %v11305_v36 = vadd.f32 %v14392_v55, %v12241_v22  ;;  %v11299_v24 = vpop.f32.mrb[235].mxu1 }
0x142d   : > { %v11300_v2 = vadd.f32 %v12241_v22, %v11299_v24 }
0x142e   : > { %v11339_v31 = vmul.f32 0.70710677, %v11305_v36  ;;  %v11331_v60 = vmul.f32 0.5, %v11305_v36 }
0x142f   : > { %v11338_v35 = vmul.f32 0.70710677, %v11300_v2  ;;  %v14395_v57 = vpop.f32.mrb[236].mxu1  ;;  %v11330_v26 = vmul.f32 0.5, %v11300_v2 }
0x1430   : > { %16431 = verf.f32 %v11339_v31  ;;  %v11315_v25 = vadd.f32 %v14395_v57, %v12241_v22  ;;  %v11309_v11 = vpop.f32.mrb[237].mxu1 }
0x1431   : > { %16433 = verf.f32 %v11338_v35  ;;  %v11310_v49 = vadd.f32 %v12241_v22, %v11309_v11 }
0x1432   : > { %v11341_v53 = vmul.f32 0.70710677, %v11315_v25  ;;  %v11333_v1 = vmul.f32 0.5, %v11315_v25 }
0x1433   : > { %v11340_v63 = vmul.f32 0.70710677, %v11310_v49  ;;  %v14398_v12 = vpop.f32.mrb[238].mxu1  ;;  %v11332_v40 = vmul.f32 0.5, %v11310_v49 }
0x1434   : > { %v16428_v34 = vpop.eup %16427  ;;  %16435 = verf.f32 %v11341_v53  ;;  %v11325_v45 = vadd.f32 %v14398_v12, %v12241_v22  ;;  %v11319_v29 = vpop.f32.mrb[239].mxu1 }
0x1435   : > { %v16430_v10 = vpop.eup %16429  ;;  %v11353_v3 = vadd.f32 1.0, %v16428_v34  ;;  %16437 = verf.f32 %v11340_v63  ;;  %v11320_v51 = vadd.f32 %v12241_v22, %v11319_v29 }
0x1436   : > { %v11352_v17 = vadd.f32 1.0, %v16430_v10  ;;  %v11343_v32 = vmul.f32 0.70710677, %v11325_v45  ;;  %v11335_v9 = vmul.f32 0.5, %v11325_v45 }
0x1437   : > { %v11342_v61 = vmul.f32 0.70710677, %v11320_v51  ;;  %v11361_v54 = vmul.f32 %v11353_v3, %v11329_v48  ;;  %v11334_v19 = vmul.f32 0.5, %v11320_v51 }
0x1438   : > { %16439 = verf.f32 %v11343_v32  ;;  %v11360_v50 = vmul.f32 %v11352_v17, %v11328_v28 }
0x1439   : > { %16441 = verf.f32 %v11342_v61 }
0x143a   : > { %v16432_v33 = vpop.eup %16431  ;;  %14431 = vmatprep.mubr.f32.mxu0 %v11360_v50 }
0x143b   : > { %v16434_v21 = vpop.eup %16433  ;;  %v11355_v5 = vadd.f32 1.0, %v16432_v33  ;;  %14432 = vmatmul.mubr.f32.vlgmr.msra.gmra.mrb[216].mxu0 %v11361_v54 }
0x143c   : > { %v11354_v7 = vadd.f32 1.0, %v16434_v21 }
0x143d   : > { %v11363_v15 = vmul.f32 %v11355_v5, %v11331_v60 }
0x143e   : > { %v16436_v18 = vpop.eup %16435  ;;  %v11362_v27 = vmul.f32 %v11354_v7, %v11330_v26 }
0x143f   : > { %v16438_v46 = vpop.eup %16437  ;;  %v11357_v30 = vadd.f32 1.0, %v16436_v18 }
0x1440   : > { %v11356_v13 = vadd.f32 1.0, %v16438_v46  ;;  %14434 = vmatprep.mubr.f32.mxu0 %v11362_v27 }
0x1441   : > { %14435 = vmatmul.mubr.f32.gmra.mrb[218].mxu0 %v11363_v15  ;;  %v11365_v59 = vmul.f32 %v11357_v30, %v11333_v1 }
0x1442   : > { %v16440_v23 = vpop.eup %16439  ;;  %v11364_v38 = vmul.f32 %v11356_v13, %v11332_v40 }
0x1443   : > { %v16442_v44 = vpop.eup %16441  ;;  %v11359_v39 = vadd.f32 1.0, %v16440_v23 }
0x1444   : > { %v11358_v42 = vadd.f32 1.0, %v16442_v44  ;;  %14437 = vmatprep.mubr.f32.mxu0 %v11364_v38 }
0x1445   : > { %14438 = vmatmul.mubr.f32.gmra.mrb[220].mxu0 %v11365_v59  ;;  %v11367_v22 = vmul.f32 %v11359_v39, %v11335_v9 }
0x1446   : > { %v11366_v20 = vmul.f32 %v11358_v42, %v11334_v19 }
0x1448   : > { %14440 = vmatprep.mubr.f32.mxu0 %v11366_v20 }
0x1449   : > { %14441 = vmatmul.mubr.f32.gmra.mrb[222].mxu0 %v11367_v22 }
0x150e   : > { %v14433_v41 = vpop.f32.mrb[216].mxu0 }
0x150f   : > { %v11491_v4 = vadd.f32 %v14433_v41, %v20534_v16  ;;  %v11451_v56 = vpop.f32.mrb[217].mxu0 }
0x1510   : > { %v11490_v0 = vadd.f32 %v11451_v56, %v20537_v43 }
0x1511   : > { %v11507_v14 = vadd.f32 %v12267_v47, %v11491_v4 }
0x1512   : > { %v11506_v55 = vadd.f32 %v12267_v47, %v11490_v0 }
0x1513   : > { %11515 = vst.msk [vmem:[%s502_s27 + $0x8] sm:$0xff] %vm574_vm0, %v11507_v14 }
0x1514   : > { %11514 = vst.msk [vmem:[%s502_s27] sm:$0xff] %vm574_vm0, %v11506_v55  ;;  %v14436_v36 = vpop.f32.mrb[218].mxu0 }
0x1515   : > { %v11493_v24 = vadd.f32 %v14436_v36, %v20547_v8  ;;  %v11461_v2 = vpop.f32.mrb[219].mxu0 }
0x1516   : > { %v11492_v31 = vadd.f32 %v11461_v2, %v20552_v58 }
0x1517   : > { %v11509_v35 = vadd.f32 %v12267_v47, %v11493_v24 }
0x1518   : > { %v11508_v57 = vadd.f32 %v12267_v47, %v11492_v31  ;;  %v14439_v16 = vpop.f32.mrb[220].mxu0 }
0x1519   : > { %11517 = vst.msk [vmem:[%s502_s27 + $0x18] sm:$0xff] %vm574_vm0, %v11509_v35  ;;  %v11495_v43 = vadd.f32 %v14439_v16, %v20558_v6  ;;  %v11471_v25 = vpop.f32.mrb[221].mxu0 }
0x151a   : > { %11516 = vst.msk [vmem:[%s502_s27 + $0x10] sm:$0xff] %vm574_vm0, %v11508_v57  ;;  %v11494_v11 = vadd.f32 %v11471_v25, %v20564_v52 }
0x151b   : > { %v11511_v49 = vadd.f32 %v12267_v47, %v11495_v43 }
0x151c   : > { %v11510_v53 = vadd.f32 %v12267_v47, %v11494_v11  ;;  %v14442_v63 = vpop.f32.mrb[222].mxu0 }
0x151d   : > { %11519 = vst.msk [vmem:[%s502_s27 + $0x28] sm:$0xff] %vm574_vm0, %v11511_v49  ;;  %v11497_v8 = vadd.f32 %v14442_v63, %v20570_v62  ;;  %v11481_v58 = vpop.f32.mrb[223].mxu0 }
0x151e   : > { %11518 = vst.msk [vmem:[%s502_s27 + $0x20] sm:$0xff] %vm574_vm0, %v11510_v53  ;;  %v11496_v6 = vadd.f32 %v11481_v58, %v20574_v37 }
0x151f   : > { %v11513_v12 = vadd.f32 %v12267_v47, %v11497_v8 }
0x1520   : > { %v11512_v52 = vadd.f32 %v12267_v47, %v11496_v6 }
0x1521   : > { %11521 = vst.msk [vmem:[%s502_s27 + $0x38] sm:$0xff] %vm574_vm0, %v11513_v12 }
0x1522   : > { %11520 = vst.msk [vmem:[%s502_s27 + $0x30] sm:$0xff] %vm574_vm0, %v11512_v52 }
0x1523   : > { %16484 = shalt.err (!%p16481_p7)
}
0x1524   : > { %s16485_s24 = scalar_lea.hbm %s20725_s20, 1024  ;;  %s16489_s30 = scalar_lea.hbm %s20789_s15, 2048 }
0x1525   : > { %p16486_p8 = scmp.ne.s32.totalorder %s20725_s20, %s16485_s24  ;;  %p16490_p1 = scmp.lt.u32.totalorder %s20725_s20, %s20789_s15 }
0x1526   : > { %p16491_p0 = scmp.lt.u32.totalorder %s16489_s30, %s16485_s24  ;;  %p16493_p6 = scmp.lt.u32.totalorder %s16485_s24, %s20725_s20 }
0x1527   : > { %p16487_p11 = pnand %p16486_p8, %p21168_p9 }
0x1528   : > { %p16492_p5 = por %p16491_p0, %p16490_p1 }
0x1529   : > { %p16488_p13 = pneg %p16487_p11 }
0x152a   : > { %p16494_p10 = por %p16493_p6, %p16492_p5 }
0x152c   : > { %p16495_p12 = pnand %p16494_p10, %p16488_p13 }
0x152e   : > { %16498 = shalt.err (!%p16495_p12)
}
0x152f   : > { %s16551_s17 = smov 128   ;;  %s16552_s26 = smov 8  }
0x1530   : > { %15215 = dma.vmem_to_hbm [thread:$0]  (%p21168_p9), %s20727_s23, 1024, %s20725_s20, %s20733_s22, %s16551_s17, %s16551_s17, %s16552_s26  }
0x1531 PF: > { %s21169_s18 = sld [smem:[#allocation8_spill]]  ;;  %s21170_s27 = sld [smem:[#allocation12_spill]] }
0x1532   : > { %p15227_p2 = scmp.ge.s32.totalorder %s16537_s21, 2 }
0x1537   : > { %s11551_s29 = sand.u32 1, %s21169_s18   ;;  %p21171_p3 = scmp.ne.s32.totalorder %s21170_s27, 0 }
0x1538   : > { %s11552_s24 = scalar_lea.sflag [#allocation4], %s11551_s29 }
0x1539   : > { %p15222_p4 = pnand %p15227_p2, %p21171_p3 }
0x153b   : > { %16520 = dma.done.wait (!%p15222_p4), %s11552_s24, 1024  }
0x153c   : > { %16522 = vsyncadd (!%p15222_p4), %s11552_s24, 4294966272  ;;  %s21172_s21 = sld [smem:[#allocation10_spill]]  ;;  %s21173_s30 = sld [smem:[#allocation9_spill]] }
0x153d   : > { %s21174_s20 = sld [smem:[#allocation11_spill]]  ;;  %s21175_s18 = smov %s16529_s19 }
0x1542   : > { %p26_p7 = scmp.ge.s32.totalorder %s21172_s21, 4   ;;  %s21176_s19 = smov %s21173_s30 }
0x1544   :  { %28 = sbr.rel (!%p26_p7) target bundleno = 4 (0x4), region = 133 }
0x154b   :  { %11557 = vsyncpa [#allocation3], 1 }
0x154c   :  { %11559 = vsyncpa [#allocation3 + $0x1], 1 }
0x154d   :  { %11560 = vsyncpa [#allocation4], 1 }
0x154e   :  { %11562 = vsyncpa [#allocation4 + $0x1], 1 }

</bundles_post_ra>
